<compile_context>
chip_gen: v7x
topology: tpu7x:2x2x1
jax: 0.10.0
libtpu: 0.0.40
codegen_flags: <defaults>
</compile_context>

<pallas_src>
import functools

import jax
import jax.numpy as jnp
from jax.experimental import pallas as pl
from jax.experimental.pallas import tpu as pltpu


def _layernorm(x, gamma, beta, eps=1e-5):
    mean = jnp.mean(x, axis=-1, keepdims=True)
    var = jnp.mean((x - mean) ** 2, axis=-1, keepdims=True)
    return (x - mean) * jax.lax.rsqrt(var + eps) * gamma + beta


def attention_block_kernel(x_ref, ln1_g_ref, ln1_b_ref,
                           wqkv_ref, bqkv_ref, wo_ref, bo_ref,
                           ln2_g_ref, ln2_b_ref,
                           w1_ref, b1_ref, w2_ref, b2_ref,
                           out_ref, stage_ref, *, num_heads, compute_dtype):
    S, Bt, E = x_ref.shape
    head_dim = E // num_heads

    # ---- (S, Bt, E) -> (Bt, S, E) swap in VMEM (replaces the old host HBM transpose pass) ----
    for s in range(S):
        stage_ref[:, s, :] = x_ref[s].astype(jnp.float32)
    x = stage_ref[...]                               # (Bt, S, E) f32, batch-major value
    xf = x.reshape(Bt * S, E)                        # major-dim merge (layout preserving)

    def proj(a_f32, w_ref, b_ref):
        # matmul operands in compute_dtype (bf16 on all gens by default), f32 accumulation + bias
        return jnp.dot(a_f32.astype(compute_dtype), w_ref[...],
                       preferred_element_type=jnp.float32) + b_ref[0]

    # ---- LayerNorm 1 (f32 stats) + fused QKV projection (1/sqrt(hd) pre-folded into Q cols) ----
    h = _layernorm(xf, ln1_g_ref[0], ln1_b_ref[0])
    qkv = proj(h, wqkv_ref, bqkv_ref)                # (Bt*S, 3E)
    q = qkv[:, :E].reshape(Bt, S, E)
    k = qkv[:, E:2 * E].reshape(Bt, S, E)
    v = qkv[:, 2 * E:].reshape(Bt, S, E)

    # ---- attention: static head loop, each head batched over Bt via single-batch-dim einsum ----
    # Head outputs written straight into stage_ref lane slices (no lane-interleaving concat).
    for hh in range(num_heads):
        sl = slice(hh * head_dim, (hh + 1) * head_dim)
        qh = q[..., sl].astype(compute_dtype)
        kh = k[..., sl].astype(compute_dtype)
        vh = v[..., sl].astype(compute_dtype)
        sc = jnp.einsum("bqd,bkd->bqk", qh, kh, preferred_element_type=jnp.float32)
        sc = sc - jnp.max(sc, axis=-1, keepdims=True)
        p = jnp.exp(sc)
        # reciprocal-multiply on the EUP slot instead of a VALU divide
        p = p * pl.reciprocal(jnp.sum(p, axis=-1, keepdims=True), approx=True)
        stage_ref[:, :, sl] = jnp.einsum("bqk,bkd->bqd", p.astype(compute_dtype), vh,
                                         preferred_element_type=jnp.float32)
    attn = proj(stage_ref[...].reshape(Bt * S, E), wo_ref, bo_ref)

    # ---- residual 1 ----
    x1 = xf + attn

    # ---- LayerNorm 2 + MLP (Linear -> exact GELU -> Linear); dropout = identity (eval / p=0) ----
    h2 = _layernorm(x1, ln2_g_ref[0], ln2_b_ref[0])
    h2 = proj(h2, w1_ref, b1_ref)
    h2 = 0.5 * h2 * (1.0 + jax.lax.erf(h2 * 0.7071067811865475))   # exact GELU (PyTorch default)
    h2 = proj(h2, w2_ref, b2_ref)

    # ---- residual 2, then (Bt, S, E) -> (S, Bt, E) swap on the way to the output block ----
    stage_ref[...] = (x1 + h2).reshape(Bt, S, E)
    for s in range(S):
        out_ref[s] = stage_ref[:, s, :].astype(out_ref.dtype)


def _default_batch_tile(batch):
    """v5e/v6e (1 TC/chip): whole batch, one grid step.  v7x (2 TCs/chip): two parallel steps."""
    try:
        kind = jax.devices()[0].device_kind.lower()
    except Exception:
        kind = ""
    n_steps = 2 if "v7" in kind else 1
    bt = batch // n_steps if (n_steps > 1 and batch % n_steps == 0) else batch
    # BlockSpec constraint on the second-minor block dim: divisible by 8 or equal to full dim.
    if bt != batch and bt % 8 != 0:
        bt = batch
    return bt


def attention_block(x_sbe, params, num_heads, *, batch_tile=None, compute_dtype=jnp.bfloat16):
    """x_sbe: (S, B, E), matching PyTorch nn.MultiheadAttention default (seq, batch, embed)."""
    S, B, E = x_sbe.shape
    hidden = params["w1"].shape[0]
    assert E % num_heads == 0, "embed_dim must be divisible by num_heads"
    assert params["in_proj_weight"].shape == (3 * E, E)
    assert params["w2"].shape == (E, hidden)

    if batch_tile is None:
        batch_tile = _default_batch_tile(B)
    assert B % batch_tile == 0, "batch must be divisible by batch_tile"
    assert batch_tile == B or batch_tile % 8 == 0, "batch_tile must be B or a multiple of 8"

    head_dim = E // num_heads
    scale = 1.0 / float(head_dim) ** 0.5
    # Fold 1/sqrt(head_dim) into the Q columns of the transposed in-proj weight and its bias.
    col_scale = jnp.concatenate(
        [jnp.full((E,), scale, jnp.float32), jnp.ones((2 * E,), jnp.float32)])

    wqkv = (params["in_proj_weight"].T * col_scale[None, :]).astype(compute_dtype)   # (E, 3E)
    bqkv = (params["in_proj_bias"] * col_scale)[None, :].astype(jnp.float32)         # (1, 3E)
    wo = params["out_proj_weight"].T.astype(compute_dtype)                           # (E, E)
    bo = params["out_proj_bias"][None, :].astype(jnp.float32)                        # (1, E)
    w1 = params["w1"].T.astype(compute_dtype)                                        # (E, hidden)
    b1 = params["b1"][None, :].astype(jnp.float32)                                   # (1, hidden)
    w2 = params["w2"].T.astype(compute_dtype)                                        # (hidden, E)
    b2 = params["b2"][None, :].astype(jnp.float32)                                   # (1, E)
    ln1_g = params["ln1_g"][None, :].astype(jnp.float32)
    ln1_b = params["ln1_b"][None, :].astype(jnp.float32)
    ln2_g = params["ln2_g"][None, :].astype(jnp.float32)
    ln2_b = params["ln2_b"][None, :].astype(jnp.float32)

    def rep(shape):
        # grid-invariant operand: constant index_map -> fetched once, stays resident in VMEM
        return pl.BlockSpec(shape, lambda i, _n=len(shape): (0,) * _n)

    kernel = functools.partial(attention_block_kernel, num_heads=num_heads,
                               compute_dtype=compute_dtype)

    # TODO(synk): at realistic sizes (E>=1024, hidden=4E) set vmem_limit_bytes and/or tile `hidden`;
    # resident weights are tiny at these demo shapes so the defaults are fine.
    out = pl.pallas_call(
        kernel,
        out_shape=jax.ShapeDtypeStruct((S, B, E), x_sbe.dtype),
        grid=(B // batch_tile,),
        in_specs=[
            pl.BlockSpec((S, batch_tile, E), lambda i: (0, i, 0)),   # x slab, seq-major (no host transpose)
            rep((1, E)), rep((1, E)),                                # ln1 gamma/beta
            rep((E, 3 * E)), rep((1, 3 * E)),                        # in_proj W^T (Q-scaled), bias
            rep((E, E)), rep((1, E)),                                # out_proj W^T, bias
            rep((1, E)), rep((1, E)),                                # ln2 gamma/beta
            rep((E, hidden)), rep((1, hidden)),                      # linear1 W^T, bias
            rep((hidden, E)), rep((1, E)),                           # linear2 W^T, bias
        ],
        out_specs=pl.BlockSpec((S, batch_tile, E), lambda i: (0, i, 0)),
        scratch_shapes=[pltpu.VMEM((batch_tile, S, E), jnp.float32)],  # transpose/head/output staging
        compiler_params=pltpu.CompilerParams(dimension_semantics=("parallel",)),
    )(x_sbe, ln1_g, ln1_b, wqkv, bqkv, wo, bo, ln2_g, ln2_b, w1, b1, w2, b2)

    return out                                     # already (S, B, E): no host transpose back


def attention_block_ref(x_sbe, params, num_heads):
    """Pure-JAX reference mirroring the PyTorch forward (eval mode)."""
    S, B, E = x_sbe.shape
    hd = E // num_heads

    def ln(x, g, b):
        m = jnp.mean(x, -1, keepdims=True)
        v = jnp.mean((x - m) ** 2, -1, keepdims=True)
        return (x - m) / jnp.sqrt(v + 1e-5) * g + b

    inp = ln(x_sbe, params["ln1_g"], params["ln1_b"])
    qkv = inp @ params["in_proj_weight"].T + params["in_proj_bias"]
    q, k, v = qkv[..., :E], qkv[..., E:2 * E], qkv[..., 2 * E:]

    def split(t):
        return jnp.transpose(t.reshape(S, B, num_heads, hd), (1, 2, 0, 3))
    qh, kh, vh = split(q) / (hd ** 0.5), split(k), split(v)
    scores = jnp.einsum("bhqd,bhkd->bhqk", qh, kh)
    p = jax.nn.softmax(scores, axis=-1)
    o = jnp.einsum("bhqk,bhkd->bhqd", p, vh)
    o = jnp.transpose(o, (2, 0, 1, 3)).reshape(S, B, E)
    o = o @ params["out_proj_weight"].T + params["out_proj_bias"]
    x1 = x_sbe + o
    h = ln(x1, params["ln2_g"], params["ln2_b"])
    h = h @ params["w1"].T + params["b1"]
    h = 0.5 * h * (1.0 + jax.lax.erf(h / jnp.sqrt(2.0)))
    h = h @ params["w2"].T + params["b2"]
    return x1 + h


if __name__ == "__main__":
    S, B = 8, 16
    embed_dim, hidden_dim, num_heads = 32, 64, 4

    key = jax.random.PRNGKey(0)
    keys = jax.random.split(key, 10)

    params = {
        "ln1_g": jnp.ones((embed_dim,), jnp.float32),
        "ln1_b": jnp.zeros((embed_dim,), jnp.float32),
        "in_proj_weight": 0.1 * jax.random.normal(keys[0], (3 * embed_dim, embed_dim), jnp.float32),
        "in_proj_bias": 0.1 * jax.random.normal(keys[1], (3 * embed_dim,), jnp.float32),
        "out_proj_weight": 0.1 * jax.random.normal(keys[2], (embed_dim, embed_dim), jnp.float32),
        "out_proj_bias": 0.1 * jax.random.normal(keys[3], (embed_dim,), jnp.float32),
        "ln2_g": jnp.ones((embed_dim,), jnp.float32),
        "ln2_b": jnp.zeros((embed_dim,), jnp.float32),
        "w1": 0.1 * jax.random.normal(keys[4], (hidden_dim, embed_dim), jnp.float32),
        "b1": 0.1 * jax.random.normal(keys[5], (hidden_dim,), jnp.float32),
        "w2": 0.1 * jax.random.normal(keys[6], (embed_dim, hidden_dim), jnp.float32),
        "b2": 0.1 * jax.random.normal(keys[7], (embed_dim,), jnp.float32),
    }

    x = jax.random.normal(keys[8], (S, B, embed_dim), jnp.float32)
    ref = attention_block_ref(x, params, num_heads)

    # Default path: bf16 matmul operands on every generation, f32 accumulation/LN/softmax/GELU.
    out = jax.block_until_ready(attention_block(x, params, num_heads))
    assert out.shape == (S, B, embed_dim)
    assert jnp.allclose(out, ref, atol=5e-2, rtol=5e-2), "bf16 kernel mismatch vs reference"

    # Full-f32 matmul path (accuracy check; approx reciprocal still used for the softmax denom).
    out_f32 = jax.block_until_ready(
        attention_block(x, params, num_heads, compute_dtype=jnp.float32))
    assert jnp.allclose(out_f32, ref, atol=2e-3, rtol=2e-3), "f32 kernel mismatch vs reference"

    print("KERNEL_OK")
</pallas_src>

<mosaic_0001>
module attributes {stable_mosaic.version = 11 : i64} {
  func.func @attention_block_kernel(%arg0: i32, %arg1: memref<8x16x32xf32, #tpu.memory_space<vmem>>, %arg2: memref<1x32xf32, #tpu.memory_space<vmem>>, %arg3: memref<1x32xf32, #tpu.memory_space<vmem>>, %arg4: memref<32x96xbf16, #tpu.memory_space<vmem>>, %arg5: memref<1x96xf32, #tpu.memory_space<vmem>>, %arg6: memref<32x32xbf16, #tpu.memory_space<vmem>>, %arg7: memref<1x32xf32, #tpu.memory_space<vmem>>, %arg8: memref<1x32xf32, #tpu.memory_space<vmem>>, %arg9: memref<1x32xf32, #tpu.memory_space<vmem>>, %arg10: memref<32x64xbf16, #tpu.memory_space<vmem>>, %arg11: memref<1x64xf32, #tpu.memory_space<vmem>>, %arg12: memref<64x32xbf16, #tpu.memory_space<vmem>>, %arg13: memref<1x32xf32, #tpu.memory_space<vmem>>, %arg14: memref<8x16x32xf32, #tpu.memory_space<vmem>>, %arg15: memref<16x8x32xf32, #tpu.memory_space<vmem>>) attributes {dimension_semantics = [#tpu.dimension_semantics<parallel>], iteration_bounds = array<i64: 1>, scalar_prefetch = 0 : i64, scratch_operands = 1 : i64, tpu.core_type = #tpu.core_type<tc>, window_params = [{transform_indices = @transform_0, window_bounds = array<i64: 8, 16, 32>}, {pipeline_mode = #tpu.pipeline_mode<synchronous>, transform_indices = @transform_1, window_bounds = array<i64: 1, 32>}, {pipeline_mode = #tpu.pipeline_mode<synchronous>, transform_indices = @transform_2, window_bounds = array<i64: 1, 32>}, {pipeline_mode = #tpu.pipeline_mode<synchronous>, transform_indices = @transform_3, window_bounds = array<i64: 32, 96>}, {pipeline_mode = #tpu.pipeline_mode<synchronous>, transform_indices = @transform_4, window_bounds = array<i64: 1, 96>}, {pipeline_mode = #tpu.pipeline_mode<synchronous>, transform_indices = @transform_5, window_bounds = array<i64: 32, 32>}, {pipeline_mode = #tpu.pipeline_mode<synchronous>, transform_indices = @transform_6, window_bounds = array<i64: 1, 32>}, {pipeline_mode = #tpu.pipeline_mode<synchronous>, transform_indices = @transform_7, window_bounds = array<i64: 1, 32>}, {pipeline_mode = #tpu.pipeline_mode<synchronous>, transform_indices = @transform_8, window_bounds = array<i64: 1, 32>}, {pipeline_mode = #tpu.pipeline_mode<synchronous>, transform_indices = @transform_9, window_bounds = array<i64: 32, 64>}, {pipeline_mode = #tpu.pipeline_mode<synchronous>, transform_indices = @transform_10, window_bounds = array<i64: 1, 64>}, {pipeline_mode = #tpu.pipeline_mode<synchronous>, transform_indices = @transform_11, window_bounds = array<i64: 64, 32>}, {pipeline_mode = #tpu.pipeline_mode<synchronous>, transform_indices = @transform_12, window_bounds = array<i64: 1, 32>}, {transform_indices = @transform_13, window_bounds = array<i64: 8, 16, 32>}]} {
    %c0 = arith.constant 0 : index
    %c0_0 = arith.constant 0 : index
    %c0_1 = arith.constant 0 : index
    %0 = vector.load %arg1[%c0, %c0_0, %c0_1] : memref<8x16x32xf32, #tpu.memory_space<vmem>>, vector<1x16x32xf32>
    %1 = vector.shape_cast %0 : vector<1x16x32xf32> to vector<16x32xf32>
    %c0_2 = arith.constant 0 : index
    %c0_3 = arith.constant 0 : index
    %c0_4 = arith.constant 0 : index
    %2 = vector.load %arg15[%c0_2, %c0_3, %c0_4] : memref<16x8x32xf32, #tpu.memory_space<vmem>>, vector<16x1x32xf32>
    %3 = vector.shape_cast %2 : vector<16x1x32xf32> to vector<16x32xf32>
    %4 = vector.shape_cast %1 : vector<16x32xf32> to vector<16x1x32xf32>
    tpu.vector_store %arg15[%c0_2, %c0_3, %c0_4], %4 {strides = array<i32>} : memref<16x8x32xf32, #tpu.memory_space<vmem>>, vector<16x1x32xf32>,
    %c1 = arith.constant 1 : index
    %c0_5 = arith.constant 0 : index
    %c0_6 = arith.constant 0 : index
    %5 = vector.load %arg1[%c1, %c0_5, %c0_6] : memref<8x16x32xf32, #tpu.memory_space<vmem>>, vector<1x16x32xf32>
    %6 = vector.shape_cast %5 : vector<1x16x32xf32> to vector<16x32xf32>
    %c0_7 = arith.constant 0 : index
    %c1_8 = arith.constant 1 : index
    %c0_9 = arith.constant 0 : index
    %7 = vector.load %arg15[%c0_7, %c1_8, %c0_9] : memref<16x8x32xf32, #tpu.memory_space<vmem>>, vector<16x1x32xf32>
    %8 = vector.shape_cast %7 : vector<16x1x32xf32> to vector<16x32xf32>
    %9 = vector.shape_cast %6 : vector<16x32xf32> to vector<16x1x32xf32>
    tpu.vector_store %arg15[%c0_7, %c1_8, %c0_9], %9 {strides = array<i32>} : memref<16x8x32xf32, #tpu.memory_space<vmem>>, vector<16x1x32xf32>,
    %c2 = arith.constant 2 : index
    %c0_10 = arith.constant 0 : index
    %c0_11 = arith.constant 0 : index
    %10 = vector.load %arg1[%c2, %c0_10, %c0_11] : memref<8x16x32xf32, #tpu.memory_space<vmem>>, vector<1x16x32xf32>
    %11 = vector.shape_cast %10 : vector<1x16x32xf32> to vector<16x32xf32>
    %c0_12 = arith.constant 0 : index
    %c2_13 = arith.constant 2 : index
    %c0_14 = arith.constant 0 : index
    %12 = vector.load %arg15[%c0_12, %c2_13, %c0_14] : memref<16x8x32xf32, #tpu.memory_space<vmem>>, vector<16x1x32xf32>
    %13 = vector.shape_cast %12 : vector<16x1x32xf32> to vector<16x32xf32>
    %14 = vector.shape_cast %11 : vector<16x32xf32> to vector<16x1x32xf32>
    tpu.vector_store %arg15[%c0_12, %c2_13, %c0_14], %14 {strides = array<i32>} : memref<16x8x32xf32, #tpu.memory_space<vmem>>, vector<16x1x32xf32>,
    %c3 = arith.constant 3 : index
    %c0_15 = arith.constant 0 : index
    %c0_16 = arith.constant 0 : index
    %15 = vector.load %arg1[%c3, %c0_15, %c0_16] : memref<8x16x32xf32, #tpu.memory_space<vmem>>, vector<1x16x32xf32>
    %16 = vector.shape_cast %15 : vector<1x16x32xf32> to vector<16x32xf32>
    %c0_17 = arith.constant 0 : index
    %c3_18 = arith.constant 3 : index
    %c0_19 = arith.constant 0 : index
    %17 = vector.load %arg15[%c0_17, %c3_18, %c0_19] : memref<16x8x32xf32, #tpu.memory_space<vmem>>, vector<16x1x32xf32>
    %18 = vector.shape_cast %17 : vector<16x1x32xf32> to vector<16x32xf32>
    %19 = vector.shape_cast %16 : vector<16x32xf32> to vector<16x1x32xf32>
    tpu.vector_store %arg15[%c0_17, %c3_18, %c0_19], %19 {strides = array<i32>} : memref<16x8x32xf32, #tpu.memory_space<vmem>>, vector<16x1x32xf32>,
    %c4 = arith.constant 4 : index
    %c0_20 = arith.constant 0 : index
    %c0_21 = arith.constant 0 : index
    %20 = vector.load %arg1[%c4, %c0_20, %c0_21] : memref<8x16x32xf32, #tpu.memory_space<vmem>>, vector<1x16x32xf32>
    %21 = vector.shape_cast %20 : vector<1x16x32xf32> to vector<16x32xf32>
    %c0_22 = arith.constant 0 : index
    %c4_23 = arith.constant 4 : index
    %c0_24 = arith.constant 0 : index
    %22 = vector.load %arg15[%c0_22, %c4_23, %c0_24] : memref<16x8x32xf32, #tpu.memory_space<vmem>>, vector<16x1x32xf32>
    %23 = vector.shape_cast %22 : vector<16x1x32xf32> to vector<16x32xf32>
    %24 = vector.shape_cast %21 : vector<16x32xf32> to vector<16x1x32xf32>
    tpu.vector_store %arg15[%c0_22, %c4_23, %c0_24], %24 {strides = array<i32>} : memref<16x8x32xf32, #tpu.memory_space<vmem>>, vector<16x1x32xf32>,
    %c5 = arith.constant 5 : index
    %c0_25 = arith.constant 0 : index
    %c0_26 = arith.constant 0 : index
    %25 = vector.load %arg1[%c5, %c0_25, %c0_26] : memref<8x16x32xf32, #tpu.memory_space<vmem>>, vector<1x16x32xf32>
    %26 = vector.shape_cast %25 : vector<1x16x32xf32> to vector<16x32xf32>
    %c0_27 = arith.constant 0 : index
    %c5_28 = arith.constant 5 : index
    %c0_29 = arith.constant 0 : index
    %27 = vector.load %arg15[%c0_27, %c5_28, %c0_29] : memref<16x8x32xf32, #tpu.memory_space<vmem>>, vector<16x1x32xf32>
    %28 = vector.shape_cast %27 : vector<16x1x32xf32> to vector<16x32xf32>
    %29 = vector.shape_cast %26 : vector<16x32xf32> to vector<16x1x32xf32>
    tpu.vector_store %arg15[%c0_27, %c5_28, %c0_29], %29 {strides = array<i32>} : memref<16x8x32xf32, #tpu.memory_space<vmem>>, vector<16x1x32xf32>,
    %c6 = arith.constant 6 : index
    %c0_30 = arith.constant 0 : index
    %c0_31 = arith.constant 0 : index
    %30 = vector.load %arg1[%c6, %c0_30, %c0_31] : memref<8x16x32xf32, #tpu.memory_space<vmem>>, vector<1x16x32xf32>
    %31 = vector.shape_cast %30 : vector<1x16x32xf32> to vector<16x32xf32>
    %c0_32 = arith.constant 0 : index
    %c6_33 = arith.constant 6 : index
    %c0_34 = arith.constant 0 : index
    %32 = vector.load %arg15[%c0_32, %c6_33, %c0_34] : memref<16x8x32xf32, #tpu.memory_space<vmem>>, vector<16x1x32xf32>
    %33 = vector.shape_cast %32 : vector<16x1x32xf32> to vector<16x32xf32>
    %34 = vector.shape_cast %31 : vector<16x32xf32> to vector<16x1x32xf32>
    tpu.vector_store %arg15[%c0_32, %c6_33, %c0_34], %34 {strides = array<i32>} : memref<16x8x32xf32, #tpu.memory_space<vmem>>, vector<16x1x32xf32>,
    %c7 = arith.constant 7 : index
    %c0_35 = arith.constant 0 : index
    %c0_36 = arith.constant 0 : index
    %35 = vector.load %arg1[%c7, %c0_35, %c0_36] : memref<8x16x32xf32, #tpu.memory_space<vmem>>, vector<1x16x32xf32>
    %36 = vector.shape_cast %35 : vector<1x16x32xf32> to vector<16x32xf32>
    %c0_37 = arith.constant 0 : index
    %c7_38 = arith.constant 7 : index
    %c0_39 = arith.constant 0 : index
    %37 = vector.load %arg15[%c0_37, %c7_38, %c0_39] : memref<16x8x32xf32, #tpu.memory_space<vmem>>, vector<16x1x32xf32>
    %38 = vector.shape_cast %37 : vector<16x1x32xf32> to vector<16x32xf32>
    %39 = vector.shape_cast %36 : vector<16x32xf32> to vector<16x1x32xf32>
    tpu.vector_store %arg15[%c0_37, %c7_38, %c0_39], %39 {strides = array<i32>} : memref<16x8x32xf32, #tpu.memory_space<vmem>>, vector<16x1x32xf32>,
    %c0_40 = arith.constant 0 : index
    %c0_41 = arith.constant 0 : index
    %c0_42 = arith.constant 0 : index
    %40 = vector.load %arg15[%c0_40, %c0_41, %c0_42] : memref<16x8x32xf32, #tpu.memory_space<vmem>>, vector<16x8x32xf32>
    %41 = vector.shape_cast %40 : vector<16x8x32xf32> to vector<128x32xf32>
    %c0_43 = arith.constant 0 : index
    %c0_44 = arith.constant 0 : index
    %42 = vector.load %arg2[%c0_43, %c0_44] : memref<1x32xf32, #tpu.memory_space<vmem>>, vector<1x32xf32>
    %43 = vector.shape_cast %42 : vector<1x32xf32> to vector<32xf32>
    %c0_45 = arith.constant 0 : index
    %c0_46 = arith.constant 0 : index
    %44 = vector.load %arg3[%c0_45, %c0_46] : memref<1x32xf32, #tpu.memory_space<vmem>>, vector<1x32xf32>
    %45 = vector.shape_cast %44 : vector<1x32xf32> to vector<32xf32>
    %cst = arith.constant dense<0.000000e+00> : vector<128xf32>
    %46 = vector.multi_reduction <add>, %41, %cst [1] : vector<128x32xf32> to vector<128xf32>
    %47 = vector.shape_cast %46 : vector<128xf32> to vector<128x1xf32>
    %cst_47 = arith.constant 3.200000e+01 : f32
    %48 = vector.broadcast %cst_47 : f32 to vector<128x1xf32>
    %49 = arith.divf %47, %48 : vector<128x1xf32>
    %50 = vector.broadcast %49 : vector<128x1xf32> to vector<128x32xf32>
    %51 = arith.subf %41, %50 : vector<128x32xf32>
    %52 = arith.mulf %51, %51 : vector<128x32xf32>
    %cst_48 = arith.constant dense<0.000000e+00> : vector<128xf32>
    %53 = vector.multi_reduction <add>, %52, %cst_48 [1] : vector<128x32xf32> to vector<128xf32>
    %54 = vector.shape_cast %53 : vector<128xf32> to vector<128x1xf32>
    %cst_49 = arith.constant 3.200000e+01 : f32
    %55 = vector.broadcast %cst_49 : f32 to vector<128x1xf32>
    %56 = arith.divf %54, %55 : vector<128x1xf32>
    %57 = vector.broadcast %49 : vector<128x1xf32> to vector<128x32xf32>
    %58 = arith.subf %41, %57 : vector<128x32xf32>
    %cst_50 = arith.constant 9.99999974E-6 : f32
    %59 = vector.broadcast %cst_50 : f32 to vector<128x1xf32>
    %60 = arith.addf %56, %59 : vector<128x1xf32>
    %61 = math.rsqrt %60 : vector<128x1xf32>
    %62 = vector.broadcast %61 : vector<128x1xf32> to vector<128x32xf32>
    %63 = arith.mulf %58, %62 : vector<128x32xf32>
    %64 = vector.shape_cast %43 : vector<32xf32> to vector<1x32xf32>
    %65 = vector.broadcast %64 : vector<1x32xf32> to vector<128x32xf32>
    %66 = arith.mulf %63, %65 : vector<128x32xf32>
    %67 = vector.shape_cast %45 : vector<32xf32> to vector<1x32xf32>
    %68 = vector.broadcast %67 : vector<1x32xf32> to vector<128x32xf32>
    %69 = arith.addf %66, %68 : vector<128x32xf32>
    %70 = arith.truncf %69 : vector<128x32xf32> to vector<128x32xbf16>
    %c0_51 = arith.constant 0 : index
    %c0_52 = arith.constant 0 : index
    %71 = vector.load %arg4[%c0_51, %c0_52] : memref<32x96xbf16, #tpu.memory_space<vmem>>, vector<32x96xbf16>
    %cst_53 = arith.constant dense<0.000000e+00> : vector<128x96xf32>
    %72 = tpu.matmul %70, %71, %cst_53 {dimension_numbers = #tpu.dot_dimension_numbers<[1], [0], [0], [1], [0, 0, 1, 1], [], []>} : vector<128x32xbf16>, vector<32x96xbf16>, vector<128x96xf32> -> vector<128x96xf32>
    %c0_54 = arith.constant 0 : index
    %c0_55 = arith.constant 0 : index
    %73 = vector.load %arg5[%c0_54, %c0_55] : memref<1x96xf32, #tpu.memory_space<vmem>>, vector<1x96xf32>
    %74 = vector.shape_cast %73 : vector<1x96xf32> to vector<96xf32>
    %75 = vector.shape_cast %74 : vector<96xf32> to vector<1x96xf32>
    %76 = vector.broadcast %75 : vector<1x96xf32> to vector<128x96xf32>
    %77 = arith.addf %72, %76 : vector<128x96xf32>
    %78 = vector.extract_strided_slice %77 {offsets = [0, 0], sizes = [128, 32], strides = [1, 1]} : vector<128x96xf32> to vector<128x32xf32>
    %79 = vector.shape_cast %78 : vector<128x32xf32> to vector<16x8x32xf32>
    %80 = vector.extract_strided_slice %77 {offsets = [0, 32], sizes = [128, 32], strides = [1, 1]} : vector<128x96xf32> to vector<128x32xf32>
    %81 = vector.shape_cast %80 : vector<128x32xf32> to vector<16x8x32xf32>
    %82 = vector.extract_strided_slice %77 {offsets = [0, 64], sizes = [128, 32], strides = [1, 1]} : vector<128x96xf32> to vector<128x32xf32>
    %83 = vector.shape_cast %82 : vector<128x32xf32> to vector<16x8x32xf32>
    %84 = vector.extract_strided_slice %79 {offsets = [0, 0, 0], sizes = [16, 8, 8], strides = [1, 1, 1]} : vector<16x8x32xf32> to vector<16x8x8xf32>
    %85 = arith.truncf %84 : vector<16x8x8xf32> to vector<16x8x8xbf16>
    %86 = vector.extract_strided_slice %81 {offsets = [0, 0, 0], sizes = [16, 8, 8], strides = [1, 1, 1]} : vector<16x8x32xf32> to vector<16x8x8xf32>
    %87 = arith.truncf %86 : vector<16x8x8xf32> to vector<16x8x8xbf16>
    %88 = vector.extract_strided_slice %83 {offsets = [0, 0, 0], sizes = [16, 8, 8], strides = [1, 1, 1]} : vector<16x8x32xf32> to vector<16x8x8xf32>
    %89 = arith.truncf %88 : vector<16x8x8xf32> to vector<16x8x8xbf16>
    "tpu.trace_start"() <{level = 10 : i32, message = "bqd,bkd->bqk"}> : () -> ()
    %cst_56 = arith.constant dense<0.000000e+00> : vector<16x8x8xf32>
    %90 = tpu.matmul %85, %87, %cst_56 {dimension_numbers = #tpu.dot_dimension_numbers<[2], [2], [1], [1], [0, 0, 0, 1, 1, 1], [0], [0]>} : vector<16x8x8xbf16>, vector<16x8x8xbf16>, vector<16x8x8xf32> -> vector<16x8x8xf32>
    "tpu.trace_stop"() : () -> ()
    %cst_57 = arith.constant dense<0xFF800000> : vector<16x8xf32>
    %91 = vector.multi_reduction <maximumf>, %90, %cst_57 [2] : vector<16x8x8xf32> to vector<16x8xf32>
    %92 = vector.shape_cast %91 : vector<16x8xf32> to vector<16x8x1xf32>
    %93 = vector.broadcast %92 : vector<16x8x1xf32> to vector<16x8x8xf32>
    %94 = arith.subf %90, %93 : vector<16x8x8xf32>
    %95 = math.exp %94 : vector<16x8x8xf32>
    %cst_58 = arith.constant dense<0.000000e+00> : vector<16x8xf32>
    %96 = vector.multi_reduction <add>, %95, %cst_58 [2] : vector<16x8x8xf32> to vector<16x8xf32>
    %97 = vector.shape_cast %96 : vector<16x8xf32> to vector<16x8x1xf32>
    %98 = tpu.reciprocal %97 {approx = true} : vector<16x8x1xf32> -> vector<16x8x1xf32>
    %99 = vector.broadcast %98 : vector<16x8x1xf32> to vector<16x8x8xf32>
    %100 = arith.mulf %95, %99 : vector<16x8x8xf32>
    %101 = arith.truncf %100 : vector<16x8x8xf32> to vector<16x8x8xbf16>
    "tpu.trace_start"() <{level = 10 : i32, message = "bqk,bkd->bqd"}> : () -> ()
    %cst_59 = arith.constant dense<0.000000e+00> : vector<16x8x8xf32>
    %102 = tpu.matmul %101, %89, %cst_59 {dimension_numbers = #tpu.dot_dimension_numbers<[2], [1], [1], [2], [0, 0, 0, 1, 1, 2], [0], [0]>} : vector<16x8x8xbf16>, vector<16x8x8xbf16>, vector<16x8x8xf32> -> vector<16x8x8xf32>
    "tpu.trace_stop"() : () -> ()
    %c0_60 = arith.constant 0 : index
    %c0_61 = arith.constant 0 : index
    %c0_62 = arith.constant 0 : index
    %103 = vector.load %arg15[%c0_60, %c0_61, %c0_62] : memref<16x8x32xf32, #tpu.memory_space<vmem>>, vector<16x8x8xf32>
    tpu.vector_store %arg15[%c0_60, %c0_61, %c0_62], %102 {strides = array<i32>} : memref<16x8x32xf32, #tpu.memory_space<vmem>>, vector<16x8x8xf32>,
    %104 = vector.extract_strided_slice %79 {offsets = [0, 0, 8], sizes = [16, 8, 8], strides = [1, 1, 1]} : vector<16x8x32xf32> to vector<16x8x8xf32>
    %105 = arith.truncf %104 : vector<16x8x8xf32> to vector<16x8x8xbf16>
    %106 = vector.extract_strided_slice %81 {offsets = [0, 0, 8], sizes = [16, 8, 8], strides = [1, 1, 1]} : vector<16x8x32xf32> to vector<16x8x8xf32>
    %107 = arith.truncf %106 : vector<16x8x8xf32> to vector<16x8x8xbf16>
    %108 = vector.extract_strided_slice %83 {offsets = [0, 0, 8], sizes = [16, 8, 8], strides = [1, 1, 1]} : vector<16x8x32xf32> to vector<16x8x8xf32>
    %109 = arith.truncf %108 : vector<16x8x8xf32> to vector<16x8x8xbf16>
    "tpu.trace_start"() <{level = 10 : i32, message = "bqd,bkd->bqk"}> : () -> ()
    %cst_63 = arith.constant dense<0.000000e+00> : vector<16x8x8xf32>
    %110 = tpu.matmul %105, %107, %cst_63 {dimension_numbers = #tpu.dot_dimension_numbers<[2], [2], [1], [1], [0, 0, 0, 1, 1, 1], [0], [0]>} : vector<16x8x8xbf16>, vector<16x8x8xbf16>, vector<16x8x8xf32> -> vector<16x8x8xf32>
    "tpu.trace_stop"() : () -> ()
    %cst_64 = arith.constant dense<0xFF800000> : vector<16x8xf32>
    %111 = vector.multi_reduction <maximumf>, %110, %cst_64 [2] : vector<16x8x8xf32> to vector<16x8xf32>
    %112 = vector.shape_cast %111 : vector<16x8xf32> to vector<16x8x1xf32>
    %113 = vector.broadcast %112 : vector<16x8x1xf32> to vector<16x8x8xf32>
    %114 = arith.subf %110, %113 : vector<16x8x8xf32>
    %115 = math.exp %114 : vector<16x8x8xf32>
    %cst_65 = arith.constant dense<0.000000e+00> : vector<16x8xf32>
    %116 = vector.multi_reduction <add>, %115, %cst_65 [2] : vector<16x8x8xf32> to vector<16x8xf32>
    %117 = vector.shape_cast %116 : vector<16x8xf32> to vector<16x8x1xf32>
    %118 = tpu.reciprocal %117 {approx = true} : vector<16x8x1xf32> -> vector<16x8x1xf32>
    %119 = vector.broadcast %118 : vector<16x8x1xf32> to vector<16x8x8xf32>
    %120 = arith.mulf %115, %119 : vector<16x8x8xf32>
    %121 = arith.truncf %120 : vector<16x8x8xf32> to vector<16x8x8xbf16>
    "tpu.trace_start"() <{level = 10 : i32, message = "bqk,bkd->bqd"}> : () -> ()
    %cst_66 = arith.constant dense<0.000000e+00> : vector<16x8x8xf32>
    %122 = tpu.matmul %121, %109, %cst_66 {dimension_numbers = #tpu.dot_dimension_numbers<[2], [1], [1], [2], [0, 0, 0, 1, 1, 2], [0], [0]>} : vector<16x8x8xbf16>, vector<16x8x8xbf16>, vector<16x8x8xf32> -> vector<16x8x8xf32>
    "tpu.trace_stop"() : () -> ()
    %c0_67 = arith.constant 0 : index
    %c0_68 = arith.constant 0 : index
    %c8 = arith.constant 8 : index
    %123 = vector.load %arg15[%c0_67, %c0_68, %c8] : memref<16x8x32xf32, #tpu.memory_space<vmem>>, vector<16x8x8xf32>
    tpu.vector_store %arg15[%c0_67, %c0_68, %c8], %122 {strides = array<i32>} : memref<16x8x32xf32, #tpu.memory_space<vmem>>, vector<16x8x8xf32>,
    %124 = vector.extract_strided_slice %79 {offsets = [0, 0, 16], sizes = [16, 8, 8], strides = [1, 1, 1]} : vector<16x8x32xf32> to vector<16x8x8xf32>
    %125 = arith.truncf %124 : vector<16x8x8xf32> to vector<16x8x8xbf16>
    %126 = vector.extract_strided_slice %81 {offsets = [0, 0, 16], sizes = [16, 8, 8], strides = [1, 1, 1]} : vector<16x8x32xf32> to vector<16x8x8xf32>
    %127 = arith.truncf %126 : vector<16x8x8xf32> to vector<16x8x8xbf16>
    %128 = vector.extract_strided_slice %83 {offsets = [0, 0, 16], sizes = [16, 8, 8], strides = [1, 1, 1]} : vector<16x8x32xf32> to vector<16x8x8xf32>
    %129 = arith.truncf %128 : vector<16x8x8xf32> to vector<16x8x8xbf16>
    "tpu.trace_start"() <{level = 10 : i32, message = "bqd,bkd->bqk"}> : () -> ()
    %cst_69 = arith.constant dense<0.000000e+00> : vector<16x8x8xf32>
    %130 = tpu.matmul %125, %127, %cst_69 {dimension_numbers = #tpu.dot_dimension_numbers<[2], [2], [1], [1], [0, 0, 0, 1, 1, 1], [0], [0]>} : vector<16x8x8xbf16>, vector<16x8x8xbf16>, vector<16x8x8xf32> -> vector<16x8x8xf32>
    "tpu.trace_stop"() : () -> ()
    %cst_70 = arith.constant dense<0xFF800000> : vector<16x8xf32>
    %131 = vector.multi_reduction <maximumf>, %130, %cst_70 [2] : vector<16x8x8xf32> to vector<16x8xf32>
    %132 = vector.shape_cast %131 : vector<16x8xf32> to vector<16x8x1xf32>
    %133 = vector.broadcast %132 : vector<16x8x1xf32> to vector<16x8x8xf32>
    %134 = arith.subf %130, %133 : vector<16x8x8xf32>
    %135 = math.exp %134 : vector<16x8x8xf32>
    %cst_71 = arith.constant dense<0.000000e+00> : vector<16x8xf32>
    %136 = vector.multi_reduction <add>, %135, %cst_71 [2] : vector<16x8x8xf32> to vector<16x8xf32>
    %137 = vector.shape_cast %136 : vector<16x8xf32> to vector<16x8x1xf32>
    %138 = tpu.reciprocal %137 {approx = true} : vector<16x8x1xf32> -> vector<16x8x1xf32>
    %139 = vector.broadcast %138 : vector<16x8x1xf32> to vector<16x8x8xf32>
    %140 = arith.mulf %135, %139 : vector<16x8x8xf32>
    %141 = arith.truncf %140 : vector<16x8x8xf32> to vector<16x8x8xbf16>
    "tpu.trace_start"() <{level = 10 : i32, message = "bqk,bkd->bqd"}> : () -> ()
    %cst_72 = arith.constant dense<0.000000e+00> : vector<16x8x8xf32>
    %142 = tpu.matmul %141, %129, %cst_72 {dimension_numbers = #tpu.dot_dimension_numbers<[2], [1], [1], [2], [0, 0, 0, 1, 1, 2], [0], [0]>} : vector<16x8x8xbf16>, vector<16x8x8xbf16>, vector<16x8x8xf32> -> vector<16x8x8xf32>
    "tpu.trace_stop"() : () -> ()
    %c0_73 = arith.constant 0 : index
    %c0_74 = arith.constant 0 : index
    %c16 = arith.constant 16 : index
    %143 = vector.load %arg15[%c0_73, %c0_74, %c16] : memref<16x8x32xf32, #tpu.memory_space<vmem>>, vector<16x8x8xf32>
    tpu.vector_store %arg15[%c0_73, %c0_74, %c16], %142 {strides = array<i32>} : memref<16x8x32xf32, #tpu.memory_space<vmem>>, vector<16x8x8xf32>,
    %144 = vector.extract_strided_slice %79 {offsets = [0, 0, 24], sizes = [16, 8, 8], strides = [1, 1, 1]} : vector<16x8x32xf32> to vector<16x8x8xf32>
    %145 = arith.truncf %144 : vector<16x8x8xf32> to vector<16x8x8xbf16>
    %146 = vector.extract_strided_slice %81 {offsets = [0, 0, 24], sizes = [16, 8, 8], strides = [1, 1, 1]} : vector<16x8x32xf32> to vector<16x8x8xf32>
    %147 = arith.truncf %146 : vector<16x8x8xf32> to vector<16x8x8xbf16>
    %148 = vector.extract_strided_slice %83 {offsets = [0, 0, 24], sizes = [16, 8, 8], strides = [1, 1, 1]} : vector<16x8x32xf32> to vector<16x8x8xf32>
    %149 = arith.truncf %148 : vector<16x8x8xf32> to vector<16x8x8xbf16>
    "tpu.trace_start"() <{level = 10 : i32, message = "bqd,bkd->bqk"}> : () -> ()
    %cst_75 = arith.constant dense<0.000000e+00> : vector<16x8x8xf32>
    %150 = tpu.matmul %145, %147, %cst_75 {dimension_numbers = #tpu.dot_dimension_numbers<[2], [2], [1], [1], [0, 0, 0, 1, 1, 1], [0], [0]>} : vector<16x8x8xbf16>, vector<16x8x8xbf16>, vector<16x8x8xf32> -> vector<16x8x8xf32>
    "tpu.trace_stop"() : () -> ()
    %cst_76 = arith.constant dense<0xFF800000> : vector<16x8xf32>
    %151 = vector.multi_reduction <maximumf>, %150, %cst_76 [2] : vector<16x8x8xf32> to vector<16x8xf32>
    %152 = vector.shape_cast %151 : vector<16x8xf32> to vector<16x8x1xf32>
    %153 = vector.broadcast %152 : vector<16x8x1xf32> to vector<16x8x8xf32>
    %154 = arith.subf %150, %153 : vector<16x8x8xf32>
    %155 = math.exp %154 : vector<16x8x8xf32>
    %cst_77 = arith.constant dense<0.000000e+00> : vector<16x8xf32>
    %156 = vector.multi_reduction <add>, %155, %cst_77 [2] : vector<16x8x8xf32> to vector<16x8xf32>
    %157 = vector.shape_cast %156 : vector<16x8xf32> to vector<16x8x1xf32>
    %158 = tpu.reciprocal %157 {approx = true} : vector<16x8x1xf32> -> vector<16x8x1xf32>
    %159 = vector.broadcast %158 : vector<16x8x1xf32> to vector<16x8x8xf32>
    %160 = arith.mulf %155, %159 : vector<16x8x8xf32>
    %161 = arith.truncf %160 : vector<16x8x8xf32> to vector<16x8x8xbf16>
    "tpu.trace_start"() <{level = 10 : i32, message = "bqk,bkd->bqd"}> : () -> ()
    %cst_78 = arith.constant dense<0.000000e+00> : vector<16x8x8xf32>
    %162 = tpu.matmul %161, %149, %cst_78 {dimension_numbers = #tpu.dot_dimension_numbers<[2], [1], [1], [2], [0, 0, 0, 1, 1, 2], [0], [0]>} : vector<16x8x8xbf16>, vector<16x8x8xbf16>, vector<16x8x8xf32> -> vector<16x8x8xf32>
    "tpu.trace_stop"() : () -> ()
    %c0_79 = arith.constant 0 : index
    %c0_80 = arith.constant 0 : index
    %c24 = arith.constant 24 : index
    %163 = vector.load %arg15[%c0_79, %c0_80, %c24] : memref<16x8x32xf32, #tpu.memory_space<vmem>>, vector<16x8x8xf32>
    tpu.vector_store %arg15[%c0_79, %c0_80, %c24], %162 {strides = array<i32>} : memref<16x8x32xf32, #tpu.memory_space<vmem>>, vector<16x8x8xf32>,
    %c0_81 = arith.constant 0 : index
    %c0_82 = arith.constant 0 : index
    %c0_83 = arith.constant 0 : index
    %164 = vector.load %arg15[%c0_81, %c0_82, %c0_83] : memref<16x8x32xf32, #tpu.memory_space<vmem>>, vector<16x8x32xf32>
    %165 = vector.shape_cast %164 : vector<16x8x32xf32> to vector<128x32xf32>
    %166 = arith.truncf %165 : vector<128x32xf32> to vector<128x32xbf16>
    %c0_84 = arith.constant 0 : index
    %c0_85 = arith.constant 0 : index
    %167 = vector.load %arg6[%c0_84, %c0_85] : memref<32x32xbf16, #tpu.memory_space<vmem>>, vector<32x32xbf16>
    %cst_86 = arith.constant dense<0.000000e+00> : vector<128x32xf32>
    %168 = tpu.matmul %166, %167, %cst_86 {dimension_numbers = #tpu.dot_dimension_numbers<[1], [0], [0], [1], [0, 0, 1, 1], [], []>} : vector<128x32xbf16>, vector<32x32xbf16>, vector<128x32xf32> -> vector<128x32xf32>
    %c0_87 = arith.constant 0 : index
    %c0_88 = arith.constant 0 : index
    %169 = vector.load %arg7[%c0_87, %c0_88] : memref<1x32xf32, #tpu.memory_space<vmem>>, vector<1x32xf32>
    %170 = vector.shape_cast %169 : vector<1x32xf32> to vector<32xf32>
    %171 = vector.shape_cast %170 : vector<32xf32> to vector<1x32xf32>
    %172 = vector.broadcast %171 : vector<1x32xf32> to vector<128x32xf32>
    %173 = arith.addf %168, %172 : vector<128x32xf32>
    %174 = arith.addf %41, %173 : vector<128x32xf32>
    %c0_89 = arith.constant 0 : index
    %c0_90 = arith.constant 0 : index
    %175 = vector.load %arg8[%c0_89, %c0_90] : memref<1x32xf32, #tpu.memory_space<vmem>>, vector<1x32xf32>
    %176 = vector.shape_cast %175 : vector<1x32xf32> to vector<32xf32>
    %c0_91 = arith.constant 0 : index
    %c0_92 = arith.constant 0 : index
    %177 = vector.load %arg9[%c0_91, %c0_92] : memref<1x32xf32, #tpu.memory_space<vmem>>, vector<1x32xf32>
    %178 = vector.shape_cast %177 : vector<1x32xf32> to vector<32xf32>
    %cst_93 = arith.constant dense<0.000000e+00> : vector<128xf32>
    %179 = vector.multi_reduction <add>, %174, %cst_93 [1] : vector<128x32xf32> to vector<128xf32>
    %180 = vector.shape_cast %179 : vector<128xf32> to vector<128x1xf32>
    %cst_94 = arith.constant 3.200000e+01 : f32
    %181 = vector.broadcast %cst_94 : f32 to vector<128x1xf32>
    %182 = arith.divf %180, %181 : vector<128x1xf32>
    %183 = vector.broadcast %182 : vector<128x1xf32> to vector<128x32xf32>
    %184 = arith.subf %174, %183 : vector<128x32xf32>
    %185 = arith.mulf %184, %184 : vector<128x32xf32>
    %cst_95 = arith.constant dense<0.000000e+00> : vector<128xf32>
    %186 = vector.multi_reduction <add>, %185, %cst_95 [1] : vector<128x32xf32> to vector<128xf32>
    %187 = vector.shape_cast %186 : vector<128xf32> to vector<128x1xf32>
    %cst_96 = arith.constant 3.200000e+01 : f32
    %188 = vector.broadcast %cst_96 : f32 to vector<128x1xf32>
    %189 = arith.divf %187, %188 : vector<128x1xf32>
    %190 = vector.broadcast %182 : vector<128x1xf32> to vector<128x32xf32>
    %191 = arith.subf %174, %190 : vector<128x32xf32>
    %cst_97 = arith.constant 9.99999974E-6 : f32
    %192 = vector.broadcast %cst_97 : f32 to vector<128x1xf32>
    %193 = arith.addf %189, %192 : vector<128x1xf32>
    %194 = math.rsqrt %193 : vector<128x1xf32>
    %195 = vector.broadcast %194 : vector<128x1xf32> to vector<128x32xf32>
    %196 = arith.mulf %191, %195 : vector<128x32xf32>
    %197 = vector.shape_cast %176 : vector<32xf32> to vector<1x32xf32>
    %198 = vector.broadcast %197 : vector<1x32xf32> to vector<128x32xf32>
    %199 = arith.mulf %196, %198 : vector<128x32xf32>
    %200 = vector.shape_cast %178 : vector<32xf32> to vector<1x32xf32>
    %201 = vector.broadcast %200 : vector<1x32xf32> to vector<128x32xf32>
    %202 = arith.addf %199, %201 : vector<128x32xf32>
    %203 = arith.truncf %202 : vector<128x32xf32> to vector<128x32xbf16>
    %c0_98 = arith.constant 0 : index
    %c0_99 = arith.constant 0 : index
    %204 = vector.load %arg10[%c0_98, %c0_99] : memref<32x64xbf16, #tpu.memory_space<vmem>>, vector<32x64xbf16>
    %cst_100 = arith.constant dense<0.000000e+00> : vector<128x64xf32>
    %205 = tpu.matmul %203, %204, %cst_100 {dimension_numbers = #tpu.dot_dimension_numbers<[1], [0], [0], [1], [0, 0, 1, 1], [], []>} : vector<128x32xbf16>, vector<32x64xbf16>, vector<128x64xf32> -> vector<128x64xf32>
    %c0_101 = arith.constant 0 : index
    %c0_102 = arith.constant 0 : index
    %206 = vector.load %arg11[%c0_101, %c0_102] : memref<1x64xf32, #tpu.memory_space<vmem>>, vector<1x64xf32>
    %207 = vector.shape_cast %206 : vector<1x64xf32> to vector<64xf32>
    %208 = vector.shape_cast %207 : vector<64xf32> to vector<1x64xf32>
    %209 = vector.broadcast %208 : vector<1x64xf32> to vector<128x64xf32>
    %210 = arith.addf %205, %209 : vector<128x64xf32>
    %cst_103 = arith.constant 5.000000e-01 : f32
    %211 = vector.broadcast %cst_103 : f32 to vector<128x64xf32>
    %212 = arith.mulf %211, %210 : vector<128x64xf32>
    %cst_104 = arith.constant 0.707106769 : f32
    %213 = vector.broadcast %cst_104 : f32 to vector<128x64xf32>
    %214 = arith.mulf %210, %213 : vector<128x64xf32>
    %215 = math.erf %214 : vector<128x64xf32>
    %cst_105 = arith.constant 1.000000e+00 : f32
    %216 = vector.broadcast %cst_105 : f32 to vector<128x64xf32>
    %217 = arith.addf %216, %215 : vector<128x64xf32>
    %218 = arith.mulf %212, %217 : vector<128x64xf32>
    %219 = arith.truncf %218 : vector<128x64xf32> to vector<128x64xbf16>
    %c0_106 = arith.constant 0 : index
    %c0_107 = arith.constant 0 : index
    %220 = vector.load %arg12[%c0_106, %c0_107] : memref<64x32xbf16, #tpu.memory_space<vmem>>, vector<64x32xbf16>
    %cst_108 = arith.constant dense<0.000000e+00> : vector<128x32xf32>
    %221 = tpu.matmul %219, %220, %cst_108 {dimension_numbers = #tpu.dot_dimension_numbers<[1], [0], [0], [1], [0, 0, 1, 1], [], []>} : vector<128x64xbf16>, vector<64x32xbf16>, vector<128x32xf32> -> vector<128x32xf32>
    %c0_109 = arith.constant 0 : index
    %c0_110 = arith.constant 0 : index
    %222 = vector.load %arg13[%c0_109, %c0_110] : memref<1x32xf32, #tpu.memory_space<vmem>>, vector<1x32xf32>
    %223 = vector.shape_cast %222 : vector<1x32xf32> to vector<32xf32>
    %224 = vector.shape_cast %223 : vector<32xf32> to vector<1x32xf32>
    %225 = vector.broadcast %224 : vector<1x32xf32> to vector<128x32xf32>
    %226 = arith.addf %221, %225 : vector<128x32xf32>
    %227 = arith.addf %174, %226 : vector<128x32xf32>
    %228 = vector.shape_cast %227 : vector<128x32xf32> to vector<16x8x32xf32>
    %c0_111 = arith.constant 0 : index
    %c0_112 = arith.constant 0 : index
    %c0_113 = arith.constant 0 : index
    %229 = vector.load %arg15[%c0_111, %c0_112, %c0_113] : memref<16x8x32xf32, #tpu.memory_space<vmem>>, vector<16x8x32xf32>
    tpu.vector_store %arg15[%c0_111, %c0_112, %c0_113], %228 {strides = array<i32>} : memref<16x8x32xf32, #tpu.memory_space<vmem>>, vector<16x8x32xf32>,
    %c0_114 = arith.constant 0 : index
    %c0_115 = arith.constant 0 : index
    %c0_116 = arith.constant 0 : index
    %230 = vector.load %arg15[%c0_114, %c0_115, %c0_116] : memref<16x8x32xf32, #tpu.memory_space<vmem>>, vector<16x1x32xf32>
    %231 = vector.shape_cast %230 : vector<16x1x32xf32> to vector<16x32xf32>
    %c0_117 = arith.constant 0 : index
    %c0_118 = arith.constant 0 : index
    %c0_119 = arith.constant 0 : index
    %232 = vector.load %arg14[%c0_117, %c0_118, %c0_119] : memref<8x16x32xf32, #tpu.memory_space<vmem>>, vector<1x16x32xf32>
    %233 = vector.shape_cast %232 : vector<1x16x32xf32> to vector<16x32xf32>
    %234 = vector.shape_cast %231 : vector<16x32xf32> to vector<1x16x32xf32>
    tpu.vector_store %arg14[%c0_117, %c0_118, %c0_119], %234 {strides = array<i32>} : memref<8x16x32xf32, #tpu.memory_space<vmem>>, vector<1x16x32xf32>,
    %c0_120 = arith.constant 0 : index
    %c1_121 = arith.constant 1 : index
    %c0_122 = arith.constant 0 : index
    %235 = vector.load %arg15[%c0_120, %c1_121, %c0_122] : memref<16x8x32xf32, #tpu.memory_space<vmem>>, vector<16x1x32xf32>
    %236 = vector.shape_cast %235 : vector<16x1x32xf32> to vector<16x32xf32>
    %c1_123 = arith.constant 1 : index
    %c0_124 = arith.constant 0 : index
    %c0_125 = arith.constant 0 : index
    %237 = vector.load %arg14[%c1_123, %c0_124, %c0_125] : memref<8x16x32xf32, #tpu.memory_space<vmem>>, vector<1x16x32xf32>
    %238 = vector.shape_cast %237 : vector<1x16x32xf32> to vector<16x32xf32>
    %239 = vector.shape_cast %236 : vector<16x32xf32> to vector<1x16x32xf32>
    tpu.vector_store %arg14[%c1_123, %c0_124, %c0_125], %239 {strides = array<i32>} : memref<8x16x32xf32, #tpu.memory_space<vmem>>, vector<1x16x32xf32>,
    %c0_126 = arith.constant 0 : index
    %c2_127 = arith.constant 2 : index
    %c0_128 = arith.constant 0 : index
    %240 = vector.load %arg15[%c0_126, %c2_127, %c0_128] : memref<16x8x32xf32, #tpu.memory_space<vmem>>, vector<16x1x32xf32>
    %241 = vector.shape_cast %240 : vector<16x1x32xf32> to vector<16x32xf32>
    %c2_129 = arith.constant 2 : index
    %c0_130 = arith.constant 0 : index
    %c0_131 = arith.constant 0 : index
    %242 = vector.load %arg14[%c2_129, %c0_130, %c0_131] : memref<8x16x32xf32, #tpu.memory_space<vmem>>, vector<1x16x32xf32>
    %243 = vector.shape_cast %242 : vector<1x16x32xf32> to vector<16x32xf32>
    %244 = vector.shape_cast %241 : vector<16x32xf32> to vector<1x16x32xf32>
    tpu.vector_store %arg14[%c2_129, %c0_130, %c0_131], %244 {strides = array<i32>} : memref<8x16x32xf32, #tpu.memory_space<vmem>>, vector<1x16x32xf32>,
    %c0_132 = arith.constant 0 : index
    %c3_133 = arith.constant 3 : index
    %c0_134 = arith.constant 0 : index
    %245 = vector.load %arg15[%c0_132, %c3_133, %c0_134] : memref<16x8x32xf32, #tpu.memory_space<vmem>>, vector<16x1x32xf32>
    %246 = vector.shape_cast %245 : vector<16x1x32xf32> to vector<16x32xf32>
    %c3_135 = arith.constant 3 : index
    %c0_136 = arith.constant 0 : index
    %c0_137 = arith.constant 0 : index
    %247 = vector.load %arg14[%c3_135, %c0_136, %c0_137] : memref<8x16x32xf32, #tpu.memory_space<vmem>>, vector<1x16x32xf32>
    %248 = vector.shape_cast %247 : vector<1x16x32xf32> to vector<16x32xf32>
    %249 = vector.shape_cast %246 : vector<16x32xf32> to vector<1x16x32xf32>
    tpu.vector_store %arg14[%c3_135, %c0_136, %c0_137], %249 {strides = array<i32>} : memref<8x16x32xf32, #tpu.memory_space<vmem>>, vector<1x16x32xf32>,
    %c0_138 = arith.constant 0 : index
    %c4_139 = arith.constant 4 : index
    %c0_140 = arith.constant 0 : index
    %250 = vector.load %arg15[%c0_138, %c4_139, %c0_140] : memref<16x8x32xf32, #tpu.memory_space<vmem>>, vector<16x1x32xf32>
    %251 = vector.shape_cast %250 : vector<16x1x32xf32> to vector<16x32xf32>
    %c4_141 = arith.constant 4 : index
    %c0_142 = arith.constant 0 : index
    %c0_143 = arith.constant 0 : index
    %252 = vector.load %arg14[%c4_141, %c0_142, %c0_143] : memref<8x16x32xf32, #tpu.memory_space<vmem>>, vector<1x16x32xf32>
    %253 = vector.shape_cast %252 : vector<1x16x32xf32> to vector<16x32xf32>
    %254 = vector.shape_cast %251 : vector<16x32xf32> to vector<1x16x32xf32>
    tpu.vector_store %arg14[%c4_141, %c0_142, %c0_143], %254 {strides = array<i32>} : memref<8x16x32xf32, #tpu.memory_space<vmem>>, vector<1x16x32xf32>,
    %c0_144 = arith.constant 0 : index
    %c5_145 = arith.constant 5 : index
    %c0_146 = arith.constant 0 : index
    %255 = vector.load %arg15[%c0_144, %c5_145, %c0_146] : memref<16x8x32xf32, #tpu.memory_space<vmem>>, vector<16x1x32xf32>
    %256 = vector.shape_cast %255 : vector<16x1x32xf32> to vector<16x32xf32>
    %c5_147 = arith.constant 5 : index
    %c0_148 = arith.constant 0 : index
    %c0_149 = arith.constant 0 : index
    %257 = vector.load %arg14[%c5_147, %c0_148, %c0_149] : memref<8x16x32xf32, #tpu.memory_space<vmem>>, vector<1x16x32xf32>
    %258 = vector.shape_cast %257 : vector<1x16x32xf32> to vector<16x32xf32>
    %259 = vector.shape_cast %256 : vector<16x32xf32> to vector<1x16x32xf32>
    tpu.vector_store %arg14[%c5_147, %c0_148, %c0_149], %259 {strides = array<i32>} : memref<8x16x32xf32, #tpu.memory_space<vmem>>, vector<1x16x32xf32>,
    %c0_150 = arith.constant 0 : index
    %c6_151 = arith.constant 6 : index
    %c0_152 = arith.constant 0 : index
    %260 = vector.load %arg15[%c0_150, %c6_151, %c0_152] : memref<16x8x32xf32, #tpu.memory_space<vmem>>, vector<16x1x32xf32>
    %261 = vector.shape_cast %260 : vector<16x1x32xf32> to vector<16x32xf32>
    %c6_153 = arith.constant 6 : index
    %c0_154 = arith.constant 0 : index
    %c0_155 = arith.constant 0 : index
    %262 = vector.load %arg14[%c6_153, %c0_154, %c0_155] : memref<8x16x32xf32, #tpu.memory_space<vmem>>, vector<1x16x32xf32>
    %263 = vector.shape_cast %262 : vector<1x16x32xf32> to vector<16x32xf32>
    %264 = vector.shape_cast %261 : vector<16x32xf32> to vector<1x16x32xf32>
    tpu.vector_store %arg14[%c6_153, %c0_154, %c0_155], %264 {strides = array<i32>} : memref<8x16x32xf32, #tpu.memory_space<vmem>>, vector<1x16x32xf32>,
    %c0_156 = arith.constant 0 : index
    %c7_157 = arith.constant 7 : index
    %c0_158 = arith.constant 0 : index
    %265 = vector.load %arg15[%c0_156, %c7_157, %c0_158] : memref<16x8x32xf32, #tpu.memory_space<vmem>>, vector<16x1x32xf32>
    %266 = vector.shape_cast %265 : vector<16x1x32xf32> to vector<16x32xf32>
    %c7_159 = arith.constant 7 : index
    %c0_160 = arith.constant 0 : index
    %c0_161 = arith.constant 0 : index
    %267 = vector.load %arg14[%c7_159, %c0_160, %c0_161] : memref<8x16x32xf32, #tpu.memory_space<vmem>>, vector<1x16x32xf32>
    %268 = vector.shape_cast %267 : vector<1x16x32xf32> to vector<16x32xf32>
    %269 = vector.shape_cast %266 : vector<16x32xf32> to vector<1x16x32xf32>
    tpu.vector_store %arg14[%c7_159, %c0_160, %c0_161], %269 {strides = array<i32>} : memref<8x16x32xf32, #tpu.memory_space<vmem>>, vector<1x16x32xf32>,
    return
  }
  func.func @transform_0(%arg0: i32) -> (i32, i32, i32) {
    %c0_i32 = arith.constant 0 : i32
    %c0_i32_0 = arith.constant 0 : i32
    %c0_i32_1 = arith.constant 0 : i32
    return %c0_i32, %arg0, %c0_i32_0 : i32, i32, i32
  }
  func.func @transform_1(%arg0: i32) -> (i32, i32) {
    %c0_i32 = arith.constant 0 : i32
    %c0_i32_0 = arith.constant 0 : i32
    %c0_i32_1 = arith.constant 0 : i32
    return %c0_i32, %c0_i32_0 : i32, i32
  }
  func.func @transform_2(%arg0: i32) -> (i32, i32) {
    %c0_i32 = arith.constant 0 : i32
    %c0_i32_0 = arith.constant 0 : i32
    %c0_i32_1 = arith.constant 0 : i32
    return %c0_i32, %c0_i32_0 : i32, i32
  }
  func.func @transform_3(%arg0: i32) -> (i32, i32) {
    %c0_i32 = arith.constant 0 : i32
    %c0_i32_0 = arith.constant 0 : i32
    %c0_i32_1 = arith.constant 0 : i32
    return %c0_i32, %c0_i32_0 : i32, i32
  }
  func.func @transform_4(%arg0: i32) -> (i32, i32) {
    %c0_i32 = arith.constant 0 : i32
    %c0_i32_0 = arith.constant 0 : i32
    %c0_i32_1 = arith.constant 0 : i32
    return %c0_i32, %c0_i32_0 : i32, i32
  }
  func.func @transform_5(%arg0: i32) -> (i32, i32) {
    %c0_i32 = arith.constant 0 : i32
    %c0_i32_0 = arith.constant 0 : i32
    %c0_i32_1 = arith.constant 0 : i32
    return %c0_i32, %c0_i32_0 : i32, i32
  }
  func.func @transform_6(%arg0: i32) -> (i32, i32) {
    %c0_i32 = arith.constant 0 : i32
    %c0_i32_0 = arith.constant 0 : i32
    %c0_i32_1 = arith.constant 0 : i32
    return %c0_i32, %c0_i32_0 : i32, i32
  }
  func.func @transform_7(%arg0: i32) -> (i32, i32) {
    %c0_i32 = arith.constant 0 : i32
    %c0_i32_0 = arith.constant 0 : i32
    %c0_i32_1 = arith.constant 0 : i32
    return %c0_i32, %c0_i32_0 : i32, i32
  }
  func.func @transform_8(%arg0: i32) -> (i32, i32) {
    %c0_i32 = arith.constant 0 : i32
    %c0_i32_0 = arith.constant 0 : i32
    %c0_i32_1 = arith.constant 0 : i32
    return %c0_i32, %c0_i32_0 : i32, i32
  }
  func.func @transform_9(%arg0: i32) -> (i32, i32) {
    %c0_i32 = arith.constant 0 : i32
    %c0_i32_0 = arith.constant 0 : i32
    %c0_i32_1 = arith.constant 0 : i32
    return %c0_i32, %c0_i32_0 : i32, i32
  }
  func.func @transform_10(%arg0: i32) -> (i32, i32) {
    %c0_i32 = arith.constant 0 : i32
    %c0_i32_0 = arith.constant 0 : i32
    %c0_i32_1 = arith.constant 0 : i32
    return %c0_i32, %c0_i32_0 : i32, i32
  }
  func.func @transform_11(%arg0: i32) -> (i32, i32) {
    %c0_i32 = arith.constant 0 : i32
    %c0_i32_0 = arith.constant 0 : i32
    %c0_i32_1 = arith.constant 0 : i32
    return %c0_i32, %c0_i32_0 : i32, i32
  }
  func.func @transform_12(%arg0: i32) -> (i32, i32) {
    %c0_i32 = arith.constant 0 : i32
    %c0_i32_0 = arith.constant 0 : i32
    %c0_i32_1 = arith.constant 0 : i32
    return %c0_i32, %c0_i32_0 : i32, i32
  }
  func.func @transform_13(%arg0: i32) -> (i32, i32, i32) {
    %c0_i32 = arith.constant 0 : i32
    %c0_i32_0 = arith.constant 0 : i32
    %c0_i32_1 = arith.constant 0 : i32
    return %c0_i32, %arg0, %c0_i32_0 : i32, i32, i32
  }
}

</mosaic_0001>

<bundles_post_ra>
// kernel: tpu_custom_call.1
= control target key start
LH: loop header
LB: loop body
LE: loop exit
PB: predicated region body
PF: predicated region fallthrough
CT: control target
= control target key end

     0   :  { %18 = vsyncpa [#allocation4], 0  ;;  %s15602_s0 = inlined_call_operand.hbm [shape: f32[8,16,32], index: 0, kind: input, shape index: {}]   ;;  %s15603_s1 = inlined_call_operand.vmem [shape: f32[1,32], index: 1, kind: input, shape index: {}]   ;;  %s15604_s2 = inlined_call_operand.vmem [shape: f32[1,32], index: 2, kind: input, shape index: {}]   ;;  %s15605_s3 = inlined_call_operand.vmem [shape: bf16[32,96], index: 3, kind: input, shape index: {}]   ;;  %s15606_s4 = inlined_call_operand.vmem [shape: f32[1,96], index: 4, kind: input, shape index: {}]   ;;  %s15607_s5 = inlined_call_operand.vmem [shape: bf16[32,32], index: 5, kind: input, shape index: {}]   ;;  %s15608_s6 = inlined_call_operand.vmem [shape: f32[1,32], index: 6, kind: input, shape index: {}]   ;;  %s15609_s7 = inlined_call_operand.vmem [shape: f32[1,32], index: 7, kind: input, shape index: {}]   ;;  %s15610_s8 = inlined_call_operand.vmem [shape: f32[1,32], index: 8, kind: input, shape index: {}]   ;;  %s15611_s9 = inlined_call_operand.vmem [shape: bf16[32,64], index: 9, kind: input, shape index: {}]   ;;  %s15612_s10 = inlined_call_operand.vmem [shape: f32[1,64], index: 10, kind: input, shape index: {}]   ;;  %s15613_s11 = inlined_call_operand.vmem [shape: bf16[64,32], index: 11, kind: input, shape index: {}]   ;;  %s15614_s12 = inlined_call_operand.vmem [shape: f32[1,32], index: 12, kind: input, shape index: {}]   ;;  %s15615_s13 = inlined_call_operand.hbm [shape: f32[8,16,32], index: 13, kind: output, shape index: {}]  }
   0x1   :  { %19 = vsyncpa [#allocation5], 0  ;;  %s12048_s25 = smov [#allocation3]   ;;  %s12000_s29 = scalar_lea.hbm %s15602_s0, 2048 }
   0x2   :  { %s25_s26 = sshll.u32 %s12048_s25, 4  ;;  %p12001_p0 = scmp.ne.s32.totalorder %s15602_s0, %s12000_s29  ;;  %s26_s26 = int_to_ptr.vmem [resolvable:$true] %s25_s26 }
   0x3   :  { %p12004_p1 = scmp.lt.u32.totalorder %s12000_s29, %s15602_s0 }
   0x5   :  { %p12006_p2 = pnand %p12004_p1, %p12001_p0 }
   0x7   :  { %12009 = shalt.err (!%p12006_p2)
}
   0x8   :  { %s12010_s17 = scalar_lea.vmem %s26_s26, 2048  ;;  %p12015_p4 = scmp.lt.s32.totalorder %s26_s26, %s26_s26 }
   0x9   :  { %p12011_p3 = scmp.ne.s32.totalorder %s26_s26, %s12010_s17  ;;  %p12016_p5 = scmp.lt.s32.totalorder %s12010_s17, %s12010_s17 }
   0xb   :  { %p12017_p6 = por %p12016_p5, %p12015_p4 }
   0xd   :  { %p12018_p7 = pnand %p12017_p6, %p12011_p3 }
   0xf   :  { %12021 = shalt.err (!%p12018_p7)
}
  0x10   :  { %s12049_s18 = smov 128   ;;  %s12050_s19 = smov 8  }
  0x11   :  { %31 = dma.hbm_to_vmem [thread:$0]  %s15602_s0, 2048, %s26_s26, [#allocation4], %s12049_s18, %s12049_s18, %s12050_s19  }
  0x12   :  { %12044 = dma.done.wait [#allocation4], 2048  }
  0x13   :  { %12045 = vsyncadd [#allocation4], 4294965248  ;;  %v68_v0 = vlaneseq  ;;  %v12051_v1 = vmov 1966171168   ;;  %v12155_v6 = vld [vmem:[#allocation3] sm:$0xff]  ;;  %vm178_vm0 = vcmask 253952  }
  0x14   :  { %v66_v2 = vunpack.c.l.s4 %v12051_v1  ;;  %v12157_v7 = vld [vmem:[#allocation3 + $0x10] sm:$0xff]  ;;  %v12159_v8 = vld [vmem:[#allocation3 + $0x20] sm:$0xff]  ;;  %vm1158_vm1 = vcmask 261120   ;;  %v64_v35 = vcombine.high %v12155_v6, %v12155_v6  ;;  %s12053_s28 = smov 96   ;;  %vm12054_vm2 = vmmov 0   ;;  %s12056_s29 = smov 88  }
  0x15   :  { %v69_v3 = vshrl.u32 %v68_v0, 7  ;;  %v200_v10 = vcombine.high %v12157_v7, %v12157_v7  ;;  %v335_v12 = vcombine.high %v12159_v8, %v12159_v8  ;;  %v12169_v13 = vld [vmem:[#allocation3 + $0x30] sm:$0xff]  ;;  %v12171_v14 = vld [vmem:[#allocation3 + $0x40] sm:$0xff]  ;;  %vm1583_vm3 = vcmask 64512   ;;  %s12057_s30 = smov 120   ;;  %s12058_s14 = smov 56  }
  0x16   :  { %v67_v4 = vunpack.c.0.s8 %v66_v2  ;;  %v12173_v15 = vld [vmem:[#allocation3 + $0x50] sm:$0xff]  ;;  %v470_v17 = vcombine.high %v12169_v13, %v12169_v13  ;;  %v605_v19 = vcombine.high %v12171_v14, %v12171_v14  ;;  %v12183_v20 = vld [vmem:[#allocation3 + $0x60] sm:$0xff]  ;;  %vm2562_vm4 = vcmask 1043456   ;;  %s12059_s15 = smov 80   ;;  %s12060_s16 = smov 112  }
  0x17   :  { %v12185_v21 = vld [vmem:[#allocation3 + $0x70] sm:$0xff]  ;;  %v740_v25 = vcombine.high %v12173_v15, %v12173_v15  ;;  %v875_v29 = vcombine.high %v12183_v20, %v12183_v20  ;;  %s12061_s17 = smov 48   ;;  %s12062_s20 = smov 72   ;;  %vm5166_vm5 = vcmask 130112   ;;  %vm7007_vm6 = vcmask 195712  }
  0x18   :  { %v12153_v5 = vsub.s32 %v67_v4, %v69_v3  ;;  %v1010_v32 = vcombine.high %v12185_v21, %v12185_v21  ;;  %s12063_s21 = smov 104   ;;  %s12064_s0 = smov 40   ;;  %vm8848_vm7 = vcmask 261312   ;;  %vm9582_vm8 = vcmask 523264  }
  0x19   :  { %s12065_s22 = smov 16   ;;  %s12066_s23 = smov 24   ;;  %vm9769_vm9 = vcmask 1041409   ;;  %vm9772_vm10 = vcmask 1042434   ;;  %vm9775_vm11 = vcmask 1043459   ;;  %vm9778_vm12 = vcmask 1044484  }
  0x1a   :  { %v71_v9 = vrot.slane %v12155_v6, %v12153_v5  ;;  %v207_v11 = vrot.slane %v12157_v7, %v12153_v5  ;;  %v342_v16 = vrot.slane %v12159_v8, %v12153_v5  ;;  %v477_v18 = vrot.slane %v12169_v13, %v12153_v5 }
  0x1b   :  { %v612_v24 = vrot.slane %v12171_v14, %v12153_v5  ;;  %v747_v28 = vrot.slane %v12173_v15, %v12153_v5  ;;  %v882_v31 = vrot.slane %v12183_v20, %v12153_v5  ;;  %v1017_v33 = vrot.slane %v12185_v21, %v12153_v5 }
  0x1c   :  { %v87_v22 = vrot.slane %v71_v9, %v12153_v5  ;;  %v223_v23 = vrot.slane %v207_v11, %v12153_v5  ;;  %v358_v26 = vrot.slane %v342_v16, %v12153_v5  ;;  %v493_v27 = vrot.slane %v477_v18, %v12153_v5 }
  0x1d   :  { %v628_v30 = vrot.slane %v612_v24, %v12153_v5  ;;  %v763_v34 = vrot.slane %v747_v28, %v12153_v5  ;;  %v898_v38 = vrot.slane %v882_v31, %v12153_v5  ;;  %v1033_v39 = vrot.slane %v1017_v33, %v12153_v5 }
  0x1e   :  { %179 = vst.msk [vmem:[#allocation2] sm:$0x1] %vm178_vm0, %v87_v22  ;;  %314 = vst.msk [vmem:[#allocation2 + $0x1] sm:$0x1] %vm178_vm0, %v223_v23  ;;  %v109_v36 = vcombine.high %v87_v22, %v87_v22  ;;  %v245_v37 = vcombine.high %v223_v23, %v223_v23  ;;  %v380_v40 = vcombine.high %v358_v26, %v358_v26  ;;  %vm9781_vm13 = vcmask 1045509  }
  0x1f   :  { %449 = vst.msk [vmem:[#allocation2 + $0x2] sm:$0x1] %vm178_vm0, %v358_v26  ;;  %584 = vst.msk [vmem:[#allocation2 + $0x3] sm:$0x1] %vm178_vm0, %v493_v27  ;;  %v515_v41 = vcombine.high %v493_v27, %v493_v27  ;;  %v650_v42 = vcombine.high %v628_v30, %v628_v30  ;;  %v785_v43 = vcombine.high %v763_v34, %v763_v34  ;;  %vm9784_vm14 = vcmask 1046534  }
  0x20   :  { %719 = vst.msk [vmem:[#allocation2 + $0x4] sm:$0x1] %vm178_vm0, %v628_v30  ;;  %854 = vst.msk [vmem:[#allocation2 + $0x5] sm:$0x1] %vm178_vm0, %v763_v34  ;;  %v79_v44 = vcombine.high %v71_v9, %v71_v9  ;;  %v215_v45 = vcombine.high %v207_v11, %v207_v11  ;;  %v920_v46 = vcombine.high %v898_v38, %v898_v38  ;;  %vm9787_vm15 = vcmask 1047559  }
  0x21   :  { %181 = vst.msk [vmem:[#allocation2 + $0x10] sm:$0x1] %vm178_vm0, %v109_v36  ;;  %316 = vst.msk [vmem:[#allocation2 + $0x11] sm:$0x1] %vm178_vm0, %v245_v37  ;;  %v1055_v47 = vcombine.high %v1033_v39, %v1033_v39  ;;  %v350_v48 = vcombine.high %v342_v16, %v342_v16  ;;  %v485_v49 = vcombine.high %v477_v18, %v477_v18 }
  0x22   :  { %989 = vst.msk [vmem:[#allocation2 + $0x6] sm:$0x1] %vm178_vm0, %v898_v38  ;;  %1124 = vst.msk [vmem:[#allocation2 + $0x7] sm:$0x1] %vm178_vm0, %v1033_v39  ;;  %v101_v50 = vrot.slane %v79_v44, %v12153_v5  ;;  %v237_v51 = vrot.slane %v215_v45, %v12153_v5  ;;  %v620_v52 = vcombine.high %v612_v24, %v612_v24 }
  0x23   :  { %451 = vst.msk [vmem:[#allocation2 + $0x12] sm:$0x1] %vm178_vm0, %v380_v40  ;;  %586 = vst.msk [vmem:[#allocation2 + $0x13] sm:$0x1] %vm178_vm0, %v515_v41  ;;  %v755_v53 = vcombine.high %v747_v28, %v747_v28  ;;  %v372_v54 = vrot.slane %v350_v48, %v12153_v5  ;;  %v507_v55 = vrot.slane %v485_v49, %v12153_v5  ;;  %v12345_v48 = vld [vmem:[#allocation3 + $0x28] sm:$0xff]  ;;  %v12347_v49 = vld [vmem:[#allocation3 + $0x38] sm:$0xff] }
  0x24   :  { %721 = vst.msk [vmem:[#allocation2 + $0x14] sm:$0x1] %vm178_vm0, %v650_v42  ;;  %856 = vst.msk [vmem:[#allocation2 + $0x15] sm:$0x1] %vm178_vm0, %v785_v43  ;;  %v890_v56 = vcombine.high %v882_v31, %v882_v31  ;;  %v1025_v57 = vcombine.high %v1017_v33, %v1017_v33  ;;  %v642_v58 = vrot.slane %v620_v52, %v12153_v5  ;;  %v12333_v42 = vld [vmem:[#allocation3 + $0x8] sm:$0xff]  ;;  %v12335_v43 = vld [vmem:[#allocation3 + $0x18] sm:$0xff] }
  0x25   :  { %991 = vst.msk [vmem:[#allocation2 + $0x16] sm:$0x1] %vm178_vm0, %v920_v46  ;;  %1126 = vst.msk [vmem:[#allocation2 + $0x17] sm:$0x1] %vm178_vm0, %v1055_v47  ;;  %v777_v59 = vrot.slane %v755_v53, %v12153_v5  ;;  %v111_v60 = vcombine.high %v101_v50, %v101_v50  ;;  %v247_v61 = vcombine.high %v237_v51, %v237_v51 }
  0x26   :  { %180 = vst.msk [vmem:[#allocation2 + $0x8] sm:$0x1] %vm178_vm0, %v101_v50  ;;  %315 = vst.msk [vmem:[#allocation2 + $0x9] sm:$0x1] %vm178_vm0, %v237_v51  ;;  %v912_v62 = vrot.slane %v890_v56, %v12153_v5  ;;  %v1047_v63 = vrot.slane %v1025_v57, %v12153_v5  ;;  %v382_v0 = vcombine.high %v372_v54, %v372_v54  ;;  %v12349_v50 = vld [vmem:[#allocation3 + $0x48] sm:$0xff]  ;;  %v12363_v56 = vld [vmem:[#allocation3 + $0x58] sm:$0xff] }
  0x27   :  { %450 = vst.msk [vmem:[#allocation2 + $0xa] sm:$0x1] %vm178_vm0, %v372_v54  ;;  %585 = vst.msk [vmem:[#allocation2 + $0xb] sm:$0x1] %vm178_vm0, %v507_v55  ;;  %v517_v1 = vcombine.high %v507_v55, %v507_v55  ;;  %v652_v2 = vcombine.high %v642_v58, %v642_v58  ;;  %v787_v3 = vcombine.high %v777_v59, %v777_v59 }
  0x28   :  { %720 = vst.msk [vmem:[#allocation2 + $0xc] sm:$0x1] %vm178_vm0, %v642_v58  ;;  %855 = vst.msk [vmem:[#allocation2 + $0xd] sm:$0x1] %vm178_vm0, %v777_v59  ;;  %v12244_v4 = vrot.slane %v64_v35, %v12153_v5  ;;  %v12250_v6 = vrot.slane %v200_v10, %v12153_v5  ;;  %v922_v9 = vcombine.high %v912_v62, %v912_v62 }
  0x29   :  { %182 = vst.msk [vmem:[#allocation2 + $0x18] sm:$0x1] %vm178_vm0, %v111_v60  ;;  %317 = vst.msk [vmem:[#allocation2 + $0x19] sm:$0x1] %vm178_vm0, %v247_v61  ;;  %v1057_v11 = vcombine.high %v1047_v63, %v1047_v63  ;;  %v349_v16 = vrot.slane %v335_v12, %v12153_v5  ;;  %v12264_v7 = vrot.slane %v470_v17, %v12153_v5  ;;  %v12266_v10 = vld [vmem:[#allocation2] sm:$0xff]  ;;  %v12381_v61 = vld [vmem:[#allocation3 + $0x68] sm:$0xff] }
  0x2a   :  { %990 = vst.msk [vmem:[#allocation2 + $0xe] sm:$0x1] %vm178_vm0, %v912_v62  ;;  %1125 = vst.msk [vmem:[#allocation2 + $0xf] sm:$0x1] %vm178_vm0, %v1047_v63  ;;  %v94_v18 = vrot.slane %v12244_v4, %v12153_v5  ;;  %v230_v22 = vrot.slane %v12250_v6, %v12153_v5  ;;  %v619_v8 = vrot.slane %v605_v19, %v12153_v5  ;;  %v1159_v13 = vsel %vm1158_vm1, %v12266_v10, 0.0 }
  0x2b   :  { %452 = vst.msk [vmem:[#allocation2 + $0x1a] sm:$0x1] %vm178_vm0, %v382_v0  ;;  %587 = vst.msk [vmem:[#allocation2 + $0x1b] sm:$0x1] %vm178_vm0, %v517_v1  ;;  %v754_v12 = vrot.slane %v740_v25, %v12153_v5  ;;  %v365_v17 = vrot.slane %v349_v16, %v12153_v5  ;;  %v500_v23 = vrot.slane %v12264_v7, %v12153_v5  ;;  %1160 = vadd.xlane.f32.xlu0 %v1159_v13 }
  0x2c   :  { %15634 = vst [vmem:[#allocation9_spill] sm:$0xff] %v12266_v10  ;;  %722 = vst.msk [vmem:[#allocation2 + $0x1c] sm:$0x1] %vm178_vm0, %v652_v2  ;;  %v12293_v14 = vrot.slane %v875_v29, %v12153_v5  ;;  %v12295_v15 = vld [vmem:[#allocation2 + $0x10] sm:$0xff]  ;;  %v635_v19 = vrot.slane %v619_v8, %v12153_v5  ;;  %v12305_v25 = vrot.slane %v1010_v32, %v12153_v5  ;;  %v12401_v2 = vld [vmem:[#allocation3 + $0x78] sm:$0xff] }
  0x2d   :  { %857 = vst.msk [vmem:[#allocation2 + $0x1d] sm:$0x1] %vm178_vm0, %v787_v3  ;;  %992 = vst.msk [vmem:[#allocation2 + $0x1e] sm:$0x1] %vm178_vm0, %v922_v9  ;;  %v770_v24 = vrot.slane %v754_v12, %v12153_v5  ;;  %v110_v20 = vcombine.high %v94_v18, %v94_v18  ;;  %v1165_v26 = vsel %vm1158_vm1, %v12295_v15, 0.0  ;;  %v246_v28 = vcombine.high %v230_v22, %v230_v22 }
  0x2e   :  { %1127 = vst.msk [vmem:[#allocation2 + $0x1f] sm:$0x1] %vm178_vm0, %v1057_v11  ;;  %15635 = vst [vmem:[#allocation10_spill] sm:$0xff] %v12295_v15  ;;  %v905_v27 = vrot.slane %v12293_v14, %v12153_v5  ;;  %v381_v29 = vcombine.high %v365_v17, %v365_v17  ;;  %1166 = vadd.xlane.f32.xlu1 %v1165_v26  ;;  %v1040_v21 = vrot.slane %v12305_v25, %v12153_v5 }
  0x2f   :  { %183 = vst.msk [vmem:[#allocation2 + $0x20] sm:$0x1] %vm178_vm0, %v94_v18  ;;  %318 = vst.msk [vmem:[#allocation2 + $0x21] sm:$0x1] %vm178_vm0, %v230_v22  ;;  %v516_v30 = vcombine.high %v500_v23, %v500_v23  ;;  %v651_v31 = vcombine.high %v635_v19, %v635_v19  ;;  %v786_v32 = vcombine.high %v770_v24, %v770_v24 }
  0x30   :  { %453 = vst.msk [vmem:[#allocation2 + $0x22] sm:$0x1] %vm178_vm0, %v365_v17  ;;  %588 = vst.msk [vmem:[#allocation2 + $0x23] sm:$0x1] %vm178_vm0, %v500_v23  ;;  %v921_v33 = vcombine.high %v905_v27, %v905_v27  ;;  %v80_v34 = vcombine.high %v12244_v4, %v12244_v4  ;;  %v216_v35 = vcombine.high %v12250_v6, %v12250_v6 }
  0x31   :  { %723 = vst.msk [vmem:[#allocation2 + $0x24] sm:$0x1] %vm178_vm0, %v635_v19  ;;  %858 = vst.msk [vmem:[#allocation2 + $0x25] sm:$0x1] %vm178_vm0, %v770_v24  ;;  %v351_v36 = vcombine.high %v349_v16, %v349_v16  ;;  %v12325_v37 = vld [vmem:[#allocation2 + $0x8] sm:$0xff]  ;;  %v1056_v38 = vcombine.high %v1040_v21, %v1040_v21  ;;  %v486_v39 = vcombine.high %v12264_v7, %v12264_v7 }
  0x32   :  { %185 = vst.msk [vmem:[#allocation2 + $0x30] sm:$0x1] %vm178_vm0, %v110_v20  ;;  %993 = vst.msk [vmem:[#allocation2 + $0x26] sm:$0x1] %vm178_vm0, %v905_v27  ;;  %v621_v40 = vcombine.high %v619_v8, %v619_v8  ;;  %v756_v41 = vcombine.high %v754_v12, %v754_v12  ;;  %v1162_v44 = vsel %vm1158_vm1, %v12325_v37, 0.0  ;;  %v108_v45 = vrot.slane %v80_v34, %v12153_v5 }
  0x33   :  { %320 = vst.msk [vmem:[#allocation2 + $0x31] sm:$0x1] %vm178_vm0, %v246_v28  ;;  %455 = vst.msk [vmem:[#allocation2 + $0x32] sm:$0x1] %vm178_vm0, %v381_v29  ;;  %v244_v46 = vrot.slane %v216_v35, %v12153_v5  ;;  %v12343_v47 = vrot.slane %v351_v36, %v12153_v5  ;;  %1163 = vadd.xlane.f32.xlu0 %v1162_v44  ;;  %v514_v52 = vrot.slane %v486_v39, %v12153_v5 }
  0x34   :  { %15636 = vst [vmem:[#allocation11_spill] sm:$0xff] %v12325_v37  ;;  %1128 = vst.msk [vmem:[#allocation2 + $0x27] sm:$0x1] %vm178_vm0, %v1040_v21  ;;  %v12356_v53 = vrot.slane %v621_v40, %v12153_v5  ;;  %v12359_v54 = vrot.slane %v756_v41, %v12153_v5  ;;  %v891_v55 = vcombine.high %v12293_v14, %v12293_v14 }
  0x35   :  { %590 = vst.msk [vmem:[#allocation2 + $0x33] sm:$0x1] %vm178_vm0, %v516_v30  ;;  %725 = vst.msk [vmem:[#allocation2 + $0x34] sm:$0x1] %vm178_vm0, %v651_v31  ;;  %v12351_v51 = vld [vmem:[#allocation2 + $0x18] sm:$0xff]  ;;  %v1026_v58 = vcombine.high %v12305_v25, %v12305_v25  ;;  %v12375_v59 = vrot.slane %v12333_v42, %v12153_v5  ;;  %v12379_v60 = vrot.slane %v12335_v43, %v12153_v5 }
  0x36   :  { %860 = vst.msk [vmem:[#allocation2 + $0x35] sm:$0x1] %vm178_vm0, %v786_v32  ;;  %995 = vst.msk [vmem:[#allocation2 + $0x36] sm:$0x1] %vm178_vm0, %v921_v33  ;;  %v1168_v57 = vsel %vm1158_vm1, %v12351_v51, 0.0  ;;  %v919_v62 = vrot.slane %v891_v55, %v12153_v5  ;;  %v12391_v63 = vrot.slane %v12345_v48, %v12153_v5  ;;  %v12395_v0 = vrot.slane %v12347_v49, %v12153_v5 }
  0x37   :  { %15637 = vst [vmem:[#allocation12_spill] sm:$0xff] %v12351_v51  ;;  %1130 = vst.msk [vmem:[#allocation2 + $0x37] sm:$0x1] %vm178_vm0, %v1056_v38  ;;  %1169 = vadd.xlane.f32.xlu1 %v1168_v57  ;;  %v12399_v1 = vrot.slane %v12349_v50, %v12153_v5  ;;  %v1054_v3 = vrot.slane %v1026_v58, %v12153_v5  ;;  %v136_v4 = vrot.slane %v12375_v59, %v12153_v5 }
  0x38   :  { %184 = vst.msk [vmem:[#allocation2 + $0x28] sm:$0x1] %vm178_vm0, %v108_v45  ;;  %319 = vst.msk [vmem:[#allocation2 + $0x29] sm:$0x1] %vm178_vm0, %v244_v46  ;;  %v272_v6 = vrot.slane %v12379_v60, %v12153_v5  ;;  %v12410_v9 = vrot.slane %v12363_v56, %v12153_v5  ;;  %v407_v11 = vrot.slane %v12391_v63, %v12153_v5 }
  0x39   :  { %454 = vst.msk [vmem:[#allocation2 + $0x2a] sm:$0x1] %vm178_vm0, %v12343_v47  ;;  %589 = vst.msk [vmem:[#allocation2 + $0x2b] sm:$0x1] %vm178_vm0, %v514_v52  ;;  %v542_v16 = vrot.slane %v12395_v0, %v12153_v5  ;;  %v677_v7 = vrot.slane %v12399_v1, %v12153_v5  ;;  %v12421_v18 = vrot.slane %v12381_v61, %v12153_v5 }
  0x3a   :  { %724 = vst.msk [vmem:[#allocation2 + $0x2c] sm:$0x1] %vm178_vm0, %v12356_v53  ;;  %859 = vst.msk [vmem:[#allocation2 + $0x2d] sm:$0x1] %vm178_vm0, %v12359_v54  ;;  %v812_v8 = vrot.slane %v12410_v9, %v12153_v5  ;;  %v12432_v12 = vrot.slane %v12401_v2, %v12153_v5  ;;  %v112_v13 = vcombine.high %v108_v45, %v108_v45 }
  0x3b   :  { %994 = vst.msk [vmem:[#allocation2 + $0x2e] sm:$0x1] %vm178_vm0, %v919_v62  ;;  %v12423_v22 = vld [vmem:[#allocation2 + $0x20] sm:$0xff]  ;;  %1129 = vst.msk [vmem:[#allocation2 + $0x2f] sm:$0x1] %vm178_vm0, %v1054_v3  ;;  %v248_v17 = vcombine.high %v244_v46, %v244_v46  ;;  %v947_v14 = vrot.slane %v12421_v18, %v12153_v5  ;;  %v383_v19 = vcombine.high %v12343_v47, %v12343_v47 }
  0x3c   :  { %15638 = vst [vmem:[#allocation13_spill] sm:$0xff] %v12423_v22  ;;  %187 = vst.msk [vmem:[#allocation2 + $0x40] sm:$0x1] %vm178_vm0, %v136_v4  ;;  %v1171_v23 = vsel %vm1158_vm1, %v12423_v22, 0.0  ;;  %v518_v24 = vcombine.high %v514_v52, %v514_v52  ;;  %v1082_v20 = vrot.slane %v12432_v12, %v12153_v5  ;;  %v653_v26 = vcombine.high %v12356_v53, %v12356_v53 }
  0x3d   :  { %322 = vst.msk [vmem:[#allocation2 + $0x41] sm:$0x1] %vm178_vm0, %v272_v6  ;;  %457 = vst.msk [vmem:[#allocation2 + $0x42] sm:$0x1] %vm178_vm0, %v407_v11  ;;  %1172 = vadd.xlane.f32.xlu0 %v1171_v23  ;;  %v788_v27 = vcombine.high %v12359_v54, %v12359_v54  ;;  %v923_v28 = vcombine.high %v919_v62, %v919_v62  ;;  %v1058_v21 = vcombine.high %v1054_v3, %v1054_v3 }
  0x3e   :  { %592 = vst.msk [vmem:[#allocation2 + $0x43] sm:$0x1] %vm178_vm0, %v542_v16  ;;  %727 = vst.msk [vmem:[#allocation2 + $0x44] sm:$0x1] %vm178_vm0, %v677_v7  ;;  %v12443_v25 = vld [vmem:[#allocation2 + $0x30] sm:$0xff]  ;;  %v158_v30 = vcombine.high %v136_v4, %v136_v4  ;;  %v294_v31 = vcombine.high %v272_v6, %v272_v6  ;;  %v429_v32 = vcombine.high %v407_v11, %v407_v11 }
  0x3f   :  { %15639 = vst [vmem:[#allocation14_spill] sm:$0xff] %v12443_v25  ;;  %862 = vst.msk [vmem:[#allocation2 + $0x45] sm:$0x1] %vm178_vm0, %v812_v8  ;;  %v1177_v29 = vsel %vm1158_vm1, %v12443_v25, 0.0  ;;  %v564_v33 = vcombine.high %v542_v16, %v542_v16  ;;  %v699_v34 = vcombine.high %v677_v7, %v677_v7  ;;  %v834_v35 = vcombine.high %v812_v8, %v812_v8 }
  0x40   :  { %186 = vst.msk [vmem:[#allocation2 + $0x38] sm:$0x1] %vm178_vm0, %v112_v13  ;;  %321 = vst.msk [vmem:[#allocation2 + $0x39] sm:$0x1] %vm178_vm0, %v248_v17  ;;  %v969_v36 = vcombine.high %v947_v14, %v947_v14  ;;  %v1104_v38 = vcombine.high %v1082_v20, %v1082_v20  ;;  %v128_v39 = vcombine.high %v12375_v59, %v12375_v59 }
  0x41   :  { %997 = vst.msk [vmem:[#allocation2 + $0x46] sm:$0x1] %vm178_vm0, %v947_v14  ;;  %456 = vst.msk [vmem:[#allocation2 + $0x3a] sm:$0x1] %vm178_vm0, %v383_v19  ;;  %v264_v40 = vcombine.high %v12379_v60, %v12379_v60  ;;  %1178 = vadd.xlane.f32.xlu0 %v1177_v29  ;;  %v399_v41 = vcombine.high %v12391_v63, %v12391_v63  ;;  %v534_v44 = vcombine.high %v12395_v0, %v12395_v0 }
  0x42   :  { %591 = vst.msk [vmem:[#allocation2 + $0x3b] sm:$0x1] %vm178_vm0, %v518_v24  ;;  %1132 = vst.msk [vmem:[#allocation2 + $0x47] sm:$0x1] %vm178_vm0, %v1082_v20  ;;  %v669_v45 = vcombine.high %v12399_v1, %v12399_v1  ;;  %v804_v46 = vcombine.high %v12410_v9, %v12410_v9  ;;  %v12482_v47 = vld [vmem:[#allocation2 + $0x28] sm:$0xff]  ;;  %v12487_v52 = vrot.slane %v128_v39, %v12153_v5 }
  0x43   :  { %726 = vst.msk [vmem:[#allocation2 + $0x3c] sm:$0x1] %vm178_vm0, %v653_v26  ;;  %861 = vst.msk [vmem:[#allocation2 + $0x3d] sm:$0x1] %vm178_vm0, %v788_v27  ;;  %v12490_v53 = vrot.slane %v264_v40, %v12153_v5  ;;  %v939_v54 = vcombine.high %v12421_v18, %v12421_v18  ;;  %v1074_v55 = vcombine.high %v12432_v12, %v12432_v12  ;;  %v1174_v57 = vsel %vm1158_vm1, %v12482_v47, 0.0 }
  0x44   :  { %996 = vst.msk [vmem:[#allocation2 + $0x3e] sm:$0x1] %vm178_vm0, %v923_v28  ;;  %1131 = vst.msk [vmem:[#allocation2 + $0x3f] sm:$0x1] %vm178_vm0, %v1058_v21  ;;  %v12499_v58 = vrot.slane %v399_v41, %v12153_v5  ;;  %v12502_v59 = vrot.slane %v534_v44, %v12153_v5  ;;  %v12505_v60 = vrot.slane %v669_v45, %v12153_v5  ;;  %1175 = vadd.xlane.f32.xlu1 %v1174_v57 }
  0x45   :  { %189 = vst.msk [vmem:[#allocation2 + $0x50] sm:$0x1] %vm178_vm0, %v158_v30  ;;  %324 = vst.msk [vmem:[#allocation2 + $0x51] sm:$0x1] %vm178_vm0, %v294_v31  ;;  %v12512_v62 = vrot.slane %v804_v46, %v12153_v5  ;;  %v12515_v63 = vrot.slane %v939_v54, %v12153_v5  ;;  %v12518_v0 = vrot.slane %v1074_v55, %v12153_v5 }
  0x46   :  { %459 = vst.msk [vmem:[#allocation2 + $0x52] sm:$0x1] %vm178_vm0, %v429_v32  ;;  %594 = vst.msk [vmem:[#allocation2 + $0x53] sm:$0x1] %vm178_vm0, %v564_v33  ;;  %v113_v1 = vcombine.high %v12333_v42, %v12333_v42  ;;  %v249_v3 = vcombine.high %v12335_v43, %v12335_v43  ;;  %v384_v4 = vcombine.high %v12345_v48, %v12345_v48 }
  0x47   :  { %729 = vst.msk [vmem:[#allocation2 + $0x54] sm:$0x1] %vm178_vm0, %v699_v34  ;;  %864 = vst.msk [vmem:[#allocation2 + $0x55] sm:$0x1] %vm178_vm0, %v834_v35  ;;  %v519_v6 = vcombine.high %v12347_v49, %v12347_v49  ;;  %v654_v42 = vcombine.high %v12349_v50, %v12349_v50  ;;  %v789_v48 = vcombine.high %v12363_v56, %v12363_v56 }
  0x48   :  { %15640 = vst [vmem:[#allocation15_spill] sm:$0xff] %v12482_v47  ;;  %999 = vst.msk [vmem:[#allocation2 + $0x56] sm:$0x1] %vm178_vm0, %v969_v36  ;;  %v12545_v43 = vrot.slane %v113_v1, %v12153_v5  ;;  %v924_v49 = vcombine.high %v12381_v61, %v12381_v61  ;;  %v1059_v50 = vcombine.high %v12401_v2, %v12401_v2 }
  0x49   :  { %1134 = vst.msk [vmem:[#allocation2 + $0x57] sm:$0x1] %vm178_vm0, %v1104_v38  ;;  %188 = vst.msk [vmem:[#allocation2 + $0x48] sm:$0x1] %vm178_vm0, %v12487_v52  ;;  %v12536_v9 = vld [vmem:[#allocation2 + $0x40] sm:$0xff]  ;;  %v12558_v7 = vrot.slane %v249_v3, %v12153_v5  ;;  %v12561_v18 = vrot.slane %v384_v4, %v12153_v5  ;;  %v12564_v8 = vrot.slane %v519_v6, %v12153_v5 }
  0x4a   :  { %323 = vst.msk [vmem:[#allocation2 + $0x49] sm:$0x1] %vm178_vm0, %v12490_v53  ;;  %458 = vst.msk [vmem:[#allocation2 + $0x4a] sm:$0x1] %vm178_vm0, %v12499_v58  ;;  %v1183_v11 = vsel %vm1158_vm1, %v12536_v9, 0.0  ;;  %v143_v61 = vrot.slane %v12545_v43, %v12153_v5  ;;  %v12571_v2 = vrot.slane %v654_v42, %v12153_v5  ;;  %v12574_v12 = vrot.slane %v789_v48, %v12153_v5 }
  0x4b   :  { %593 = vst.msk [vmem:[#allocation2 + $0x4b] sm:$0x1] %vm178_vm0, %v12502_v59  ;;  %728 = vst.msk [vmem:[#allocation2 + $0x4c] sm:$0x1] %vm178_vm0, %v12505_v60  ;;  %v12555_v16 = vld [vmem:[#allocation2 + $0x38] sm:$0xff]  ;;  %1184 = vadd.xlane.f32.xlu0 %v1183_v11  ;;  %v279_v17 = vrot.slane %v12558_v7, %v12153_v5  ;;  %v414_v23 = vrot.slane %v12561_v18, %v12153_v5  ;;  %v549_v14 = vrot.slane %v12564_v8, %v12153_v5 }
  0x4c   :  { %15641 = vst [vmem:[#allocation16_spill] sm:$0xff] %v12536_v9  ;;  %863 = vst.msk [vmem:[#allocation2 + $0x4d] sm:$0x1] %vm178_vm0, %v12512_v62  ;;  %v1180_v56 = vsel %vm1158_vm1, %v12555_v16, 0.0  ;;  %v12585_v19 = vrot.slane %v924_v49, %v12153_v5  ;;  %v684_v20 = vrot.slane %v12571_v2, %v12153_v5  ;;  %v819_v26 = vrot.slane %v12574_v12, %v12153_v5 }
  0x4d   :  { %998 = vst.msk [vmem:[#allocation2 + $0x4e] sm:$0x1] %vm178_vm0, %v12515_v63  ;;  %1133 = vst.msk [vmem:[#allocation2 + $0x4f] sm:$0x1] %vm178_vm0, %v12518_v0  ;;  %1181 = vadd.xlane.f32.xlu1 %v1180_v56  ;;  %v12595_v27 = vrot.slane %v1059_v50, %v12153_v5  ;;  %v160_v29 = vcombine.high %v12487_v52, %v12487_v52  ;;  %v296_v21 = vcombine.high %v12490_v53, %v12490_v53 }
  0x4e   :  { %15642 = vst [vmem:[#allocation17_spill] sm:$0xff] %v12555_v16  ;;  %191 = vst.msk [vmem:[#allocation2 + $0x60] sm:$0x1] %vm178_vm0, %v143_v61  ;;  %v954_v28 = vrot.slane %v12585_v19, %v12153_v5  ;;  %v431_v30 = vcombine.high %v12499_v58, %v12499_v58  ;;  %v566_v32 = vcombine.high %v12502_v59, %v12502_v59 }
  0x4f   :  { %326 = vst.msk [vmem:[#allocation2 + $0x61] sm:$0x1] %vm178_vm0, %v279_v17  ;;  %461 = vst.msk [vmem:[#allocation2 + $0x62] sm:$0x1] %vm178_vm0, %v414_v23  ;;  %v1089_v31 = vrot.slane %v12595_v27, %v12153_v5  ;;  %v701_v33 = vcombine.high %v12505_v60, %v12505_v60  ;;  %v836_v34 = vcombine.high %v12512_v62, %v12512_v62 }
  0x50   :  { %v12576_v13 = vld [vmem:[#allocation2 + $0x50] sm:$0xff]  ;;  %596 = vst.msk [vmem:[#allocation2 + $0x63] sm:$0x1] %vm178_vm0, %v549_v14  ;;  %731 = vst.msk [vmem:[#allocation2 + $0x64] sm:$0x1] %vm178_vm0, %v684_v20  ;;  %v971_v36 = vcombine.high %v12515_v63, %v12515_v63  ;;  %v1106_v38 = vcombine.high %v12518_v0, %v12518_v0  ;;  %v159_v39 = vcombine.high %v143_v61, %v143_v61 }
  0x51   :  { %15643 = vst [vmem:[#allocation18_spill] sm:$0xff] %v12576_v13  ;;  %v1189_v24 = vsel %vm1158_vm1, %v12576_v13, 0.0  ;;  %866 = vst.msk [vmem:[#allocation2 + $0x65] sm:$0x1] %vm178_vm0, %v819_v26  ;;  %v295_v40 = vcombine.high %v279_v17, %v279_v17  ;;  %v430_v44 = vcombine.high %v414_v23, %v414_v23  ;;  %v565_v45 = vcombine.high %v549_v14, %v549_v14 }
  0x52   :  { %1190 = vadd.xlane.f32.xlu0 %v1189_v24  ;;  %1001 = vst.msk [vmem:[#allocation2 + $0x66] sm:$0x1] %vm178_vm0, %v954_v28  ;;  %190 = vst.msk [vmem:[#allocation2 + $0x58] sm:$0x1] %vm178_vm0, %v160_v29  ;;  %v700_v46 = vcombine.high %v684_v20, %v684_v20  ;;  %v835_v52 = vcombine.high %v819_v26, %v819_v26  ;;  %v970_v53 = vcombine.high %v954_v28, %v954_v28 }
  0x53   :  { %325 = vst.msk [vmem:[#allocation2 + $0x59] sm:$0x1] %vm178_vm0, %v296_v21  ;;  %460 = vst.msk [vmem:[#allocation2 + $0x5a] sm:$0x1] %vm178_vm0, %v431_v30  ;;  %v1105_v54 = vcombine.high %v1089_v31, %v1089_v31  ;;  %v129_v55 = vcombine.high %v12545_v43, %v12545_v43  ;;  %v265_v57 = vcombine.high %v12558_v7, %v12558_v7 }
  0x54   :  { %v12618_v35 = vld [vmem:[#allocation2 + $0x48] sm:$0xff]  ;;  %1136 = vst.msk [vmem:[#allocation2 + $0x67] sm:$0x1] %vm178_vm0, %v1089_v31  ;;  %595 = vst.msk [vmem:[#allocation2 + $0x5b] sm:$0x1] %vm178_vm0, %v566_v32  ;;  %v400_v58 = vcombine.high %v12561_v18, %v12561_v18  ;;  %v535_v59 = vcombine.high %v12564_v8, %v12564_v8  ;;  %v670_v60 = vcombine.high %v12571_v2, %v12571_v2 }
  0x55   :  { %15644 = vst [vmem:[#allocation19_spill] sm:$0xff] %v12618_v35  ;;  %v1186_v41 = vsel %vm1158_vm1, %v12618_v35, 0.0  ;;  %730 = vst.msk [vmem:[#allocation2 + $0x5c] sm:$0x1] %vm178_vm0, %v701_v33  ;;  %v157_v62 = vrot.slane %v129_v55, %v12153_v5  ;;  %v805_v63 = vcombine.high %v12574_v12, %v12574_v12  ;;  %v940_v0 = vcombine.high %v12585_v19, %v12585_v19 }
  0x56   :  { %865 = vst.msk [vmem:[#allocation2 + $0x5d] sm:$0x1] %vm178_vm0, %v836_v34  ;;  %1187 = vadd.xlane.f32.xlu1 %v1186_v41  ;;  %1000 = vst.msk [vmem:[#allocation2 + $0x5e] sm:$0x1] %vm178_vm0, %v971_v36  ;;  %v1075_v1 = vcombine.high %v12595_v27, %v12595_v27  ;;  %v293_v3 = vrot.slane %v265_v57, %v12153_v5  ;;  %v428_v4 = vrot.slane %v400_v58, %v12153_v5 }
  0x57   :  { %1135 = vst.msk [vmem:[#allocation2 + $0x5f] sm:$0x1] %vm178_vm0, %v1106_v38  ;;  %193 = vst.msk [vmem:[#allocation2 + $0x70] sm:$0x1] %vm178_vm0, %v159_v39  ;;  %v563_v6 = vrot.slane %v535_v59, %v12153_v5  ;;  %v698_v42 = vrot.slane %v670_v60, %v12153_v5  ;;  %v833_v43 = vrot.slane %v805_v63, %v12153_v5 }
  0x58   :  { %328 = vst.msk [vmem:[#allocation2 + $0x71] sm:$0x1] %vm178_vm0, %v295_v40  ;;  %463 = vst.msk [vmem:[#allocation2 + $0x72] sm:$0x1] %vm178_vm0, %v430_v44  ;;  %v968_v48 = vrot.slane %v940_v0, %v12153_v5  ;;  %v1103_v49 = vrot.slane %v1075_v1, %v12153_v5  ;;  %v161_v50 = vcombine.high %v157_v62, %v157_v62 }
  0x59   :  { %598 = vst.msk [vmem:[#allocation2 + $0x73] sm:$0x1] %vm178_vm0, %v565_v45  ;;  %733 = vst.msk [vmem:[#allocation2 + $0x74] sm:$0x1] %vm178_vm0, %v700_v46  ;;  %v297_v11 = vcombine.high %v293_v3, %v293_v3  ;;  %v432_v7 = vcombine.high %v428_v4, %v428_v4  ;;  %v567_v18 = vcombine.high %v563_v6, %v563_v6 }
  0x5a   :  { %868 = vst.msk [vmem:[#allocation2 + $0x75] sm:$0x1] %vm178_vm0, %v835_v52  ;;  %1003 = vst.msk [vmem:[#allocation2 + $0x76] sm:$0x1] %vm178_vm0, %v970_v53  ;;  %v702_v8 = vcombine.high %v698_v42, %v698_v42  ;;  %v837_v5 = vcombine.high %v833_v43, %v833_v43  ;;  %v972_v61 = vcombine.high %v968_v48, %v968_v48 }
  0x5b   :  { %1138 = vst.msk [vmem:[#allocation2 + $0x77] sm:$0x1] %vm178_vm0, %v1105_v54  ;;  %192 = vst.msk [vmem:[#allocation2 + $0x68] sm:$0x1] %vm178_vm0, %v157_v62  ;;  %v12673_v56 = vld [vmem:[#allocation2 + $0x60] sm:$0xff]  ;;  %v1107_v2 = vcombine.high %v1103_v49, %v1103_v49 }
  0x5c   :  { %327 = vst.msk [vmem:[#allocation2 + $0x69] sm:$0x1] %vm178_vm0, %v293_v3  ;;  %462 = vst.msk [vmem:[#allocation2 + $0x6a] sm:$0x1] %vm178_vm0, %v428_v4  ;;  %v1195_v12 = vsel %vm1158_vm1, %v12673_v56, 0.0 }
  0x5d   :  { %597 = vst.msk [vmem:[#allocation2 + $0x6b] sm:$0x1] %vm178_vm0, %v563_v6  ;;  %732 = vst.msk [vmem:[#allocation2 + $0x6c] sm:$0x1] %vm178_vm0, %v698_v42  ;;  %1196 = vadd.xlane.f32.xlu0 %v1195_v12 }
  0x5e   :  { %15645 = vst [vmem:[#allocation20_spill] sm:$0xff] %v12673_v56  ;;  %867 = vst.msk [vmem:[#allocation2 + $0x6d] sm:$0x1] %vm178_vm0, %v833_v43  ;;  %v12681_v17 = vld [vmem:[#allocation2 + $0x58] sm:$0xff] }
  0x5f   :  { %1002 = vst.msk [vmem:[#allocation2 + $0x6e] sm:$0x1] %vm178_vm0, %v968_v48  ;;  %1137 = vst.msk [vmem:[#allocation2 + $0x6f] sm:$0x1] %vm178_vm0, %v1103_v49  ;;  %v1192_v23 = vsel %vm1158_vm1, %v12681_v17, 0.0 }
  0x60   :  { %194 = vst.msk [vmem:[#allocation2 + $0x78] sm:$0x1] %vm178_vm0, %v161_v50  ;;  %15646 = vst [vmem:[#allocation21_spill] sm:$0xff] %v12681_v17  ;;  %1193 = vadd.xlane.f32.xlu1 %v1192_v23 }
  0x61   :  { %329 = vst.msk [vmem:[#allocation2 + $0x79] sm:$0x1] %vm178_vm0, %v297_v11  ;;  %464 = vst.msk [vmem:[#allocation2 + $0x7a] sm:$0x1] %vm178_vm0, %v432_v7 }
  0x62   :  { %599 = vst.msk [vmem:[#allocation2 + $0x7b] sm:$0x1] %vm178_vm0, %v567_v18  ;;  %734 = vst.msk [vmem:[#allocation2 + $0x7c] sm:$0x1] %vm178_vm0, %v702_v8  ;;  %v12692_v14 = vld [vmem:[#allocation2 + $0x70] sm:$0xff] }
  0x63   :  { %869 = vst.msk [vmem:[#allocation2 + $0x7d] sm:$0x1] %vm178_vm0, %v837_v5  ;;  %1004 = vst.msk [vmem:[#allocation2 + $0x7e] sm:$0x1] %vm178_vm0, %v972_v61  ;;  %v1201_v19 = vsel %vm1158_vm1, %v12692_v14, 0.0 }
  0x64   :  { %1139 = vst.msk [vmem:[#allocation2 + $0x7f] sm:$0x1] %vm178_vm0, %v1107_v2  ;;  %15647 = vst [vmem:[#allocation22_spill] sm:$0xff] %v12692_v14  ;;  %1202 = vadd.xlane.f32.xlu0 %v1201_v19 }
  0x66   :  { %v12696_v24 = vld [vmem:[#allocation2 + $0x68] sm:$0xff] }
  0x67   :  { %15648 = vst [vmem:[#allocation23_spill] sm:$0xff] %v12696_v24  ;;  %v1198_v20 = vsel %vm1158_vm1, %v12696_v24, 0.0 }
  0x68   :  { %1199 = vadd.xlane.f32.xlu1 %v1198_v20 }
  0x6b   :  { %v12700_v26 = vld [vmem:[#allocation2 + $0x78] sm:$0xff] }
  0x6c   :  { %15649 = vst [vmem:[#allocation24_spill] sm:$0xff] %v12700_v26  ;;  %v1204_v27 = vsel %vm1158_vm1, %v12700_v26, 0.0 }
  0x6d   :  { %1205 = vadd.xlane.f32.xlu1 %v1204_v27 }
  0xb8   :  { %v1161_v28 = vpop.xlane.xlu0 %1160 }
  0xb9   :  { %v1208_v29 = vmul.f32 0.03125, %v1161_v28 }
  0xbb   :  { %v1167_v21 = vpop.xlane.xlu1 %1166  ;;  %v12705_v30 = vsub.f32 %v12266_v10, %v1208_v29 }
  0xbc   :  { %v1210_v31 = vmul.f32 0.03125, %v1167_v21 }
  0xbd   :  { %v1240_v33 = vmul.f32 %v12705_v30, %v12705_v30 }
  0xbe   :  { %v12708_v32 = vsub.f32 %v12295_v15, %v1210_v31 }
  0xbf   :  { %v1256_v38 = vsel %vm1158_vm1, %v1240_v33, 0.0 }
  0xc0   :  { %v1164_v34 = vpop.xlane.xlu0 %1163  ;;  %v1242_v39 = vmul.f32 %v12708_v32, %v12708_v32  ;;  %1257 = vadd.xlane.f32.xlu0 %v1256_v38 }
  0xc1   :  { %v1209_v36 = vmul.f32 0.03125, %v1164_v34 }
  0xc2   :  { %v1262_v45 = vsel %vm1158_vm1, %v1242_v39, 0.0 }
  0xc3   :  { %v12716_v41 = vsub.f32 %v12325_v37, %v1209_v36 }
  0xc4   :  { %v1170_v40 = vpop.xlane.xlu1 %1169  ;;  %1263 = vadd.xlane.f32.xlu0 %v1262_v45 }
  0xc5   :  { %v1211_v44 = vmul.f32 0.03125, %v1170_v40  ;;  %v1241_v52 = vmul.f32 %v12716_v41, %v12716_v41 }
  0xc7   :  { %v12720_v46 = vsub.f32 %v12351_v51, %v1211_v44  ;;  %v1259_v54 = vsel %vm1158_vm1, %v1241_v52, 0.0 }
  0xc8   :  { %1260 = vadd.xlane.f32.xlu1 %v1259_v54 }
  0xc9   :  { %v1243_v55 = vmul.f32 %v12720_v46, %v12720_v46 }
  0xca   :  { %v1173_v53 = vpop.xlane.xlu0 %1172 }
  0xcb   :  { %v1212_v57 = vmul.f32 0.03125, %v1173_v53  ;;  %v1265_v58 = vsel %vm1158_vm1, %v1243_v55, 0.0 }
  0xcc   :  { %1266 = vadd.xlane.f32.xlu1 %v1265_v58 }
  0xcd   :  { %v12729_v59 = vsub.f32 %v12423_v22, %v1212_v57 }
  0xce   :  { %v1179_v60 = vpop.xlane.xlu0 %1178 }
  0xcf   :  { %v1214_v62 = vmul.f32 0.03125, %v1179_v60  ;;  %v1244_v63 = vmul.f32 %v12729_v59, %v12729_v59 }
  0xd1   :  { %v12734_v0 = vsub.f32 %v12443_v25, %v1214_v62  ;;  %v1176_v1 = vpop.xlane.xlu1 %1175  ;;  %v1268_v3 = vsel %vm1158_vm1, %v1244_v63, 0.0 }
  0xd2   :  { %v1213_v4 = vmul.f32 0.03125, %v1176_v1  ;;  %1269 = vadd.xlane.f32.xlu0 %v1268_v3 }
  0xd3   :  { %v1246_v6 = vmul.f32 %v12734_v0, %v12734_v0 }
  0xd4   :  { %v12740_v42 = vsub.f32 %v12482_v47, %v1213_v4 }
  0xd5   :  { %v1274_v48 = vsel %vm1158_vm1, %v1246_v6, 0.0 }
  0xd6   :  { %1275 = vadd.xlane.f32.xlu0 %v1274_v48  ;;  %v1245_v11 = vmul.f32 %v12740_v42, %v12740_v42 }
  0xd8   :  { %v1185_v43 = vpop.xlane.xlu0 %1184  ;;  %v1271_v8 = vsel %vm1158_vm1, %v1245_v11, 0.0 }
  0xd9   :  { %v1216_v49 = vmul.f32 0.03125, %v1185_v43  ;;  %1272 = vadd.xlane.f32.xlu1 %v1271_v8 }
  0xda   :  { %v1182_v50 = vpop.xlane.xlu1 %1181 }
  0xdb   :  { %v1215_v7 = vmul.f32 0.03125, %v1182_v50  ;;  %v12746_v18 = vsub.f32 %v12536_v9, %v1216_v49 }
  0xdd   :  { %v12750_v5 = vsub.f32 %v12555_v16, %v1215_v7  ;;  %v1248_v12 = vmul.f32 %v12746_v18, %v12746_v18 }
  0xdf   :  { %v1191_v61 = vpop.xlane.xlu0 %1190  ;;  %v1247_v23 = vmul.f32 %v12750_v5, %v12750_v5  ;;  %v1280_v27 = vsel %vm1158_vm1, %v1248_v12, 0.0 }
  0xe0   :  { %v1218_v2 = vmul.f32 0.03125, %v1191_v61  ;;  %1281 = vadd.xlane.f32.xlu0 %v1280_v27  ;;  %v11638_v61 = vld [vmem:[%s15605_s3] sm:$0xff]  }
  0xe1   :  { %v1277_v29 = vsel %vm1158_vm1, %v1247_v23, 0.0  ;;  %10755 = vmatprep.subr.bf16.mxu0 %v11638_v61  ;;  %11607 = vmatprep.subr.bf16.mxu1 %v11638_v61 }
  0xe2   :  { %v12757_v19 = vsub.f32 %v12576_v13, %v1218_v2  ;;  %1278 = vadd.xlane.f32.xlu1 %v1277_v29  ;;  %10756 = vmatpush3.bf16.msra.mxu0 %v11638_v61  ;;  %v11639_v2 = vld [vmem:[%s15605_s3 + $0x8] sm:$0xff]  }
  0xe3   :  { %v1188_v20 = vpop.xlane.xlu1 %1187  ;;  %11609 = vmatpush3.bf16.msra.mxu1 %v11638_v61  ;;  %10757 = vmatprep.subr.bf16.mxu0 %v11639_v2 }
  0xe4   :  { %v1217_v28 = vmul.f32 0.03125, %v1188_v20  ;;  %v1250_v21 = vmul.f32 %v12757_v19, %v12757_v19  ;;  %11608 = vmatprep.subr.bf16.mxu1 %v11639_v2 }
  0xe6   :  { %v12764_v31 = vsub.f32 %v12618_v35, %v1217_v28  ;;  %v1286_v33 = vsel %vm1158_vm1, %v1250_v21, 0.0  ;;  %10758 = vmatpush3.bf16.msra.mxu0 %v11639_v2 }
  0xe7   :  { %1287 = vadd.xlane.f32.xlu0 %v1286_v33  ;;  %11610 = vmatpush3.bf16.msra.mxu1 %v11639_v2 }
  0xe8   :  { %v1249_v34 = vmul.f32 %v12764_v31, %v12764_v31 }
  0xea   :  { %v1283_v36 = vsel %vm1158_vm1, %v1249_v34, 0.0  ;;  %v1197_v38 = vpop.xlane.xlu0 %1196 }
  0xeb   :  { %1284 = vadd.xlane.f32.xlu1 %v1283_v36  ;;  %v1220_v39 = vmul.f32 0.03125, %v1197_v38 }
  0xed   :  { %v1194_v40 = vpop.xlane.xlu1 %1193  ;;  %v12771_v45 = vsub.f32 %v12673_v56, %v1220_v39 }
  0xee   :  { %v1219_v44 = vmul.f32 0.03125, %v1194_v40 }
  0xef   :  { %v1252_v55 = vmul.f32 %v12771_v45, %v12771_v45 }
  0xf0   :  { %v12774_v52 = vsub.f32 %v12681_v17, %v1219_v44 }
  0xf1   :  { %v1203_v53 = vpop.xlane.xlu0 %1202  ;;  %v1292_v62 = vsel %vm1158_vm1, %v1252_v55, 0.0 }
  0xf2   :  { %v1222_v54 = vmul.f32 0.03125, %v1203_v53  ;;  %v1251_v57 = vmul.f32 %v12774_v52, %v12774_v52  ;;  %1293 = vadd.xlane.f32.xlu0 %v1292_v62  ;;  %v12810_v62 = vld [vmem:[%s15603_s1] ss:$0 sm:$0xff] }
  0xf4   :  { %v12781_v58 = vsub.f32 %v12692_v14, %v1222_v54  ;;  %v1289_v1 = vsel %vm1158_vm1, %v1251_v57, 0.0 }
  0xf5   :  { %v1200_v60 = vpop.xlane.xlu1 %1199  ;;  %1290 = vadd.xlane.f32.xlu1 %v1289_v1 }
  0xf6   :  { %v1221_v63 = vmul.f32 0.03125, %v1200_v60  ;;  %v1254_v3 = vmul.f32 %v12781_v58, %v12781_v58 }
  0xf8   :  { %v12788_v4 = vsub.f32 %v12696_v24, %v1221_v63  ;;  %v1298_v43 = vsel %vm1158_vm1, %v1254_v3, 0.0 }
  0xf9   :  { %1299 = vadd.xlane.f32.xlu0 %v1298_v43 }
  0xfa   :  { %v1206_v6 = vpop.xlane.xlu1 %1205  ;;  %v1253_v49 = vmul.f32 %v12788_v4, %v12788_v4 }
  0xfb   :  { %v1223_v48 = vmul.f32 0.03125, %v1206_v6 }
  0xfc   :  { %v1295_v11 = vsel %vm1158_vm1, %v1253_v49, 0.0  ;;  %v12816_v49 = vld [vmem:[%s15604_s2] ss:$0 sm:$0xff] }
  0xfd   :  { %v12794_v50 = vsub.f32 %v12700_v26, %v1223_v48  ;;  %1296 = vadd.xlane.f32.xlu1 %v1295_v11 }
  0xff   :  { %v1255_v7 = vmul.f32 %v12794_v50, %v12794_v50 }
 0x101   :  { %v1301_v8 = vsel %vm1158_vm1, %v1255_v7, 0.0 }
 0x102   :  { %1302 = vadd.xlane.f32.xlu1 %v1301_v8 }
 0x14d   :  { %v1258_v12 = vpop.xlane.xlu0 %1257 }
 0x14e   :  { %v1304_v23 = vmul.f32 0.03125, %v1258_v12 }
 0x150   :  { %v1320_v20 = vadd.f32 1e-05, %v1304_v23 }
 0x151   :  { %v1264_v27 = vpop.xlane.xlu0 %1263 }
 0x152   :  { %11648 = vrsqrt.f32 %v1320_v20  ;;  %v1306_v28 = vmul.f32 0.03125, %v1264_v27 }
 0x154   :  { %v1322_v21 = vadd.f32 1e-05, %v1306_v28 }
 0x155   :  { %v1261_v29 = vpop.xlane.xlu1 %1260 }
 0x156   :  { %v1305_v33 = vmul.f32 0.03125, %v1261_v29  ;;  %11650 = vrsqrt.f32 %v1322_v21 }
 0x158   :  { %v1321_v34 = vadd.f32 1e-05, %v1305_v33 }
 0x159   :  { %v1267_v36 = vpop.xlane.xlu1 %1266 }
 0x15a   :  { %11652 = vrsqrt.f32 %v1321_v34  ;;  %v1307_v38 = vmul.f32 0.03125, %v1267_v36 }
 0x15c   :  { %v1323_v40 = vadd.f32 1e-05, %v1307_v38  ;;  %v11649_v53 = vpop.eup %11648 }
 0x15d   :  { %v1352_v57 = vmul.f32 %v11649_v53, %v12705_v30 }
 0x15e   :  { %11654 = vrsqrt.f32 %v1323_v40 }
 0x15f   :  { %v1270_v39 = vpop.xlane.xlu0 %1269  ;;  %v1374_v48 = vmul.f32 %v12810_v62, %v1352_v57 }
 0x160   :  { %v1308_v44 = vmul.f32 0.03125, %v1270_v39  ;;  %v11651_v63 = vpop.eup %11650 }
 0x161   :  { %v1354_v11 = vmul.f32 %v11651_v63, %v12708_v32  ;;  %v1396_v20 = vadd.f32 %v12816_v49, %v1374_v48 }
 0x162   :  { %v1324_v54 = vadd.f32 1e-05, %v1308_v44 }
 0x163   :  { %v1276_v55 = vpop.xlane.xlu0 %1275 }
 0x164   :  { %v1310_v60 = vmul.f32 0.03125, %v1276_v55  ;;  %11656 = vrsqrt.f32 %v1324_v54  ;;  %v11653_v6 = vpop.eup %11652 }
 0x165   :  { %v1353_v30 = vmul.f32 %v11653_v6, %v12716_v41  ;;  %v1376_v41 = vmul.f32 %v12810_v62, %v1354_v11 }
 0x166   :  { %v1326_v1 = vadd.f32 1e-05, %v1310_v60  ;;  %v1273_v3 = vpop.xlane.xlu1 %1272 }
 0x167   :  { %v1309_v43 = vmul.f32 0.03125, %v1273_v3  ;;  %v1375_v61 = vmul.f32 %v12810_v62, %v1353_v30  ;;  %v1398_v39 = vadd.f32 %v12816_v49, %v1376_v41 }
 0x168   :  { %11658 = vrsqrt.f32 %v1326_v1  ;;  %v11655_v2 = vpop.eup %11654 }
 0x169   :  { %v1325_v7 = vadd.f32 1e-05, %v1309_v43  ;;  %v1397_v28 = vadd.f32 %v12816_v49, %v1375_v61  ;;  %v1355_v29 = vmul.f32 %v11655_v2, %v12720_v46 }
 0x16b   :  { %11660 = vrsqrt.f32 %v1325_v7  ;;  %v1412_v34 = vpack.c.bf16 %v1397_v28, %v1396_v20  ;;  %v1377_v36 = vmul.f32 %v12810_v62, %v1355_v29 }
 0x16d   :  { %v1282_v8 = vpop.xlane.xlu0 %1281  ;;  %10759 = vmatprep.mubr.msk.bf16.mxu0 %vm1158_vm1, %v1412_v34  ;;  %v1399_v40 = vadd.f32 %v12816_v49, %v1377_v36 }
 0x16e   :  { %v1312_v12 = vmul.f32 0.03125, %v1282_v8  ;;  %v11657_v38 = vpop.eup %11656 }
 0x16f   :  { %v1279_v23 = vpop.xlane.xlu1 %1278  ;;  %v1413_v54 = vpack.c.bf16 %v1399_v40, %v1398_v39  ;;  %v1356_v55 = vmul.f32 %v11657_v38, %v12729_v59 }
 0x170   :  { %v1311_v27 = vmul.f32 0.03125, %v1279_v23  ;;  %v1328_v21 = vadd.f32 1e-05, %v1312_v12 }
 0x171   :  { %10760 = vmatmul.mubr.msk.bf16.vlgmr.msra.gmra.mrb[0].mxu0 %vm1158_vm1, %v1413_v54  ;;  %v1378_v6 = vmul.f32 %v12810_v62, %v1356_v55 }
 0x172   :  { %v1327_v32 = vadd.f32 1e-05, %v1311_v27  ;;  %11662 = vrsqrt.f32 %v1328_v21  ;;  %v11659_v57 = vpop.eup %11658 }
 0x173   :  { %v1358_v43 = vmul.f32 %v11659_v57, %v12734_v0  ;;  %v1400_v61 = vadd.f32 %v12816_v49, %v1378_v6 }
 0x174   :  { %v1288_v33 = vpop.xlane.xlu0 %1287  ;;  %11664 = vrsqrt.f32 %v1327_v32 }
 0x175   :  { %v1314_v44 = vmul.f32 0.03125, %v1288_v33  ;;  %v11661_v63 = vpop.eup %11660 }
 0x176   :  { %v1357_v3 = vmul.f32 %v11661_v63, %v12740_v42  ;;  %v1380_v42 = vmul.f32 %v12810_v62, %v1358_v43 }
 0x177   :  { %v1330_v1 = vadd.f32 1e-05, %v1314_v44 }
 0x178   :  { %v1285_v53 = vpop.xlane.xlu1 %1284  ;;  %v1379_v48 = vmul.f32 %v12810_v62, %v1357_v3  ;;  %v1402_v32 = vadd.f32 %v12816_v49, %v1380_v42 }
 0x179   :  { %v1313_v46 = vmul.f32 0.03125, %v1285_v53 }
 0x17a   :  { %v1401_v2 = vadd.f32 %v12816_v49, %v1379_v48 }
 0x17b   :  { %v1329_v60 = vadd.f32 1e-05, %v1313_v46 }
 0x17c   :  { %v11663_v30 = vpop.eup %11662  ;;  %v1414_v27 = vpack.c.bf16 %v1401_v2, %v1400_v61 }
 0x17d   :  { %11666 = vrsqrt.f32 %v1329_v60  ;;  %v1360_v41 = vmul.f32 %v11663_v30, %v12746_v18 }
 0x17e   :  { %11668 = vrsqrt.f32 %v1330_v1  ;;  %v11665_v7 = vpop.eup %11664  ;;  %10763 = vmatprep.mubr.msk.bf16.mxu0 %vm1158_vm1, %v1414_v27 }
 0x17f   :  { %v1294_v11 = vpop.xlane.xlu0 %1293  ;;  %v1359_v23 = vmul.f32 %v11665_v7, %v12750_v5  ;;  %v1382_v44 = vmul.f32 %v12810_v62, %v1360_v41 }
 0x180   :  { %v1316_v59 = vmul.f32 0.03125, %v1294_v11 }
 0x181   :  { %v1381_v29 = vmul.f32 %v12810_v62, %v1359_v23  ;;  %v1404_v57 = vadd.f32 %v12816_v49, %v1382_v44 }
 0x182   :  { %v1291_v8 = vpop.xlane.xlu1 %1290  ;;  %v1332_v20 = vadd.f32 1e-05, %v1316_v59 }
 0x183   :  { %v1315_v12 = vmul.f32 0.03125, %v1291_v8  ;;  %v1403_v33 = vadd.f32 %v12816_v49, %v1381_v29 }
 0x184   :  { %11670 = vrsqrt.f32 %v1332_v20 }
 0x185   :  { %v1331_v0 = vadd.f32 1e-05, %v1315_v12  ;;  %v1415_v39 = vpack.c.bf16 %v1403_v33, %v1402_v32 }
 0x186   :  { %v1300_v28 = vpop.xlane.xlu0 %1299 }
 0x187   :  { %v1318_v21 = vmul.f32 0.03125, %v1300_v28  ;;  %11672 = vrsqrt.f32 %v1331_v0  ;;  %v11667_v5 = vpop.eup %11666  ;;  %10764 = vmatmul.mubr.msk.bf16.gmra.mrb[4].mxu0 %vm1158_vm1, %v1415_v39 }
 0x188   :  { %v1361_v40 = vmul.f32 %v11667_v5, %v12764_v31  ;;  %v11669_v53 = vpop.eup %11668 }
 0x189   :  { %v1334_v34 = vadd.f32 1e-05, %v1318_v21  ;;  %v1362_v63 = vmul.f32 %v11669_v53, %v12757_v19  ;;  %v15616_v21 = vmov 0.0  }
 0x18a   :  { %v1297_v36 = vpop.xlane.xlu1 %1296  ;;  %v1383_v46 = vmul.f32 %v12810_v62, %v1361_v40  ;;  %10775 = vmatprep.subr.bf16.mxu1 %v15616_v21  ;;  %10799 = vmatprep.subr.bf16.mxu0 %v15616_v21 }
 0x18b   :  { %v1317_v38 = vmul.f32 0.03125, %v1297_v36  ;;  %11674 = vrsqrt.f32 %v1334_v34  ;;  %v1384_v48 = vmul.f32 %v12810_v62, %v1362_v63  ;;  %10801 = vmatprep.mubr.msk.bf16.mxu0 %vm12054_vm2, %v15616_v21 }
 0x18c   :  { %v1405_v60 = vadd.f32 %v12816_v49, %v1383_v46 }
 0x18d   :  { %v1333_v18 = vadd.f32 1e-05, %v1317_v38  ;;  %v1406_v59 = vadd.f32 %v12816_v49, %v1384_v48 }
 0x18e   :  { %v1416_v31 = vpack.c.bf16 %v1405_v60, %v1404_v57  ;;  %v11671_v3 = vpop.eup %11670 }
 0x18f   :  { %v1303_v54 = vpop.xlane.xlu1 %1302  ;;  %11676 = vrsqrt.f32 %v1333_v18  ;;  %v1364_v11 = vmul.f32 %v11671_v3, %v12771_v45 }
 0x190   :  { %v1319_v55 = vmul.f32 0.03125, %v1303_v54  ;;  %10767 = vmatprep.mubr.msk.bf16.mxu1 %vm1158_vm1, %v1416_v31 }
 0x191   :  { %v11673_v6 = vpop.eup %11672  ;;  %v1386_v12 = vmul.f32 %v12810_v62, %v1364_v11 }
 0x192   :  { %v1335_v1 = vadd.f32 1e-05, %v1319_v55  ;;  %v1363_v43 = vmul.f32 %v11673_v6, %v12774_v52 }
 0x193   :  { %v1408_v45 = vadd.f32 %v12816_v49, %v1386_v12 }
 0x194   :  { %11678 = vrsqrt.f32 %v1335_v1  ;;  %v1385_v30 = vmul.f32 %v12810_v62, %v1363_v43 }
 0x195   :  { %v11675_v7 = vpop.eup %11674 }
 0x196   :  { %v1407_v19 = vadd.f32 %v12816_v49, %v1385_v30  ;;  %v1366_v23 = vmul.f32 %v11675_v7, %v12781_v58 }
 0x198   :  { %v1417_v61 = vpack.c.bf16 %v1407_v19, %v1406_v59  ;;  %v1388_v0 = vmul.f32 %v12810_v62, %v1366_v23 }
 0x199   :  { %v11677_v8 = vpop.eup %11676 }
 0x19a   :  { %v1365_v2 = vmul.f32 %v11677_v8, %v12788_v4  ;;  %10768 = vmatmul.mubr.msk.bf16.vlgmr.msra.gmra.mrb[0].mxu1 %vm1158_vm1, %v1417_v61  ;;  %v1410_v58 = vadd.f32 %v12816_v49, %v1388_v0 }
 0x19c   :  { %v1387_v52 = vmul.f32 %v12810_v62, %v1365_v2 }
 0x19e   :  { %v11679_v42 = vpop.eup %11678  ;;  %v1409_v20 = vadd.f32 %v12816_v49, %v1387_v52 }
 0x19f   :  { %v1367_v27 = vmul.f32 %v11679_v42, %v12794_v50  ;;  %v10281_v50 = vld [vmem:[%s15606_s4] ss:$0 sm:$0xff]  ;;  %s12055_s4 = smov 64  }
 0x1a0   :  { %v1418_v28 = vpack.c.bf16 %v1409_v20, %v1408_v45 }
 0x1a1   :  { %v1389_v4 = vmul.f32 %v12810_v62, %v1367_v27 }
 0x1a2   :  { %10771 = vmatprep.mubr.msk.bf16.mxu1 %vm1158_vm1, %v1418_v28 }
 0x1a3   :  { %v1411_v29 = vadd.f32 %v12816_v49, %v1389_v4 }
 0x1a5   :  { %v1419_v41 = vpack.c.bf16 %v1411_v29, %v1410_v58 }
 0x1a7   :  { %10772 = vmatmul.mubr.msk.bf16.gmra.mrb[4].mxu1 %vm1158_vm1, %v1419_v41 }
 0x1a8   :  { %10777 = vmatprep.mubr.msk.bf16.mxu1 %vm12054_vm2, %v15616_v21 }
 0x244   :  { %v10761_v32 = vpop.f32.mrb[0].mxu0 }
 0x245   :  { %v1501_v62 = vpop.f32.mrb[1].mxu0  ;;  %v1510_v38 = vadd.f32 %v10761_v32, %v10281_v50 }
 0x246   :  { %v1502_v33 = vadd.f32 %v10281_v50, %v1501_v62  ;;  %v10762_v5 = vpop.f32.mrb[2].mxu0 }
 0x247   :  { %v1504_v34 = vpop.f32.mrb[3].mxu0  ;;  %v12889_v40 = vpack.c.bf16 %v1510_v38, %v1510_v38  ;;  %v1513_v44 = vadd.f32 %v10762_v5, %v10281_v50 }
 0x248   :  { %v12877_v36 = vpack.c.bf16 %v1502_v33, %v1502_v33  ;;  %v1505_v49 = vadd.f32 %v10281_v50, %v1504_v34 }
 0x249   :  { %v12893_v53 = vpack.c.bf16 %v1513_v44, %v1513_v44 }
 0x24a   :  { %v12879_v39 = vpack.c.bf16 %v1505_v49, %v1505_v49  ;;  %1581 = vrot.lane.b32.xlu0 %v12877_v36, %s12053_s28 }
 0x24c   :  { %1631 = vrot.lane.b32.xlu1 %v12879_v39, %s12053_s28 }
 0x250   :  { %1680 = vrot.lane.b32.xlu1 %v12889_v40, %s12053_s28 }
 0x254   :  { %1729 = vrot.lane.b32.xlu1 %v12893_v53, %s12053_s28 }
 0x25a   :  { %v10765_v18 = vpop.f32.mrb[4].mxu0 }
 0x25b   :  { %v1517_v46 = vpop.f32.mrb[5].mxu0  ;;  %v1526_v60 = vadd.f32 %v10765_v18, %v10281_v50 }
 0x25c   :  { %v1518_v54 = vadd.f32 %v10281_v50, %v1517_v46  ;;  %v10766_v55 = vpop.f32.mrb[6].mxu0 }
 0x25d   :  { %v1520_v57 = vpop.f32.mrb[7].mxu0  ;;  %v1529_v31 = vadd.f32 %v10766_v55, %v10281_v50  ;;  %v12903_v6 = vpack.c.bf16 %v1526_v60, %v1526_v60 }
 0x25e   :  { %v12897_v63 = vpack.c.bf16 %v1518_v54, %v1518_v54  ;;  %v1521_v1 = vadd.f32 %v10281_v50, %v1520_v57 }
 0x25f   :  { %v12907_v43 = vpack.c.bf16 %v1529_v31, %v1529_v31 }
 0x260   :  { %v12899_v3 = vpack.c.bf16 %v1521_v1, %v1521_v1  ;;  %1778 = vrot.lane.b32.xlu0 %v12897_v63, %s12053_s28 }
 0x262   :  { %1827 = vrot.lane.b32.xlu1 %v12899_v3, %s12053_s28 }
 0x264   :  { %1876 = vrot.lane.b32.xlu0 %v12903_v6, %s12053_s28 }
 0x266   :  { %1925 = vrot.lane.b32.xlu1 %v12907_v43, %s12053_s28 }
 0x26d   :  { %v10769_v48 = vpop.f32.mrb[0].mxu1 }
 0x26e   :  { %v1533_v30 = vpop.f32.mrb[1].mxu1  ;;  %v1542_v19 = vadd.f32 %v10769_v48, %v10281_v50 }
 0x26f   :  { %v1534_v11 = vadd.f32 %v10281_v50, %v1533_v30  ;;  %v10770_v7 = vpop.f32.mrb[2].mxu1 }
 0x270   :  { %v1536_v59 = vpop.f32.mrb[3].mxu1  ;;  %v1545_v2 = vadd.f32 %v10770_v7, %v10281_v50  ;;  %v12919_v23 = vpack.c.bf16 %v1542_v19, %v1542_v19 }
 0x271   :  { %v12913_v8 = vpack.c.bf16 %v1534_v11, %v1534_v11  ;;  %v1537_v61 = vadd.f32 %v10281_v50, %v1536_v59 }
 0x272   :  { %v12923_v52 = vpack.c.bf16 %v1545_v2, %v1545_v2 }
 0x273   :  { %v12915_v12 = vpack.c.bf16 %v1537_v61, %v1537_v61  ;;  %1974 = vrot.lane.b32.xlu0 %v12913_v8, %s12053_s28 }
 0x275   :  { %2023 = vrot.lane.b32.xlu1 %v12915_v12, %s12053_s28 }
 0x277   :  { %2072 = vrot.lane.b32.xlu0 %v12919_v23, %s12053_s28 }
 0x279   :  { %2121 = vrot.lane.b32.xlu1 %v12923_v52, %s12053_s28 }
 0x27a   :  { %v10773_v42 = vpop.f32.mrb[4].mxu1 }
 0x27b   :  { %v1549_v45 = vpop.f32.mrb[5].mxu1  ;;  %v1558_v28 = vadd.f32 %v10773_v42, %v10281_v50 }
 0x27c   :  { %v1550_v20 = vadd.f32 %v10281_v50, %v1549_v45  ;;  %v10774_v27 = vpop.f32.mrb[6].mxu1 }
 0x27d   :  { %v1552_v0 = vpop.f32.mrb[7].mxu1  ;;  %v1561_v29 = vadd.f32 %v10774_v27, %v10281_v50  ;;  %v12935_v32 = vpack.c.bf16 %v1558_v28, %v1558_v28 }
 0x27e   :  { %v12929_v4 = vpack.c.bf16 %v1550_v20, %v1550_v20  ;;  %v1553_v58 = vadd.f32 %v10281_v50, %v1552_v0 }
 0x27f   :  { %v12939_v62 = vpack.c.bf16 %v1561_v29, %v1561_v29 }
 0x280   :  { %v12931_v41 = vpack.c.bf16 %v1553_v58, %v1553_v58  ;;  %2170 = vrot.lane.b32.xlu0 %v12929_v4, %s12053_s28 }
 0x282   :  { %2219 = vrot.lane.b32.xlu1 %v12931_v41, %s12053_s28 }
 0x284   :  { %2268 = vrot.lane.b32.xlu0 %v12935_v32, %s12053_s28 }
 0x286   :  { %2317 = vrot.lane.b32.xlu1 %v12939_v62, %s12053_s28 }
 0x288   :  { %2557 = vrot.lane.b32.xlu0 %v12877_v36, %s12055_s4 }
 0x28a   :  { %2606 = vrot.lane.b32.xlu1 %v12879_v39, %s12055_s4 }
 0x28c   :  { %2654 = vrot.lane.b32.xlu0 %v12889_v40, %s12055_s4 }
 0x28e   :  { %2702 = vrot.lane.b32.xlu1 %v12893_v53, %s12055_s4 }
 0x290   :  { %2750 = vrot.lane.b32.xlu0 %v12897_v63, %s12055_s4 }
 0x292   :  { %2894 = vrot.lane.b32.xlu1 %v12907_v43, %s12055_s4 }
 0x294   :  { %2846 = vrot.lane.b32.xlu0 %v12903_v6, %s12055_s4 }
 0x296   :  { %2990 = vrot.lane.b32.xlu1 %v12915_v12, %s12055_s4 }
 0x298   :  { %2942 = vrot.lane.b32.xlu0 %v12913_v8, %s12055_s4 }
 0x29a   :  { %3038 = vrot.lane.b32.xlu1 %v12919_v23, %s12055_s4 }
 0x29e   :  { %2798 = vrot.lane.b32.xlu1 %v12899_v3, %s12055_s4 }
 0x2bc   :  { %v1582_v50 = vpop.permute.xlu0 %1581 }
 0x2bd   :  { %v1588_v33 = vsel %vm1583_vm3, %v1582_v50, 0 }
 0x2be   :  { %10776 = vmatpush3.bf16.xpose.msra.mxu1 %v1588_v33  ;;  %v1632_v5 = vpop.permute.xlu1 %1631 }
 0x2bf   :  { %10781 = vmatprep.subr.bf16.mxu1 %v15616_v21  ;;  %v1637_v34 = vsel %vm1583_vm3, %v1632_v5, 0 }
 0x2c2   :  { %v1681_v49 = vpop.permute.xlu1 %1680 }
 0x2c3   :  { %v1686_v18 = vsel %vm1583_vm3, %v1681_v49, 0 }
 0x2c5   :  { %10778 = vmatmul.mubr.msk.bf16.vlgmr.msra.gmra.mrb[8].mxu1 %vm1583_vm3, %v12877_v36 }
 0x2c6   :  { %10782 = vmatpush3.bf16.xpose.msra.mxu1 %v1637_v34  ;;  %10783 = vmatprep.mubr.msk.bf16.mxu1 %vm12054_vm2, %v15616_v21  ;;  %v1730_v54 = vpop.permute.xlu1 %1729 }
 0x2c7   :  { %10787 = vmatprep.subr.bf16.mxu1 %v15616_v21  ;;  %v1735_v57 = vsel %vm1583_vm3, %v1730_v54, 0 }
 0x2cd   :  { %10784 = vmatmul.mubr.msk.bf16.vlgmr.msra.gmra.mrb[12].mxu1 %vm1583_vm3, %v12879_v39 }
 0x2ce   :  { %10788 = vmatpush3.bf16.xpose.msra.mxu1 %v1686_v18  ;;  %10789 = vmatprep.mubr.msk.bf16.mxu1 %vm12054_vm2, %v15616_v21 }
 0x2cf   :  { %10793 = vmatprep.subr.bf16.mxu1 %v15616_v21 }
 0x2d2   :  { %v1779_v38 = vpop.permute.xlu0 %1778 }
 0x2d3   :  { %v1784_v44 = vsel %vm1583_vm3, %v1779_v38, 0 }
 0x2d4   :  { %10800 = vmatpush3.bf16.xpose.msra.mxu0 %v1784_v44  ;;  %v1828_v1 = vpop.permute.xlu1 %1827 }
 0x2d5   :  { %10811 = vmatprep.subr.bf16.mxu0 %v15616_v21  ;;  %10790 = vmatmul.mubr.msk.bf16.vlgmr.msra.gmra.mrb[16].mxu1 %vm1583_vm3, %v12889_v40  ;;  %v1833_v48 = vsel %vm1583_vm3, %v1828_v1, 0 }
 0x2d6   :  { %v1877_v46 = vpop.permute.xlu0 %1876  ;;  %10794 = vmatpush3.bf16.xpose.msra.mxu1 %v1735_v57  ;;  %10795 = vmatprep.mubr.msk.bf16.mxu1 %vm12054_vm2, %v15616_v21 }
 0x2d7   :  { %v1882_v55 = vsel %vm1583_vm3, %v1877_v46, 0  ;;  %10805 = vmatprep.subr.bf16.mxu1 %v15616_v21 }
 0x2d8   :  { %v1926_v11 = vpop.permute.xlu1 %1925 }
 0x2d9   :  { %v1931_v59 = vsel %vm1583_vm3, %v1926_v11, 0 }
 0x2db   :  { %10802 = vmatmul.mubr.msk.bf16.vlgmr.msra.gmra.mrb[8].mxu0 %vm1583_vm3, %v12897_v63 }
 0x2dc   :  { %10812 = vmatpush3.bf16.xpose.msra.mxu0 %v1882_v55  ;;  %10813 = vmatprep.mubr.msk.bf16.mxu0 %vm12054_vm2, %v15616_v21 }
 0x2dd   :  { %10823 = vmatprep.subr.bf16.mxu0 %v15616_v21  ;;  %10796 = vmatmul.mubr.msk.bf16.vlgmr.msra.gmra.mrb[20].mxu1 %vm1583_vm3, %v12893_v53 }
 0x2de   :  { %10806 = vmatpush3.bf16.xpose.msra.mxu1 %v1833_v48  ;;  %10807 = vmatprep.mubr.msk.bf16.mxu1 %vm12054_vm2, %v15616_v21 }
 0x2df   :  { %10817 = vmatprep.subr.bf16.mxu1 %v15616_v21 }
 0x2e3   :  { %10814 = vmatmul.mubr.msk.bf16.vlgmr.msra.gmra.mrb[12].mxu0 %vm1583_vm3, %v12903_v6 }
 0x2e4   :  { %10825 = vmatprep.mubr.msk.bf16.mxu0 %vm12054_vm2, %v15616_v21 }
 0x2e5   :  { %v1975_v60 = vpop.permute.xlu0 %1974  ;;  %10808 = vmatmul.mubr.msk.bf16.vlgmr.msra.gmra.mrb[24].mxu1 %vm1583_vm3, %v12899_v3 }
 0x2e6   :  { %v1980_v31 = vsel %vm1583_vm3, %v1975_v60, 0  ;;  %10818 = vmatpush3.bf16.xpose.msra.mxu1 %v1931_v59  ;;  %10819 = vmatprep.mubr.msk.bf16.mxu1 %vm12054_vm2, %v15616_v21 }
 0x2e7   :  { %10824 = vmatpush3.bf16.xpose.msra.mxu0 %v1980_v31  ;;  %10829 = vmatprep.subr.bf16.mxu1 %v15616_v21  ;;  %v2024_v61 = vpop.permute.xlu1 %2023 }
 0x2e8   :  { %10835 = vmatprep.subr.bf16.mxu0 %v15616_v21  ;;  %v2029_v42 = vsel %vm1583_vm3, %v2024_v61, 0 }
 0x2e9   :  { %v2073_v30 = vpop.permute.xlu0 %2072 }
 0x2ea   :  { %v2078_v7 = vsel %vm1583_vm3, %v2073_v30, 0 }
 0x2eb   :  { %v2122_v20 = vpop.permute.xlu1 %2121 }
 0x2ec   :  { %v2127_v0 = vsel %vm1583_vm3, %v2122_v20, 0 }
 0x2ed   :  { %10820 = vmatmul.mubr.msk.bf16.vlgmr.msra.gmra.mrb[28].mxu1 %vm1583_vm3, %v12907_v43 }
 0x2ee   :  { %10826 = vmatmul.mubr.msk.bf16.vlgmr.msra.gmra.mrb[16].mxu0 %vm1583_vm3, %v12913_v8  ;;  %10830 = vmatpush3.bf16.xpose.msra.mxu1 %v2029_v42 }
 0x2ef   :  { %10836 = vmatpush3.bf16.xpose.msra.mxu0 %v2078_v7  ;;  %10837 = vmatprep.mubr.msk.bf16.mxu0 %vm12054_vm2, %v15616_v21 }
 0x2f0   :  { %10847 = vmatprep.subr.bf16.mxu0 %v15616_v21  ;;  %10831 = vmatprep.mubr.msk.bf16.mxu1 %vm12054_vm2, %v15616_v21 }
 0x2f1   :  { %10841 = vmatprep.subr.bf16.mxu1 %v15616_v21 }
 0x2f2   :  { %v2171_v19 = vpop.permute.xlu0 %2170 }
 0x2f3   :  { %v2176_v2 = vsel %vm1583_vm3, %v2171_v19, 0 }
 0x2f4   :  { %v2220_v58 = vpop.permute.xlu1 %2219 }
 0x2f5   :  { %10832 = vmatmul.mubr.msk.bf16.vlgmr.msra.gmra.mrb[32].mxu1 %vm1583_vm3, %v12915_v12  ;;  %v2225_v50 = vsel %vm1583_vm3, %v2220_v58, 0 }
 0x2f6   :  { %10838 = vmatmul.mubr.msk.bf16.vlgmr.msra.gmra.mrb[20].mxu0 %vm1583_vm3, %v12919_v23  ;;  %v2269_v45 = vpop.permute.xlu0 %2268  ;;  %10842 = vmatpush3.bf16.xpose.msra.mxu1 %v2127_v0 }
 0x2f7   :  { %10848 = vmatpush3.bf16.xpose.msra.mxu0 %v2176_v2  ;;  %10849 = vmatprep.mubr.msk.bf16.mxu0 %vm12054_vm2, %v15616_v21  ;;  %v2274_v27 = vsel %vm1583_vm3, %v2269_v45, 0 }
 0x2f8   :  { %10859 = vmatprep.subr.bf16.mxu0 %v15616_v21  ;;  %10843 = vmatprep.mubr.msk.bf16.mxu1 %vm12054_vm2, %v15616_v21  ;;  %v2318_v33 = vpop.permute.xlu1 %2317 }
 0x2f9   :  { %10853 = vmatprep.subr.bf16.mxu1 %v15616_v21  ;;  %v2323_v5 = vsel %vm1583_vm3, %v2318_v33, 0 }
 0x2fa   :  { %v2558_v28 = vpop.permute.xlu0 %2557 }
 0x2fb   :  { %v2564_v29 = vsel %vm2562_vm4, %v2558_v28, 0 }
 0x2fc   :  { %v2607_v34 = vpop.permute.xlu1 %2606 }
 0x2fd   :  { %10844 = vmatmul.mubr.msk.bf16.vlgmr.msra.gmra.mrb[36].mxu1 %vm1583_vm3, %v12923_v52  ;;  %v2612_v49 = vsel %vm2562_vm4, %v2607_v34, 0 }
 0x2fe   :  { %10850 = vmatmul.mubr.msk.bf16.vlgmr.msra.gmra.mrb[24].mxu0 %vm1583_vm3, %v12929_v4  ;;  %10854 = vmatpush3.bf16.xpose.msra.mxu1 %v2225_v50 }
 0x2ff   :  { %10860 = vmatpush3.bf16.xpose.msra.mxu0 %v2274_v27  ;;  %10861 = vmatprep.mubr.msk.bf16.mxu0 %vm12054_vm2, %v15616_v21 }
 0x300   :  { %10871 = vmatprep.subr.bf16.mxu0 %v15616_v21  ;;  %10855 = vmatprep.mubr.msk.bf16.mxu1 %vm12054_vm2, %v15616_v21 }
 0x301   :  { %10865 = vmatprep.subr.bf16.mxu1 %v15616_v21 }
 0x305   :  { %10856 = vmatmul.mubr.msk.bf16.vlgmr.msra.gmra.mrb[40].mxu1 %vm1583_vm3, %v12931_v41 }
 0x306   :  { %10862 = vmatmul.mubr.msk.bf16.vlgmr.msra.gmra.mrb[28].mxu0 %vm1583_vm3, %v12935_v32  ;;  %10866 = vmatpush3.bf16.xpose.msra.mxu1 %v2323_v5 }
 0x307   :  { %10872 = vmatpush3.bf16.msra.mxu0 %v2564_v29  ;;  %10873 = vmatprep.mubr.msk.bf16.mxu0 %vm12054_vm2, %v15616_v21 }
 0x308   :  { %10883 = vmatprep.subr.bf16.mxu0 %v15616_v21  ;;  %10867 = vmatprep.mubr.msk.bf16.mxu1 %vm12054_vm2, %v15616_v21 }
 0x309   :  { %10877 = vmatprep.subr.bf16.mxu1 %v15616_v21 }
 0x30d   :  { %10868 = vmatmul.mubr.msk.bf16.vlgmr.msra.gmra.mrb[44].mxu1 %vm1583_vm3, %v12939_v62 }
 0x30e   :  { %10878 = vmatpush3.bf16.msra.mxu1 %v2612_v49  ;;  %10879 = vmatprep.mubr.msk.bf16.mxu1 %vm12054_vm2, %v15616_v21 }
 0x30f   :  { %10889 = vmatprep.subr.bf16.mxu1 %v15616_v21 }
 0x398   :  { %v13067_v38 = vpop.f32.mrb[8].mxu1 }
 0x399   :  { %v10779_v44 = vpop.f32.mrb[9].mxu1  ;;  %v2365_v18 = vsel %vm1583_vm3, %v13067_v38, -inf }
 0x39a   :  { %v1627_v46 = vpop.f32.mrb[10].mxu1  ;;  %2366 = vmax.xlane.f32.xlu0 %v2365_v18 }
 0x39b   :  { %v10780_v54 = vpop.f32.mrb[11].mxu1 }
 0x3a0   :  { %v13071_v55 = vpop.f32.mrb[12].mxu1 }
 0x3a1   :  { %v10785_v57 = vpop.f32.mrb[13].mxu1  ;;  %v2368_v60 = vsel %vm1583_vm3, %v13071_v55, -inf }
 0x3a2   :  { %2369 = vmax.xlane.f32.xlu1 %v2368_v60  ;;  %v1676_v1 = vpop.f32.mrb[14].mxu1 }
 0x3a3   :  { %v10786_v31 = vpop.f32.mrb[15].mxu1 }
 0x3a8   :  { %v13079_v59 = vpop.f32.mrb[16].mxu1 }
 0x3a9   :  { %v10791_v61 = vpop.f32.mrb[17].mxu1  ;;  %v2371_v2 = vsel %vm1583_vm3, %v13079_v59, -inf }
 0x3aa   :  { %v1725_v42 = vpop.f32.mrb[18].mxu1 }
 0x3ab   :  { %v10792_v45 = vpop.f32.mrb[19].mxu1 }
 0x3ae   :  { %v13075_v48 = vpop.f32.mrb[8].mxu0 }
 0x3af   :  { %v10803_v30 = vpop.f32.mrb[9].mxu0  ;;  %v2377_v11 = vsel %vm1583_vm3, %v13075_v48, -inf }
 0x3b0   :  { %v1823_v7 = vpop.f32.mrb[10].mxu0  ;;  %2378 = vmax.xlane.f32.xlu0 %v2377_v11  ;;  %v13087_v58 = vpop.f32.mrb[20].mxu1 }
 0x3b1   :  { %v10804_v19 = vpop.f32.mrb[11].mxu0  ;;  %v10797_v50 = vpop.f32.mrb[21].mxu1  ;;  %v2374_v33 = vsel %vm1583_vm3, %v13087_v58, -inf }
 0x3b2   :  { %v1774_v5 = vpop.f32.mrb[22].mxu1 }
 0x3b3   :  { %v10798_v34 = vpop.f32.mrb[23].mxu1 }
 0x3b4   :  { %2372 = vmax.xlane.f32.xlu0 %v2371_v2 }
 0x3b6   :  { %v13083_v20 = vpop.f32.mrb[12].mxu0 }
 0x3b7   :  { %v10815_v27 = vpop.f32.mrb[13].mxu0  ;;  %v2383_v0 = vsel %vm1583_vm3, %v13083_v20, -inf }
 0x3b8   :  { %v1921_v28 = vpop.f32.mrb[14].mxu0  ;;  %2384 = vmax.xlane.f32.xlu0 %v2383_v0  ;;  %v13095_v54 = vpop.f32.mrb[24].mxu1 }
 0x3b9   :  { %v10816_v29 = vpop.f32.mrb[15].mxu0  ;;  %v10809_v60 = vpop.f32.mrb[25].mxu1  ;;  %v2380_v1 = vsel %vm1583_vm3, %v13095_v54, -inf }
 0x3ba   :  { %2381 = vmax.xlane.f32.xlu1 %v2380_v1  ;;  %v1872_v31 = vpop.f32.mrb[26].mxu1 }
 0x3bb   :  { %v10810_v30 = vpop.f32.mrb[27].mxu1 }
 0x3bc   :  { %2375 = vmax.xlane.f32.xlu0 %v2374_v33 }
 0x3c0   :  { %v13103_v2 = vpop.f32.mrb[28].mxu1 }
 0x3c1   :  { %v13091_v49 = vpop.f32.mrb[16].mxu0  ;;  %v10821_v45 = vpop.f32.mrb[29].mxu1  ;;  %v2386_v27 = vsel %vm1583_vm3, %v13103_v2, -inf }
 0x3c2   :  { %v10827_v44 = vpop.f32.mrb[17].mxu0  ;;  %v2389_v18 = vsel %vm1583_vm3, %v13091_v49, -inf  ;;  %2387 = vmax.xlane.f32.xlu1 %v2386_v27  ;;  %v1970_v0 = vpop.f32.mrb[30].mxu1 }
 0x3c3   :  { %v2019_v46 = vpop.f32.mrb[18].mxu0  ;;  %2390 = vmax.xlane.f32.xlu0 %v2389_v18  ;;  %v10822_v28 = vpop.f32.mrb[31].mxu1 }
 0x3c4   :  { %v10828_v57 = vpop.f32.mrb[19].mxu0 }
 0x3c8   :  { %v13111_v34 = vpop.f32.mrb[32].mxu1 }
 0x3c9   :  { %v13099_v11 = vpop.f32.mrb[20].mxu0  ;;  %v10833_v18 = vpop.f32.mrb[33].mxu1  ;;  %v2392_v46 = vsel %vm1583_vm3, %v13111_v34, -inf }
 0x3ca   :  { %v10839_v7 = vpop.f32.mrb[21].mxu0  ;;  %v2395_v19 = vsel %vm1583_vm3, %v13099_v11, -inf  ;;  %2393 = vmax.xlane.f32.xlu1 %v2392_v46  ;;  %v2068_v57 = vpop.f32.mrb[34].mxu1 }
 0x3cb   :  { %v2117_v61 = vpop.f32.mrb[22].mxu0  ;;  %2396 = vmax.xlane.f32.xlu0 %v2395_v19  ;;  %v10834_v60 = vpop.f32.mrb[35].mxu1 }
 0x3cc   :  { %v10840_v42 = vpop.f32.mrb[23].mxu0 }
 0x3d0   :  { %v13119_v19 = vpop.f32.mrb[36].mxu1 }
 0x3d1   :  { %v13107_v29 = vpop.f32.mrb[24].mxu0  ;;  %v10845_v42 = vpop.f32.mrb[37].mxu1  ;;  %v2398_v57 = vsel %vm1583_vm3, %v13119_v19, -inf }
 0x3d2   :  { %v10851_v50 = vpop.f32.mrb[25].mxu0  ;;  %v2401_v33 = vsel %vm1583_vm3, %v13107_v29, -inf  ;;  %v2166_v45 = vpop.f32.mrb[38].mxu1 }
 0x3d3   :  { %v2215_v5 = vpop.f32.mrb[26].mxu0  ;;  %2402 = vmax.xlane.f32.xlu0 %v2401_v33  ;;  %v10846_v27 = vpop.f32.mrb[39].mxu1 }
 0x3d4   :  { %v10852_v44 = vpop.f32.mrb[27].mxu0 }
 0x3d8   :  { %v13121_v0 = vpop.f32.mrb[40].mxu1 }
 0x3d9   :  { %v13115_v1 = vpop.f32.mrb[28].mxu0  ;;  %v10857_v28 = vpop.f32.mrb[41].mxu1  ;;  %v2404_v60 = vsel %vm1583_vm3, %v13121_v0, -inf }
 0x3da   :  { %v10863_v31 = vpop.f32.mrb[29].mxu0  ;;  %v2407_v30 = vsel %vm1583_vm3, %v13115_v1, -inf  ;;  %v2264_v50 = vpop.f32.mrb[42].mxu1 }
 0x3db   :  { %v2313_v7 = vpop.f32.mrb[30].mxu0  ;;  %2408 = vmax.xlane.f32.xlu0 %v2407_v30  ;;  %3086 = vrot.lane.b32.xlu1 %v12923_v52, %s12055_s4  ;;  %v10858_v33 = vpop.f32.mrb[43].mxu1 }
 0x3dc   :  { %v10864_v61 = vpop.f32.mrb[31].mxu0  ;;  %v13135_v30 = vpop.permute.xlu0 %2654 }
 0x3dd   :  { %v13137_v7 = vpop.permute.xlu1 %2702 }
 0x3e0   :  { %v13125_v5 = vpop.f32.mrb[44].mxu1  ;;  %v13139_v61 = vpop.permute.xlu0 %2750 }
 0x3e1   :  { %v10869_v44 = vpop.f32.mrb[45].mxu1  ;;  %v2410_v31 = vsel %vm1583_vm3, %v13125_v5, -inf  ;;  %v13141_v42 = vpop.permute.xlu1 %2894 }
 0x3e2   :  { %v2362_v18 = vpop.f32.mrb[46].mxu1 }
 0x3e3   :  { %v10870_v46 = vpop.f32.mrb[47].mxu1 }
 0x3e4   :  { %v13143_v45 = vpop.permute.xlu0 %2846 }
 0x3e5   :  { %v13145_v27 = vpop.permute.xlu1 %2990 }
 0x3e8   :  { %v13147_v28 = vpop.permute.xlu0 %2942 }
 0x3e9   :  { %v13149_v50 = vpop.permute.xlu1 %3038 }
 0x3ed   :  { %v13152_v46 = vpop.permute.xlu1 %2798 }
 0x3f1   :  { %3134 = vrot.lane.b32.xlu0 %v12929_v4, %s12055_s4 }
 0x3ff   :  { %2399 = vmax.xlane.f32.xlu1 %v2398_v57 }
 0x403   :  { %2405 = vmax.xlane.f32.xlu1 %v2404_v60 }
 0x407   :  { %2411 = vmax.xlane.f32.xlu1 %v2410_v31 }
 0x427   :  { %v2367_v33 = vpop.xlane.xlu0 %2366 }
 0x428   :  { %v2413_v44 = vsub.f32 %v13067_v38, %v2367_v33 }
 0x42a   :  { %v2429_v18 = vmul.f32 1.442695, %v2413_v44 }
 0x42c   :  { %11680 = vpow2.f32 %v2429_v18 }
 0x42f   :  { %v2370_v57 = vpop.xlane.xlu1 %2369 }
 0x430   :  { %v2414_v60 = vsub.f32 %v13071_v55, %v2370_v57 }
 0x432   :  { %v2431_v31 = vmul.f32 1.442695, %v2414_v60 }
 0x434   :  { %11682 = vpow2.f32 %v2431_v31 }
 0x436   :  { %v13155_v21 = vpop.eup %11680 }
 0x437   :  { %v2461_v14 = vsel %vm1583_vm3, %v13155_v21, 0.0 }
 0x438   :  { %2462 = vadd.xlane.f32.xlu0 %v2461_v14 }
 0x43d   :  { %v2379_v26 = vpop.xlane.xlu0 %2378 }
 0x43e   :  { %v2417_v24 = vsub.f32 %v13075_v48, %v2379_v26  ;;  %v13161_v18 = vpop.eup %11682 }
 0x43f   :  { %v2464_v60 = vsel %vm1583_vm3, %v13161_v18, 0.0 }
 0x440   :  { %v2437_v56 = vmul.f32 1.442695, %v2417_v24  ;;  %2465 = vadd.xlane.f32.xlu1 %v2464_v60 }
 0x441   :  { %v2373_v38 = vpop.xlane.xlu0 %2372 }
 0x442   :  { %11684 = vpow2.f32 %v2437_v56  ;;  %v2415_v33 = vsub.f32 %v13079_v59, %v2373_v38 }
 0x444   :  { %v2433_v44 = vmul.f32 1.442695, %v2415_v33 }
 0x445   :  { %v2385_v55 = vpop.xlane.xlu0 %2384 }
 0x446   :  { %11686 = vpow2.f32 %v2433_v44  ;;  %v2419_v57 = vsub.f32 %v13083_v20, %v2385_v55 }
 0x447   :  { %v2382_v38 = vpop.xlane.xlu1 %2381 }
 0x448   :  { %v2441_v26 = vmul.f32 1.442695, %v2419_v57  ;;  %v2418_v55 = vsub.f32 %v13095_v54, %v2382_v38 }
 0x449   :  { %v2376_v48 = vpop.xlane.xlu0 %2375 }
 0x44a   :  { %11688 = vpow2.f32 %v2441_v26  ;;  %v2416_v14 = vsub.f32 %v13087_v58, %v2376_v48  ;;  %v2439_v57 = vmul.f32 1.442695, %v2418_v55 }
 0x44c   :  { %v13167_v24 = vpop.eup %11684  ;;  %v2435_v56 = vmul.f32 1.442695, %v2416_v14 }
 0x44d   :  { %v2473_v59 = vsel %vm1583_vm3, %v13167_v24, 0.0 }
 0x44e   :  { %11690 = vpow2.f32 %v2435_v56  ;;  %2474 = vadd.xlane.f32.xlu0 %v2473_v59 }
 0x44f   :  { %v2388_v14 = vpop.xlane.xlu1 %2387 }
 0x450   :  { %v2391_v31 = vpop.xlane.xlu0 %2390  ;;  %v13172_v33 = vpop.eup %11686  ;;  %v2420_v59 = vsub.f32 %v13103_v2, %v2388_v14 }
 0x451   :  { %v2421_v20 = vsub.f32 %v13091_v49, %v2391_v31  ;;  %v2467_v58 = vsel %vm1583_vm3, %v13172_v33, 0.0 }
 0x452   :  { %2468 = vadd.xlane.f32.xlu0 %v2467_v58 }
 0x453   :  { %v2445_v44 = vmul.f32 1.442695, %v2421_v20  ;;  %v2443_v20 = vmul.f32 1.442695, %v2420_v59 }
 0x454   :  { %v13177_v60 = vpop.eup %11688 }
 0x455   :  { %11692 = vpow2.f32 %v2445_v44  ;;  %v2479_v48 = vsel %vm1583_vm3, %v13177_v60, 0.0 }
 0x456   :  { %11694 = vpow2.f32 %v2439_v57  ;;  %2480 = vadd.xlane.f32.xlu0 %v2479_v48 }
 0x457   :  { %v2394_v55 = vpop.xlane.xlu1 %2393 }
 0x458   :  { %v2397_v26 = vpop.xlane.xlu0 %2396  ;;  %v13182_v56 = vpop.eup %11690  ;;  %v2422_v2 = vsub.f32 %v13111_v34, %v2394_v55 }
 0x459   :  { %v2423_v49 = vsub.f32 %v13099_v11, %v2397_v26  ;;  %v2470_v31 = vsel %vm1583_vm3, %v13182_v56, 0.0 }
 0x45a   :  { %2471 = vadd.xlane.f32.xlu1 %v2470_v31  ;;  %v2447_v57 = vmul.f32 1.442695, %v2422_v2 }
 0x45b   :  { %v2449_v54 = vmul.f32 1.442695, %v2423_v49 }
 0x45d   :  { %11696 = vpow2.f32 %v2449_v54 }
 0x45e   :  { %11698 = vpow2.f32 %v2443_v20 }
 0x45f   :  { %v13187_v38 = vpop.eup %11692  ;;  %11700 = vpow2.f32 %v2447_v57 }
 0x460   :  { %v2485_v44 = vsel %vm1583_vm3, %v13187_v38, 0.0  ;;  %v13191_v11 = vpop.eup %11694  ;;  %v2403_v59 = vpop.xlane.xlu0 %2402 }
 0x461   :  { %2486 = vadd.xlane.f32.xlu1 %v2485_v44  ;;  %v2476_v58 = vsel %vm1583_vm3, %v13191_v11, 0.0  ;;  %v2425_v31 = vsub.f32 %v13107_v29, %v2403_v59 }
 0x463   :  { %v2453_v44 = vmul.f32 1.442695, %v2425_v31 }
 0x465   :  { %2477 = vadd.xlane.f32.xlu1 %v2476_v58  ;;  %v13212_v58 = vpop.permute.xlu1 %3086  ;;  %11702 = vpow2.f32 %v2453_v44 }
 0x467   :  { %v13196_v26 = vpop.eup %11696 }
 0x468   :  { %v2491_v48 = vsel %vm1583_vm3, %v13196_v26, 0.0  ;;  %v13200_v49 = vpop.eup %11698  ;;  %v2409_v20 = vpop.xlane.xlu0 %2408 }
 0x469   :  { %2492 = vadd.xlane.f32.xlu1 %v2491_v48  ;;  %v2482_v14 = vsel %vm1583_vm3, %v13200_v49, 0.0  ;;  %v13204_v54 = vpop.eup %11700  ;;  %v2427_v55 = vsub.f32 %v13115_v1, %v2409_v20 }
 0x46a   :  { %v2488_v34 = vsel %vm1583_vm3, %v13204_v54, 0.0 }
 0x46b   :  { %2489 = vadd.xlane.f32.xlu0 %v2488_v34  ;;  %v2457_v2 = vmul.f32 1.442695, %v2427_v55 }
 0x46c   :  { %v13244_v55 = vpop.permute.xlu0 %3134 }
 0x46d   :  { %2483 = vadd.xlane.f32.xlu1 %v2482_v14  ;;  %11704 = vpow2.f32 %v2457_v2 }
 0x46f   :  { %v13216_v35 = vpop.eup %11702 }
 0x470   :  { %v2497_v1 = vsel %vm1583_vm3, %v13216_v35, 0.0 }
 0x477   :  { %v13220_v59 = vpop.eup %11704 }
 0x478   :  { %v2503_v31 = vsel %vm1583_vm3, %v13220_v59, 0.0 }
 0x47e   :  { %3182 = vrot.lane.b32.xlu1 %v12931_v41, %s12055_s4 }
 0x48c   :  { %v2400_v57 = vpop.xlane.xlu1 %2399 }
 0x48d   :  { %v2424_v48 = vsub.f32 %v13119_v19, %v2400_v57 }
 0x48f   :  { %v2451_v14 = vmul.f32 1.442695, %v2424_v48 }
 0x490   :  { %v2406_v34 = vpop.xlane.xlu1 %2405 }
 0x491   :  { %11706 = vpow2.f32 %v2451_v14  ;;  %v2426_v17 = vsub.f32 %v13121_v0, %v2406_v34 }
 0x493   :  { %v2455_v29 = vmul.f32 1.442695, %v2426_v17 }
 0x494   :  { %v2412_v44 = vpop.xlane.xlu1 %2411 }
 0x495   :  { %11708 = vpow2.f32 %v2455_v29  ;;  %v2428_v2 = vsub.f32 %v13125_v5, %v2412_v44  ;;  %v15650_v44 = vmov 0.0  }
 0x497   :  { %v2459_v57 = vmul.f32 1.442695, %v2428_v2 }
 0x49b   :  { %v13224_v20 = vpop.eup %11706 }
 0x49c   :  { %v2494_v19 = vsel %vm1583_vm3, %v13224_v20, 0.0 }
 0x49d   :  { %2495 = vadd.xlane.f32.xlu0 %v2494_v19  ;;  %v2660_v19 = vsel %vm2562_vm4, %v13135_v30, 0 }
 0x49f   :  { %v13228_v0 = vpop.eup %11708 }
 0x4a0   :  { %v2500_v17 = vsel %vm1583_vm3, %v13228_v0, 0.0 }
 0x4a1   :  { %2501 = vadd.xlane.f32.xlu0 %v2500_v17 }
 0x4a2   :  { %2498 = vadd.xlane.f32.xlu1 %v2497_v1 }
 0x4a6   :  { %2504 = vadd.xlane.f32.xlu1 %v2503_v31 }
 0x4b7   :  { %3278 = vrot.lane.b32.xlu1 %v12939_v62, %s12055_s4  ;;  %3230 = vrot.lane.b32.xlu0 %v12935_v32, %s12055_s4 }
 0x4bb   :  { %3394 = vrot.lane.b32.xlu1 %v12879_v39, %s12056_s29 }
 0x4bf   :  { %3392 = vrot.lane.b32.xlu1 %v12879_v39, %s12057_s30 }
 0x4c3   :  { %3494 = vrot.lane.b32.xlu1 %v12893_v53, %s12056_s29 }
 0x4c5   :  { %v2463_v48 = vpop.xlane.xlu0 %2462 }
 0x4c6   :  { %11710 = vrcp.f32 %v2463_v48  ;;  %v2708_v48 = vsel %vm2562_vm4, %v13137_v7, 0 }
 0x4c7   :  { %3492 = vrot.lane.b32.xlu1 %v12893_v53, %s12057_s30  ;;  %11712 = vpow2.f32 %v2459_v57 }
 0x4cb   :  { %3594 = vrot.lane.b32.xlu1 %v12899_v3, %s12056_s29 }
 0x4cd   :  { %v2466_v14 = vpop.xlane.xlu1 %2465 }
 0x4ce   :  { %11714 = vrcp.f32 %v2466_v14 }
 0x4cf   :  { %3592 = vrot.lane.b32.xlu1 %v12899_v3, %s12057_s30 }
 0x4d0   :  { %v11711_v34 = vpop.eup %11710 }
 0x4d1   :  { %v2525_v5 = vmul.f32 %v11711_v34, %v13155_v21  ;;  %v13258_v29 = vpop.eup %11712 }
 0x4d2   :  { %v2506_v17 = vsel %vm1583_vm3, %v13258_v29, 0.0 }
 0x4d3   :  { %3694 = vrot.lane.b32.xlu1 %v12907_v43, %s12056_s29  ;;  %v2541_v1 = vpack.c.bf16 %v2525_v5, %v2525_v5 }
 0x4d5   :  { %10874 = vmatmul.mubr.msk.bf16.vlgmr.msra.gmra.mrb[32].mxu0 %vm1583_vm3, %v2541_v1 }
 0x4d6   :  { %10884 = vmatpush3.bf16.msra.mxu0 %v2660_v19  ;;  %10885 = vmatprep.mubr.msk.bf16.mxu0 %vm12054_vm2, %v15650_v44  ;;  %v2756_v19 = vsel %vm2562_vm4, %v13139_v61, 0 }
 0x4d7   :  { %3692 = vrot.lane.b32.xlu1 %v12907_v43, %s12057_s30  ;;  %2507 = vadd.xlane.f32.xlu0 %v2506_v17 }
 0x4d8   :  { %10895 = vmatprep.subr.bf16.mxu0 %v15650_v44  ;;  %v11715_v21 = vpop.eup %11714 }
 0x4d9   :  { %v2526_v30 = vmul.f32 %v11715_v21, %v13161_v18 }
 0x4db   :  { %3794 = vrot.lane.b32.xlu1 %v12915_v12, %s12056_s29  ;;  %v2475_v31 = vpop.xlane.xlu0 %2474  ;;  %v2542_v57 = vpack.c.bf16 %v2526_v30, %v2526_v30 }
 0x4dd   :  { %10880 = vmatmul.mubr.msk.bf16.vlgmr.msra.gmra.mrb[48].mxu1 %vm1583_vm3, %v2542_v57 }
 0x4de   :  { %10890 = vmatpush3.bf16.msra.mxu1 %v2708_v48  ;;  %10891 = vmatprep.mubr.msk.bf16.mxu1 %vm12054_vm2, %v15650_v44 }
 0x4df   :  { %3792 = vrot.lane.b32.xlu1 %v12915_v12, %s12057_s30  ;;  %v2469_v2 = vpop.xlane.xlu0 %2468  ;;  %10901 = vmatprep.subr.bf16.mxu1 %v15650_v44 }
 0x4e0   :  { %11716 = vrcp.f32 %v2469_v2 }
 0x4e1   :  { %11718 = vrcp.f32 %v2475_v31 }
 0x4e3   :  { %3894 = vrot.lane.b32.xlu1 %v12923_v52, %s12056_s29  ;;  %v2481_v18 = vpop.xlane.xlu0 %2480 }
 0x4e7   :  { %3892 = vrot.lane.b32.xlu1 %v12923_v52, %s12057_s30  ;;  %v2472_v14 = vpop.xlane.xlu1 %2471 }
 0x4e8   :  { %11720 = vrcp.f32 %v2472_v14  ;;  %v2852_v14 = vsel %vm2562_vm4, %v13143_v45, 0 }
 0x4e9   :  { %11722 = vrcp.f32 %v2481_v18 }
 0x4ea   :  { %v11717_v34 = vpop.eup %11716 }
 0x4eb   :  { %3994 = vrot.lane.b32.xlu1 %v12931_v41, %s12056_s29  ;;  %v2527_v5 = vmul.f32 %v11717_v34, %v13172_v33  ;;  %v11719_v31 = vpop.eup %11718 }
 0x4ec   :  { %v2529_v33 = vmul.f32 %v11719_v31, %v13167_v24  ;;  %v2804_v24 = vsel %vm2562_vm4, %v13152_v46, 0  ;;  %v2948_v31 = vsel %vm2562_vm4, %v13147_v28, 0 }
 0x4ed   :  { %v2543_v1 = vpack.c.bf16 %v2527_v5, %v2527_v5  ;;  %3344 = vrot.lane.b32.xlu0 %v12877_v36, %s12056_s29 }
 0x4ee   :  { %v2487_v7 = vpop.xlane.xlu1 %2486  ;;  %v2545_v57 = vpack.c.bf16 %v2529_v33, %v2529_v33  ;;  %v2996_v33 = vsel %vm2562_vm4, %v13145_v27, 0 }
 0x4ef   :  { %3992 = vrot.lane.b32.xlu1 %v12931_v41, %s12057_s30  ;;  %10886 = vmatmul.mubr.msk.bf16.vlgmr.msra.gmra.mrb[36].mxu0 %vm1583_vm3, %v2543_v1  ;;  %v2900_v1 = vsel %vm2562_vm4, %v13141_v42, 0 }
 0x4f0   :  { %10896 = vmatpush3.bf16.msra.mxu0 %v2756_v19  ;;  %10897 = vmatprep.mubr.msk.bf16.mxu0 %vm12054_vm2, %v15650_v44 }
 0x4f1   :  { %10907 = vmatprep.subr.bf16.mxu0 %v15650_v44  ;;  %3342 = vrot.lane.b32.xlu0 %v12877_v36, %s12057_s30 }
 0x4f2   :  { %v2478_v17 = vpop.xlane.xlu1 %2477  ;;  %v11721_v21 = vpop.eup %11720 }
 0x4f3   :  { %11724 = vrcp.f32 %v2478_v17  ;;  %4094 = vrot.lane.b32.xlu1 %v12939_v62, %s12056_s29  ;;  %v2528_v30 = vmul.f32 %v11721_v21, %v13182_v56  ;;  %v11723_v48 = vpop.eup %11722  ;;  %v3044_v21 = vsel %vm2562_vm4, %v13149_v50, 0 }
 0x4f4   :  { %11726 = vrcp.f32 %v2487_v7  ;;  %v2531_v45 = vmul.f32 %v11723_v48, %v13177_v60 }
 0x4f5   :  { %v2544_v61 = vpack.c.bf16 %v2528_v30, %v2528_v30  ;;  %3444 = vrot.lane.b32.xlu0 %v12889_v40, %s12056_s29  ;;  %v3092_v30 = vsel %vm2562_vm4, %v13212_v58, 0 }
 0x4f6   :  { %v2493_v2 = vpop.xlane.xlu1 %2492  ;;  %v2547_v60 = vpack.c.bf16 %v2531_v45, %v2531_v45 }
 0x4f7   :  { %4092 = vrot.lane.b32.xlu1 %v12939_v62, %s12057_s30  ;;  %10892 = vmatmul.mubr.msk.bf16.vlgmr.msra.gmra.mrb[52].mxu1 %vm1583_vm3, %v2544_v61 }
 0x4f8   :  { %10898 = vmatmul.mubr.msk.bf16.vlgmr.msra.gmra.mrb[40].mxu0 %vm1583_vm3, %v2545_v57  ;;  %10902 = vmatpush3.bf16.msra.mxu1 %v2804_v24  ;;  %v2490_v34 = vpop.xlane.xlu0 %2489 }
 0x4f9   :  { %10908 = vmatpush3.bf16.msra.mxu0 %v2852_v14  ;;  %10909 = vmatprep.mubr.msk.bf16.mxu0 %vm12054_vm2, %v15650_v44 }
 0x4fa   :  { %v2484_v56 = vpop.xlane.xlu1 %2483  ;;  %10919 = vmatprep.subr.bf16.mxu0 %v15650_v44  ;;  %10903 = vmatprep.mubr.msk.bf16.mxu1 %vm12054_vm2, %v15650_v44 }
 0x4fb   :  { %11728 = vrcp.f32 %v2484_v56  ;;  %4382 = vrot.lane.b32.xlu1 %v12879_v39, %s12058_s14  ;;  %10913 = vmatprep.subr.bf16.mxu1 %v15650_v44 }
 0x4fc   :  { %11730 = vrcp.f32 %v2493_v2  ;;  %3442 = vrot.lane.b32.xlu0 %v12889_v40, %s12057_s30 }
 0x4fd   :  { %v11725_v18 = vpop.eup %11724  ;;  %11732 = vrcp.f32 %v2490_v34 }
 0x4fe   :  { %v2530_v46 = vmul.f32 %v11725_v18, %v13191_v11  ;;  %v11727_v5 = vpop.eup %11726  ;;  %v3183_v58 = vpop.permute.xlu1 %3182 }
 0x4ff   :  { %4478 = vrot.lane.b32.xlu1 %v12893_v53, %s12058_s14  ;;  %v2533_v11 = vmul.f32 %v11727_v5, %v13187_v38 }
 0x500   :  { %v2546_v7 = vpack.c.bf16 %v2530_v46, %v2530_v46  ;;  %10910 = vmatmul.mubr.msk.bf16.vlgmr.msra.gmra.mrb[44].mxu0 %vm1583_vm3, %v2547_v60  ;;  %3544 = vrot.lane.b32.xlu0 %v12897_v63, %s12056_s29 }
 0x501   :  { %10920 = vmatpush3.bf16.msra.mxu0 %v2948_v31  ;;  %10921 = vmatprep.mubr.msk.bf16.mxu0 %vm12054_vm2, %v15650_v44  ;;  %v2549_v38 = vpack.c.bf16 %v2533_v11, %v2533_v11 }
 0x502   :  { %10904 = vmatmul.mubr.msk.bf16.vlgmr.msra.gmra.mrb[56].mxu1 %vm1583_vm3, %v2546_v7  ;;  %10931 = vmatprep.subr.bf16.mxu0 %v15650_v44 }
 0x503   :  { %10914 = vmatpush3.bf16.msra.mxu1 %v2900_v1  ;;  %4574 = vrot.lane.b32.xlu1 %v12899_v3, %s12058_s14  ;;  %v3188_v1 = vsel %vm2562_vm4, %v3183_v58, 0 }
 0x504   :  { %10915 = vmatprep.mubr.msk.bf16.mxu1 %vm12054_vm2, %v15650_v44  ;;  %10925 = vmatprep.subr.bf16.mxu1 %v15650_v44 }
 0x505   :  { %v11729_v19 = vpop.eup %11728  ;;  %3542 = vrot.lane.b32.xlu0 %v12897_v63, %s12057_s30 }
 0x506   :  { %v2532_v42 = vmul.f32 %v11729_v19, %v13200_v49  ;;  %v11731_v17 = vpop.eup %11730 }
 0x507   :  { %4670 = vrot.lane.b32.xlu1 %v12907_v43, %s12058_s14  ;;  %v11733_v49 = vpop.eup %11732  ;;  %v2535_v27 = vmul.f32 %v11731_v17, %v13196_v26  ;;  %v3140_v26 = vsel %vm2562_vm4, %v13244_v55, 0 }
 0x508   :  { %v2548_v28 = vpack.c.bf16 %v2532_v42, %v2532_v42  ;;  %10922 = vmatmul.mubr.msk.bf16.vlgmr.msra.gmra.mrb[48].mxu0 %vm1583_vm3, %v2549_v38  ;;  %v2534_v2 = vmul.f32 %v11733_v49, %v13204_v54 }
 0x509   :  { %10932 = vmatpush3.bf16.msra.mxu0 %v3044_v21  ;;  %10933 = vmatprep.mubr.msk.bf16.mxu0 %vm12054_vm2, %v15650_v44  ;;  %v2551_v54 = vpack.c.bf16 %v2535_v27, %v2535_v27 }
 0x50a   :  { %10916 = vmatmul.mubr.msk.bf16.vlgmr.msra.gmra.mrb[60].mxu1 %vm1583_vm3, %v2548_v28  ;;  %10943 = vmatprep.subr.bf16.mxu0 %v15650_v44  ;;  %v2550_v50 = vpack.c.bf16 %v2534_v2, %v2534_v2 }
 0x50b   :  { %10926 = vmatpush3.bf16.msra.mxu1 %v2996_v33  ;;  %4766 = vrot.lane.b32.xlu1 %v12915_v12, %s12058_s14 }
 0x50c   :  { %10927 = vmatprep.mubr.msk.bf16.mxu1 %vm12054_vm2, %v15650_v44  ;;  %10937 = vmatprep.subr.bf16.mxu1 %v15650_v44 }
 0x50d   :  { %3644 = vrot.lane.b32.xlu0 %v12903_v6, %s12056_s29 }
 0x50f   :  { %4814 = vrot.lane.b32.xlu1 %v12919_v23, %s12058_s14 }
 0x510   :  { %10934 = vmatmul.mubr.msk.bf16.vlgmr.msra.gmra.mrb[52].mxu0 %vm1583_vm3, %v2551_v54 }
 0x511   :  { %10944 = vmatpush3.bf16.msra.mxu0 %v3140_v26  ;;  %3642 = vrot.lane.b32.xlu0 %v12903_v6, %s12057_s30 }
 0x512   :  { %10928 = vmatmul.mubr.msk.bf16.vlgmr.msra.gmra.mrb[64].mxu1 %vm1583_vm3, %v2550_v50  ;;  %10945 = vmatprep.mubr.msk.bf16.mxu0 %vm12054_vm2, %v15650_v44 }
 0x513   :  { %10938 = vmatpush3.bf16.msra.mxu1 %v3092_v30  ;;  %4862 = vrot.lane.b32.xlu1 %v12923_v52, %s12058_s14 }
 0x514   :  { %10955 = vmatprep.subr.bf16.mxu0 %v15650_v44  ;;  %10939 = vmatprep.mubr.msk.bf16.mxu1 %vm12054_vm2, %v15650_v44 }
 0x515   :  { %10949 = vmatprep.subr.bf16.mxu1 %v15650_v44  ;;  %3744 = vrot.lane.b32.xlu0 %v12913_v8, %s12056_s29 }
 0x519   :  { %3742 = vrot.lane.b32.xlu0 %v12913_v8, %s12057_s30 }
 0x51d   :  { %3844 = vrot.lane.b32.xlu0 %v12919_v23, %s12056_s29 }
 0x521   :  { %3842 = vrot.lane.b32.xlu0 %v12919_v23, %s12057_s30 }
 0x525   :  { %3944 = vrot.lane.b32.xlu0 %v12929_v4, %s12056_s29 }
 0x529   :  { %3942 = vrot.lane.b32.xlu0 %v12929_v4, %s12057_s30 }
 0x52a   :  { %v2496_v57 = vpop.xlane.xlu0 %2495 }
 0x52d   :  { %4044 = vrot.lane.b32.xlu0 %v12935_v32, %s12056_s29 }
 0x52e   :  { %v2502_v48 = vpop.xlane.xlu0 %2501 }
 0x52f   :  { %v2499_v55 = vpop.xlane.xlu1 %2498 }
 0x530   :  { %11734 = vrcp.f32 %v2499_v55 }
 0x531   :  { %4042 = vrot.lane.b32.xlu0 %v12935_v32, %s12057_s30 }
 0x532   :  { %v3231_v56 = vpop.permute.xlu0 %3230 }
 0x533   :  { %v2505_v61 = vpop.xlane.xlu1 %2504  ;;  %v3236_v46 = vsel %vm2562_vm4, %v3231_v56, 0 }
 0x534   :  { %11736 = vrcp.f32 %v2505_v61 }
 0x535   :  { %11738 = vrcp.f32 %v2496_v57  ;;  %4334 = vrot.lane.b32.xlu0 %v12877_v36, %s12058_s14 }
 0x536   :  { %11740 = vrcp.f32 %v2502_v48 }
 0x539   :  { %4430 = vrot.lane.b32.xlu0 %v12889_v40, %s12058_s14 }
 0x53a   :  { %v11735_v14 = vpop.eup %11734 }
 0x53b   :  { %v2537_v24 = vmul.f32 %v11735_v14, %v13216_v35 }
 0x53d   :  { %v2553_v45 = vpack.c.bf16 %v2537_v24, %v2537_v24  ;;  %4526 = vrot.lane.b32.xlu0 %v12897_v63, %s12058_s14 }
 0x53e   :  { %v11737_v18 = vpop.eup %11736 }
 0x53f   :  { %10946 = vmatmul.mubr.msk.bf16.vlgmr.msra.gmra.mrb[56].mxu0 %vm1583_vm3, %v2553_v45  ;;  %v11739_v60 = vpop.eup %11738  ;;  %v2539_v34 = vmul.f32 %v11737_v18, %v13220_v59 }
 0x540   :  { %10956 = vmatpush3.bf16.msra.mxu0 %v3236_v46  ;;  %10957 = vmatprep.mubr.msk.bf16.mxu0 %vm12054_vm2, %v15650_v44  ;;  %v2536_v35 = vmul.f32 %v11739_v60, %v13224_v20  ;;  %v11741_v5 = vpop.eup %11740  ;;  %v3279_v20 = vpop.permute.xlu1 %3278 }
 0x541   :  { %10967 = vmatprep.subr.bf16.mxu0 %v15650_v44  ;;  %4622 = vrot.lane.b32.xlu0 %v12903_v6, %s12058_s14  ;;  %v2555_v31 = vpack.c.bf16 %v2539_v34, %v2539_v34  ;;  %v2538_v59 = vmul.f32 %v11741_v5, %v13228_v0  ;;  %v3284_v19 = vsel %vm2562_vm4, %v3279_v20, 0 }
 0x542   :  { %v2552_v7 = vpack.c.bf16 %v2536_v35, %v2536_v35 }
 0x543   :  { %v2554_v11 = vpack.c.bf16 %v2538_v59, %v2538_v59 }
 0x544   :  { %10940 = vmatmul.mubr.msk.bf16.vlgmr.msra.gmra.mrb[68].mxu1 %vm1583_vm3, %v2552_v7  ;;  %v3395_v42 = vpop.permute.xlu1 %3394 }
 0x545   :  { %10950 = vmatpush3.bf16.msra.mxu1 %v3188_v1  ;;  %10951 = vmatprep.mubr.msk.bf16.mxu1 %vm12054_vm2, %v15650_v44  ;;  %v3400_v55 = vsel %vm1583_vm3, %v3395_v42, 0 }
 0x546   :  { %10961 = vmatprep.subr.bf16.mxu1 %v15650_v44  ;;  %4718 = vrot.lane.b32.xlu0 %v12913_v8, %s12058_s14 }
 0x547   :  { %10958 = vmatmul.mubr.msk.bf16.vlgmr.msra.gmra.mrb[60].mxu0 %vm1583_vm3, %v2555_v31 }
 0x548   :  { %10969 = vmatprep.mubr.msk.bf16.mxu0 %vm12054_vm2, %v15650_v44  ;;  %v3393_v0 = vpop.permute.xlu1 %3392 }
 0x54c   :  { %10952 = vmatmul.mubr.msk.bf16.vlgmr.msra.gmra.mrb[72].mxu1 %vm1583_vm3, %v2554_v11  ;;  %v3495_v28 = vpop.permute.xlu1 %3494 }
 0x54d   :  { %10962 = vmatpush3.bf16.msra.mxu1 %v3284_v19  ;;  %10963 = vmatprep.mubr.msk.bf16.mxu1 %vm12054_vm2, %v15650_v44  ;;  %v3500_v24 = vsel %vm1583_vm3, %v3495_v28, 0 }
 0x54e   :  { %10973 = vmatprep.subr.bf16.mxu1 %v15650_v44 }
 0x550   :  { %v3493_v38 = vpop.permute.xlu1 %3492 }
 0x554   :  { %v3595_v21 = vpop.permute.xlu1 %3594 }
 0x555   :  { %v3600_v60 = vsel %vm1583_vm3, %v3595_v21, 0 }
 0x558   :  { %v3593_v50 = vpop.permute.xlu1 %3592 }
 0x55c   :  { %v3695_v57 = vpop.permute.xlu1 %3694 }
 0x55d   :  { %v3700_v1 = vsel %vm1583_vm3, %v3695_v57, 0 }
 0x560   :  { %v3693_v14 = vpop.permute.xlu1 %3692 }
 0x564   :  { %v2508_v17 = vpop.xlane.xlu0 %2507  ;;  %v3795_v18 = vpop.permute.xlu1 %3794 }
 0x565   :  { %11742 = vrcp.f32 %v2508_v17  ;;  %v3800_v42 = vsel %vm1583_vm3, %v3795_v18, 0 }
 0x568   :  { %v3345_v33 = vpop.permute.xlu0 %3344  ;;  %v3793_v34 = vpop.permute.xlu1 %3792 }
 0x569   :  { %v3350_v49 = vsel %vm1583_vm3, %v3345_v33, 0 }
 0x56a   :  { %10968 = vmatpush3.bf16.xpose.msra.mxu0 %v3350_v49 }
 0x56b   :  { %10979 = vmatprep.subr.bf16.mxu0 %v15650_v44 }
 0x56c   :  { %v3343_v2 = vpop.permute.xlu0 %3342  ;;  %v3895_v59 = vpop.permute.xlu1 %3894 }
 0x56d   :  { %v3900_v33 = vsel %vm1583_vm3, %v3895_v59, 0 }
 0x56f   :  { %v11743_v27 = vpop.eup %11742 }
 0x570   :  { %v3445_v54 = vpop.permute.xlu0 %3444  ;;  %v2540_v26 = vmul.f32 %v11743_v27, %v13258_v29  ;;  %v3893_v19 = vpop.permute.xlu1 %3892 }
 0x571   :  { %v3450_v30 = vsel %vm1583_vm3, %v3445_v54, 0  ;;  %10970 = vmatmul.mubr.msk.bf16.vlgmr.msra.gmra.mrb[64].mxu0 %vm1583_vm3, %v3343_v2 }
 0x572   :  { %10980 = vmatpush3.bf16.xpose.msra.mxu0 %v3450_v30  ;;  %v2556_v58 = vpack.c.bf16 %v2540_v26, %v2540_v26  ;;  %10981 = vmatprep.mubr.msk.bf16.mxu0 %vm12054_vm2, %v15650_v44 }
 0x573   :  { %10991 = vmatprep.subr.bf16.mxu0 %v15650_v44 }
 0x574   :  { %v3443_v61 = vpop.permute.xlu0 %3442  ;;  %10964 = vmatmul.mubr.msk.bf16.vlgmr.msra.gmra.mrb[76].mxu1 %vm1583_vm3, %v2556_v58 }
 0x575   :  { %10974 = vmatpush3.bf16.xpose.msra.mxu1 %v3400_v55  ;;  %10975 = vmatprep.mubr.msk.bf16.mxu1 %vm12054_vm2, %v15650_v44 }
 0x576   :  { %10985 = vmatprep.subr.bf16.mxu1 %v15650_v44 }
 0x578   :  { %v3545_v29 = vpop.permute.xlu0 %3544 }
 0x579   :  { %v3550_v48 = vsel %vm1583_vm3, %v3545_v29, 0  ;;  %10982 = vmatmul.mubr.msk.bf16.vlgmr.msra.gmra.mrb[68].mxu0 %vm1583_vm3, %v3443_v61 }
 0x57a   :  { %10992 = vmatpush3.bf16.xpose.msra.mxu0 %v3550_v48  ;;  %10993 = vmatprep.mubr.msk.bf16.mxu0 %vm12054_vm2, %v15650_v44 }
 0x57b   :  { %11003 = vmatprep.subr.bf16.mxu0 %v15650_v44 }
 0x57c   :  { %v3543_v56 = vpop.permute.xlu0 %3542  ;;  %10976 = vmatmul.mubr.msk.bf16.vlgmr.msra.gmra.mrb[80].mxu1 %vm1583_vm3, %v3393_v0 }
 0x57d   :  { %10986 = vmatpush3.bf16.xpose.msra.mxu1 %v3500_v24  ;;  %10987 = vmatprep.mubr.msk.bf16.mxu1 %vm12054_vm2, %v15650_v44 }
 0x57e   :  { %10997 = vmatprep.subr.bf16.mxu1 %v15650_v44 }
 0x580   :  { %v3645_v45 = vpop.permute.xlu0 %3644 }
 0x581   :  { %v3650_v46 = vsel %vm1583_vm3, %v3645_v45, 0  ;;  %10994 = vmatmul.mubr.msk.bf16.vlgmr.msra.gmra.mrb[72].mxu0 %vm1583_vm3, %v3543_v56 }
 0x582   :  { %11004 = vmatpush3.bf16.xpose.msra.mxu0 %v3650_v46  ;;  %11005 = vmatprep.mubr.msk.bf16.mxu0 %vm12054_vm2, %v15650_v44 }
 0x583   :  { %11015 = vmatprep.subr.bf16.mxu0 %v15650_v44 }
 0x584   :  { %v3643_v35 = vpop.permute.xlu0 %3642  ;;  %10988 = vmatmul.mubr.msk.bf16.vlgmr.msra.gmra.mrb[84].mxu1 %vm1583_vm3, %v3493_v38  ;;  %v3995_v38 = vpop.permute.xlu1 %3994 }
 0x585   :  { %10998 = vmatpush3.bf16.xpose.msra.mxu1 %v3600_v60  ;;  %10999 = vmatprep.mubr.msk.bf16.mxu1 %vm12054_vm2, %v15650_v44 }
 0x586   :  { %11009 = vmatprep.subr.bf16.mxu1 %v15650_v44 }
 0x588   :  { %v3745_v7 = vpop.permute.xlu0 %3744  ;;  %v3993_v49 = vpop.permute.xlu1 %3992 }
 0x589   :  { %v3750_v5 = vsel %vm1583_vm3, %v3745_v7, 0  ;;  %11006 = vmatmul.mubr.msk.bf16.vlgmr.msra.gmra.mrb[76].mxu0 %vm1583_vm3, %v3643_v35 }
 0x58a   :  { %11016 = vmatpush3.bf16.xpose.msra.mxu0 %v3750_v5  ;;  %11017 = vmatprep.mubr.msk.bf16.mxu0 %vm12054_vm2, %v15650_v44 }
 0x58b   :  { %11027 = vmatprep.subr.bf16.mxu0 %v15650_v44 }
 0x58c   :  { %v3743_v31 = vpop.permute.xlu0 %3742  ;;  %11000 = vmatmul.mubr.msk.bf16.vlgmr.msra.gmra.mrb[88].mxu1 %vm1583_vm3, %v3593_v50  ;;  %v4000_v50 = vsel %vm1583_vm3, %v3995_v38, 0  ;;  %v4095_v26 = vpop.permute.xlu1 %4094 }
 0x58d   :  { %11010 = vmatpush3.bf16.xpose.msra.mxu1 %v3700_v1  ;;  %11011 = vmatprep.mubr.msk.bf16.mxu1 %vm12054_vm2, %v15650_v44 }
 0x58e   :  { %11021 = vmatprep.subr.bf16.mxu1 %v15650_v44 }
 0x590   :  { %v3845_v20 = vpop.permute.xlu0 %3844  ;;  %v4093_v29 = vpop.permute.xlu1 %4092 }
 0x591   :  { %v3850_v11 = vsel %vm1583_vm3, %v3845_v20, 0  ;;  %11018 = vmatmul.mubr.msk.bf16.vlgmr.msra.gmra.mrb[80].mxu0 %vm1583_vm3, %v3743_v31 }
 0x592   :  { %11028 = vmatpush3.bf16.xpose.msra.mxu0 %v3850_v11  ;;  %11029 = vmatprep.mubr.msk.bf16.mxu0 %vm12054_vm2, %v15650_v44 }
 0x593   :  { %11039 = vmatprep.subr.bf16.mxu0 %v15650_v44 }
 0x594   :  { %v3843_v0 = vpop.permute.xlu0 %3842  ;;  %11012 = vmatmul.mubr.msk.bf16.vlgmr.msra.gmra.mrb[92].mxu1 %vm1583_vm3, %v3693_v14  ;;  %v4100_v14 = vsel %vm1583_vm3, %v4095_v26, 0  ;;  %v4383_v56 = vpop.permute.xlu1 %4382 }
 0x595   :  { %11022 = vmatpush3.bf16.xpose.msra.mxu1 %v3800_v42  ;;  %11023 = vmatprep.mubr.msk.bf16.mxu1 %vm12054_vm2, %v15650_v44  ;;  %v4388_v60 = vsel %vm2562_vm4, %v4383_v56, 0 }
 0x596   :  { %11033 = vmatprep.subr.bf16.mxu1 %v15650_v44 }
 0x598   :  { %v3945_v28 = vpop.permute.xlu0 %3944 }
 0x599   :  { %v3950_v17 = vsel %vm1583_vm3, %v3945_v28, 0  ;;  %11030 = vmatmul.mubr.msk.bf16.vlgmr.msra.gmra.mrb[84].mxu0 %vm1583_vm3, %v3843_v0 }
 0x59a   :  { %11040 = vmatpush3.bf16.xpose.msra.mxu0 %v3950_v17  ;;  %11041 = vmatprep.mubr.msk.bf16.mxu0 %vm12054_vm2, %v15650_v44 }
 0x59b   :  { %11051 = vmatprep.subr.bf16.mxu0 %v15650_v44 }
 0x59c   :  { %v3943_v21 = vpop.permute.xlu0 %3942  ;;  %11024 = vmatmul.mubr.msk.bf16.vlgmr.msra.gmra.mrb[96].mxu1 %vm1583_vm3, %v3793_v34 }
 0x59d   :  { %11034 = vmatpush3.bf16.xpose.msra.mxu1 %v3900_v33  ;;  %11035 = vmatprep.mubr.msk.bf16.mxu1 %vm12054_vm2, %v15650_v44 }
 0x59e   :  { %11045 = vmatprep.subr.bf16.mxu1 %v15650_v44 }
 0x5a0   :  { %v4045_v2 = vpop.permute.xlu0 %4044 }
 0x5a1   :  { %v4050_v27 = vsel %vm1583_vm3, %v4045_v2, 0  ;;  %11042 = vmatmul.mubr.msk.bf16.vlgmr.msra.gmra.mrb[88].mxu0 %vm1583_vm3, %v3943_v21 }
 0x5a2   :  { %11052 = vmatpush3.bf16.xpose.msra.mxu0 %v4050_v27  ;;  %11053 = vmatprep.mubr.msk.bf16.mxu0 %vm12054_vm2, %v15650_v44 }
 0x5a3   :  { %11063 = vmatprep.subr.bf16.mxu0 %v15650_v44 }
 0x5a4   :  { %v4043_v54 = vpop.permute.xlu0 %4042  ;;  %11036 = vmatmul.mubr.msk.bf16.vlgmr.msra.gmra.mrb[100].mxu1 %vm1583_vm3, %v3893_v19 }
 0x5a5   :  { %11046 = vmatpush3.bf16.xpose.msra.mxu1 %v4000_v50  ;;  %11047 = vmatprep.mubr.msk.bf16.mxu1 %vm12054_vm2, %v15650_v44 }
 0x5a6   :  { %11057 = vmatprep.subr.bf16.mxu1 %v15650_v44 }
 0x5a8   :  { %v4335_v30 = vpop.permute.xlu0 %4334  ;;  %v2600_v58 = vpop.f32.mrb[32].mxu0 }
 0x5a9   :  { %v4340_v55 = vsel %vm2562_vm4, %v4335_v30, 0  ;;  %3326 = vst.msk [vmem:[#allocation2] sm:$0xff] %vm1583_vm3, %v2600_v58  ;;  %11054 = vmatmul.mubr.msk.bf16.vlgmr.msra.gmra.mrb[92].mxu0 %vm1583_vm3, %v4043_v54  ;;  %v10875_v61 = vpop.f32.mrb[33].mxu0 }
 0x5aa   :  { %11064 = vmatpush3.bf16.msra.mxu0 %v4340_v55  ;;  %v2603_v57 = vpop.f32.mrb[34].mxu0  ;;  %11065 = vmatprep.mubr.msk.bf16.mxu0 %vm12054_vm2, %v15650_v44 }
 0x5ab   :  { %v10876_v48 = vpop.f32.mrb[35].mxu0  ;;  %11075 = vmatprep.subr.bf16.mxu0 %v15650_v44 }
 0x5ac   :  { %11048 = vmatmul.mubr.msk.bf16.vlgmr.msra.gmra.mrb[104].mxu1 %vm1583_vm3, %v3993_v49 }
 0x5ad   :  { %11058 = vmatpush3.bf16.xpose.msra.mxu1 %v4100_v14  ;;  %11059 = vmatprep.mubr.msk.bf16.mxu1 %vm12054_vm2, %v15650_v44 }
 0x5ae   :  { %11069 = vmatprep.subr.bf16.mxu1 %v15650_v44 }
 0x5b0   :  { %v2648_v24 = vpop.f32.mrb[48].mxu1 }
 0x5b1   :  { %3327 = vst.msk [vmem:[#allocation2 + $0x8] sm:$0xff] %vm1583_vm3, %v2648_v24  ;;  %v10881_v45 = vpop.f32.mrb[49].mxu1 }
 0x5b2   :  { %v2651_v18 = vpop.f32.mrb[50].mxu1 }
 0x5b3   :  { %v10882_v46 = vpop.f32.mrb[51].mxu1 }
 0x5b4   :  { %11060 = vmatmul.mubr.msk.bf16.vlgmr.msra.gmra.mrb[108].mxu1 %vm1583_vm3, %v4093_v29 }
 0x5b5   :  { %11070 = vmatpush3.bf16.msra.mxu1 %v4388_v60  ;;  %11071 = vmatprep.mubr.msk.bf16.mxu1 %vm12054_vm2, %v15650_v44 }
 0x5b6   :  { %11081 = vmatprep.subr.bf16.mxu1 %v15650_v44 }
 0x5c2   :  { %v2696_v35 = vpop.f32.mrb[36].mxu0 }
 0x5c3   :  { %3328 = vst.msk [vmem:[#allocation2 + $0x10] sm:$0xff] %vm1583_vm3, %v2696_v35  ;;  %v10887_v34 = vpop.f32.mrb[37].mxu0 }
 0x5c4   :  { %v2699_v7 = vpop.f32.mrb[38].mxu0 }
 0x5c5   :  { %v10888_v5 = vpop.f32.mrb[39].mxu0 }
 0x5ca   :  { %v2744_v1 = vpop.f32.mrb[52].mxu1 }
 0x5cb   :  { %v2792_v31 = vpop.f32.mrb[40].mxu0  ;;  %3329 = vst.msk [vmem:[#allocation2 + $0x18] sm:$0xff] %vm1583_vm3, %v2744_v1  ;;  %v10893_v59 = vpop.f32.mrb[53].mxu1 }
 0x5cc   :  { %3330 = vst.msk [vmem:[#allocation2 + $0x20] sm:$0xff] %vm1583_vm3, %v2792_v31  ;;  %v10899_v20 = vpop.f32.mrb[41].mxu0  ;;  %v2747_v11 = vpop.f32.mrb[54].mxu1 }
 0x5cd   :  { %v2795_v19 = vpop.f32.mrb[42].mxu0  ;;  %v10894_v42 = vpop.f32.mrb[55].mxu1 }
 0x5ce   :  { %v10900_v0 = vpop.f32.mrb[43].mxu0 }
 0x5d3   :  { %v2888_v38 = vpop.f32.mrb[44].mxu0 }
 0x5d4   :  { %3332 = vst.msk [vmem:[#allocation2 + $0x30] sm:$0xff] %vm1583_vm3, %v2888_v38  ;;  %v10911_v33 = vpop.f32.mrb[45].mxu0 }
 0x5d5   :  { %v2840_v28 = vpop.f32.mrb[56].mxu1  ;;  %v2891_v49 = vpop.f32.mrb[46].mxu0 }
 0x5d6   :  { %3331 = vst.msk [vmem:[#allocation2 + $0x28] sm:$0xff] %vm1583_vm3, %v2840_v28  ;;  %v10905_v17 = vpop.f32.mrb[57].mxu1  ;;  %v10912_v27 = vpop.f32.mrb[47].mxu0 }
 0x5d7   :  { %v2843_v21 = vpop.f32.mrb[58].mxu1 }
 0x5d8   :  { %v10906_v2 = vpop.f32.mrb[59].mxu1 }
 0x5db   :  { %v2984_v54 = vpop.f32.mrb[48].mxu0 }
 0x5dc   :  { %3334 = vst.msk [vmem:[#allocation2 + $0x40] sm:$0xff] %vm1583_vm3, %v2984_v54  ;;  %v10923_v30 = vpop.f32.mrb[49].mxu0 }
 0x5dd   :  { %v2936_v50 = vpop.f32.mrb[60].mxu1  ;;  %v2987_v55 = vpop.f32.mrb[50].mxu0 }
 0x5de   :  { %3333 = vst.msk [vmem:[#allocation2 + $0x38] sm:$0xff] %vm1583_vm3, %v2936_v50  ;;  %v10917_v26 = vpop.f32.mrb[61].mxu1  ;;  %v10924_v57 = vpop.f32.mrb[51].mxu0 }
 0x5df   :  { %v2939_v58 = vpop.f32.mrb[62].mxu1 }
 0x5e0   :  { %v10918_v61 = vpop.f32.mrb[63].mxu1 }
 0x5e3   :  { %v3080_v48 = vpop.f32.mrb[52].mxu0 }
 0x5e4   :  { %3336 = vst.msk [vmem:[#allocation2 + $0x50] sm:$0xff] %vm1583_vm3, %v3080_v48  ;;  %v10935_v24 = vpop.f32.mrb[53].mxu0 }
 0x5e5   :  { %v3032_v29 = vpop.f32.mrb[64].mxu1  ;;  %v3083_v45 = vpop.f32.mrb[54].mxu0 }
 0x5e6   :  { %3335 = vst.msk [vmem:[#allocation2 + $0x48] sm:$0xff] %vm1583_vm3, %v3032_v29  ;;  %v10929_v14 = vpop.f32.mrb[65].mxu1  ;;  %v10936_v46 = vpop.f32.mrb[55].mxu0 }
 0x5e7   :  { %v3035_v56 = vpop.f32.mrb[66].mxu1 }
 0x5e8   :  { %v10930_v18 = vpop.f32.mrb[67].mxu1 }
 0x612   :  { %v3176_v60 = vpop.f32.mrb[56].mxu0 }
 0x613   :  { %3338 = vst.msk [vmem:[#allocation2 + $0x60] sm:$0xff] %vm1583_vm3, %v3176_v60  ;;  %v10947_v35 = vpop.f32.mrb[57].mxu0 }
 0x614   :  { %v3179_v34 = vpop.f32.mrb[58].mxu0 }
 0x615   :  { %v10948_v7 = vpop.f32.mrb[59].mxu0 }
 0x617   :  { %v3128_v5 = vpop.f32.mrb[68].mxu1 }
 0x618   :  { %3337 = vst.msk [vmem:[#allocation2 + $0x58] sm:$0xff] %vm1583_vm3, %v3128_v5  ;;  %v10941_v1 = vpop.f32.mrb[69].mxu1 }
 0x619   :  { %v3131_v59 = vpop.f32.mrb[70].mxu1 }
 0x61a   :  { %v3272_v31 = vpop.f32.mrb[60].mxu0  ;;  %v10942_v11 = vpop.f32.mrb[71].mxu1 }
 0x61b   :  { %3340 = vst.msk [vmem:[#allocation2 + $0x70] sm:$0xff] %vm1583_vm3, %v3272_v31  ;;  %v10959_v20 = vpop.f32.mrb[61].mxu0 }
 0x61c   :  { %v3275_v19 = vpop.f32.mrb[62].mxu0 }
 0x61d   :  { %v10960_v42 = vpop.f32.mrb[63].mxu0 }
 0x61f   :  { %v3224_v0 = vpop.f32.mrb[72].mxu1 }
 0x620   :  { %3339 = vst.msk [vmem:[#allocation2 + $0x68] sm:$0xff] %vm1583_vm3, %v3224_v0  ;;  %v10953_v28 = vpop.f32.mrb[73].mxu1 }
 0x621   :  { %v3227_v38 = vpop.f32.mrb[74].mxu1 }
 0x622   :  { %v10954_v17 = vpop.f32.mrb[75].mxu1 }
 0x644   :  { %v13533_v33 = vpop.f32.mrb[64].mxu0 }
 0x645   :  { %v10971_v21 = vpop.f32.mrb[65].mxu0  ;;  %v4142_v49 = vsel %vm1583_vm3, %v13533_v33, -inf }
 0x646   :  { %4143 = vmax.xlane.f32.xlu0 %v4142_v49  ;;  %v3389_v2 = vpop.f32.mrb[66].mxu0 }
 0x647   :  { %v3320_v27 = vpop.f32.mrb[76].mxu1  ;;  %v10972_v50 = vpop.f32.mrb[67].mxu0 }
 0x648   :  { %3341 = vst.msk [vmem:[#allocation2 + $0x78] sm:$0xff] %vm1583_vm3, %v3320_v27  ;;  %v10965_v54 = vpop.f32.mrb[77].mxu1 }
 0x649   :  { %v3323_v26 = vpop.f32.mrb[78].mxu1 }
 0x64a   :  { %v10966_v30 = vpop.f32.mrb[79].mxu1 }
 0x64c   :  { %v13538_v58 = vpop.f32.mrb[68].mxu0 }
 0x64d   :  { %v10983_v55 = vpop.f32.mrb[69].mxu0  ;;  %v4148_v61 = vsel %vm1583_vm3, %v13538_v58, -inf }
 0x64e   :  { %4149 = vmax.xlane.f32.xlu0 %v4148_v61  ;;  %v3489_v57 = vpop.f32.mrb[70].mxu0 }
 0x64f   :  { %v13542_v29 = vpop.f32.mrb[80].mxu1  ;;  %v10984_v48 = vpop.f32.mrb[71].mxu0 }
 0x650   :  { %v10977_v14 = vpop.f32.mrb[81].mxu1  ;;  %v4145_v24 = vsel %vm1583_vm3, %v13542_v29, -inf }
 0x651   :  { %4146 = vmax.xlane.f32.xlu1 %v4145_v24  ;;  %v3439_v56 = vpop.f32.mrb[82].mxu1 }
 0x652   :  { %v10978_v45 = vpop.f32.mrb[83].mxu1 }
 0x654   :  { %v13546_v18 = vpop.f32.mrb[72].mxu0 }
 0x655   :  { %v10995_v46 = vpop.f32.mrb[73].mxu0  ;;  %v4154_v20 = vsel %vm1583_vm3, %v13546_v18, -inf }
 0x656   :  { %v3589_v60 = vpop.f32.mrb[74].mxu0 }
 0x657   :  { %v13548_v35 = vpop.f32.mrb[84].mxu1  ;;  %v10996_v34 = vpop.f32.mrb[75].mxu0 }
 0x658   :  { %v10989_v7 = vpop.f32.mrb[85].mxu1  ;;  %v4151_v5 = vsel %vm1583_vm3, %v13548_v35, -inf }
 0x659   :  { %4152 = vmax.xlane.f32.xlu0 %v4151_v5  ;;  %v3539_v1 = vpop.f32.mrb[86].mxu1 }
 0x65a   :  { %v10990_v31 = vpop.f32.mrb[87].mxu1 }
 0x65c   :  { %v13552_v59 = vpop.f32.mrb[76].mxu0 }
 0x65d   :  { %v11007_v11 = vpop.f32.mrb[77].mxu0  ;;  %4155 = vmax.xlane.f32.xlu0 %v4154_v20  ;;  %v4160_v38 = vsel %vm1583_vm3, %v13552_v59, -inf }
 0x65e   :  { %v3689_v19 = vpop.f32.mrb[78].mxu0 }
 0x65f   :  { %v13556_v42 = vpop.f32.mrb[88].mxu1  ;;  %v11008_v0 = vpop.f32.mrb[79].mxu0 }
 0x660   :  { %v11001_v28 = vpop.f32.mrb[89].mxu1  ;;  %v4157_v17 = vsel %vm1583_vm3, %v13556_v42, -inf }
 0x661   :  { %4161 = vmax.xlane.f32.xlu0 %v4160_v38  ;;  %4158 = vmax.xlane.f32.xlu1 %v4157_v17  ;;  %v3639_v21 = vpop.f32.mrb[90].mxu1 }
 0x662   :  { %v11002_v49 = vpop.f32.mrb[91].mxu1 }
 0x664   :  { %v13562_v2 = vpop.f32.mrb[80].mxu0 }
 0x665   :  { %v11019_v27 = vpop.f32.mrb[81].mxu0  ;;  %v4166_v50 = vsel %vm1583_vm3, %v13562_v2, -inf }
 0x666   :  { %v3789_v54 = vpop.f32.mrb[82].mxu0  ;;  %4167 = vmax.xlane.f32.xlu0 %v4166_v50 }
 0x667   :  { %v13566_v26 = vpop.f32.mrb[92].mxu1  ;;  %v11020_v30 = vpop.f32.mrb[83].mxu0 }
 0x668   :  { %v11013_v55 = vpop.f32.mrb[93].mxu1  ;;  %v4163_v61 = vsel %vm1583_vm3, %v13566_v26, -inf }
 0x669   :  { %4164 = vmax.xlane.f32.xlu1 %v4163_v61  ;;  %v3739_v57 = vpop.f32.mrb[94].mxu1 }
 0x66a   :  { %v11014_v48 = vpop.f32.mrb[95].mxu1 }
 0x66c   :  { %v13570_v14 = vpop.f32.mrb[84].mxu0 }
 0x66d   :  { %v11031_v24 = vpop.f32.mrb[85].mxu0  ;;  %v4172_v56 = vsel %vm1583_vm3, %v13570_v14, -inf }
 0x66e   :  { %v3889_v45 = vpop.f32.mrb[86].mxu0  ;;  %4173 = vmax.xlane.f32.xlu0 %v4172_v56 }
 0x66f   :  { %v13574_v46 = vpop.f32.mrb[96].mxu1  ;;  %v11032_v60 = vpop.f32.mrb[87].mxu0 }
 0x670   :  { %v11025_v34 = vpop.f32.mrb[97].mxu1  ;;  %v4169_v7 = vsel %vm1583_vm3, %v13574_v46, -inf }
 0x671   :  { %4170 = vmax.xlane.f32.xlu1 %v4169_v7  ;;  %v3839_v5 = vpop.f32.mrb[98].mxu1 }
 0x672   :  { %v11026_v1 = vpop.f32.mrb[99].mxu1 }
 0x673   :  { %v13602_v1 = vpop.permute.xlu1 %4478 }
 0x674   :  { %v13578_v31 = vpop.f32.mrb[88].mxu0 }
 0x675   :  { %v11043_v20 = vpop.f32.mrb[89].mxu0  ;;  %v4178_v11 = vsel %vm1583_vm3, %v13578_v31, -inf }
 0x676   :  { %v3989_v19 = vpop.f32.mrb[90].mxu0  ;;  %4179 = vmax.xlane.f32.xlu0 %v4178_v11  ;;  %v13604_v20 = vpop.permute.xlu0 %4430 }
 0x677   :  { %v13582_v0 = vpop.f32.mrb[100].mxu1  ;;  %v11044_v28 = vpop.f32.mrb[91].mxu0 }
 0x678   :  { %v11037_v38 = vpop.f32.mrb[101].mxu1  ;;  %v4175_v17 = vsel %vm1583_vm3, %v13582_v0, -inf  ;;  %v13606_v11 = vpop.permute.xlu1 %4574 }
 0x679   :  { %4176 = vmax.xlane.f32.xlu1 %v4175_v17  ;;  %v3939_v21 = vpop.f32.mrb[102].mxu1 }
 0x67a   :  { %v11038_v49 = vpop.f32.mrb[103].mxu1  ;;  %v13608_v19 = vpop.permute.xlu0 %4526 }
 0x67c   :  { %v13586_v27 = vpop.f32.mrb[92].mxu0  ;;  %v13610_v28 = vpop.permute.xlu1 %4670 }
 0x67d   :  { %v11055_v50 = vpop.f32.mrb[93].mxu0  ;;  %v4184_v54 = vsel %vm1583_vm3, %v13586_v27, -inf }
 0x67e   :  { %v4089_v30 = vpop.f32.mrb[94].mxu0  ;;  %4185 = vmax.xlane.f32.xlu0 %v4184_v54  ;;  %v13612_v38 = vpop.permute.xlu0 %4622 }
 0x67f   :  { %v13590_v55 = vpop.f32.mrb[104].mxu1  ;;  %v11056_v61 = vpop.f32.mrb[95].mxu0 }
 0x680   :  { %v11049_v57 = vpop.f32.mrb[105].mxu1  ;;  %v4181_v48 = vsel %vm1583_vm3, %v13590_v55, -inf  ;;  %v13614_v17 = vpop.permute.xlu1 %4766 }
 0x681   :  { %4182 = vmax.xlane.f32.xlu1 %v4181_v48  ;;  %v4039_v24 = vpop.f32.mrb[106].mxu1 }
 0x682   :  { %v11050_v56 = vpop.f32.mrb[107].mxu1  ;;  %v13616_v21 = vpop.permute.xlu0 %4718 }
 0x684   :  { %v13618_v50 = vpop.permute.xlu1 %4814 }
 0x687   :  { %v13594_v45 = vpop.f32.mrb[108].mxu1 }
 0x688   :  { %v11061_v60 = vpop.f32.mrb[109].mxu1  ;;  %v4187_v5 = vsel %vm1583_vm3, %v13594_v45, -inf  ;;  %v13621_v61 = vpop.permute.xlu1 %4862 }
 0x689   :  { %v4139_v34 = vpop.f32.mrb[110].mxu1 }
 0x68a   :  { %v11062_v7 = vpop.f32.mrb[111].mxu1 }
 0x692   :  { %4958 = vrot.lane.b32.xlu1 %v12931_v41, %s12058_s14 }
 0x694   :  { %4910 = vrot.lane.b32.xlu0 %v12929_v4, %s12058_s14 }
 0x6b6   :  { %4188 = vmax.xlane.f32.xlu1 %v4187_v5 }
 0x6d3   :  { %v4144_v49 = vpop.xlane.xlu0 %4143 }
 0x6d4   :  { %v4190_v54 = vsub.f32 %v13533_v33, %v4144_v49 }
 0x6d6   :  { %v4206_v30 = vmul.f32 1.442695, %v4190_v54 }
 0x6d8   :  { %11744 = vpow2.f32 %v4206_v30 }
 0x6db   :  { %v4150_v57 = vpop.xlane.xlu0 %4149 }
 0x6dc   :  { %v4192_v48 = vsub.f32 %v13538_v58, %v4150_v57 }
 0x6de   :  { %v4210_v24 = vmul.f32 1.442695, %v4192_v48  ;;  %v4147_v56 = vpop.xlane.xlu1 %4146 }
 0x6df   :  { %v4191_v60 = vsub.f32 %v13542_v29, %v4147_v56 }
 0x6e0   :  { %11746 = vpow2.f32 %v4210_v24 }
 0x6e1   :  { %v4208_v34 = vmul.f32 1.442695, %v4191_v60 }
 0x6e2   :  { %v13625_v7 = vpop.eup %11744 }
 0x6e3   :  { %11748 = vpow2.f32 %v4208_v34  ;;  %v4238_v5 = vsel %vm1583_vm3, %v13625_v7, 0.0 }
 0x6e4   :  { %4239 = vadd.xlane.f32.xlu0 %v4238_v5 }
 0x6e6   :  { %v4153_v33 = vpop.xlane.xlu0 %4152 }
 0x6e7   :  { %v4193_v49 = vsub.f32 %v13548_v35, %v4153_v33 }
 0x6e9   :  { %v4212_v54 = vmul.f32 1.442695, %v4193_v49 }
 0x6ea   :  { %v13630_v30 = vpop.eup %11746  ;;  %v4156_v58 = vpop.xlane.xlu0 %4155 }
 0x6eb   :  { %11750 = vpow2.f32 %v4212_v54  ;;  %v4194_v57 = vsub.f32 %v13546_v18, %v4156_v58  ;;  %v4244_v29 = vsel %vm1583_vm3, %v13630_v30, 0.0 }
 0x6ec   :  { %4245 = vadd.xlane.f32.xlu0 %v4244_v29 }
 0x6ed   :  { %v13635_v48 = vpop.eup %11748  ;;  %v4214_v24 = vmul.f32 1.442695, %v4194_v57 }
 0x6ee   :  { %v4162_v56 = vpop.xlane.xlu0 %4161  ;;  %v4159_v60 = vpop.xlane.xlu1 %4158  ;;  %v4241_v34 = vsel %vm1583_vm3, %v13635_v48, 0.0 }
 0x6ef   :  { %11752 = vpow2.f32 %v4214_v24  ;;  %v4196_v35 = vsub.f32 %v13552_v59, %v4162_v56  ;;  %v4195_v5 = vsub.f32 %v13556_v42, %v4159_v60  ;;  %4242 = vadd.xlane.f32.xlu1 %v4241_v34 }
 0x6f1   :  { %v4218_v33 = vmul.f32 1.442695, %v4196_v35  ;;  %v4216_v18 = vmul.f32 1.442695, %v4195_v5 }
 0x6f3   :  { %11754 = vpow2.f32 %v4218_v33  ;;  %v4168_v49 = vpop.xlane.xlu0 %4167 }
 0x6f4   :  { %11756 = vpow2.f32 %v4216_v18  ;;  %v4198_v58 = vsub.f32 %v13562_v2, %v4168_v49 }
 0x6f5   :  { %v13641_v54 = vpop.eup %11750 }
 0x6f6   :  { %v4165_v57 = vpop.xlane.xlu1 %4164  ;;  %v4247_v29 = vsel %vm1583_vm3, %v13641_v54, 0.0  ;;  %v4222_v42 = vmul.f32 1.442695, %v4198_v58 }
 0x6f7   :  { %v4197_v24 = vsub.f32 %v13566_v26, %v4165_v57  ;;  %4248 = vadd.xlane.f32.xlu1 %v4247_v29 }
 0x6f9   :  { %v13647_v59 = vpop.eup %11752  ;;  %v4220_v56 = vmul.f32 1.442695, %v4197_v24 }
 0x6fa   :  { %v4250_v60 = vsel %vm1583_vm3, %v13647_v59, 0.0 }
 0x6fb   :  { %11758 = vpow2.f32 %v4220_v56  ;;  %4251 = vadd.xlane.f32.xlu0 %v4250_v60  ;;  %v4174_v34 = vpop.xlane.xlu0 %4173 }
 0x6fc   :  { %v4200_v35 = vsub.f32 %v13570_v14, %v4174_v34  ;;  %11760 = vpow2.f32 %v4222_v42 }
 0x6fd   :  { %v13652_v2 = vpop.eup %11754 }
 0x6fe   :  { %v13654_v5 = vpop.eup %11756  ;;  %v4226_v33 = vmul.f32 1.442695, %v4200_v35  ;;  %v4171_v26 = vpop.xlane.xlu1 %4170  ;;  %v4256_v18 = vsel %vm1583_vm3, %v13652_v2, 0.0 }
 0x6ff   :  { %v4199_v49 = vsub.f32 %v13574_v46, %v4171_v26  ;;  %4257 = vadd.xlane.f32.xlu0 %v4256_v18  ;;  %v4253_v58 = vsel %vm1583_vm3, %v13654_v5, 0.0 }
 0x700   :  { %4254 = vadd.xlane.f32.xlu1 %v4253_v58  ;;  %11762 = vpow2.f32 %v4226_v33 }
 0x701   :  { %v4224_v57 = vmul.f32 1.442695, %v4199_v49 }
 0x703   :  { %11764 = vpow2.f32 %v4224_v57  ;;  %v4180_v14 = vpop.xlane.xlu0 %4179 }
 0x704   :  { %v4202_v29 = vsub.f32 %v13578_v31, %v4180_v14 }
 0x705   :  { %v13662_v24 = vpop.eup %11758 }
 0x706   :  { %v4230_v42 = vmul.f32 1.442695, %v4202_v29  ;;  %v4177_v56 = vpop.xlane.xlu1 %4176  ;;  %v4259_v60 = vsel %vm1583_vm3, %v13662_v24, 0.0  ;;  %v13666_v34 = vpop.eup %11760 }
 0x707   :  { %v4201_v46 = vsub.f32 %v13582_v0, %v4177_v56  ;;  %4260 = vadd.xlane.f32.xlu1 %v4259_v60  ;;  %v4262_v33 = vsel %vm1583_vm3, %v13666_v34, 0.0 }
 0x708   :  { %11766 = vpow2.f32 %v4230_v42 }
 0x709   :  { %v4228_v35 = vmul.f32 1.442695, %v4201_v46 }
 0x70a   :  { %v13671_v26 = vpop.eup %11762 }
 0x70b   :  { %11768 = vpow2.f32 %v4228_v35  ;;  %4263 = vadd.xlane.f32.xlu1 %v4262_v33  ;;  %v4268_v49 = vsel %vm1583_vm3, %v13671_v26, 0.0  ;;  %v4186_v46 = vpop.xlane.xlu0 %4185 }
 0x70c   :  { %v4204_v35 = vsub.f32 %v13586_v27, %v4186_v46 }
 0x70d   :  { %v13673_v31 = vpop.eup %11764 }
 0x70e   :  { %v4183_v18 = vpop.xlane.xlu1 %4182  ;;  %v4265_v58 = vsel %vm1583_vm3, %v13673_v31, 0.0  ;;  %v4234_v33 = vmul.f32 1.442695, %v4204_v35 }
 0x70f   :  { %v4203_v0 = vsub.f32 %v13590_v55, %v4183_v18  ;;  %4269 = vadd.xlane.f32.xlu1 %v4268_v49  ;;  %4266 = vadd.xlane.f32.xlu0 %v4265_v58 }
 0x711   :  { %v4232_v57 = vmul.f32 1.442695, %v4203_v0 }
 0x712   :  { %v13680_v14 = vpop.eup %11766  ;;  %v13697_v18 = vpop.permute.xlu1 %4958 }
 0x713   :  { %11770 = vpow2.f32 %v4232_v57  ;;  %v4274_v29 = vsel %vm1583_vm3, %v13680_v14, 0.0 }
 0x714   :  { %4275 = vadd.xlane.f32.xlu1 %v4274_v29  ;;  %11772 = vpow2.f32 %v4234_v33 }
 0x715   :  { %v13684_v42 = vpop.eup %11768 }
 0x716   :  { %v4271_v56 = vsel %vm1583_vm3, %v13684_v42, 0.0 }
 0x717   :  { %4272 = vadd.xlane.f32.xlu0 %v4271_v56 }
 0x71d   :  { %v13688_v60 = vpop.eup %11770 }
 0x71e   :  { %v4277_v55 = vsel %vm1583_vm3, %v13688_v60, 0.0  ;;  %v13700_v0 = vpop.eup %11772 }
 0x71f   :  { %4278 = vadd.xlane.f32.xlu0 %v4277_v55  ;;  %v4280_v29 = vsel %vm1583_vm3, %v13700_v0, 0.0 }
 0x725   :  { %5054 = vrot.lane.b32.xlu1 %v12939_v62, %s12058_s14 }
 0x735   :  { %5006 = vrot.lane.b32.xlu0 %v12935_v32, %s12058_s14 }
 0x743   :  { %v4189_v49 = vpop.xlane.xlu1 %4188 }
 0x744   :  { %v4205_v58 = vsub.f32 %v13594_v45, %v4189_v49  ;;  %v13720_v45 = vpop.permute.xlu0 %4910 }
 0x746   :  { %v4236_v57 = vmul.f32 1.442695, %v4205_v58 }
 0x748   :  { %11774 = vpow2.f32 %v4236_v57  ;;  %v4436_v57 = vsel %vm2562_vm4, %v13604_v20, 0 }
 0x749   :  { %4281 = vadd.xlane.f32.xlu1 %v4280_v29 }
 0x752   :  { %v13704_v56 = vpop.eup %11774 }
 0x753   :  { %v4283_v27 = vsel %vm1583_vm3, %v13704_v56, 0.0 }
 0x754   :  { %4284 = vadd.xlane.f32.xlu0 %v4283_v27 }
 0x75a   :  { %5235 = vrot.lane.b32.xlu1 %v12879_v39, %s12059_s15 }
 0x75e   :  { %5233 = vrot.lane.b32.xlu1 %v12879_v39, %s12060_s16 }
 0x762   :  { %5335 = vrot.lane.b32.xlu1 %v12893_v53, %s12059_s15 }
 0x766   :  { %5333 = vrot.lane.b32.xlu1 %v12893_v53, %s12060_s16 }
 0x76a   :  { %5435 = vrot.lane.b32.xlu1 %v12899_v3, %s12059_s15  ;;  %5185 = vrot.lane.b32.xlu0 %v12877_v36, %s12059_s15 }
 0x76e   :  { %5433 = vrot.lane.b32.xlu1 %v12899_v3, %s12060_s16  ;;  %5183 = vrot.lane.b32.xlu0 %v12877_v36, %s12060_s16 }
 0x771   :  { %v4240_v55 = vpop.xlane.xlu0 %4239 }
 0x772   :  { %11776 = vrcp.f32 %v4240_v55  ;;  %5535 = vrot.lane.b32.xlu1 %v12907_v43, %s12059_s15  ;;  %5285 = vrot.lane.b32.xlu0 %v12889_v40, %s12059_s15 }
 0x776   :  { %5533 = vrot.lane.b32.xlu1 %v12907_v43, %s12060_s16  ;;  %5283 = vrot.lane.b32.xlu0 %v12889_v40, %s12060_s16 }
 0x779   :  { %v4246_v46 = vpop.xlane.xlu0 %4245 }
 0x77a   :  { %11778 = vrcp.f32 %v4246_v46  ;;  %5635 = vrot.lane.b32.xlu1 %v12915_v12, %s12059_s15  ;;  %5385 = vrot.lane.b32.xlu0 %v12897_v63, %s12059_s15 }
 0x77c   :  { %v11777_v35 = vpop.eup %11776  ;;  %v4243_v33 = vpop.xlane.xlu1 %4242 }
 0x77d   :  { %11780 = vrcp.f32 %v4243_v33  ;;  %v4302_v49 = vmul.f32 %v11777_v35, %v13625_v7  ;;  %v4532_v33 = vsel %vm2562_vm4, %v13608_v19, 0 }
 0x77e   :  { %5633 = vrot.lane.b32.xlu1 %v12915_v12, %s12060_s16  ;;  %5383 = vrot.lane.b32.xlu0 %v12897_v63, %s12060_s16 }
 0x77f   :  { %v4318_v58 = vpack.c.bf16 %v4302_v49, %v4302_v49 }
 0x781   :  { %11066 = vmatmul.mubr.msk.bf16.vlgmr.msra.gmra.mrb[96].mxu0 %vm1583_vm3, %v4318_v58 }
 0x782   :  { %11076 = vmatpush3.bf16.msra.mxu0 %v4436_v57  ;;  %5735 = vrot.lane.b32.xlu1 %v12923_v52, %s12059_s15 }
 0x783   :  { %5485 = vrot.lane.b32.xlu0 %v12903_v6, %s12059_s15  ;;  %11077 = vmatprep.mubr.msk.bf16.mxu0 %vm12054_vm2, %v15650_v44 }
 0x784   :  { %v11779_v7 = vpop.eup %11778  ;;  %v4249_v29 = vpop.xlane.xlu1 %4248  ;;  %11087 = vmatprep.subr.bf16.mxu0 %v15650_v44 }
 0x785   :  { %11782 = vrcp.f32 %v4249_v29  ;;  %v4304_v27 = vmul.f32 %v11779_v7, %v13630_v30  ;;  %v4580_v29 = vsel %vm2562_vm4, %v13606_v11, 0 }
 0x786   :  { %5733 = vrot.lane.b32.xlu1 %v12923_v52, %s12060_s16 }
 0x787   :  { %v11781_v20 = vpop.eup %11780  ;;  %5483 = vrot.lane.b32.xlu0 %v12903_v6, %s12060_s16  ;;  %v4320_v55 = vpack.c.bf16 %v4304_v27, %v4304_v27 }
 0x788   :  { %v4252_v46 = vpop.xlane.xlu0 %4251  ;;  %v4303_v35 = vmul.f32 %v11781_v20, %v13635_v48  ;;  %v4484_v48 = vsel %vm2562_vm4, %v13602_v1, 0 }
 0x789   :  { %11784 = vrcp.f32 %v4252_v46  ;;  %11078 = vmatmul.mubr.msk.bf16.vlgmr.msra.gmra.mrb[100].mxu0 %vm1583_vm3, %v4320_v55  ;;  %v4628_v46 = vsel %vm2562_vm4, %v13612_v38, 0 }
 0x78a   :  { %11088 = vmatpush3.bf16.msra.mxu0 %v4532_v33  ;;  %5835 = vrot.lane.b32.xlu1 %v12931_v41, %s12059_s15  ;;  %v4319_v30 = vpack.c.bf16 %v4303_v35, %v4303_v35 }
 0x78b   :  { %5585 = vrot.lane.b32.xlu0 %v12913_v8, %s12059_s15  ;;  %11089 = vmatprep.mubr.msk.bf16.mxu0 %vm12054_vm2, %v15650_v44 }
 0x78c   :  { %v4258_v49 = vpop.xlane.xlu0 %4257  ;;  %11072 = vmatmul.mubr.msk.bf16.vlgmr.msra.gmra.mrb[112].mxu1 %vm1583_vm3, %v4319_v30  ;;  %11099 = vmatprep.subr.bf16.mxu0 %v15650_v44 }
 0x78d   :  { %11786 = vrcp.f32 %v4258_v49  ;;  %11082 = vmatpush3.bf16.msra.mxu1 %v4484_v48  ;;  %v4255_v19 = vpop.xlane.xlu1 %4254  ;;  %11083 = vmatprep.mubr.msk.bf16.mxu1 %vm12054_vm2, %v15650_v44 }
 0x78e   :  { %11788 = vrcp.f32 %v4255_v19  ;;  %5833 = vrot.lane.b32.xlu1 %v12931_v41, %s12060_s16  ;;  %11093 = vmatprep.subr.bf16.mxu1 %v15650_v44 }
 0x78f   :  { %v11783_v58 = vpop.eup %11782  ;;  %5583 = vrot.lane.b32.xlu0 %v12913_v8, %s12060_s16 }
 0x790   :  { %v4305_v1 = vmul.f32 %v11783_v58, %v13641_v54 }
 0x792   :  { %5935 = vrot.lane.b32.xlu1 %v12939_v62, %s12059_s15  ;;  %v4321_v57 = vpack.c.bf16 %v4305_v1, %v4305_v1 }
 0x793   :  { %v11785_v7 = vpop.eup %11784  ;;  %5685 = vrot.lane.b32.xlu0 %v12919_v23, %s12059_s15 }
 0x794   :  { %11084 = vmatmul.mubr.msk.bf16.vlgmr.msra.gmra.mrb[116].mxu1 %vm1583_vm3, %v4321_v57  ;;  %v4261_v27 = vpop.xlane.xlu1 %4260  ;;  %v4306_v20 = vmul.f32 %v11785_v7, %v13647_v59 }
 0x795   :  { %11094 = vmatpush3.bf16.msra.mxu1 %v4580_v29  ;;  %11790 = vrcp.f32 %v4261_v27  ;;  %11095 = vmatprep.mubr.msk.bf16.mxu1 %vm12054_vm2, %v15650_v44 }
 0x796   :  { %5933 = vrot.lane.b32.xlu1 %v12939_v62, %s12060_s16  ;;  %v4322_v54 = vpack.c.bf16 %v4306_v20, %v4306_v20  ;;  %11105 = vmatprep.subr.bf16.mxu1 %v15650_v44 }
 0x797   :  { %v11787_v55 = vpop.eup %11786  ;;  %5683 = vrot.lane.b32.xlu0 %v12919_v23, %s12060_s16 }
 0x798   :  { %v11789_v11 = vpop.eup %11788  ;;  %11090 = vmatmul.mubr.msk.bf16.vlgmr.msra.gmra.mrb[104].mxu0 %vm1583_vm3, %v4322_v54  ;;  %v4264_v59 = vpop.xlane.xlu1 %4263  ;;  %v4308_v33 = vmul.f32 %v11787_v55, %v13652_v2  ;;  %v4724_v2 = vsel %vm2562_vm4, %v13616_v21, 0 }
 0x799   :  { %11100 = vmatpush3.bf16.msra.mxu0 %v4628_v46  ;;  %11792 = vrcp.f32 %v4264_v59  ;;  %v4307_v35 = vmul.f32 %v11789_v11, %v13654_v5  ;;  %11101 = vmatprep.mubr.msk.bf16.mxu0 %vm12054_vm2, %v15650_v44  ;;  %v4676_v5 = vsel %vm2562_vm4, %v13610_v28, 0  ;;  %v4868_v11 = vsel %vm2562_vm4, %v13621_v61, 0 }
 0x79a   :  { %6223 = vrot.lane.b32.xlu1 %v12879_v39, %s12061_s17  ;;  %11111 = vmatprep.subr.bf16.mxu0 %v15650_v44  ;;  %v4324_v49 = vpack.c.bf16 %v4308_v33, %v4308_v33 }
 0x79b   :  { %5785 = vrot.lane.b32.xlu0 %v12929_v4, %s12059_s15  ;;  %v4323_v38 = vpack.c.bf16 %v4307_v35, %v4307_v35 }
 0x79c   :  { %v4267_v30 = vpop.xlane.xlu0 %4266  ;;  %v4270_v48 = vpop.xlane.xlu1 %4269 }
 0x79d   :  { %11794 = vrcp.f32 %v4267_v30  ;;  %11096 = vmatmul.mubr.msk.bf16.vlgmr.msra.gmra.mrb[120].mxu1 %vm1583_vm3, %v4323_v38 }
 0x79e   :  { %11106 = vmatpush3.bf16.msra.mxu1 %v4676_v5  ;;  %11796 = vrcp.f32 %v4270_v48  ;;  %6319 = vrot.lane.b32.xlu1 %v12893_v53, %s12061_s17 }
 0x79f   :  { %v11791_v19 = vpop.eup %11790  ;;  %5783 = vrot.lane.b32.xlu0 %v12929_v4, %s12060_s16  ;;  %11107 = vmatprep.mubr.msk.bf16.mxu1 %vm12054_vm2, %v15650_v44 }
 0x7a0   :  { %11102 = vmatmul.mubr.msk.bf16.vlgmr.msra.gmra.mrb[108].mxu0 %vm1583_vm3, %v4324_v49  ;;  %11117 = vmatprep.subr.bf16.mxu1 %v15650_v44  ;;  %v4309_v28 = vmul.f32 %v11791_v19, %v13662_v24  ;;  %v4772_v24 = vsel %vm2562_vm4, %v13614_v17, 0 }
 0x7a1   :  { %11112 = vmatpush3.bf16.msra.mxu0 %v4724_v2  ;;  %v4276_v58 = vpop.xlane.xlu1 %4275  ;;  %11113 = vmatprep.mubr.msk.bf16.mxu0 %vm12054_vm2, %v15650_v44 }
 0x7a2   :  { %6415 = vrot.lane.b32.xlu1 %v12899_v3, %s12061_s17  ;;  %v4325_v1 = vpack.c.bf16 %v4309_v28, %v4309_v28  ;;  %11123 = vmatprep.subr.bf16.mxu0 %v15650_v44  ;;  %11798 = vrcp.f32 %v4276_v58 }
 0x7a3   :  { %v11793_v57 = vpop.eup %11792  ;;  %5885 = vrot.lane.b32.xlu0 %v12935_v32, %s12059_s15 }
 0x7a4   :  { %v4273_v21 = vpop.xlane.xlu0 %4272  ;;  %v4310_v7 = vmul.f32 %v11793_v57, %v13666_v34  ;;  %v4820_v34 = vsel %vm2562_vm4, %v13618_v50, 0 }
 0x7a5   :  { %11800 = vrcp.f32 %v4273_v21  ;;  %11108 = vmatmul.mubr.msk.bf16.vlgmr.msra.gmra.mrb[124].mxu1 %vm1583_vm3, %v4325_v1  ;;  %v5055_v48 = vpop.permute.xlu1 %5054 }
 0x7a6   :  { %11118 = vmatpush3.bf16.msra.mxu1 %v4772_v24  ;;  %6511 = vrot.lane.b32.xlu1 %v12907_v43, %s12061_s17  ;;  %v4326_v29 = vpack.c.bf16 %v4310_v7, %v4310_v7  ;;  %v5060_v49 = vsel %vm2562_vm4, %v5055_v48, 0 }
 0x7a7   :  { %v11795_v27 = vpop.eup %11794  ;;  %5883 = vrot.lane.b32.xlu0 %v12935_v32, %s12060_s16  ;;  %11119 = vmatprep.mubr.msk.bf16.mxu1 %vm12054_vm2, %v15650_v44 }
 0x7a8   :  { %v11797_v20 = vpop.eup %11796  ;;  %11114 = vmatmul.mubr.msk.bf16.vlgmr.msra.gmra.mrb[112].mxu0 %vm1583_vm3, %v4326_v29  ;;  %11129 = vmatprep.subr.bf16.mxu1 %v15650_v44  ;;  %v4311_v17 = vmul.f32 %v11795_v27, %v13673_v31 }
 0x7a9   :  { %11124 = vmatpush3.bf16.msra.mxu0 %v4820_v34  ;;  %11125 = vmatprep.mubr.msk.bf16.mxu0 %vm12054_vm2, %v15650_v44  ;;  %v4312_v55 = vmul.f32 %v11797_v20, %v13671_v26  ;;  %v4916_v26 = vsel %vm2562_vm4, %v13720_v45, 0  ;;  %v4964_v45 = vsel %vm2562_vm4, %v13697_v18, 0 }
 0x7aa   :  { %6607 = vrot.lane.b32.xlu1 %v12915_v12, %s12061_s17  ;;  %v4327_v54 = vpack.c.bf16 %v4311_v17, %v4311_v17  ;;  %11135 = vmatprep.subr.bf16.mxu0 %v15650_v44 }
 0x7ab   :  { %6175 = vrot.lane.b32.xlu0 %v12877_v36, %s12061_s17  ;;  %v4328_v46 = vpack.c.bf16 %v4312_v55, %v4312_v55 }
 0x7ac   :  { %v4279_v50 = vpop.xlane.xlu0 %4278  ;;  %v11799_v31 = vpop.eup %11798 }
 0x7ad   :  { %11802 = vrcp.f32 %v4279_v50  ;;  %11120 = vmatmul.mubr.msk.bf16.vlgmr.msra.gmra.mrb[128].mxu1 %vm1583_vm3, %v4327_v54  ;;  %v4314_v33 = vmul.f32 %v11799_v31, %v13680_v14 }
 0x7ae   :  { %11130 = vmatpush3.bf16.msra.mxu1 %v4868_v11  ;;  %6655 = vrot.lane.b32.xlu1 %v12919_v23, %s12061_s17 }
 0x7af   :  { %v11801_v59 = vpop.eup %11800  ;;  %6271 = vrot.lane.b32.xlu0 %v12889_v40, %s12061_s17  ;;  %11131 = vmatprep.mubr.msk.bf16.mxu1 %vm12054_vm2, %v15650_v44 }
 0x7b0   :  { %11126 = vmatmul.mubr.msk.bf16.vlgmr.msra.gmra.mrb[116].mxu0 %vm1583_vm3, %v4328_v46  ;;  %11141 = vmatprep.subr.bf16.mxu1 %v15650_v44  ;;  %v4313_v61 = vmul.f32 %v11801_v59, %v13684_v42  ;;  %v5007_v38 = vpop.permute.xlu0 %5006  ;;  %v4330_v42 = vpack.c.bf16 %v4314_v33, %v4314_v33 }
 0x7b1   :  { %11136 = vmatpush3.bf16.msra.mxu0 %v4916_v26  ;;  %11137 = vmatprep.mubr.msk.bf16.mxu0 %vm12054_vm2, %v15650_v44  ;;  %v5012_v14 = vsel %vm2562_vm4, %v5007_v38, 0 }
 0x7b2   :  { %6703 = vrot.lane.b32.xlu1 %v12923_v52, %s12061_s17  ;;  %v4329_v35 = vpack.c.bf16 %v4313_v61, %v4313_v61  ;;  %11147 = vmatprep.subr.bf16.mxu0 %v15650_v44 }
 0x7b3   :  { %6367 = vrot.lane.b32.xlu0 %v12897_v63, %s12061_s17 }
 0x7b5   :  { %11132 = vmatmul.mubr.msk.bf16.vlgmr.msra.gmra.mrb[132].mxu1 %vm1583_vm3, %v4329_v35 }
 0x7b6   :  { %11142 = vmatpush3.bf16.msra.mxu1 %v4964_v45  ;;  %11143 = vmatprep.mubr.msk.bf16.mxu1 %vm12054_vm2, %v15650_v44 }
 0x7b7   :  { %v11803_v30 = vpop.eup %11802  ;;  %6463 = vrot.lane.b32.xlu0 %v12903_v6, %s12061_s17  ;;  %11153 = vmatprep.subr.bf16.mxu1 %v15650_v44 }
 0x7b8   :  { %11138 = vmatmul.mubr.msk.bf16.vlgmr.msra.gmra.mrb[120].mxu0 %vm1583_vm3, %v4330_v42  ;;  %v4315_v18 = vmul.f32 %v11803_v30, %v13688_v60 }
 0x7b9   :  { %11148 = vmatpush3.bf16.msra.mxu0 %v5012_v14  ;;  %11149 = vmatprep.mubr.msk.bf16.mxu0 %vm12054_vm2, %v15650_v44 }
 0x7ba   :  { %v4331_v5 = vpack.c.bf16 %v4315_v18, %v4315_v18  ;;  %11159 = vmatprep.subr.bf16.mxu0 %v15650_v44 }
 0x7bb   :  { %6559 = vrot.lane.b32.xlu0 %v12913_v8, %s12061_s17 }
 0x7bd   :  { %11144 = vmatmul.mubr.msk.bf16.vlgmr.msra.gmra.mrb[136].mxu1 %vm1583_vm3, %v4331_v5 }
 0x7be   :  { %11154 = vmatpush3.bf16.msra.mxu1 %v5060_v49  ;;  %11155 = vmatprep.mubr.msk.bf16.mxu1 %vm12054_vm2, %v15650_v44 }
 0x7bf   :  { %11165 = vmatprep.subr.bf16.mxu1 %v15650_v44 }
 0x7d6   :  { %v4282_v60 = vpop.xlane.xlu1 %4281 }
 0x7d7   :  { %11804 = vrcp.f32 %v4282_v60 }
 0x7da   :  { %v5236_v19 = vpop.permute.xlu1 %5235 }
 0x7db   :  { %v5241_v11 = vsel %vm1583_vm3, %v5236_v19, 0 }
 0x7de   :  { %v5234_v2 = vpop.permute.xlu1 %5233 }
 0x7e1   :  { %v11805_v28 = vpop.eup %11804  ;;  %v4285_v58 = vpop.xlane.xlu0 %4284 }
 0x7e2   :  { %11806 = vrcp.f32 %v4285_v58  ;;  %v5336_v1 = vpop.permute.xlu1 %5335  ;;  %v4316_v57 = vmul.f32 %v11805_v28, %v13700_v0 }
 0x7e3   :  { %v5341_v61 = vsel %vm1583_vm3, %v5336_v1, 0 }
 0x7e4   :  { %v4332_v21 = vpack.c.bf16 %v4316_v57, %v4316_v57 }
 0x7e5   :  { %v5186_v7 = vpop.permute.xlu0 %5185 }
 0x7e6   :  { %v5191_v24 = vsel %vm1583_vm3, %v5186_v7, 0  ;;  %11150 = vmatmul.mubr.msk.bf16.vlgmr.msra.gmra.mrb[124].mxu0 %vm1583_vm3, %v4332_v21  ;;  %v5334_v29 = vpop.permute.xlu1 %5333 }
 0x7e7   :  { %11160 = vmatpush3.bf16.xpose.msra.mxu0 %v5191_v24  ;;  %11161 = vmatprep.mubr.msk.bf16.mxu0 %vm12054_vm2, %v15650_v44 }
 0x7e8   :  { %11171 = vmatprep.subr.bf16.mxu0 %v15650_v44 }
 0x7e9   :  { %v5184_v27 = vpop.permute.xlu0 %5183 }
 0x7ea   :  { %v5436_v20 = vpop.permute.xlu1 %5435 }
 0x7eb   :  { %v5441_v42 = vsel %vm1583_vm3, %v5436_v20, 0 }
 0x7ec   :  { %v11807_v34 = vpop.eup %11806 }
 0x7ed   :  { %v5286_v17 = vpop.permute.xlu0 %5285  ;;  %v4317_v54 = vmul.f32 %v11807_v34, %v13704_v56 }
 0x7ee   :  { %v5291_v0 = vsel %vm1583_vm3, %v5286_v17, 0  ;;  %11162 = vmatmul.mubr.msk.bf16.vlgmr.msra.gmra.mrb[128].mxu0 %vm1583_vm3, %v5184_v27  ;;  %v5434_v55 = vpop.permute.xlu1 %5433 }
 0x7ef   :  { %11172 = vmatpush3.bf16.xpose.msra.mxu0 %v5291_v0  ;;  %v4333_v50 = vpack.c.bf16 %v4317_v54, %v4317_v54  ;;  %11173 = vmatprep.mubr.msk.bf16.mxu0 %vm12054_vm2, %v15650_v44 }
 0x7f0   :  { %11183 = vmatprep.subr.bf16.mxu0 %v15650_v44 }
 0x7f1   :  { %v5284_v31 = vpop.permute.xlu0 %5283  ;;  %11156 = vmatmul.mubr.msk.bf16.vlgmr.msra.gmra.mrb[140].mxu1 %vm1583_vm3, %v4333_v50 }
 0x7f2   :  { %11166 = vmatpush3.bf16.xpose.msra.mxu1 %v5241_v11  ;;  %v5536_v46 = vpop.permute.xlu1 %5535  ;;  %11167 = vmatprep.mubr.msk.bf16.mxu1 %vm12054_vm2, %v15650_v44 }
 0x7f3   :  { %11177 = vmatprep.subr.bf16.mxu1 %v15650_v44  ;;  %v5541_v5 = vsel %vm1583_vm3, %v5536_v46, 0 }
 0x7f5   :  { %v5386_v56 = vpop.permute.xlu0 %5385 }
 0x7f6   :  { %v5391_v59 = vsel %vm1583_vm3, %v5386_v56, 0  ;;  %11174 = vmatmul.mubr.msk.bf16.vlgmr.msra.gmra.mrb[132].mxu0 %vm1583_vm3, %v5284_v31  ;;  %v5534_v26 = vpop.permute.xlu1 %5533 }
 0x7f7   :  { %11184 = vmatpush3.bf16.xpose.msra.mxu0 %v5391_v59  ;;  %11185 = vmatprep.mubr.msk.bf16.mxu0 %vm12054_vm2, %v15650_v44 }
 0x7f8   :  { %11195 = vmatprep.subr.bf16.mxu0 %v15650_v44 }
 0x7f9   :  { %v5384_v35 = vpop.permute.xlu0 %5383  ;;  %11168 = vmatmul.mubr.msk.bf16.vlgmr.msra.gmra.mrb[144].mxu1 %vm1583_vm3, %v5234_v2 }
 0x7fa   :  { %11178 = vmatpush3.bf16.xpose.msra.mxu1 %v5341_v61  ;;  %11179 = vmatprep.mubr.msk.bf16.mxu1 %vm12054_vm2, %v15650_v44  ;;  %v5636_v45 = vpop.permute.xlu1 %5635 }
 0x7fb   :  { %11189 = vmatprep.subr.bf16.mxu1 %v15650_v44  ;;  %v5641_v58 = vsel %vm1583_vm3, %v5636_v45, 0 }
 0x7fd   :  { %v5486_v33 = vpop.permute.xlu0 %5485 }
 0x7fe   :  { %v5491_v38 = vsel %vm1583_vm3, %v5486_v33, 0  ;;  %11186 = vmatmul.mubr.msk.bf16.vlgmr.msra.gmra.mrb[136].mxu0 %vm1583_vm3, %v5384_v35  ;;  %v5634_v14 = vpop.permute.xlu1 %5633 }
 0x7ff   :  { %11196 = vmatpush3.bf16.xpose.msra.mxu0 %v5491_v38  ;;  %11197 = vmatprep.mubr.msk.bf16.mxu0 %vm12054_vm2, %v15650_v44 }
 0x800   :  { %11207 = vmatprep.subr.bf16.mxu0 %v15650_v44 }
 0x801   :  { %v5484_v30 = vpop.permute.xlu0 %5483  ;;  %11180 = vmatmul.mubr.msk.bf16.vlgmr.msra.gmra.mrb[148].mxu1 %vm1583_vm3, %v5334_v29 }
 0x802   :  { %11190 = vmatpush3.bf16.xpose.msra.mxu1 %v5441_v42  ;;  %11191 = vmatprep.mubr.msk.bf16.mxu1 %vm12054_vm2, %v15650_v44  ;;  %v5736_v60 = vpop.permute.xlu1 %5735 }
 0x803   :  { %11201 = vmatprep.subr.bf16.mxu1 %v15650_v44  ;;  %v5741_v24 = vsel %vm1583_vm3, %v5736_v60, 0 }
 0x805   :  { %v5586_v18 = vpop.permute.xlu0 %5585 }
 0x806   :  { %v5591_v48 = vsel %vm1583_vm3, %v5586_v18, 0  ;;  %11198 = vmatmul.mubr.msk.bf16.vlgmr.msra.gmra.mrb[140].mxu0 %vm1583_vm3, %v5484_v30  ;;  %v5734_v28 = vpop.permute.xlu1 %5733 }
 0x807   :  { %11208 = vmatpush3.bf16.xpose.msra.mxu0 %v5591_v48  ;;  %11209 = vmatprep.mubr.msk.bf16.mxu0 %vm12054_vm2, %v15650_v44 }
 0x808   :  { %11219 = vmatprep.subr.bf16.mxu0 %v15650_v44 }
 0x809   :  { %v5584_v49 = vpop.permute.xlu0 %5583  ;;  %11192 = vmatmul.mubr.msk.bf16.vlgmr.msra.gmra.mrb[152].mxu1 %vm1583_vm3, %v5434_v55 }
 0x80a   :  { %11202 = vmatpush3.bf16.xpose.msra.mxu1 %v5541_v5  ;;  %11203 = vmatprep.mubr.msk.bf16.mxu1 %vm12054_vm2, %v15650_v44  ;;  %v5836_v21 = vpop.permute.xlu1 %5835 }
 0x80b   :  { %11213 = vmatprep.subr.bf16.mxu1 %v15650_v44  ;;  %v5841_v17 = vsel %vm1583_vm3, %v5836_v21, 0 }
 0x80d   :  { %v5686_v19 = vpop.permute.xlu0 %5685 }
 0x80e   :  { %v5691_v2 = vsel %vm1583_vm3, %v5686_v19, 0  ;;  %11210 = vmatmul.mubr.msk.bf16.vlgmr.msra.gmra.mrb[144].mxu0 %vm1583_vm3, %v5584_v49  ;;  %v5834_v27 = vpop.permute.xlu1 %5833 }
 0x80f   :  { %11220 = vmatpush3.bf16.xpose.msra.mxu0 %v5691_v2  ;;  %11221 = vmatprep.mubr.msk.bf16.mxu0 %vm12054_vm2, %v15650_v44 }
 0x810   :  { %11231 = vmatprep.subr.bf16.mxu0 %v15650_v44 }
 0x811   :  { %v5684_v1 = vpop.permute.xlu0 %5683  ;;  %11204 = vmatmul.mubr.msk.bf16.vlgmr.msra.gmra.mrb[156].mxu1 %vm1583_vm3, %v5534_v26 }
 0x812   :  { %11214 = vmatpush3.bf16.xpose.msra.mxu1 %v5641_v58  ;;  %11215 = vmatprep.mubr.msk.bf16.mxu1 %vm12054_vm2, %v15650_v44  ;;  %v5936_v0 = vpop.permute.xlu1 %5935 }
 0x813   :  { %11225 = vmatprep.subr.bf16.mxu1 %v15650_v44  ;;  %v5941_v31 = vsel %vm1583_vm3, %v5936_v0, 0 }
 0x815   :  { %v5786_v57 = vpop.permute.xlu0 %5785 }
 0x816   :  { %v5791_v7 = vsel %vm1583_vm3, %v5786_v57, 0  ;;  %11222 = vmatmul.mubr.msk.bf16.vlgmr.msra.gmra.mrb[148].mxu0 %vm1583_vm3, %v5684_v1  ;;  %v5934_v11 = vpop.permute.xlu1 %5933 }
 0x817   :  { %11232 = vmatpush3.bf16.xpose.msra.mxu0 %v5791_v7  ;;  %11233 = vmatprep.mubr.msk.bf16.mxu0 %vm12054_vm2, %v15650_v44 }
 0x818   :  { %11243 = vmatprep.subr.bf16.mxu0 %v15650_v44 }
 0x819   :  { %v5784_v29 = vpop.permute.xlu0 %5783  ;;  %11216 = vmatmul.mubr.msk.bf16.vlgmr.msra.gmra.mrb[160].mxu1 %vm1583_vm3, %v5634_v14 }
 0x81a   :  { %11226 = vmatpush3.bf16.xpose.msra.mxu1 %v5741_v24  ;;  %11227 = vmatprep.mubr.msk.bf16.mxu1 %vm12054_vm2, %v15650_v44  ;;  %v6224_v46 = vpop.permute.xlu1 %6223 }
 0x81b   :  { %11237 = vmatprep.subr.bf16.mxu1 %v15650_v44  ;;  %v6229_v56 = vsel %vm2562_vm4, %v6224_v46, 0 }
 0x81d   :  { %v5886_v20 = vpop.permute.xlu0 %5885 }
 0x81e   :  { %v5891_v34 = vsel %vm1583_vm3, %v5886_v20, 0  ;;  %11234 = vmatmul.mubr.msk.bf16.vlgmr.msra.gmra.mrb[152].mxu0 %vm1583_vm3, %v5784_v29 }
 0x81f   :  { %11244 = vmatpush3.bf16.xpose.msra.mxu0 %v5891_v34  ;;  %11245 = vmatprep.mubr.msk.bf16.mxu0 %vm12054_vm2, %v15650_v44 }
 0x820   :  { %11255 = vmatprep.subr.bf16.mxu0 %v15650_v44 }
 0x821   :  { %v5884_v54 = vpop.permute.xlu0 %5883  ;;  %11228 = vmatmul.mubr.msk.bf16.vlgmr.msra.gmra.mrb[164].mxu1 %vm1583_vm3, %v5734_v28 }
 0x822   :  { %11238 = vmatpush3.bf16.xpose.msra.mxu1 %v5841_v17  ;;  %11239 = vmatprep.mubr.msk.bf16.mxu1 %vm12054_vm2, %v15650_v44 }
 0x823   :  { %11249 = vmatprep.subr.bf16.mxu1 %v15650_v44 }
 0x825   :  { %v6176_v55 = vpop.permute.xlu0 %6175 }
 0x826   :  { %v6181_v50 = vsel %vm2562_vm4, %v6176_v55, 0  ;;  %11246 = vmatmul.mubr.msk.bf16.vlgmr.msra.gmra.mrb[156].mxu0 %vm1583_vm3, %v5884_v54 }
 0x827   :  { %11256 = vmatpush3.bf16.msra.mxu0 %v6181_v50  ;;  %11257 = vmatprep.mubr.msk.bf16.mxu0 %vm12054_vm2, %v15650_v44 }
 0x828   :  { %11267 = vmatprep.subr.bf16.mxu0 %v15650_v44 }
 0x829   :  { %11240 = vmatmul.mubr.msk.bf16.vlgmr.msra.gmra.mrb[168].mxu1 %vm1583_vm3, %v5834_v27 }
 0x82a   :  { %11250 = vmatpush3.bf16.xpose.msra.mxu1 %v5941_v31  ;;  %11251 = vmatprep.mubr.msk.bf16.mxu1 %vm12054_vm2, %v15650_v44 }
 0x82b   :  { %11261 = vmatprep.subr.bf16.mxu1 %v15650_v44 }
 0x831   :  { %11252 = vmatmul.mubr.msk.bf16.vlgmr.msra.gmra.mrb[172].mxu1 %vm1583_vm3, %v5934_v11 }
 0x832   :  { %11262 = vmatpush3.bf16.msra.mxu1 %v6229_v56  ;;  %11263 = vmatprep.mubr.msk.bf16.mxu1 %vm12054_vm2, %v15650_v44 }
 0x833   :  { %11273 = vmatprep.subr.bf16.mxu1 %v15650_v44 }
 0x854   :  { %v13986_v59 = vpop.f32.mrb[96].mxu0 }
 0x855   :  { %v11067_v26 = vpop.f32.mrb[97].mxu0 }
 0x856   :  { %v4379_v61 = vpop.f32.mrb[98].mxu0 }
 0x857   :  { %v11068_v35 = vpop.f32.mrb[99].mxu0 }
 0x85c   :  { %v13988_v33 = vpop.f32.mrb[100].mxu0 }
 0x85d   :  { %v11079_v45 = vpop.f32.mrb[101].mxu0 }
 0x85e   :  { %v4475_v38 = vpop.f32.mrb[102].mxu0 }
 0x85f   :  { %v13990_v42 = vpop.f32.mrb[112].mxu1  ;;  %v11080_v30 = vpop.f32.mrb[103].mxu0 }
 0x860   :  { %v11073_v14 = vpop.f32.mrb[113].mxu1 }
 0x861   :  { %v4427_v18 = vpop.f32.mrb[114].mxu1 }
 0x862   :  { %v11074_v48 = vpop.f32.mrb[115].mxu1 }
 0x867   :  { %v13992_v5 = vpop.f32.mrb[116].mxu1 }
 0x868   :  { %v11085_v49 = vpop.f32.mrb[117].mxu1 }
 0x869   :  { %v4523_v60 = vpop.f32.mrb[118].mxu1 }
 0x86a   :  { %v11086_v19 = vpop.f32.mrb[119].mxu1 }
 0x86b   :  { %v13994_v2 = vpop.f32.mrb[104].mxu0 }
 0x86c   :  { %v11091_v28 = vpop.f32.mrb[105].mxu0 }
 0x86d   :  { %v4571_v58 = vpop.f32.mrb[106].mxu0 }
 0x86e   :  { %v11092_v1 = vpop.f32.mrb[107].mxu0 }
 0x870   :  { %v13996_v57 = vpop.f32.mrb[120].mxu1 }
 0x871   :  { %v11097_v21 = vpop.f32.mrb[121].mxu1 }
 0x872   :  { %v4619_v7 = vpop.f32.mrb[122].mxu1 }
 0x873   :  { %v11098_v24 = vpop.f32.mrb[123].mxu1  ;;  %v13998_v29 = vpop.f32.mrb[108].mxu0 }
 0x874   :  { %v11103_v27 = vpop.f32.mrb[109].mxu0 }
 0x875   :  { %v4667_v20 = vpop.f32.mrb[110].mxu0 }
 0x876   :  { %v11104_v34 = vpop.f32.mrb[111].mxu0 }
 0x878   :  { %v14000_v17 = vpop.f32.mrb[124].mxu1 }
 0x879   :  { %v11109_v54 = vpop.f32.mrb[125].mxu1 }
 0x87a   :  { %v4715_v0 = vpop.f32.mrb[126].mxu1 }
 0x87b   :  { %v11110_v55 = vpop.f32.mrb[127].mxu1  ;;  %v14002_v50 = vpop.f32.mrb[112].mxu0 }
 0x87c   :  { %15651 = vst [vmem:[#allocation25_spill] sm:$0xff] %v14002_v50  ;;  %v11115_v11 = vpop.f32.mrb[113].mxu0 }
 0x87d   :  { %v4763_v31 = vpop.f32.mrb[114].mxu0 }
 0x87e   :  { %v11116_v46 = vpop.f32.mrb[115].mxu0 }
 0x880   :  { %v14004_v56 = vpop.f32.mrb[128].mxu1 }
 0x881   :  { %v11121_v26 = vpop.f32.mrb[129].mxu1 }
 0x882   :  { %v4811_v61 = vpop.f32.mrb[130].mxu1 }
 0x883   :  { %v11122_v35 = vpop.f32.mrb[131].mxu1  ;;  %v14006_v45 = vpop.f32.mrb[116].mxu0 }
 0x884   :  { %15652 = vst [vmem:[#allocation26_spill] sm:$0xff] %v14006_v45  ;;  %v11127_v38 = vpop.f32.mrb[117].mxu0 }
 0x885   :  { %v4859_v30 = vpop.f32.mrb[118].mxu0 }
 0x886   :  { %v11128_v14 = vpop.f32.mrb[119].mxu0 }
 0x888   :  { %v14008_v18 = vpop.f32.mrb[132].mxu1 }
 0x889   :  { %v11133_v48 = vpop.f32.mrb[133].mxu1 }
 0x88a   :  { %v4907_v49 = vpop.f32.mrb[134].mxu1 }
 0x88b   :  { %v11134_v60 = vpop.f32.mrb[135].mxu1  ;;  %v14010_v19 = vpop.f32.mrb[120].mxu0 }
 0x88c   :  { %15653 = vst [vmem:[#allocation27_spill] sm:$0xff] %v14010_v19  ;;  %v11139_v28 = vpop.f32.mrb[121].mxu0 }
 0x88d   :  { %v4955_v58 = vpop.f32.mrb[122].mxu0 }
 0x88e   :  { %v11140_v1 = vpop.f32.mrb[123].mxu0 }
 0x890   :  { %v14012_v21 = vpop.f32.mrb[136].mxu1 }
 0x891   :  { %15654 = vst [vmem:[#allocation28_spill] sm:$0xff] %v14012_v21  ;;  %v11145_v7 = vpop.f32.mrb[137].mxu1 }
 0x892   :  { %v5003_v24 = vpop.f32.mrb[138].mxu1 }
 0x893   :  { %v11146_v27 = vpop.f32.mrb[139].mxu1 }
 0x8b9   :  { %v14014_v20 = vpop.f32.mrb[124].mxu0 }
 0x8ba   :  { %15655 = vst [vmem:[#allocation29_spill] sm:$0xff] %v14014_v20  ;;  %v11151_v34 = vpop.f32.mrb[125].mxu0 }
 0x8bb   :  { %v5051_v54 = vpop.f32.mrb[126].mxu0 }
 0x8bc   :  { %v11152_v0 = vpop.f32.mrb[127].mxu0 }
 0x8c1   :  { %v14016_v55 = vpop.f32.mrb[128].mxu0 }
 0x8c2   :  { %v11163_v11 = vpop.f32.mrb[129].mxu0  ;;  %v5983_v31 = vsel %vm1583_vm3, %v14016_v55, -inf }
 0x8c3   :  { %5984 = vmax.xlane.f32.xlu0 %v5983_v31  ;;  %v5230_v46 = vpop.f32.mrb[130].mxu0 }
 0x8c4   :  { %v14020_v26 = vpop.f32.mrb[140].mxu1  ;;  %v11164_v61 = vpop.f32.mrb[131].mxu0 }
 0x8c5   :  { %15656 = vst [vmem:[#allocation30_spill] sm:$0xff] %v14020_v26  ;;  %v11157_v35 = vpop.f32.mrb[141].mxu1 }
 0x8c6   :  { %v5099_v38 = vpop.f32.mrb[142].mxu1 }
 0x8c7   :  { %v11158_v30 = vpop.f32.mrb[143].mxu1 }
 0x8c9   :  { %v14022_v14 = vpop.f32.mrb[132].mxu0 }
 0x8ca   :  { %v11175_v48 = vpop.f32.mrb[133].mxu0  ;;  %v5989_v49 = vsel %vm1583_vm3, %v14022_v14, -inf }
 0x8cb   :  { %5990 = vmax.xlane.f32.xlu0 %v5989_v49  ;;  %v5330_v60 = vpop.f32.mrb[134].mxu0 }
 0x8cc   :  { %v14026_v28 = vpop.f32.mrb[144].mxu1  ;;  %v11176_v58 = vpop.f32.mrb[135].mxu0 }
 0x8cd   :  { %v11169_v1 = vpop.f32.mrb[145].mxu1  ;;  %v5986_v7 = vsel %vm1583_vm3, %v14026_v28, -inf }
 0x8ce   :  { %5987 = vmax.xlane.f32.xlu1 %v5986_v7  ;;  %v5280_v24 = vpop.f32.mrb[146].mxu1 }
 0x8cf   :  { %v11170_v27 = vpop.f32.mrb[147].mxu1 }
 0x8d1   :  { %v14030_v34 = vpop.f32.mrb[136].mxu0 }
 0x8d2   :  { %v11187_v54 = vpop.f32.mrb[137].mxu0  ;;  %v5995_v48 = vsel %vm1583_vm3, %v14030_v34, -inf }
 0x8d3   :  { %v5430_v0 = vpop.f32.mrb[138].mxu0 }
 0x8d4   :  { %v14032_v11 = vpop.f32.mrb[148].mxu1  ;;  %v11188_v31 = vpop.f32.mrb[139].mxu0 }
 0x8d5   :  { %v11181_v46 = vpop.f32.mrb[149].mxu1  ;;  %v5992_v61 = vsel %vm1583_vm3, %v14032_v11, -inf }
 0x8d6   :  { %5993 = vmax.xlane.f32.xlu0 %v5992_v61  ;;  %v5380_v35 = vpop.f32.mrb[150].mxu1 }
 0x8d7   :  { %v11182_v38 = vpop.f32.mrb[151].mxu1 }
 0x8d9   :  { %v14036_v30 = vpop.f32.mrb[140].mxu0 }
 0x8da   :  { %v11199_v49 = vpop.f32.mrb[141].mxu0  ;;  %5996 = vmax.xlane.f32.xlu0 %v5995_v48  ;;  %v6001_v24 = vsel %vm1583_vm3, %v14036_v30, -inf }
 0x8db   :  { %v5530_v60 = vpop.f32.mrb[142].mxu0 }
 0x8dc   :  { %v14040_v58 = vpop.f32.mrb[152].mxu1  ;;  %v11200_v1 = vpop.f32.mrb[143].mxu0 }
 0x8dd   :  { %v11193_v7 = vpop.f32.mrb[153].mxu1  ;;  %v5998_v27 = vsel %vm1583_vm3, %v14040_v58, -inf }
 0x8de   :  { %6002 = vmax.xlane.f32.xlu0 %v6001_v24  ;;  %5999 = vmax.xlane.f32.xlu1 %v5998_v27  ;;  %v5480_v54 = vpop.f32.mrb[154].mxu1 }
 0x8df   :  { %v11194_v0 = vpop.f32.mrb[155].mxu1 }
 0x8e1   :  { %v14046_v31 = vpop.f32.mrb[144].mxu0 }
 0x8e2   :  { %v11211_v46 = vpop.f32.mrb[145].mxu0  ;;  %v6007_v61 = vsel %vm1583_vm3, %v14046_v31, -inf }
 0x8e3   :  { %v5630_v35 = vpop.f32.mrb[146].mxu0  ;;  %6008 = vmax.xlane.f32.xlu0 %v6007_v61 }
 0x8e4   :  { %v14050_v38 = vpop.f32.mrb[156].mxu1  ;;  %v11212_v48 = vpop.f32.mrb[147].mxu0 }
 0x8e5   :  { %v11205_v49 = vpop.f32.mrb[157].mxu1  ;;  %v6004_v60 = vsel %vm1583_vm3, %v14050_v38, -inf }
 0x8e6   :  { %6005 = vmax.xlane.f32.xlu1 %v6004_v60  ;;  %v5580_v1 = vpop.f32.mrb[158].mxu1 }
 0x8e7   :  { %v11206_v7 = vpop.f32.mrb[159].mxu1 }
 0x8e9   :  { %v14054_v24 = vpop.f32.mrb[148].mxu0 }
 0x8ea   :  { %v11223_v27 = vpop.f32.mrb[149].mxu0  ;;  %v6013_v54 = vsel %vm1583_vm3, %v14054_v24, -inf }
 0x8eb   :  { %v5730_v0 = vpop.f32.mrb[150].mxu0  ;;  %6014 = vmax.xlane.f32.xlu0 %v6013_v54 }
 0x8ec   :  { %v14058_v46 = vpop.f32.mrb[160].mxu1  ;;  %v11224_v61 = vpop.f32.mrb[151].mxu0 }
 0x8ed   :  { %v11217_v35 = vpop.f32.mrb[161].mxu1  ;;  %v6010_v48 = vsel %vm1583_vm3, %v14058_v46, -inf }
 0x8ee   :  { %6011 = vmax.xlane.f32.xlu1 %v6010_v48  ;;  %v5680_v49 = vpop.f32.mrb[162].mxu1 }
 0x8ef   :  { %v11218_v60 = vpop.f32.mrb[163].mxu1 }
 0x8f1   :  { %v14062_v1 = vpop.f32.mrb[152].mxu0 }
 0x8f2   :  { %v11235_v7 = vpop.f32.mrb[153].mxu0  ;;  %v6019_v27 = vsel %vm1583_vm3, %v14062_v1, -inf }
 0x8f3   :  { %v5830_v13 = vpop.f32.mrb[154].mxu0  ;;  %6020 = vmax.xlane.f32.xlu0 %v6019_v27 }
 0x8f4   :  { %v14066_v0 = vpop.f32.mrb[164].mxu1  ;;  %v11236_v54 = vpop.f32.mrb[155].mxu0 }
 0x8f5   :  { %v11229_v9 = vpop.f32.mrb[165].mxu1  ;;  %v6016_v61 = vsel %vm1583_vm3, %v14066_v0, -inf }
 0x8f6   :  { %6017 = vmax.xlane.f32.xlu1 %v6016_v61  ;;  %v5780_v35 = vpop.f32.mrb[166].mxu1 }
 0x8f7   :  { %v11230_v48 = vpop.f32.mrb[167].mxu1 }
 0x8f9   :  { %v14070_v49 = vpop.f32.mrb[156].mxu0 }
 0x8fa   :  { %v11247_v60 = vpop.f32.mrb[157].mxu0  ;;  %v6025_v7 = vsel %vm1583_vm3, %v14070_v49, -inf }
 0x8fb   :  { %v5930_v16 = vpop.f32.mrb[158].mxu0  ;;  %6026 = vmax.xlane.f32.xlu0 %v6025_v7  ;;  %v14088_v7 = vpop.permute.xlu0 %6271 }
 0x8fc   :  { %v14074_v13 = vpop.f32.mrb[168].mxu1  ;;  %v11248_v27 = vpop.f32.mrb[159].mxu0 }
 0x8fd   :  { %v11241_v47 = vpop.f32.mrb[169].mxu1  ;;  %v6022_v9 = vsel %vm1583_vm3, %v14074_v13, -inf  ;;  %v14086_v16 = vpop.permute.xlu1 %6319 }
 0x8fe   :  { %6023 = vmax.xlane.f32.xlu1 %v6022_v9  ;;  %v5880_v54 = vpop.f32.mrb[170].mxu1 }
 0x8ff   :  { %v11242_v61 = vpop.f32.mrb[171].mxu1  ;;  %v14092_v9 = vpop.permute.xlu0 %6367 }
 0x901   :  { %v14090_v27 = vpop.permute.xlu1 %6415 }
 0x903   :  { %v14096_v54 = vpop.permute.xlu0 %6463 }
 0x904   :  { %v14078_v35 = vpop.f32.mrb[172].mxu1 }
 0x905   :  { %v11253_v48 = vpop.f32.mrb[173].mxu1  ;;  %v6028_v47 = vsel %vm1583_vm3, %v14078_v35, -inf }
 0x906   :  { %v5980_v25 = vpop.f32.mrb[174].mxu1 }
 0x907   :  { %v11254_v60 = vpop.f32.mrb[175].mxu1  ;;  %v14094_v25 = vpop.permute.xlu1 %6511 }
 0x908   :  { %v14100_v48 = vpop.permute.xlu0 %6559 }
 0x90b   :  { %v14098_v61 = vpop.permute.xlu1 %6607 }
 0x90f   :  { %6799 = vrot.lane.b32.xlu1 %v12931_v41, %s12061_s17  ;;  %v14102_v22 = vpop.permute.xlu1 %6655 }
 0x911   :  { %6751 = vrot.lane.b32.xlu0 %v12929_v4, %s12061_s17 }
 0x913   :  { %v14105_v37 = vpop.permute.xlu1 %6703 }
 0x933   :  { %6029 = vmax.xlane.f32.xlu1 %v6028_v47 }
 0x950   :  { %v5985_v60 = vpop.xlane.xlu0 %5984 }
 0x951   :  { %v6031_v47 = vsub.f32 %v14016_v55, %v5985_v60 }
 0x953   :  { %v6047_v51 = vmul.f32 1.442695, %v6031_v47 }
 0x955   :  { %11808 = vpow2.f32 %v6047_v51 }
 0x958   :  { %v5991_v15 = vpop.xlane.xlu0 %5990 }
 0x959   :  { %v6033_v10 = vsub.f32 %v14022_v14, %v5991_v15 }
 0x95b   :  { %v6051_v20 = vmul.f32 1.442695, %v6033_v10  ;;  %v5988_v19 = vpop.xlane.xlu1 %5987 }
 0x95c   :  { %v6032_v45 = vsub.f32 %v14026_v28, %v5988_v19 }
 0x95d   :  { %11810 = vpow2.f32 %v6051_v20 }
 0x95e   :  { %v6049_v50 = vmul.f32 1.442695, %v6032_v45 }
 0x95f   :  { %v14109_v26 = vpop.eup %11808 }
 0x960   :  { %11812 = vpow2.f32 %v6049_v50  ;;  %v6079_v21 = vsel %vm1583_vm3, %v14109_v26, 0.0 }
 0x961   :  { %6080 = vadd.xlane.f32.xlu0 %v6079_v21 }
 0x963   :  { %v5994_v55 = vpop.xlane.xlu0 %5993 }
 0x964   :  { %v6034_v51 = vsub.f32 %v14032_v11, %v5994_v55 }
 0x966   :  { %v6053_v60 = vmul.f32 1.442695, %v6034_v51 }
 0x967   :  { %v14114_v47 = vpop.eup %11810  ;;  %v5997_v15 = vpop.xlane.xlu0 %5996 }
 0x968   :  { %11814 = vpow2.f32 %v6053_v60  ;;  %v6035_v10 = vsub.f32 %v14030_v34, %v5997_v15  ;;  %v6085_v45 = vsel %vm1583_vm3, %v14114_v47, 0.0 }
 0x969   :  { %6086 = vadd.xlane.f32.xlu0 %v6085_v45 }
 0x96a   :  { %v14119_v19 = vpop.eup %11812  ;;  %v6055_v50 = vmul.f32 1.442695, %v6035_v10 }
 0x96b   :  { %v6003_v20 = vpop.xlane.xlu0 %6002  ;;  %v6000_v14 = vpop.xlane.xlu1 %5999  ;;  %v6082_v21 = vsel %vm1583_vm3, %v14119_v19, 0.0 }
 0x96c   :  { %11816 = vpow2.f32 %v6055_v50  ;;  %v6037_v28 = vsub.f32 %v14036_v30, %v6003_v20  ;;  %v6036_v11 = vsub.f32 %v14040_v58, %v6000_v14  ;;  %6083 = vadd.xlane.f32.xlu1 %v6082_v21 }
 0x96e   :  { %v6059_v55 = vmul.f32 1.442695, %v6037_v28  ;;  %v6057_v34 = vmul.f32 1.442695, %v6036_v11 }
 0x970   :  { %11818 = vpow2.f32 %v6059_v55  ;;  %v6009_v51 = vpop.xlane.xlu0 %6008 }
 0x971   :  { %11820 = vpow2.f32 %v6057_v34  ;;  %v6039_v15 = vsub.f32 %v14046_v31, %v6009_v51 }
 0x972   :  { %v14125_v60 = vpop.eup %11814 }
 0x973   :  { %v6006_v10 = vpop.xlane.xlu1 %6005  ;;  %v6088_v45 = vsel %vm1583_vm3, %v14125_v60, 0.0  ;;  %v6063_v58 = vmul.f32 1.442695, %v6039_v15 }
 0x974   :  { %v6038_v50 = vsub.f32 %v14050_v38, %v6006_v10  ;;  %6089 = vadd.xlane.f32.xlu1 %v6088_v45 }
 0x976   :  { %v14131_v30 = vpop.eup %11816  ;;  %v6061_v20 = vmul.f32 1.442695, %v6038_v50 }
 0x977   :  { %v6091_v14 = vsel %vm1583_vm3, %v14131_v30, 0.0 }
 0x978   :  { %11822 = vpow2.f32 %v6061_v20  ;;  %6092 = vadd.xlane.f32.xlu0 %v6091_v14  ;;  %v6015_v21 = vpop.xlane.xlu0 %6014 }
 0x979   :  { %v6041_v28 = vsub.f32 %v14054_v24, %v6015_v21  ;;  %11824 = vpow2.f32 %v6063_v58 }
 0x97a   :  { %v14136_v31 = vpop.eup %11818 }
 0x97b   :  { %v14138_v11 = vpop.eup %11820  ;;  %v6067_v55 = vmul.f32 1.442695, %v6041_v28  ;;  %v6012_v38 = vpop.xlane.xlu1 %6011  ;;  %v6097_v34 = vsel %vm1583_vm3, %v14136_v31, 0.0 }
 0x97c   :  { %v6040_v51 = vsub.f32 %v14058_v46, %v6012_v38  ;;  %6098 = vadd.xlane.f32.xlu0 %v6097_v34  ;;  %v6094_v15 = vsel %vm1583_vm3, %v14138_v11, 0.0 }
 0x97d   :  { %6095 = vadd.xlane.f32.xlu1 %v6094_v15  ;;  %11826 = vpow2.f32 %v6067_v55 }
 0x97e   :  { %v6065_v10 = vmul.f32 1.442695, %v6040_v51 }
 0x980   :  { %11828 = vpow2.f32 %v6065_v10  ;;  %v6021_v24 = vpop.xlane.xlu0 %6020 }
 0x981   :  { %v6043_v45 = vsub.f32 %v14062_v1, %v6021_v24 }
 0x982   :  { %v14146_v50 = vpop.eup %11822 }
 0x983   :  { %v6071_v58 = vmul.f32 1.442695, %v6043_v45  ;;  %v6018_v20 = vpop.xlane.xlu1 %6017  ;;  %v6100_v14 = vsel %vm1583_vm3, %v14146_v50, 0.0  ;;  %v14150_v21 = vpop.eup %11824 }
 0x984   :  { %v6042_v46 = vsub.f32 %v14066_v0, %v6018_v20  ;;  %6101 = vadd.xlane.f32.xlu1 %v6100_v14  ;;  %v6103_v55 = vsel %vm1583_vm3, %v14150_v21, 0.0 }
 0x985   :  { %11830 = vpow2.f32 %v6071_v58 }
 0x986   :  { %v6069_v28 = vmul.f32 1.442695, %v6042_v46 }
 0x987   :  { %v14155_v38 = vpop.eup %11826 }
 0x988   :  { %11832 = vpow2.f32 %v6069_v28  ;;  %6104 = vadd.xlane.f32.xlu1 %v6103_v55  ;;  %v6109_v51 = vsel %vm1583_vm3, %v14155_v38, 0.0  ;;  %v6027_v46 = vpop.xlane.xlu0 %6026 }
 0x989   :  { %v6045_v28 = vsub.f32 %v14070_v49, %v6027_v46 }
 0x98a   :  { %v14157_v1 = vpop.eup %11828 }
 0x98b   :  { %v6024_v34 = vpop.xlane.xlu1 %6023  ;;  %v6106_v15 = vsel %vm1583_vm3, %v14157_v1, 0.0  ;;  %v6075_v55 = vmul.f32 1.442695, %v6045_v28 }
 0x98c   :  { %v6044_v0 = vsub.f32 %v14074_v13, %v6024_v34  ;;  %6110 = vadd.xlane.f32.xlu1 %v6109_v51  ;;  %6107 = vadd.xlane.f32.xlu0 %v6106_v15 }
 0x98e   :  { %v6073_v10 = vmul.f32 1.442695, %v6044_v0 }
 0x98f   :  { %v14164_v24 = vpop.eup %11830  ;;  %v14181_v34 = vpop.permute.xlu1 %6799 }
 0x990   :  { %11834 = vpow2.f32 %v6073_v10  ;;  %v6115_v45 = vsel %vm1583_vm3, %v14164_v24, 0.0 }
 0x991   :  { %6116 = vadd.xlane.f32.xlu1 %v6115_v45  ;;  %11836 = vpow2.f32 %v6075_v55 }
 0x992   :  { %v14168_v58 = vpop.eup %11832 }
 0x993   :  { %v6112_v20 = vsel %vm1583_vm3, %v14168_v58, 0.0 }
 0x994   :  { %6113 = vadd.xlane.f32.xlu0 %v6112_v20 }
 0x99a   :  { %v14172_v14 = vpop.eup %11834 }
 0x99b   :  { %v6118_v13 = vsel %vm1583_vm3, %v14172_v14, 0.0  ;;  %v14184_v0 = vpop.eup %11836 }
 0x99c   :  { %6119 = vadd.xlane.f32.xlu0 %v6118_v13  ;;  %v6121_v45 = vsel %vm1583_vm3, %v14184_v0, 0.0 }
 0x9a2   :  { %6895 = vrot.lane.b32.xlu1 %v12939_v62, %s12061_s17 }
 0x9b2   :  { %6847 = vrot.lane.b32.xlu0 %v12935_v32, %s12061_s17 }
 0x9c0   :  { %v6030_v51 = vpop.xlane.xlu1 %6029 }
 0x9c1   :  { %v6046_v15 = vsub.f32 %v14078_v35, %v6030_v51  ;;  %v14204_v35 = vpop.permute.xlu0 %6751 }
 0x9c3   :  { %v6077_v10 = vmul.f32 1.442695, %v6046_v15 }
 0x9c5   :  { %11838 = vpow2.f32 %v6077_v10  ;;  %v6277_v10 = vsel %vm2562_vm4, %v14088_v7, 0 }
 0x9c6   :  { %6122 = vadd.xlane.f32.xlu1 %v6121_v45 }
 0x9cf   :  { %v14188_v20 = vpop.eup %11838 }
 0x9d0   :  { %v6124_v49 = vsel %vm1583_vm3, %v14188_v20, 0.0 }
 0x9d1   :  { %6125 = vadd.xlane.f32.xlu0 %v6124_v49 }
 0x9d7   :  { %7076 = vrot.lane.b32.xlu1 %v12879_v39, %s12062_s20 }
 0x9db   :  { %7074 = vrot.lane.b32.xlu1 %v12879_v39, %s12063_s21 }
 0x9df   :  { %7176 = vrot.lane.b32.xlu1 %v12893_v53, %s12062_s20 }
 0x9e3   :  { %7174 = vrot.lane.b32.xlu1 %v12893_v53, %s12063_s21 }
 0x9e7   :  { %7276 = vrot.lane.b32.xlu1 %v12899_v3, %s12062_s20  ;;  %7026 = vrot.lane.b32.xlu0 %v12877_v36, %s12062_s20 }
 0x9eb   :  { %7274 = vrot.lane.b32.xlu1 %v12899_v3, %s12063_s21  ;;  %7024 = vrot.lane.b32.xlu0 %v12877_v36, %s12063_s21 }
 0x9ee   :  { %v6081_v13 = vpop.xlane.xlu0 %6080 }
 0x9ef   :  { %11840 = vrcp.f32 %v6081_v13  ;;  %7376 = vrot.lane.b32.xlu1 %v12907_v43, %s12062_s20  ;;  %7126 = vrot.lane.b32.xlu0 %v12889_v40, %s12062_s20 }
 0x9f3   :  { %7374 = vrot.lane.b32.xlu1 %v12907_v43, %s12063_s21  ;;  %7124 = vrot.lane.b32.xlu0 %v12889_v40, %s12063_s21 }
 0x9f6   :  { %v6087_v46 = vpop.xlane.xlu0 %6086 }
 0x9f7   :  { %11842 = vrcp.f32 %v6087_v46  ;;  %7476 = vrot.lane.b32.xlu1 %v12915_v12, %s12062_s20  ;;  %7226 = vrot.lane.b32.xlu0 %v12897_v63, %s12062_s20 }
 0x9f9   :  { %v11841_v28 = vpop.eup %11840  ;;  %v6084_v55 = vpop.xlane.xlu1 %6083 }
 0x9fa   :  { %11844 = vrcp.f32 %v6084_v55  ;;  %v6143_v51 = vmul.f32 %v11841_v28, %v14109_v26  ;;  %v6373_v55 = vsel %vm2562_vm4, %v14092_v9, 0 }
 0x9fb   :  { %7474 = vrot.lane.b32.xlu1 %v12915_v12, %s12063_s21  ;;  %7224 = vrot.lane.b32.xlu0 %v12897_v63, %s12063_s21 }
 0x9fc   :  { %v6159_v15 = vpack.c.bf16 %v6143_v51, %v6143_v51 }
 0x9fe   :  { %11258 = vmatmul.mubr.msk.bf16.vlgmr.msra.gmra.mrb[160].mxu0 %vm1583_vm3, %v6159_v15 }
 0x9ff   :  { %11268 = vmatpush3.bf16.msra.mxu0 %v6277_v10  ;;  %7576 = vrot.lane.b32.xlu1 %v12923_v52, %s12062_s20 }
 0xa00   :  { %7326 = vrot.lane.b32.xlu0 %v12903_v6, %s12062_s20  ;;  %11269 = vmatprep.mubr.msk.bf16.mxu0 %vm12054_vm2, %v15650_v44 }
 0xa01   :  { %v11843_v26 = vpop.eup %11842  ;;  %v6090_v45 = vpop.xlane.xlu1 %6089  ;;  %11279 = vmatprep.subr.bf16.mxu0 %v15650_v44 }
 0xa02   :  { %11846 = vrcp.f32 %v6090_v45  ;;  %v6145_v49 = vmul.f32 %v11843_v26, %v14114_v47  ;;  %v6421_v45 = vsel %vm2562_vm4, %v14090_v27, 0 }
 0xa03   :  { %7574 = vrot.lane.b32.xlu1 %v12923_v52, %s12063_s21 }
 0xa04   :  { %v11845_v7 = vpop.eup %11844  ;;  %7324 = vrot.lane.b32.xlu0 %v12903_v6, %s12063_s21  ;;  %v6161_v13 = vpack.c.bf16 %v6145_v49, %v6145_v49 }
 0xa05   :  { %v6093_v46 = vpop.xlane.xlu0 %6092  ;;  %v6144_v28 = vmul.f32 %v11845_v7, %v14119_v19  ;;  %v6325_v19 = vsel %vm2562_vm4, %v14086_v16, 0 }
 0xa06   :  { %11848 = vrcp.f32 %v6093_v46  ;;  %11270 = vmatmul.mubr.msk.bf16.vlgmr.msra.gmra.mrb[164].mxu0 %vm1583_vm3, %v6161_v13  ;;  %v6469_v46 = vsel %vm2562_vm4, %v14096_v54, 0 }
 0xa07   :  { %11280 = vmatpush3.bf16.msra.mxu0 %v6373_v55  ;;  %7676 = vrot.lane.b32.xlu1 %v12931_v41, %s12062_s20  ;;  %v6160_v47 = vpack.c.bf16 %v6144_v28, %v6144_v28 }
 0xa08   :  { %7426 = vrot.lane.b32.xlu0 %v12913_v8, %s12062_s20  ;;  %11281 = vmatprep.mubr.msk.bf16.mxu0 %vm12054_vm2, %v15650_v44 }
 0xa09   :  { %v6099_v51 = vpop.xlane.xlu0 %6098  ;;  %11264 = vmatmul.mubr.msk.bf16.vlgmr.msra.gmra.mrb[176].mxu1 %vm1583_vm3, %v6160_v47  ;;  %11291 = vmatprep.subr.bf16.mxu0 %v15650_v44 }
 0xa0a   :  { %11850 = vrcp.f32 %v6099_v51  ;;  %11274 = vmatpush3.bf16.msra.mxu1 %v6325_v19  ;;  %v6096_v9 = vpop.xlane.xlu1 %6095  ;;  %11275 = vmatprep.mubr.msk.bf16.mxu1 %vm12054_vm2, %v15650_v44 }
 0xa0b   :  { %11852 = vrcp.f32 %v6096_v9  ;;  %7674 = vrot.lane.b32.xlu1 %v12931_v41, %s12063_s21  ;;  %11285 = vmatprep.subr.bf16.mxu1 %v15650_v44 }
 0xa0c   :  { %v11847_v15 = vpop.eup %11846  ;;  %7424 = vrot.lane.b32.xlu0 %v12913_v8, %s12063_s21 }
 0xa0d   :  { %v6146_v16 = vmul.f32 %v11847_v15, %v14125_v60 }
 0xa0f   :  { %7776 = vrot.lane.b32.xlu1 %v12939_v62, %s12062_s20  ;;  %v6162_v10 = vpack.c.bf16 %v6146_v16, %v6146_v16 }
 0xa10   :  { %v11849_v26 = vpop.eup %11848  ;;  %7526 = vrot.lane.b32.xlu0 %v12919_v23, %s12062_s20 }
 0xa11   :  { %11276 = vmatmul.mubr.msk.bf16.vlgmr.msra.gmra.mrb[180].mxu1 %vm1583_vm3, %v6162_v10  ;;  %v6102_v49 = vpop.xlane.xlu1 %6101  ;;  %v6147_v7 = vmul.f32 %v11849_v26, %v14131_v30 }
 0xa12   :  { %11286 = vmatpush3.bf16.msra.mxu1 %v6421_v45  ;;  %11854 = vrcp.f32 %v6102_v49  ;;  %11287 = vmatprep.mubr.msk.bf16.mxu1 %vm12054_vm2, %v15650_v44 }
 0xa13   :  { %7774 = vrot.lane.b32.xlu1 %v12939_v62, %s12063_s21  ;;  %v6163_v60 = vpack.c.bf16 %v6147_v7, %v6147_v7  ;;  %11297 = vmatprep.subr.bf16.mxu1 %v15650_v44 }
 0xa14   :  { %v11851_v13 = vpop.eup %11850  ;;  %7524 = vrot.lane.b32.xlu0 %v12919_v23, %s12063_s21 }
 0xa15   :  { %v11853_v27 = vpop.eup %11852  ;;  %11282 = vmatmul.mubr.msk.bf16.vlgmr.msra.gmra.mrb[168].mxu0 %vm1583_vm3, %v6163_v60  ;;  %v6105_v30 = vpop.xlane.xlu1 %6104  ;;  %v6149_v55 = vmul.f32 %v11851_v13, %v14136_v31  ;;  %v6565_v31 = vsel %vm2562_vm4, %v14100_v48, 0 }
 0xa16   :  { %11292 = vmatpush3.bf16.msra.mxu0 %v6469_v46  ;;  %11856 = vrcp.f32 %v6105_v30  ;;  %v6148_v28 = vmul.f32 %v11853_v27, %v14138_v11  ;;  %11293 = vmatprep.mubr.msk.bf16.mxu0 %vm12054_vm2, %v15650_v44  ;;  %v6517_v11 = vsel %vm2562_vm4, %v14094_v25, 0 }
 0xa17   :  { %8064 = vrot.lane.b32.xlu1 %v12879_v39, %s12064_s0  ;;  %11303 = vmatprep.subr.bf16.mxu0 %v15650_v44  ;;  %v6165_v39 = vpack.c.bf16 %v6149_v55, %v6149_v55 }
 0xa18   :  { %7626 = vrot.lane.b32.xlu0 %v12929_v4, %s12062_s20  ;;  %v6164_v54 = vpack.c.bf16 %v6148_v28, %v6148_v28 }
 0xa19   :  { %v6108_v47 = vpop.xlane.xlu0 %6107  ;;  %v6111_v19 = vpop.xlane.xlu1 %6110 }
 0xa1a   :  { %11858 = vrcp.f32 %v6108_v47  ;;  %11288 = vmatmul.mubr.msk.bf16.vlgmr.msra.gmra.mrb[184].mxu1 %vm1583_vm3, %v6164_v54 }
 0xa1b   :  { %11298 = vmatpush3.bf16.msra.mxu1 %v6517_v11  ;;  %11860 = vrcp.f32 %v6111_v19  ;;  %8160 = vrot.lane.b32.xlu1 %v12893_v53, %s12064_s0 }
 0xa1c   :  { %v11855_v51 = vpop.eup %11854  ;;  %7624 = vrot.lane.b32.xlu0 %v12929_v4, %s12063_s21  ;;  %11299 = vmatprep.mubr.msk.bf16.mxu1 %vm12054_vm2, %v15650_v44 }
 0xa1d   :  { %11294 = vmatmul.mubr.msk.bf16.vlgmr.msra.gmra.mrb[172].mxu0 %vm1583_vm3, %v6165_v39  ;;  %11309 = vmatprep.subr.bf16.mxu1 %v15650_v44  ;;  %v6150_v25 = vmul.f32 %v11855_v51, %v14146_v50  ;;  %v6613_v50 = vsel %vm2562_vm4, %v14098_v61, 0 }
 0xa1e   :  { %11304 = vmatpush3.bf16.msra.mxu0 %v6565_v31  ;;  %v6117_v9 = vpop.xlane.xlu1 %6116  ;;  %11305 = vmatprep.mubr.msk.bf16.mxu0 %vm12054_vm2, %v15650_v44 }
 0xa1f   :  { %8256 = vrot.lane.b32.xlu1 %v12899_v3, %s12064_s0  ;;  %v6166_v53 = vpack.c.bf16 %v6150_v25, %v6150_v25  ;;  %11315 = vmatprep.subr.bf16.mxu0 %v15650_v44  ;;  %11862 = vrcp.f32 %v6117_v9 }
 0xa20   :  { %v11857_v15 = vpop.eup %11856  ;;  %7726 = vrot.lane.b32.xlu0 %v12935_v32, %s12062_s20 }
 0xa21   :  { %v6114_v48 = vpop.xlane.xlu0 %6113  ;;  %v6151_v16 = vmul.f32 %v11857_v15, %v14150_v21  ;;  %v6661_v21 = vsel %vm2562_vm4, %v14102_v22, 0  ;;  %v6709_v22 = vsel %vm2562_vm4, %v14105_v37, 0 }
 0xa22   :  { %11864 = vrcp.f32 %v6114_v48  ;;  %11300 = vmatmul.mubr.msk.bf16.vlgmr.msra.gmra.mrb[188].mxu1 %vm1583_vm3, %v6166_v53 }
 0xa23   :  { %11310 = vmatpush3.bf16.msra.mxu1 %v6613_v50  ;;  %8352 = vrot.lane.b32.xlu1 %v12907_v43, %s12064_s0  ;;  %v6167_v3 = vpack.c.bf16 %v6151_v16, %v6151_v16 }
 0xa24   :  { %v11859_v10 = vpop.eup %11858  ;;  %7724 = vrot.lane.b32.xlu0 %v12935_v32, %s12063_s21  ;;  %11311 = vmatprep.mubr.msk.bf16.mxu1 %vm12054_vm2, %v15650_v44 }
 0xa25   :  { %v11861_v26 = vpop.eup %11860  ;;  %11306 = vmatmul.mubr.msk.bf16.vlgmr.msra.gmra.mrb[176].mxu0 %vm1583_vm3, %v6167_v3  ;;  %11321 = vmatprep.subr.bf16.mxu1 %v15650_v44  ;;  %v6152_v61 = vmul.f32 %v11859_v10, %v14157_v1 }
 0xa26   :  { %11316 = vmatpush3.bf16.msra.mxu0 %v6661_v21  ;;  %11317 = vmatprep.mubr.msk.bf16.mxu0 %vm12054_vm2, %v15650_v44  ;;  %v6153_v45 = vmul.f32 %v11861_v26, %v14155_v38 }
 0xa27   :  { %v6168_v43 = vpack.c.bf16 %v6152_v61, %v6152_v61  ;;  %11327 = vmatprep.subr.bf16.mxu0 %v15650_v44 }
 0xa28   :  { %8016 = vrot.lane.b32.xlu0 %v12877_v36, %s12064_s0  ;;  %v6169_v7 = vpack.c.bf16 %v6153_v45, %v6153_v45  ;;  %v6757_v36 = vsel %vm2562_vm4, %v14204_v35, 0 }
 0xa29   :  { %v6120_v49 = vpop.xlane.xlu0 %6119  ;;  %v11863_v1 = vpop.eup %11862 }
 0xa2a   :  { %11866 = vrcp.f32 %v6120_v49  ;;  %11312 = vmatmul.mubr.msk.bf16.vlgmr.msra.gmra.mrb[192].mxu1 %vm1583_vm3, %v6168_v43  ;;  %v6155_v13 = vmul.f32 %v11863_v1, %v14164_v24 }
 0xa2b   :  { %11322 = vmatpush3.bf16.msra.mxu1 %v6709_v22  ;;  %11323 = vmatprep.mubr.msk.bf16.mxu1 %vm12054_vm2, %v15650_v44 }
 0xa2c   :  { %v11865_v60 = vpop.eup %11864  ;;  %8112 = vrot.lane.b32.xlu0 %v12889_v40, %s12064_s0  ;;  %11333 = vmatprep.subr.bf16.mxu1 %v15650_v44  ;;  %v6805_v40 = vsel %vm2562_vm4, %v14181_v34, 0  ;;  %v6896_v34 = vpop.permute.xlu1 %6895 }
 0xa2d   :  { %11318 = vmatmul.mubr.msk.bf16.vlgmr.msra.gmra.mrb[180].mxu0 %vm1583_vm3, %v6169_v7  ;;  %v6154_v37 = vmul.f32 %v11865_v60, %v14168_v58  ;;  %v6848_v35 = vpop.permute.xlu0 %6847  ;;  %v6171_v58 = vpack.c.bf16 %v6155_v13, %v6155_v13  ;;  %v6901_v30 = vsel %vm2562_vm4, %v6896_v34, 0 }
 0xa2e   :  { %11328 = vmatpush3.bf16.msra.mxu0 %v6757_v36  ;;  %11329 = vmatprep.mubr.msk.bf16.mxu0 %vm12054_vm2, %v15650_v44  ;;  %v6853_v24 = vsel %vm2562_vm4, %v6848_v35, 0 }
 0xa2f   :  { %v6170_v38 = vpack.c.bf16 %v6154_v37, %v6154_v37  ;;  %11339 = vmatprep.subr.bf16.mxu0 %v15650_v44 }
 0xa30   :  { %8208 = vrot.lane.b32.xlu0 %v12897_v63, %s12064_s0 }
 0xa32   :  { %11324 = vmatmul.mubr.msk.bf16.vlgmr.msra.gmra.mrb[196].mxu1 %vm1583_vm3, %v6170_v38 }
 0xa33   :  { %11334 = vmatpush3.bf16.msra.mxu1 %v6805_v40  ;;  %11335 = vmatprep.mubr.msk.bf16.mxu1 %vm12054_vm2, %v15650_v44 }
 0xa34   :  { %v11867_v27 = vpop.eup %11866  ;;  %8304 = vrot.lane.b32.xlu0 %v12903_v6, %s12064_s0  ;;  %11345 = vmatprep.subr.bf16.mxu1 %v15650_v44 }
 0xa35   :  { %11330 = vmatmul.mubr.msk.bf16.vlgmr.msra.gmra.mrb[184].mxu0 %vm1583_vm3, %v6171_v58  ;;  %v6156_v63 = vmul.f32 %v11867_v27, %v14172_v14 }
 0xa36   :  { %11340 = vmatpush3.bf16.msra.mxu0 %v6853_v24  ;;  %11341 = vmatprep.mubr.msk.bf16.mxu0 %vm12054_vm2, %v15650_v44 }
 0xa37   :  { %v6172_v46 = vpack.c.bf16 %v6156_v63, %v6156_v63  ;;  %11351 = vmatprep.subr.bf16.mxu0 %v15650_v44 }
 0xa3a   :  { %11336 = vmatmul.mubr.msk.bf16.vlgmr.msra.gmra.mrb[200].mxu1 %vm1583_vm3, %v6172_v46 }
 0xa3b   :  { %11346 = vmatpush3.bf16.msra.mxu1 %v6901_v30  ;;  %11347 = vmatprep.mubr.msk.bf16.mxu1 %vm12054_vm2, %v15650_v44 }
 0xa3c   :  { %11357 = vmatprep.subr.bf16.mxu1 %v15650_v44 }
 0xa53   :  { %v6123_v6 = vpop.xlane.xlu1 %6122 }
 0xa54   :  { %11868 = vrcp.f32 %v6123_v6 }
 0xa57   :  { %v7077_v14 = vpop.permute.xlu1 %7076 }
 0xa58   :  { %v7082_v3 = vsel %vm1583_vm3, %v7077_v14, 0 }
 0xa5b   :  { %v7075_v28 = vpop.permute.xlu1 %7074 }
 0xa5e   :  { %v11869_v55 = vpop.eup %11868  ;;  %v6126_v54 = vpop.xlane.xlu0 %6125 }
 0xa5f   :  { %11870 = vrcp.f32 %v6126_v54  ;;  %v7177_v47 = vpop.permute.xlu1 %7176  ;;  %v6157_v19 = vmul.f32 %v11869_v55, %v14184_v0 }
 0xa60   :  { %v7182_v43 = vsel %vm1583_vm3, %v7177_v47, 0 }
 0xa61   :  { %v6173_v11 = vpack.c.bf16 %v6157_v19, %v6157_v19 }
 0xa62   :  { %v7027_v39 = vpop.permute.xlu0 %7026 }
 0xa63   :  { %v7032_v51 = vsel %vm1583_vm3, %v7027_v39, 0  ;;  %11342 = vmatmul.mubr.msk.bf16.vlgmr.msra.gmra.mrb[188].mxu0 %vm1583_vm3, %v6173_v11  ;;  %v7175_v31 = vpop.permute.xlu1 %7174 }
 0xa64   :  { %11352 = vmatpush3.bf16.xpose.msra.mxu0 %v7032_v51  ;;  %11353 = vmatprep.mubr.msk.bf16.mxu0 %vm12054_vm2, %v15650_v44 }
 0xa65   :  { %11363 = vmatprep.subr.bf16.mxu0 %v15650_v44 }
 0xa66   :  { %v7025_v25 = vpop.permute.xlu0 %7024 }
 0xa67   :  { %v7277_v9 = vpop.permute.xlu1 %7276 }
 0xa68   :  { %v7282_v7 = vsel %vm1583_vm3, %v7277_v9, 0 }
 0xa69   :  { %v11871_v53 = vpop.eup %11870 }
 0xa6a   :  { %v7127_v15 = vpop.permute.xlu0 %7126  ;;  %v6158_v48 = vmul.f32 %v11871_v53, %v14188_v20 }
 0xa6b   :  { %v7132_v0 = vsel %vm1583_vm3, %v7127_v15, 0  ;;  %11354 = vmatmul.mubr.msk.bf16.vlgmr.msra.gmra.mrb[192].mxu0 %vm1583_vm3, %v7025_v25  ;;  %v7275_v16 = vpop.permute.xlu1 %7274 }
 0xa6c   :  { %11364 = vmatpush3.bf16.xpose.msra.mxu0 %v7132_v0  ;;  %v6174_v50 = vpack.c.bf16 %v6158_v48, %v6158_v48  ;;  %11365 = vmatprep.mubr.msk.bf16.mxu0 %vm12054_vm2, %v15650_v44 }
 0xa6d   :  { %11375 = vmatprep.subr.bf16.mxu0 %v15650_v44 }
 0xa6e   :  { %v7125_v10 = vpop.permute.xlu0 %7124  ;;  %11348 = vmatmul.mubr.msk.bf16.vlgmr.msra.gmra.mrb[204].mxu1 %vm1583_vm3, %v6174_v50 }
 0xa6f   :  { %11358 = vmatpush3.bf16.xpose.msra.mxu1 %v7082_v3  ;;  %v7377_v26 = vpop.permute.xlu1 %7376  ;;  %11359 = vmatprep.mubr.msk.bf16.mxu1 %vm12054_vm2, %v15650_v44 }
 0xa70   :  { %11369 = vmatprep.subr.bf16.mxu1 %v15650_v44  ;;  %v7382_v13 = vsel %vm1583_vm3, %v7377_v26, 0 }
 0xa72   :  { %v7227_v20 = vpop.permute.xlu0 %7226 }
 0xa73   :  { %v7232_v21 = vsel %vm1583_vm3, %v7227_v20, 0  ;;  %11366 = vmatmul.mubr.msk.bf16.vlgmr.msra.gmra.mrb[196].mxu0 %vm1583_vm3, %v7125_v10  ;;  %v7375_v61 = vpop.permute.xlu1 %7374 }
 0xa74   :  { %11376 = vmatpush3.bf16.xpose.msra.mxu0 %v7232_v21  ;;  %11377 = vmatprep.mubr.msk.bf16.mxu0 %vm12054_vm2, %v15650_v44 }
 0xa75   :  { %11387 = vmatprep.subr.bf16.mxu0 %v15650_v44 }
 0xa76   :  { %v7225_v45 = vpop.permute.xlu0 %7224  ;;  %11360 = vmatmul.mubr.msk.bf16.vlgmr.msra.gmra.mrb[208].mxu1 %vm1583_vm3, %v7075_v28 }
 0xa77   :  { %11370 = vmatpush3.bf16.xpose.msra.mxu1 %v7182_v43  ;;  %11371 = vmatprep.mubr.msk.bf16.mxu1 %vm12054_vm2, %v15650_v44  ;;  %v7477_v22 = vpop.permute.xlu1 %7476 }
 0xa78   :  { %11381 = vmatprep.subr.bf16.mxu1 %v15650_v44  ;;  %v7482_v63 = vsel %vm1583_vm3, %v7477_v22, 0 }
 0xa7a   :  { %v7327_v49 = vpop.permute.xlu0 %7326 }
 0xa7b   :  { %v7332_v1 = vsel %vm1583_vm3, %v7327_v49, 0  ;;  %11378 = vmatmul.mubr.msk.bf16.vlgmr.msra.gmra.mrb[200].mxu0 %vm1583_vm3, %v7225_v45  ;;  %v7475_v36 = vpop.permute.xlu1 %7474 }
 0xa7c   :  { %11388 = vmatpush3.bf16.xpose.msra.mxu0 %v7332_v1  ;;  %11389 = vmatprep.mubr.msk.bf16.mxu0 %vm12054_vm2, %v15650_v44 }
 0xa7d   :  { %11399 = vmatprep.subr.bf16.mxu0 %v15650_v44 }
 0xa7e   :  { %v7325_v60 = vpop.permute.xlu0 %7324  ;;  %11372 = vmatmul.mubr.msk.bf16.vlgmr.msra.gmra.mrb[212].mxu1 %vm1583_vm3, %v7175_v31 }
 0xa7f   :  { %11382 = vmatpush3.bf16.xpose.msra.mxu1 %v7282_v7  ;;  %11383 = vmatprep.mubr.msk.bf16.mxu1 %vm12054_vm2, %v15650_v44  ;;  %v7577_v35 = vpop.permute.xlu1 %7576 }
 0xa80   :  { %11393 = vmatprep.subr.bf16.mxu1 %v15650_v44  ;;  %v7582_v14 = vsel %vm1583_vm3, %v7577_v35, 0 }
 0xa82   :  { %v7427_v37 = vpop.permute.xlu0 %7426 }
 0xa83   :  { %v7432_v38 = vsel %vm1583_vm3, %v7427_v37, 0  ;;  %11390 = vmatmul.mubr.msk.bf16.vlgmr.msra.gmra.mrb[204].mxu0 %vm1583_vm3, %v7325_v60  ;;  %v7575_v24 = vpop.permute.xlu1 %7574 }
 0xa84   :  { %11400 = vmatpush3.bf16.xpose.msra.mxu0 %v7432_v38  ;;  %11401 = vmatprep.mubr.msk.bf16.mxu0 %vm12054_vm2, %v15650_v44 }
 0xa85   :  { %11411 = vmatprep.subr.bf16.mxu0 %v15650_v44 }
 0xa86   :  { %v7425_v40 = vpop.permute.xlu0 %7424  ;;  %11384 = vmatmul.mubr.msk.bf16.vlgmr.msra.gmra.mrb[216].mxu1 %vm1583_vm3, %v7275_v16 }
 0xa87   :  { %11394 = vmatpush3.bf16.xpose.msra.mxu1 %v7382_v13  ;;  %11395 = vmatprep.mubr.msk.bf16.mxu1 %vm12054_vm2, %v15650_v44  ;;  %v7677_v30 = vpop.permute.xlu1 %7676 }
 0xa88   :  { %11405 = vmatprep.subr.bf16.mxu1 %v15650_v44  ;;  %v7682_v19 = vsel %vm1583_vm3, %v7677_v30, 0 }
 0xa8a   :  { %v7527_v58 = vpop.permute.xlu0 %7526 }
 0xa8b   :  { %v7532_v27 = vsel %vm1583_vm3, %v7527_v58, 0  ;;  %11402 = vmatmul.mubr.msk.bf16.vlgmr.msra.gmra.mrb[208].mxu0 %vm1583_vm3, %v7425_v40  ;;  %v7675_v55 = vpop.permute.xlu1 %7674 }
 0xa8c   :  { %11412 = vmatpush3.bf16.xpose.msra.mxu0 %v7532_v27  ;;  %11413 = vmatprep.mubr.msk.bf16.mxu0 %vm12054_vm2, %v15650_v44 }
 0xa8d   :  { %11423 = vmatprep.subr.bf16.mxu0 %v15650_v44 }
 0xa8e   :  { %v7525_v34 = vpop.permute.xlu0 %7524  ;;  %11396 = vmatmul.mubr.msk.bf16.vlgmr.msra.gmra.mrb[220].mxu1 %vm1583_vm3, %v7375_v61 }
 0xa8f   :  { %11406 = vmatpush3.bf16.xpose.msra.mxu1 %v7482_v63  ;;  %11407 = vmatprep.mubr.msk.bf16.mxu1 %vm12054_vm2, %v15650_v44  ;;  %v7777_v39 = vpop.permute.xlu1 %7776 }
 0xa90   :  { %11417 = vmatprep.subr.bf16.mxu1 %v15650_v44  ;;  %v7782_v9 = vsel %vm1583_vm3, %v7777_v39, 0 }
 0xa92   :  { %v7627_v46 = vpop.permute.xlu0 %7626 }
 0xa93   :  { %v7632_v6 = vsel %vm1583_vm3, %v7627_v46, 0  ;;  %11414 = vmatmul.mubr.msk.bf16.vlgmr.msra.gmra.mrb[212].mxu0 %vm1583_vm3, %v7525_v34  ;;  %v7775_v25 = vpop.permute.xlu1 %7774 }
 0xa94   :  { %11424 = vmatpush3.bf16.xpose.msra.mxu0 %v7632_v6  ;;  %11425 = vmatprep.mubr.msk.bf16.mxu0 %vm12054_vm2, %v15650_v44 }
 0xa95   :  { %11435 = vmatprep.subr.bf16.mxu0 %v15650_v44 }
 0xa96   :  { %v7625_v28 = vpop.permute.xlu0 %7624  ;;  %11408 = vmatmul.mubr.msk.bf16.vlgmr.msra.gmra.mrb[224].mxu1 %vm1583_vm3, %v7475_v36 }
 0xa97   :  { %11418 = vmatpush3.bf16.xpose.msra.mxu1 %v7582_v14  ;;  %11419 = vmatprep.mubr.msk.bf16.mxu1 %vm12054_vm2, %v15650_v44  ;;  %v8065_v53 = vpop.permute.xlu1 %8064 }
 0xa98   :  { %11429 = vmatprep.subr.bf16.mxu1 %v15650_v44  ;;  %v8070_v15 = vsel %vm2562_vm4, %v8065_v53, 0 }
 0xa9a   :  { %v7727_v54 = vpop.permute.xlu0 %7726 }
 0xa9b   :  { %v7732_v47 = vsel %vm1583_vm3, %v7727_v54, 0  ;;  %11426 = vmatmul.mubr.msk.bf16.vlgmr.msra.gmra.mrb[216].mxu0 %vm1583_vm3, %v7625_v28 }
 0xa9c   :  { %11436 = vmatpush3.bf16.xpose.msra.mxu0 %v7732_v47  ;;  %11437 = vmatprep.mubr.msk.bf16.mxu0 %vm12054_vm2, %v15650_v44 }
 0xa9d   :  { %11447 = vmatprep.subr.bf16.mxu0 %v15650_v44 }
 0xa9e   :  { %v7725_v11 = vpop.permute.xlu0 %7724  ;;  %11420 = vmatmul.mubr.msk.bf16.vlgmr.msra.gmra.mrb[228].mxu1 %vm1583_vm3, %v7575_v24 }
 0xa9f   :  { %11430 = vmatpush3.bf16.xpose.msra.mxu1 %v7682_v19  ;;  %11431 = vmatprep.mubr.msk.bf16.mxu1 %vm12054_vm2, %v15650_v44 }
 0xaa0   :  { %11441 = vmatprep.subr.bf16.mxu1 %v15650_v44 }
 0xaa2   :  { %v8017_v51 = vpop.permute.xlu0 %8016 }
 0xaa3   :  { %v8022_v31 = vsel %vm2562_vm4, %v8017_v51, 0  ;;  %11438 = vmatmul.mubr.msk.bf16.vlgmr.msra.gmra.mrb[220].mxu0 %vm1583_vm3, %v7725_v11 }
 0xaa4   :  { %11448 = vmatpush3.bf16.msra.mxu0 %v8022_v31  ;;  %11449 = vmatprep.mubr.msk.bf16.mxu0 %vm12054_vm2, %v15650_v44 }
 0xaa5   :  { %11459 = vmatprep.subr.bf16.mxu0 %v15650_v44 }
 0xaa6   :  { %11432 = vmatmul.mubr.msk.bf16.vlgmr.msra.gmra.mrb[232].mxu1 %vm1583_vm3, %v7675_v55 }
 0xaa7   :  { %11442 = vmatpush3.bf16.xpose.msra.mxu1 %v7782_v9  ;;  %11443 = vmatprep.mubr.msk.bf16.mxu1 %vm12054_vm2, %v15650_v44 }
 0xaa8   :  { %11453 = vmatprep.subr.bf16.mxu1 %v15650_v44 }
 0xaae   :  { %11444 = vmatmul.mubr.msk.bf16.vlgmr.msra.gmra.mrb[236].mxu1 %vm1583_vm3, %v7775_v25 }
 0xaaf   :  { %11454 = vmatpush3.bf16.msra.mxu1 %v8070_v15  ;;  %11455 = vmatprep.mubr.msk.bf16.mxu1 %vm12054_vm2, %v15650_v44 }
 0xab0   :  { %11465 = vmatprep.subr.bf16.mxu1 %v15650_v44 }
 0xad1   :  { %v14462_v48 = vpop.f32.mrb[160].mxu0 }
 0xad2   :  { %v11259_v0 = vpop.f32.mrb[161].mxu0 }
 0xad3   :  { %v6220_v16 = vpop.f32.mrb[162].mxu0 }
 0xad4   :  { %v11260_v50 = vpop.f32.mrb[163].mxu0 }
 0xad9   :  { %v14464_v3 = vpop.f32.mrb[164].mxu0 }
 0xada   :  { %v11271_v10 = vpop.f32.mrb[165].mxu0 }
 0xadb   :  { %v6316_v26 = vpop.f32.mrb[166].mxu0 }
 0xadc   :  { %v14466_v20 = vpop.f32.mrb[176].mxu1  ;;  %v11272_v21 = vpop.f32.mrb[167].mxu0 }
 0xadd   :  { %v11265_v61 = vpop.f32.mrb[177].mxu1 }
 0xade   :  { %v6268_v43 = vpop.f32.mrb[178].mxu1 }
 0xadf   :  { %v11266_v45 = vpop.f32.mrb[179].mxu1 }
 0xae4   :  { %v14468_v49 = vpop.f32.mrb[180].mxu1 }
 0xae5   :  { %v11277_v22 = vpop.f32.mrb[181].mxu1 }
 0xae6   :  { %v6364_v1 = vpop.f32.mrb[182].mxu1 }
 0xae7   :  { %v11278_v7 = vpop.f32.mrb[183].mxu1 }
 0xae8   :  { %v14470_v60 = vpop.f32.mrb[168].mxu0 }
 0xae9   :  { %v11283_v36 = vpop.f32.mrb[169].mxu0 }
 0xaea   :  { %v6412_v37 = vpop.f32.mrb[170].mxu0 }
 0xaeb   :  { %v11284_v38 = vpop.f32.mrb[171].mxu0 }
 0xaed   :  { %v14472_v13 = vpop.f32.mrb[184].mxu1 }
 0xaee   :  { %v11289_v40 = vpop.f32.mrb[185].mxu1 }
 0xaef   :  { %v6460_v35 = vpop.f32.mrb[186].mxu1 }
 0xaf0   :  { %v11290_v58 = vpop.f32.mrb[187].mxu1  ;;  %v14474_v27 = vpop.f32.mrb[172].mxu0 }
 0xaf1   :  { %v11295_v24 = vpop.f32.mrb[173].mxu0 }
 0xaf2   :  { %v6508_v63 = vpop.f32.mrb[174].mxu0 }
 0xaf3   :  { %v11296_v34 = vpop.f32.mrb[175].mxu0 }
 0xaf5   :  { %v14476_v46 = vpop.f32.mrb[188].mxu1 }
 0xaf6   :  { %v11301_v30 = vpop.f32.mrb[189].mxu1 }
 0xaf7   :  { %v6556_v6 = vpop.f32.mrb[190].mxu1 }
 0xaf8   :  { %v11302_v14 = vpop.f32.mrb[191].mxu1  ;;  %v14478_v28 = vpop.f32.mrb[176].mxu0 }
 0xaf9   :  { %v11307_v55 = vpop.f32.mrb[177].mxu0 }
 0xafa   :  { %v6604_v54 = vpop.f32.mrb[178].mxu0 }
 0xafb   :  { %v11308_v47 = vpop.f32.mrb[179].mxu0 }
 0xafd   :  { %v14480_v19 = vpop.f32.mrb[192].mxu1 }
 0xafe   :  { %v11313_v11 = vpop.f32.mrb[193].mxu1 }
 0xaff   :  { %v6652_v39 = vpop.f32.mrb[194].mxu1 }
 0xb00   :  { %v11314_v51 = vpop.f32.mrb[195].mxu1  ;;  %v14482_v31 = vpop.f32.mrb[180].mxu0 }
 0xb01   :  { %v11319_v25 = vpop.f32.mrb[181].mxu0 }
 0xb02   :  { %v6700_v9 = vpop.f32.mrb[182].mxu0 }
 0xb03   :  { %v11320_v53 = vpop.f32.mrb[183].mxu0 }
 0xb05   :  { %v14484_v15 = vpop.f32.mrb[196].mxu1 }
 0xb06   :  { %v11325_v0 = vpop.f32.mrb[197].mxu1 }
 0xb07   :  { %v6748_v16 = vpop.f32.mrb[198].mxu1 }
 0xb08   :  { %v11326_v50 = vpop.f32.mrb[199].mxu1  ;;  %v14486_v10 = vpop.f32.mrb[184].mxu0 }
 0xb09   :  { %v11331_v26 = vpop.f32.mrb[185].mxu0 }
 0xb0a   :  { %v6796_v21 = vpop.f32.mrb[186].mxu0 }
 0xb0b   :  { %v11332_v61 = vpop.f32.mrb[187].mxu0 }
 0xb0d   :  { %v14488_v43 = vpop.f32.mrb[200].mxu1 }
 0xb0e   :  { %v11337_v45 = vpop.f32.mrb[201].mxu1 }
 0xb0f   :  { %v6844_v22 = vpop.f32.mrb[202].mxu1 }
 0xb10   :  { %v11338_v1 = vpop.f32.mrb[203].mxu1 }
 0xb36   :  { %v14490_v7 = vpop.f32.mrb[188].mxu0 }
 0xb37   :  { %v11343_v36 = vpop.f32.mrb[189].mxu0 }
 0xb38   :  { %v6892_v37 = vpop.f32.mrb[190].mxu0 }
 0xb39   :  { %v11344_v38 = vpop.f32.mrb[191].mxu0 }
 0xb3e   :  { %v14492_v40 = vpop.f32.mrb[192].mxu0 }
 0xb3f   :  { %v11355_v35 = vpop.f32.mrb[193].mxu0  ;;  %v7824_v58 = vsel %vm1583_vm3, %v14492_v40, -inf }
 0xb40   :  { %7825 = vmax.xlane.f32.xlu0 %v7824_v58  ;;  %v7071_v24 = vpop.f32.mrb[194].mxu0 }
 0xb41   :  { %v14496_v63 = vpop.f32.mrb[204].mxu1  ;;  %v11356_v34 = vpop.f32.mrb[195].mxu0 }
 0xb42   :  { %v11349_v30 = vpop.f32.mrb[205].mxu1 }
 0xb43   :  { %v6940_v6 = vpop.f32.mrb[206].mxu1 }
 0xb44   :  { %v11350_v14 = vpop.f32.mrb[207].mxu1 }
 0xb46   :  { %v14498_v55 = vpop.f32.mrb[196].mxu0 }
 0xb47   :  { %v11367_v54 = vpop.f32.mrb[197].mxu0  ;;  %v7830_v47 = vsel %vm1583_vm3, %v14498_v55, -inf }
 0xb48   :  { %7831 = vmax.xlane.f32.xlu0 %v7830_v47  ;;  %v7171_v11 = vpop.f32.mrb[198].mxu0 }
 0xb49   :  { %v14502_v39 = vpop.f32.mrb[208].mxu1  ;;  %v11368_v51 = vpop.f32.mrb[199].mxu0 }
 0xb4a   :  { %v11361_v25 = vpop.f32.mrb[209].mxu1  ;;  %v7827_v9 = vsel %vm1583_vm3, %v14502_v39, -inf }
 0xb4b   :  { %7828 = vmax.xlane.f32.xlu1 %v7827_v9  ;;  %v7121_v53 = vpop.f32.mrb[210].mxu1 }
 0xb4c   :  { %v11362_v0 = vpop.f32.mrb[211].mxu1 }
 0xb4e   :  { %v14506_v16 = vpop.f32.mrb[200].mxu0 }
 0xb4f   :  { %v11379_v50 = vpop.f32.mrb[201].mxu0  ;;  %v7836_v38 = vsel %vm1583_vm3, %v14506_v16, -inf }
 0xb50   :  { %v7271_v26 = vpop.f32.mrb[202].mxu0 }
 0xb51   :  { %v14508_v21 = vpop.f32.mrb[212].mxu1  ;;  %v11380_v61 = vpop.f32.mrb[203].mxu0 }
 0xb52   :  { %v11373_v45 = vpop.f32.mrb[213].mxu1  ;;  %v7833_v22 = vsel %vm1583_vm3, %v14508_v21, -inf }
 0xb53   :  { %7834 = vmax.xlane.f32.xlu0 %v7833_v22  ;;  %v7221_v1 = vpop.f32.mrb[214].mxu1 }
 0xb54   :  { %v11374_v36 = vpop.f32.mrb[215].mxu1 }
 0xb56   :  { %v14512_v37 = vpop.f32.mrb[204].mxu0 }
 0xb57   :  { %v11391_v35 = vpop.f32.mrb[205].mxu0  ;;  %7837 = vmax.xlane.f32.xlu0 %v7836_v38  ;;  %v7842_v6 = vsel %vm1583_vm3, %v14512_v37, -inf }
 0xb58   :  { %v7371_v58 = vpop.f32.mrb[206].mxu0 }
 0xb59   :  { %v14516_v24 = vpop.f32.mrb[216].mxu1  ;;  %v11392_v34 = vpop.f32.mrb[207].mxu0 }
 0xb5a   :  { %v11385_v30 = vpop.f32.mrb[217].mxu1  ;;  %v7839_v14 = vsel %vm1583_vm3, %v14516_v24, -inf }
 0xb5b   :  { %7843 = vmax.xlane.f32.xlu0 %v7842_v6  ;;  %7840 = vmax.xlane.f32.xlu1 %v7839_v14  ;;  %v7321_v54 = vpop.f32.mrb[218].mxu1 }
 0xb5c   :  { %v11386_v47 = vpop.f32.mrb[219].mxu1 }
 0xb5e   :  { %v14522_v11 = vpop.f32.mrb[208].mxu0 }
 0xb5f   :  { %v11403_v51 = vpop.f32.mrb[209].mxu0  ;;  %v7848_v25 = vsel %vm1583_vm3, %v14522_v11, -inf }
 0xb60   :  { %v7471_v9 = vpop.f32.mrb[210].mxu0  ;;  %7849 = vmax.xlane.f32.xlu0 %v7848_v25 }
 0xb61   :  { %v14526_v53 = vpop.f32.mrb[220].mxu1  ;;  %v11404_v0 = vpop.f32.mrb[211].mxu0 }
 0xb62   :  { %v11397_v50 = vpop.f32.mrb[221].mxu1  ;;  %v7845_v26 = vsel %vm1583_vm3, %v14526_v53, -inf }
 0xb63   :  { %7846 = vmax.xlane.f32.xlu1 %v7845_v26  ;;  %v7421_v61 = vpop.f32.mrb[222].mxu1 }
 0xb64   :  { %v11398_v45 = vpop.f32.mrb[223].mxu1 }
 0xb66   :  { %v14530_v22 = vpop.f32.mrb[212].mxu0 }
 0xb67   :  { %v11415_v1 = vpop.f32.mrb[213].mxu0  ;;  %v7854_v36 = vsel %vm1583_vm3, %v14530_v22, -inf }
 0xb68   :  { %v7571_v38 = vpop.f32.mrb[214].mxu0  ;;  %7855 = vmax.xlane.f32.xlu0 %v7854_v36 }
 0xb69   :  { %v14534_v35 = vpop.f32.mrb[224].mxu1  ;;  %v11416_v58 = vpop.f32.mrb[215].mxu0 }
 0xb6a   :  { %v11409_v34 = vpop.f32.mrb[225].mxu1  ;;  %v7851_v30 = vsel %vm1583_vm3, %v14534_v35, -inf }
 0xb6b   :  { %7852 = vmax.xlane.f32.xlu1 %v7851_v30  ;;  %v7521_v6 = vpop.f32.mrb[226].mxu1 }
 0xb6c   :  { %v11410_v14 = vpop.f32.mrb[227].mxu1 }
 0xb6e   :  { %v14538_v54 = vpop.f32.mrb[216].mxu0 }
 0xb6f   :  { %v11427_v47 = vpop.f32.mrb[217].mxu0  ;;  %v7860_v51 = vsel %vm1583_vm3, %v14538_v54, -inf }
 0xb70   :  { %v7671_v25 = vpop.f32.mrb[218].mxu0  ;;  %7861 = vmax.xlane.f32.xlu0 %v7860_v51 }
 0xb71   :  { %v14542_v9 = vpop.f32.mrb[228].mxu1  ;;  %v11428_v0 = vpop.f32.mrb[219].mxu0 }
 0xb72   :  { %v11421_v50 = vpop.f32.mrb[229].mxu1  ;;  %v7857_v26 = vsel %vm1583_vm3, %v14542_v9, -inf }
 0xb73   :  { %7858 = vmax.xlane.f32.xlu1 %v7857_v26  ;;  %v7621_v61 = vpop.f32.mrb[230].mxu1 }
 0xb74   :  { %v11422_v45 = vpop.f32.mrb[231].mxu1 }
 0xb75   :  { %v14566_v45 = vpop.permute.xlu0 %8112 }
 0xb76   :  { %v14546_v1 = vpop.f32.mrb[220].mxu0 }
 0xb77   :  { %v11439_v36 = vpop.f32.mrb[221].mxu0  ;;  %v7866_v38 = vsel %vm1583_vm3, %v14546_v1, -inf }
 0xb78   :  { %v7771_v58 = vpop.f32.mrb[222].mxu0  ;;  %7867 = vmax.xlane.f32.xlu0 %v7866_v38  ;;  %v14570_v38 = vpop.permute.xlu1 %8160 }
 0xb79   :  { %v14550_v34 = vpop.f32.mrb[232].mxu1  ;;  %v11440_v30 = vpop.f32.mrb[223].mxu0 }
 0xb7a   :  { %v11433_v6 = vpop.f32.mrb[233].mxu1  ;;  %v7863_v14 = vsel %vm1583_vm3, %v14550_v34, -inf  ;;  %v14568_v36 = vpop.permute.xlu0 %8208 }
 0xb7b   :  { %7864 = vmax.xlane.f32.xlu1 %v7863_v14  ;;  %v7721_v47 = vpop.f32.mrb[234].mxu1 }
 0xb7c   :  { %v11434_v51 = vpop.f32.mrb[235].mxu1 }
 0xb81   :  { %v14554_v25 = vpop.f32.mrb[236].mxu1 }
 0xb82   :  { %v11445_v0 = vpop.f32.mrb[237].mxu1  ;;  %v7869_v61 = vsel %vm1583_vm3, %v14554_v25, -inf }
 0xb83   :  { %v7821_v50 = vpop.f32.mrb[238].mxu1 }
 0xb84   :  { %v11446_v26 = vpop.f32.mrb[239].mxu1 }
 0xb8c   :  { %8448 = vrot.lane.b32.xlu1 %v12915_v12, %s12064_s0  ;;  %v14572_v12 = vpop.permute.xlu0 %8304 }
 0xb8e   :  { %8400 = vrot.lane.b32.xlu0 %v12913_v8, %s12064_s0  ;;  %v14574_v8 = vpop.permute.xlu1 %8256 }
 0xb90   :  { %8496 = vrot.lane.b32.xlu1 %v12919_v23, %s12064_s0 }
 0xb94   :  { %8544 = vrot.lane.b32.xlu1 %v12923_v52, %s12064_s0  ;;  %v14577_v52 = vpop.permute.xlu1 %8352 }
 0xbb8   :  { %7870 = vmax.xlane.f32.xlu1 %v7869_v61 }
 0xbcd   :  { %v7826_v58 = vpop.xlane.xlu0 %7825 }
 0xbce   :  { %v7872_v23 = vsub.f32 %v14492_v40, %v7826_v58 }
 0xbd0   :  { %v7888_v30 = vmul.f32 1.442695, %v7872_v23 }
 0xbd2   :  { %11872 = vpow2.f32 %v7888_v30 }
 0xbd5   :  { %v7832_v6 = vpop.xlane.xlu0 %7831 }
 0xbd6   :  { %v7874_v14 = vsub.f32 %v14498_v55, %v7832_v6 }
 0xbd8   :  { %v7892_v47 = vmul.f32 1.442695, %v7874_v14  ;;  %v7829_v51 = vpop.xlane.xlu1 %7828 }
 0xbd9   :  { %v7873_v0 = vsub.f32 %v14502_v39, %v7829_v51 }
 0xbda   :  { %11874 = vpow2.f32 %v7892_v47 }
 0xbdb   :  { %v7890_v50 = vmul.f32 1.442695, %v7873_v0 }
 0xbdc   :  { %v14581_v26 = vpop.eup %11872 }
 0xbdd   :  { %11876 = vpow2.f32 %v7890_v50  ;;  %v7920_v61 = vsel %vm1583_vm3, %v14581_v26, 0.0 }
 0xbde   :  { %7921 = vadd.xlane.f32.xlu0 %v7920_v61 }
 0xbe0   :  { %v7835_v40 = vpop.xlane.xlu0 %7834 }
 0xbe1   :  { %v7875_v58 = vsub.f32 %v14508_v21, %v7835_v40 }
 0xbe3   :  { %v7894_v23 = vmul.f32 1.442695, %v7875_v58 }
 0xbe4   :  { %v14586_v30 = vpop.eup %11874  ;;  %v7838_v55 = vpop.xlane.xlu0 %7837 }
 0xbe5   :  { %11878 = vpow2.f32 %v7894_v23  ;;  %v7876_v6 = vsub.f32 %v14506_v16, %v7838_v55  ;;  %v7926_v39 = vsel %vm1583_vm3, %v14586_v30, 0.0 }
 0xbe6   :  { %7927 = vadd.xlane.f32.xlu0 %v7926_v39 }
 0xbe7   :  { %v14591_v14 = vpop.eup %11876  ;;  %v7896_v47 = vmul.f32 1.442695, %v7876_v6 }
 0xbe8   :  { %v7844_v51 = vpop.xlane.xlu0 %7843  ;;  %v7841_v0 = vpop.xlane.xlu1 %7840  ;;  %v7923_v50 = vsel %vm1583_vm3, %v14591_v14, 0.0 }
 0xbe9   :  { %11880 = vpow2.f32 %v7896_v47  ;;  %v7878_v21 = vsub.f32 %v14512_v37, %v7844_v51  ;;  %v7877_v61 = vsub.f32 %v14516_v24, %v7841_v0  ;;  %7924 = vadd.xlane.f32.xlu1 %v7923_v50 }
 0xbeb   :  { %v7900_v40 = vmul.f32 1.442695, %v7878_v21  ;;  %v7898_v16 = vmul.f32 1.442695, %v7877_v61 }
 0xbed   :  { %11882 = vpow2.f32 %v7900_v40  ;;  %v7850_v58 = vpop.xlane.xlu0 %7849 }
 0xbee   :  { %11884 = vpow2.f32 %v7898_v16  ;;  %v7880_v55 = vsub.f32 %v14522_v11, %v7850_v58 }
 0xbef   :  { %v14597_v23 = vpop.eup %11878 }
 0xbf0   :  { %v7847_v6 = vpop.xlane.xlu1 %7846  ;;  %v7929_v39 = vsel %vm1583_vm3, %v14597_v23, 0.0  ;;  %v7904_v24 = vmul.f32 1.442695, %v7880_v55 }
 0xbf1   :  { %v7879_v47 = vsub.f32 %v14526_v53, %v7847_v6  ;;  %7930 = vadd.xlane.f32.xlu1 %v7929_v39 }
 0xbf3   :  { %v14603_v37 = vpop.eup %11880  ;;  %v7902_v51 = vmul.f32 1.442695, %v7879_v47 }
 0xbf4   :  { %v7932_v0 = vsel %vm1583_vm3, %v14603_v37, 0.0 }
 0xbf5   :  { %11886 = vpow2.f32 %v7902_v51  ;;  %7933 = vadd.xlane.f32.xlu0 %v7932_v0  ;;  %v7856_v50 = vpop.xlane.xlu0 %7855 }
 0xbf6   :  { %v7882_v21 = vsub.f32 %v14530_v22, %v7856_v50  ;;  %11888 = vpow2.f32 %v7904_v24 }
 0xbf7   :  { %v14608_v11 = vpop.eup %11882 }
 0xbf8   :  { %v14610_v61 = vpop.eup %11884  ;;  %v7908_v40 = vmul.f32 1.442695, %v7882_v21  ;;  %v7853_v53 = vpop.xlane.xlu1 %7852  ;;  %v7938_v16 = vsel %vm1583_vm3, %v14608_v11, 0.0 }
 0xbf9   :  { %v7881_v58 = vsub.f32 %v14534_v35, %v7853_v53  ;;  %7939 = vadd.xlane.f32.xlu0 %v7938_v16  ;;  %v7935_v55 = vsel %vm1583_vm3, %v14610_v61, 0.0 }
 0xbfa   :  { %7936 = vadd.xlane.f32.xlu1 %v7935_v55  ;;  %11890 = vpow2.f32 %v7908_v40 }
 0xbfb   :  { %v7906_v6 = vmul.f32 1.442695, %v7881_v58 }
 0xbfd   :  { %11892 = vpow2.f32 %v7906_v6  ;;  %v7862_v58 = vpop.xlane.xlu0 %7861 }
 0xbfe   :  { %v7884_v55 = vsub.f32 %v14538_v54, %v7862_v58 }
 0xbff   :  { %v14617_v22 = vpop.eup %11886 }
 0xc00   :  { %v7859_v39 = vpop.xlane.xlu1 %7858  ;;  %v7941_v47 = vsel %vm1583_vm3, %v14617_v22, 0.0  ;;  %v14621_v24 = vpop.eup %11888 }
 0xc01   :  { %v7883_v51 = vsub.f32 %v14542_v9, %v7859_v39  ;;  %7942 = vadd.xlane.f32.xlu1 %v7941_v47  ;;  %v7944_v0 = vsel %vm1583_vm3, %v14621_v24, 0.0  ;;  %v7912_v39 = vmul.f32 1.442695, %v7884_v55 }
 0xc03   :  { %v7910_v35 = vmul.f32 1.442695, %v7883_v51 }
 0xc04   :  { %v14626_v50 = vpop.eup %11890 }
 0xc05   :  { %11894 = vpow2.f32 %v7910_v35  ;;  %7945 = vadd.xlane.f32.xlu1 %v7944_v0  ;;  %v7950_v40 = vsel %vm1583_vm3, %v14626_v50, 0.0  ;;  %v7868_v6 = vpop.xlane.xlu0 %7867 }
 0xc06   :  { %v7886_v47 = vsub.f32 %v14546_v1, %v7868_v6  ;;  %11896 = vpow2.f32 %v7912_v39 }
 0xc07   :  { %v14628_v21 = vpop.eup %11892 }
 0xc08   :  { %v7947_v53 = vsel %vm1583_vm3, %v14628_v21, 0.0  ;;  %v7865_v51 = vpop.xlane.xlu1 %7864  ;;  %v7916_v35 = vmul.f32 1.442695, %v7886_v47 }
 0xc09   :  { %7951 = vadd.xlane.f32.xlu1 %v7950_v40  ;;  %7948 = vadd.xlane.f32.xlu0 %v7947_v53  ;;  %v7885_v0 = vsub.f32 %v14550_v34, %v7865_v51 }
 0xc0a   :  { %11898 = vpow2.f32 %v7916_v35 }
 0xc0b   :  { %v7914_v40 = vmul.f32 1.442695, %v7885_v0 }
 0xc0c   :  { %v14645_v53 = vpop.permute.xlu1 %8448 }
 0xc0d   :  { %11900 = vpow2.f32 %v7914_v40 }
 0xc0f   :  { %v14634_v9 = vpop.eup %11894 }
 0xc10   :  { %v7953_v16 = vsel %vm1583_vm3, %v14634_v9, 0.0 }
 0xc11   :  { %7954 = vadd.xlane.f32.xlu0 %v7953_v16  ;;  %v14649_v16 = vpop.permute.xlu1 %8496 }
 0xc15   :  { %v14655_v1 = vpop.permute.xlu1 %8544 }
 0xc1a   :  { %8640 = vrot.lane.b32.xlu1 %v12931_v41, %s12064_s0  ;;  %v14647_v41 = vpop.eup %11896 }
 0xc1b   :  { %v14653_v54 = vpop.eup %11898 }
 0xc1c   :  { %v7962_v34 = vsel %vm1583_vm3, %v14653_v54, 0.0  ;;  %v14659_v58 = vpop.eup %11900 }
 0xc1d   :  { %v7959_v6 = vsel %vm1583_vm3, %v14659_v58, 0.0 }
 0xc27   :  { %8592 = vrot.lane.b32.xlu0 %v12929_v4, %s12064_s0  ;;  %v7956_v4 = vsel %vm1583_vm3, %v14647_v41, 0.0 }
 0xc3e   :  { %7957 = vadd.xlane.f32.xlu1 %v7956_v4 }
 0xc42   :  { %7963 = vadd.xlane.f32.xlu1 %v7962_v34 }
 0xc45   :  { %v7871_v55 = vpop.xlane.xlu1 %7870 }
 0xc46   :  { %v7887_v39 = vsub.f32 %v14554_v25, %v7871_v55  ;;  %7960 = vadd.xlane.f32.xlu0 %v7959_v6  ;;  %v15660_v55 = vld [vmem:[#allocation26_spill] sm:$0xff] }
 0xc48   :  { %v7918_v47 = vmul.f32 1.442695, %v7887_v39 }
 0xc4a   :  { %11902 = vpow2.f32 %v7918_v47 }
 0xc53   :  { %8736 = vrot.lane.b32.xlu1 %v12939_v62, %s12064_s0  ;;  %v14678_v62 = vpop.permute.xlu0 %8400 }
 0xc54   :  { %v14666_v51 = vpop.eup %11902  ;;  %v8406_v47 = vsel %vm2562_vm4, %v14678_v62, 0  ;;  %v8454_v62 = vsel %vm2562_vm4, %v14645_v53, 0 }
 0xc55   :  { %v7965_v35 = vsel %vm1583_vm3, %v14666_v51, 0.0 }
 0xc56   :  { %7966 = vadd.xlane.f32.xlu0 %v7965_v35 }
 0xc57   :  { %5120 = vrot.lane.b32.xlu1 %v13990_v42, %s12050_s19 }
 0xc5b   :  { %5124 = vrot.lane.b32.xlu1 %v13992_v5, %s12050_s19 }
 0xc5f   :  { %6961 = vrot.lane.b32.xlu1 %v14466_v20, %s12065_s22 }
 0xc63   :  { %6965 = vrot.lane.b32.xlu1 %v14468_v49, %s12065_s22 }
 0xc67   :  { %5128 = vrot.lane.b32.xlu1 %v13996_v57, %s12050_s19 }
 0xc6b   :  { %v7922_v25 = vpop.xlane.xlu0 %7921  ;;  %5132 = vrot.lane.b32.xlu1 %v14000_v17, %s12050_s19  ;;  %v8118_v17 = vsel %vm2562_vm4, %v14566_v45, 0 }
 0xc6c   :  { %11904 = vrcp.f32 %v7922_v25  ;;  %8688 = vrot.lane.b32.xlu0 %v12935_v32, %s12064_s0 }
 0xc6f   :  { %6969 = vrot.lane.b32.xlu1 %v14472_v13, %s12065_s22  ;;  %v8214_v13 = vsel %vm2562_vm4, %v14568_v36, 0 }
 0xc70   :  { %5118 = vrot.lane.b32.xlu0 %v13986_v59, %s12050_s19 }
 0xc73   :  { %v7928_v42 = vpop.xlane.xlu0 %7927  ;;  %6973 = vrot.lane.b32.xlu1 %v14476_v46, %s12065_s22 }
 0xc74   :  { %11906 = vrcp.f32 %v7928_v42  ;;  %5122 = vrot.lane.b32.xlu0 %v13988_v33, %s12050_s19 }
 0xc76   :  { %v11905_v5 = vpop.eup %11904  ;;  %v7925_v57 = vpop.xlane.xlu1 %7924 }
 0xc77   :  { %11908 = vrcp.f32 %v7925_v57  ;;  %5136 = vrot.lane.b32.xlu1 %v14004_v56, %s12050_s19  ;;  %v7984_v32 = vmul.f32 %v11905_v5, %v14581_v26 }
 0xc78   :  { %6959 = vrot.lane.b32.xlu0 %v14462_v48, %s12065_s22 }
 0xc79   :  { %v8000_v59 = vpack.c.bf16 %v7984_v32, %v7984_v32 }
 0xc7b   :  { %11450 = vmatmul.mubr.msk.bf16.vlgmr.msra.gmra.mrb[224].mxu0 %vm1583_vm3, %v8000_v59  ;;  %5140 = vrot.lane.b32.xlu1 %v14008_v18, %s12050_s19 }
 0xc7c   :  { %11460 = vmatpush3.bf16.msra.mxu0 %v8118_v17  ;;  %6963 = vrot.lane.b32.xlu0 %v14464_v3, %s12065_s22  ;;  %v15662_v17 = vld [vmem:[#allocation29_spill] sm:$0xff] }
 0xc7d   :  { %11461 = vmatprep.mubr.msk.bf16.mxu0 %vm12054_vm2, %v15650_v44  ;;  %11471 = vmatprep.subr.bf16.mxu0 %v15650_v44 }
 0xc7e   :  { %v11907_v33 = vpop.eup %11906  ;;  %v7931_v56 = vpop.xlane.xlu1 %7930 }
 0xc7f   :  { %11910 = vrcp.f32 %v7931_v56  ;;  %6977 = vrot.lane.b32.xlu1 %v14480_v19, %s12065_s22  ;;  %v7986_v48 = vmul.f32 %v11907_v33, %v14586_v30  ;;  %v8550_v33 = vsel %vm2562_vm4, %v14655_v1, 0 }
 0xc80   :  { %5126 = vrot.lane.b32.xlu0 %v13994_v2, %s12050_s19  ;;  %v8166_v2 = vsel %vm2562_vm4, %v14570_v38, 0  ;;  %v15658_v38 = vld [vmem:[#allocation30_spill] sm:$0xff] }
 0xc81   :  { %v11909_v18 = vpop.eup %11908  ;;  %v8002_v20 = vpack.c.bf16 %v7986_v48, %v7986_v48 }
 0xc82   :  { %v7985_v3 = vmul.f32 %v11909_v18, %v14591_v14  ;;  %v7934_v49 = vpop.xlane.xlu0 %7933  ;;  %v8262_v14 = vsel %vm2562_vm4, %v14574_v8, 0 }
 0xc83   :  { %11912 = vrcp.f32 %v7934_v49  ;;  %11462 = vmatmul.mubr.msk.bf16.vlgmr.msra.gmra.mrb[228].mxu0 %vm1583_vm3, %v8002_v20  ;;  %6981 = vrot.lane.b32.xlu1 %v14484_v15, %s12065_s22  ;;  %v15657_v15 = vld [vmem:[#allocation28_spill] sm:$0xff] }
 0xc84   :  { %11472 = vmatpush3.bf16.msra.mxu0 %v8214_v13  ;;  %5130 = vrot.lane.b32.xlu0 %v13998_v29, %s12050_s19  ;;  %v8001_v46 = vpack.c.bf16 %v7985_v3, %v7985_v3 }
 0xc85   :  { %11473 = vmatprep.mubr.msk.bf16.mxu0 %vm12054_vm2, %v15650_v44  ;;  %11483 = vmatprep.subr.bf16.mxu0 %v15650_v44 }
 0xc86   :  { %v7940_v19 = vpop.xlane.xlu0 %7939  ;;  %11456 = vmatmul.mubr.msk.bf16.vlgmr.msra.gmra.mrb[240].mxu1 %vm1583_vm3, %v8001_v46 }
 0xc87   :  { %11914 = vrcp.f32 %v7940_v19  ;;  %11466 = vmatpush3.bf16.msra.mxu1 %v8166_v2  ;;  %v7937_v45 = vpop.xlane.xlu1 %7936  ;;  %5144 = vrot.lane.b32.xlu1 %v15657_v15, %s12050_s19 }
 0xc88   :  { %11916 = vrcp.f32 %v7937_v45  ;;  %6967 = vrot.lane.b32.xlu0 %v14470_v60, %s12065_s22  ;;  %11467 = vmatprep.mubr.msk.bf16.mxu1 %vm12054_vm2, %v15650_v44 }
 0xc89   :  { %v11911_v29 = vpop.eup %11910  ;;  %11477 = vmatprep.subr.bf16.mxu1 %v15650_v44 }
 0xc8a   :  { %v7987_v36 = vmul.f32 %v11911_v29, %v14597_v23  ;;  %v15659_v23 = vld [vmem:[#allocation25_spill] sm:$0xff] }
 0xc8b   :  { %5148 = vrot.lane.b32.xlu1 %v15658_v38, %s12050_s19 }
 0xc8c   :  { %6971 = vrot.lane.b32.xlu0 %v14474_v27, %s12065_s22  ;;  %v8003_v26 = vpack.c.bf16 %v7987_v36, %v7987_v36 }
 0xc8d   :  { %v11913_v30 = vpop.eup %11912 }
 0xc8e   :  { %v7988_v60 = vmul.f32 %v11913_v30, %v14603_v37  ;;  %11468 = vmatmul.mubr.msk.bf16.vlgmr.msra.gmra.mrb[244].mxu1 %vm1583_vm3, %v8003_v26  ;;  %v7943_v0 = vpop.xlane.xlu1 %7942  ;;  %v8310_v37 = vsel %vm2562_vm4, %v14572_v12, 0 }
 0xc8f   :  { %11478 = vmatpush3.bf16.msra.mxu1 %v8262_v14  ;;  %11918 = vrcp.f32 %v7943_v0  ;;  %6985 = vrot.lane.b32.xlu1 %v14488_v43, %s12065_s22 }
 0xc90   :  { %5134 = vrot.lane.b32.xlu0 %v15659_v23, %s12050_s19  ;;  %v8004_v40 = vpack.c.bf16 %v7988_v60, %v7988_v60  ;;  %11479 = vmatprep.mubr.msk.bf16.mxu1 %vm12054_vm2, %v15650_v44 }
 0xc91   :  { %v11915_v27 = vpop.eup %11914  ;;  %11489 = vmatprep.subr.bf16.mxu1 %v15650_v44 }
 0xc92   :  { %v11917_v8 = vpop.eup %11916  ;;  %11474 = vmatmul.mubr.msk.bf16.vlgmr.msra.gmra.mrb[232].mxu0 %vm1583_vm3, %v8004_v40  ;;  %v7946_v4 = vpop.xlane.xlu1 %7945  ;;  %v7990_v43 = vmul.f32 %v11915_v27, %v14608_v11 }
 0xc93   :  { %v7989_v34 = vmul.f32 %v11917_v8, %v14610_v61  ;;  %11484 = vmatpush3.bf16.msra.mxu0 %v8310_v37  ;;  %11920 = vrcp.f32 %v7946_v4  ;;  %6989 = vrot.lane.b32.xlu1 %v14496_v63, %s12065_s22  ;;  %v8358_v61 = vsel %vm2562_vm4, %v14577_v52, 0 }
 0xc94   :  { %5138 = vrot.lane.b32.xlu0 %v15660_v55, %s12050_s19  ;;  %11485 = vmatprep.mubr.msk.bf16.mxu0 %vm12054_vm2, %v15650_v44  ;;  %v8006_v63 = vpack.c.bf16 %v7990_v43, %v7990_v43 }
 0xc95   :  { %v8005_v6 = vpack.c.bf16 %v7989_v34, %v7989_v34  ;;  %11495 = vmatprep.subr.bf16.mxu0 %v15650_v44 }
 0xc96   :  { %v7949_v12 = vpop.xlane.xlu0 %7948  ;;  %v7952_v39 = vpop.xlane.xlu1 %7951 }
 0xc97   :  { %11922 = vrcp.f32 %v7949_v12  ;;  %11480 = vmatmul.mubr.msk.bf16.vlgmr.msra.gmra.mrb[248].mxu1 %vm1583_vm3, %v8005_v6 }
 0xc98   :  { %11490 = vmatpush3.bf16.msra.mxu1 %v8358_v61  ;;  %11924 = vrcp.f32 %v7952_v39  ;;  %6975 = vrot.lane.b32.xlu0 %v14478_v28, %s12065_s22 }
 0xc99   :  { %v11919_v11 = vpop.eup %11918  ;;  %11491 = vmatprep.mubr.msk.bf16.mxu1 %vm12054_vm2, %v15650_v44  ;;  %11501 = vmatprep.subr.bf16.mxu1 %v15650_v44 }
 0xc9a   :  { %v7991_v52 = vmul.f32 %v11919_v11, %v14617_v22  ;;  %11486 = vmatmul.mubr.msk.bf16.vlgmr.msra.gmra.mrb[236].mxu0 %vm1583_vm3, %v8006_v63  ;;  %v15661_v22 = vld [vmem:[#allocation27_spill] sm:$0xff]  ;;  %v8641_v1 = vpop.permute.xlu1 %8640 }
 0xc9b   :  { %11496 = vmatpush3.bf16.msra.mxu0 %v8406_v47  ;;  %11497 = vmatprep.mubr.msk.bf16.mxu0 %vm12054_vm2, %v15650_v44 }
 0xc9c   :  { %6979 = vrot.lane.b32.xlu0 %v14482_v31, %s12065_s22  ;;  %v8007_v28 = vpack.c.bf16 %v7991_v52, %v7991_v52  ;;  %11507 = vmatprep.subr.bf16.mxu0 %v15650_v44 }
 0xc9d   :  { %v11921_v35 = vpop.eup %11920 }
 0xc9e   :  { %v7992_v25 = vmul.f32 %v11921_v35, %v14621_v24  ;;  %v7955_v42 = vpop.xlane.xlu0 %7954  ;;  %v8502_v24 = vsel %vm2562_vm4, %v14649_v16, 0 }
 0xc9f   :  { %11926 = vrcp.f32 %v7955_v42  ;;  %11492 = vmatmul.mubr.msk.bf16.vlgmr.msra.gmra.mrb[252].mxu1 %vm1583_vm3, %v8007_v28 }
 0xca0   :  { %11502 = vmatpush3.bf16.msra.mxu1 %v8454_v62  ;;  %5142 = vrot.lane.b32.xlu0 %v15661_v22, %s12050_s19  ;;  %v8008_v5 = vpack.c.bf16 %v7992_v25, %v7992_v25 }
 0xca1   :  { %v11923_v57 = vpop.eup %11922  ;;  %11503 = vmatprep.mubr.msk.bf16.mxu1 %vm12054_vm2, %v15650_v44  ;;  %11513 = vmatprep.subr.bf16.mxu1 %v15650_v44 }
 0xca2   :  { %v11925_v31 = vpop.eup %11924  ;;  %v7993_v53 = vmul.f32 %v11923_v57, %v14628_v21  ;;  %11498 = vmatmul.mubr.msk.bf16.vlgmr.msra.gmra.mrb[240].mxu0 %vm1583_vm3, %v8008_v5  ;;  %v8593_v16 = vpop.permute.xlu0 %8592 }
 0xca3   :  { %11508 = vmatpush3.bf16.msra.mxu0 %v8502_v24  ;;  %11509 = vmatprep.mubr.msk.bf16.mxu0 %vm12054_vm2, %v15650_v44  ;;  %v7994_v59 = vmul.f32 %v11925_v31, %v14626_v50  ;;  %v8598_v48 = vsel %vm2562_vm4, %v8593_v16, 0 }
 0xca4   :  { %v8009_v32 = vpack.c.bf16 %v7993_v53, %v7993_v53  ;;  %5146 = vrot.lane.b32.xlu0 %v15662_v17, %s12050_s19  ;;  %11519 = vmatprep.subr.bf16.mxu0 %v15650_v44 }
 0xca5   :  { %v8010_v21 = vpack.c.bf16 %v7994_v59, %v7994_v59 }
 0xca7   :  { %11504 = vmatmul.mubr.msk.bf16.vlgmr.msra.gmra.mrb[0].mxu1 %vm1583_vm3, %v8009_v32 }
 0xca8   :  { %11514 = vmatpush3.bf16.msra.mxu1 %v8550_v33  ;;  %6983 = vrot.lane.b32.xlu0 %v14486_v10, %s12065_s22  ;;  %v8646_v10 = vsel %vm2562_vm4, %v8641_v1, 0 }
 0xca9   :  { %v11927_v56 = vpop.eup %11926  ;;  %11515 = vmatprep.mubr.msk.bf16.mxu1 %vm12054_vm2, %v15650_v44  ;;  %11525 = vmatprep.subr.bf16.mxu1 %v15650_v44 }
 0xcaa   :  { %v7995_v50 = vmul.f32 %v11927_v56, %v14634_v9  ;;  %11510 = vmatmul.mubr.msk.bf16.vlgmr.msra.gmra.mrb[244].mxu0 %vm1583_vm3, %v8010_v21 }
 0xcab   :  { %11520 = vmatpush3.bf16.msra.mxu0 %v8598_v48  ;;  %11521 = vmatprep.mubr.msk.bf16.mxu0 %vm12054_vm2, %v15650_v44 }
 0xcac   :  { %v8011_v18 = vpack.c.bf16 %v7995_v50, %v7995_v50  ;;  %6987 = vrot.lane.b32.xlu0 %v14490_v7, %s12065_s22  ;;  %11531 = vmatprep.subr.bf16.mxu0 %v15650_v44 }
 0xcaf   :  { %11516 = vmatmul.mubr.msk.bf16.vlgmr.msra.gmra.mrb[4].mxu1 %vm1583_vm3, %v8011_v18 }
 0xcb0   :  { %11526 = vmatpush3.bf16.msra.mxu1 %v8646_v10  ;;  %11527 = vmatprep.mubr.msk.bf16.mxu1 %vm12054_vm2, %v15650_v44 }
 0xcb1   :  { %11537 = vmatprep.subr.bf16.mxu1 %v15650_v44 }
 0xccb   :  { %v7958_v9 = vpop.xlane.xlu1 %7957 }
 0xccc   :  { %11928 = vrcp.f32 %v7958_v9  ;;  %v11640_v9 = vld [vmem:[%s15607_s5] sm:$0xff]  }
 0xccf   :  { %v7964_v20 = vpop.xlane.xlu1 %7963 }
 0xcd3   :  { %v7961_v3 = vpop.xlane.xlu0 %7960  ;;  %v8737_v49 = vpop.permute.xlu1 %8736 }
 0xcd4   :  { %11930 = vrcp.f32 %v7961_v3  ;;  %v8742_v38 = vsel %vm2562_vm4, %v8737_v49, 0 }
 0xcd5   :  { %11932 = vrcp.f32 %v7964_v20  ;;  %v11641_v20 = vld [vmem:[%s15607_s5 + $0x8] sm:$0xff]  }
 0xcd6   :  { %v11929_v7 = vpop.eup %11928 }
 0xcd7   :  { %v7996_v13 = vmul.f32 %v11929_v7, %v14647_v41  ;;  %v5121_v46 = vpop.permute.xlu1 %5120 }
 0xcd8   :  { %5168 = vst.msk [vmem:[#allocation2 + $0x8] sm:$0xff] %vm5166_vm5, %v5121_v46 }
 0xcd9   :  { %v8012_v2 = vpack.c.bf16 %v7996_v13, %v7996_v13 }
 0xcdb   :  { %11522 = vmatmul.mubr.msk.bf16.vlgmr.msra.gmra.mrb[248].mxu0 %vm1583_vm3, %v8012_v2  ;;  %v5125_v19 = vpop.permute.xlu1 %5124 }
 0xcdc   :  { %5170 = vst.msk [vmem:[#allocation2 + $0x18] sm:$0xff] %vm5166_vm5, %v5125_v19  ;;  %11533 = vmatprep.mubr.msk.bf16.mxu0 %vm12054_vm2, %v15650_v44 }
 0xcde   :  { %v11931_v45 = vpop.eup %11930 }
 0xcdf   :  { %v7997_v15 = vmul.f32 %v11931_v45, %v14659_v58  ;;  %v6962_v29 = vpop.permute.xlu1 %6961  ;;  %v11933_v36 = vpop.eup %11932 }
 0xce0   :  { %7009 = vst.msk [vmem:[#allocation2 + $0x8] sm:$0xff] %vm7007_vm6, %v6962_v29  ;;  %v7998_v58 = vmul.f32 %v11933_v36, %v14653_v54 }
 0xce1   :  { %v8013_v41 = vpack.c.bf16 %v7997_v15, %v7997_v15 }
 0xce2   :  { %v8014_v23 = vpack.c.bf16 %v7998_v58, %v7998_v58 }
 0xce3   :  { %v7967_v26 = vpop.xlane.xlu0 %7966  ;;  %11528 = vmatmul.mubr.msk.bf16.vlgmr.msra.gmra.mrb[8].mxu1 %vm1583_vm3, %v8013_v41  ;;  %v6966_v30 = vpop.permute.xlu1 %6965 }
 0xce4   :  { %11934 = vrcp.f32 %v7967_v26  ;;  %11538 = vmatpush3.bf16.msra.mxu1 %v8742_v38  ;;  %7011 = vst.msk [vmem:[#allocation2 + $0x18] sm:$0xff] %vm7007_vm6, %v6966_v30  ;;  %11539 = vmatprep.mubr.msk.bf16.mxu1 %vm12054_vm2, %v15650_v44 }
 0xce7   :  { %v8689_v14 = vpop.permute.xlu0 %8688  ;;  %v5129_v60 = vpop.permute.xlu1 %5128 }
 0xce8   :  { %v8694_v0 = vsel %vm2562_vm4, %v8689_v14, 0  ;;  %5172 = vst.msk [vmem:[#allocation2 + $0x28] sm:$0xff] %vm5166_vm5, %v5129_v60 }
 0xce9   :  { %11532 = vmatpush3.bf16.msra.mxu0 %v8694_v0 }
 0xcea   :  { %11543 = vmatprep.subr.bf16.mxu0 %v11640_v9 }
 0xceb   :  { %v5119_v40 = vpop.permute.xlu0 %5118  ;;  %v5133_v27 = vpop.permute.xlu1 %5132 }
 0xcec   :  { %5167 = vst.msk [vmem:[#allocation2] sm:$0xff] %vm5166_vm5, %v5119_v40  ;;  %5174 = vst.msk [vmem:[#allocation2 + $0x38] sm:$0xff] %vm5166_vm5, %v5133_v27  ;;  %11534 = vmatmul.mubr.msk.bf16.vlgmr.msra.gmra.mrb[252].mxu0 %vm1583_vm3, %v8014_v23 }
 0xced   :  { %11544 = vmatpush3.bf16.msra.mxu0 %v11640_v9 }
 0xcee   :  { %v11935_v8 = vpop.eup %11934  ;;  %11545 = vmatprep.subr.bf16.mxu0 %v11641_v20 }
 0xcef   :  { %v7999_v44 = vmul.f32 %v11935_v8, %v14666_v51  ;;  %v5123_v54 = vpop.permute.xlu0 %5122  ;;  %v6970_v37 = vpop.permute.xlu1 %6969 }
 0xcf0   :  { %5169 = vst.msk [vmem:[#allocation2 + $0x10] sm:$0xff] %vm5166_vm5, %v5123_v54 }
 0xcf1   :  { %7013 = vst.msk [vmem:[#allocation2 + $0x28] sm:$0xff] %vm7007_vm6, %v6970_v37  ;;  %v8015_v4 = vpack.c.bf16 %v7999_v44, %v7999_v44  ;;  %11546 = vmatpush3.bf16.msra.mxu0 %v11641_v20 }
 0xcf3   :  { %v6960_v34 = vpop.permute.xlu0 %6959  ;;  %11540 = vmatmul.mubr.msk.bf16.vlgmr.msra.gmra.mrb[12].mxu1 %vm1583_vm3, %v8015_v4  ;;  %v6974_v43 = vpop.permute.xlu1 %6973 }
 0xcf4   :  { %7008 = vst.msk [vmem:[#allocation2] sm:$0xff] %vm7007_vm6, %v6960_v34  ;;  %7015 = vst.msk [vmem:[#allocation2 + $0x38] sm:$0xff] %vm7007_vm6, %v6974_v43 }
 0xcf7   :  { %v6964_v55 = vpop.permute.xlu0 %6963  ;;  %v5137_v6 = vpop.permute.xlu1 %5136 }
 0xcf8   :  { %7010 = vst.msk [vmem:[#allocation2 + $0x10] sm:$0xff] %vm7007_vm6, %v6964_v55 }
 0xcf9   :  { %5176 = vst.msk [vmem:[#allocation2 + $0x48] sm:$0xff] %vm5166_vm5, %v5137_v6 }
 0xcfb   :  { %v5127_v51 = vpop.permute.xlu0 %5126  ;;  %v5141_v12 = vpop.permute.xlu1 %5140 }
 0xcfc   :  { %5171 = vst.msk [vmem:[#allocation2 + $0x20] sm:$0xff] %vm5166_vm5, %v5127_v51  ;;  %5178 = vst.msk [vmem:[#allocation2 + $0x58] sm:$0xff] %vm5166_vm5, %v5141_v12 }
 0xcff   :  { %v5131_v39 = vpop.permute.xlu0 %5130  ;;  %v6978_v61 = vpop.permute.xlu1 %6977 }
 0xd00   :  { %5173 = vst.msk [vmem:[#allocation2 + $0x30] sm:$0xff] %vm5166_vm5, %v5131_v39 }
 0xd01   :  { %7017 = vst.msk [vmem:[#allocation2 + $0x48] sm:$0xff] %vm7007_vm6, %v6978_v61 }
 0xd03   :  { %v6968_v63 = vpop.permute.xlu0 %6967  ;;  %v6982_v11 = vpop.permute.xlu1 %6981 }
 0xd04   :  { %7012 = vst.msk [vmem:[#allocation2 + $0x20] sm:$0xff] %vm7007_vm6, %v6968_v63  ;;  %7019 = vst.msk [vmem:[#allocation2 + $0x58] sm:$0xff] %vm7007_vm6, %v6982_v11 }
 0xd07   :  { %v6972_v47 = vpop.permute.xlu0 %6971  ;;  %v5145_v52 = vpop.permute.xlu1 %5144 }
 0xd08   :  { %7014 = vst.msk [vmem:[#allocation2 + $0x30] sm:$0xff] %vm7007_vm6, %v6972_v47 }
 0xd09   :  { %5180 = vst.msk [vmem:[#allocation2 + $0x68] sm:$0xff] %vm5166_vm5, %v5145_v52 }
 0xd0b   :  { %v5135_v28 = vpop.permute.xlu0 %5134  ;;  %v5149_v35 = vpop.permute.xlu1 %5148 }
 0xd0c   :  { %5175 = vst.msk [vmem:[#allocation2 + $0x40] sm:$0xff] %vm5166_vm5, %v5135_v28  ;;  %5182 = vst.msk [vmem:[#allocation2 + $0x78] sm:$0xff] %vm5166_vm5, %v5149_v35 }
 0xd0f   :  { %v5139_v25 = vpop.permute.xlu0 %5138  ;;  %v6986_v42 = vpop.permute.xlu1 %6985 }
 0xd10   :  { %5177 = vst.msk [vmem:[#allocation2 + $0x50] sm:$0xff] %vm5166_vm5, %v5139_v25 }
 0xd11   :  { %7021 = vst.msk [vmem:[#allocation2 + $0x68] sm:$0xff] %vm7007_vm6, %v6986_v42 }
 0xd13   :  { %v6976_v62 = vpop.permute.xlu0 %6975  ;;  %v6990_v22 = vpop.permute.xlu1 %6989 }
 0xd14   :  { %7016 = vst.msk [vmem:[#allocation2 + $0x40] sm:$0xff] %vm7007_vm6, %v6976_v62  ;;  %7023 = vst.msk [vmem:[#allocation2 + $0x78] sm:$0xff] %vm7007_vm6, %v6990_v22 }
 0xd17   :  { %v6980_v5 = vpop.permute.xlu0 %6979 }
 0xd18   :  { %7018 = vst.msk [vmem:[#allocation2 + $0x50] sm:$0xff] %vm7007_vm6, %v6980_v5 }
 0xd1b   :  { %v5143_v57 = vpop.permute.xlu0 %5142 }
 0xd1c   :  { %5179 = vst.msk [vmem:[#allocation2 + $0x60] sm:$0xff] %vm5166_vm5, %v5143_v57 }
 0xd1f   :  { %v5147_v31 = vpop.permute.xlu0 %5146 }
 0xd20   :  { %5181 = vst.msk [vmem:[#allocation2 + $0x70] sm:$0xff] %vm5166_vm5, %v5147_v31 }
 0xd23   :  { %v6984_v24 = vpop.permute.xlu0 %6983 }
 0xd24   :  { %7020 = vst.msk [vmem:[#allocation2 + $0x60] sm:$0xff] %vm7007_vm6, %v6984_v24 }
 0xd27   :  { %v6988_v53 = vpop.permute.xlu0 %6987 }
 0xd28   :  { %7022 = vst.msk [vmem:[#allocation2 + $0x70] sm:$0xff] %vm7007_vm6, %v6988_v53 }
 0xd4e   :  { %v8058_v32 = vpop.f32.mrb[224].mxu0 }
 0xd4f   :  { %v11451_v59 = vpop.f32.mrb[225].mxu0  ;;  %8800 = vrot.lane.b32.xlu0 %v8058_v32, %s12066_s23 }
 0xd50   :  { %v8061_v17 = vpop.f32.mrb[226].mxu0 }
 0xd51   :  { %v11452_v33 = vpop.f32.mrb[227].mxu0 }
 0xd56   :  { %v8154_v16 = vpop.f32.mrb[228].mxu0 }
 0xd57   :  { %v11463_v21 = vpop.f32.mrb[229].mxu0  ;;  %8804 = vrot.lane.b32.xlu0 %v8154_v16, %s12066_s23 }
 0xd58   :  { %v8157_v56 = vpop.f32.mrb[230].mxu0 }
 0xd59   :  { %v8106_v50 = vpop.f32.mrb[240].mxu1  ;;  %v11464_v48 = vpop.f32.mrb[231].mxu0 }
 0xd5a   :  { %8802 = vrot.lane.b32.xlu1 %v8106_v50, %s12066_s23  ;;  %v11457_v1 = vpop.f32.mrb[241].mxu1 }
 0xd5b   :  { %v8109_v18 = vpop.f32.mrb[242].mxu1 }
 0xd5c   :  { %v11458_v10 = vpop.f32.mrb[243].mxu1 }
 0xd61   :  { %v8202_v3 = vpop.f32.mrb[244].mxu1 }
 0xd62   :  { %8806 = vrot.lane.b32.xlu1 %v8202_v3, %s12066_s23  ;;  %v11469_v49 = vpop.f32.mrb[245].mxu1 }
 0xd63   :  { %v8205_v7 = vpop.f32.mrb[246].mxu1 }
 0xd64   :  { %v11470_v13 = vpop.f32.mrb[247].mxu1 }
 0xd65   :  { %v8250_v46 = vpop.f32.mrb[232].mxu0 }
 0xd66   :  { %v11475_v2 = vpop.f32.mrb[233].mxu0  ;;  %8808 = vrot.lane.b32.xlu0 %v8250_v46, %s12066_s23 }
 0xd67   :  { %v8253_v19 = vpop.f32.mrb[234].mxu0 }
 0xd68   :  { %v11476_v45 = vpop.f32.mrb[235].mxu0 }
 0xd6a   :  { %v8298_v15 = vpop.f32.mrb[248].mxu1 }
 0xd6b   :  { %8810 = vrot.lane.b32.xlu1 %v8298_v15, %s12066_s23  ;;  %v11481_v29 = vpop.f32.mrb[249].mxu1 }
 0xd6c   :  { %v8301_v41 = vpop.f32.mrb[250].mxu1 }
 0xd6d   :  { %v11482_v36 = vpop.f32.mrb[251].mxu1  ;;  %v8346_v38 = vpop.f32.mrb[236].mxu0 }
 0xd6e   :  { %v11487_v26 = vpop.f32.mrb[237].mxu0  ;;  %8812 = vrot.lane.b32.xlu0 %v8346_v38, %s12066_s23 }
 0xd6f   :  { %v8349_v30 = vpop.f32.mrb[238].mxu0 }
 0xd70   :  { %v11488_v58 = vpop.f32.mrb[239].mxu0 }
 0xd72   :  { %v8394_v14 = vpop.f32.mrb[252].mxu1 }
 0xd73   :  { %8814 = vrot.lane.b32.xlu1 %v8394_v14, %s12066_s23  ;;  %v11493_v60 = vpop.f32.mrb[253].mxu1 }
 0xd74   :  { %v8397_v0 = vpop.f32.mrb[254].mxu1 }
 0xd75   :  { %v11494_v23 = vpop.f32.mrb[255].mxu1  ;;  %v8442_v40 = vpop.f32.mrb[240].mxu0 }
 0xd76   :  { %8816 = vrot.lane.b32.xlu0 %v8442_v40, %s12066_s23  ;;  %v11499_v27 = vpop.f32.mrb[241].mxu0 }
 0xd77   :  { %v8445_v8 = vpop.f32.mrb[242].mxu0 }
 0xd78   :  { %v11500_v44 = vpop.f32.mrb[243].mxu0 }
 0xd7a   :  { %v8490_v54 = vpop.f32.mrb[0].mxu1 }
 0xd7b   :  { %8818 = vrot.lane.b32.xlu1 %v8490_v54, %s12066_s23  ;;  %v11505_v37 = vpop.f32.mrb[1].mxu1 }
 0xd7c   :  { %v8493_v4 = vpop.f32.mrb[2].mxu1 }
 0xd7d   :  { %v11506_v34 = vpop.f32.mrb[3].mxu1  ;;  %v8538_v43 = vpop.f32.mrb[244].mxu0 }
 0xd7e   :  { %8820 = vrot.lane.b32.xlu0 %v8538_v43, %s12066_s23  ;;  %v11511_v55 = vpop.f32.mrb[245].mxu0  ;;  %v14915_v43 = vld [vmem:[%s15608_s6] ss:$0 sm:$0xff] }
 0xd7f   :  { %v8541_v6 = vpop.f32.mrb[246].mxu0 }
 0xd80   :  { %v11512_v51 = vpop.f32.mrb[247].mxu0 }
 0xd82   :  { %v8586_v12 = vpop.f32.mrb[4].mxu1 }
 0xd83   :  { %8822 = vrot.lane.b32.xlu1 %v8586_v12, %s12066_s23  ;;  %v11517_v39 = vpop.f32.mrb[5].mxu1 }
 0xd84   :  { %v8589_v61 = vpop.f32.mrb[6].mxu1 }
 0xd85   :  { %v11518_v63 = vpop.f32.mrb[7].mxu1 }
 0xd86   :  { %v15663_v63 = vld [vmem:[#allocation9_spill] sm:$0xff] }
 0xdae   :  { %v8634_v11 = vpop.f32.mrb[248].mxu0 }
 0xdaf   :  { %8824 = vrot.lane.b32.xlu0 %v8634_v11, %s12066_s23  ;;  %v11523_v47 = vpop.f32.mrb[249].mxu0 }
 0xdb0   :  { %v8637_v52 = vpop.f32.mrb[250].mxu0 }
 0xdb1   :  { %v11524_v28 = vpop.f32.mrb[251].mxu0  ;;  %v15664_v52 = vld [vmem:[#allocation10_spill] sm:$0xff] }
 0xdb6   :  { %v8682_v35 = vpop.f32.mrb[8].mxu1 }
 0xdb7   :  { %8826 = vrot.lane.b32.xlu1 %v8682_v35, %s12066_s23  ;;  %v11529_v25 = vpop.f32.mrb[9].mxu1 }
 0xdb8   :  { %v8685_v42 = vpop.f32.mrb[10].mxu1  ;;  %v15665_v25 = vld [vmem:[#allocation11_spill] sm:$0xff] }
 0xdb9   :  { %v11530_v62 = vpop.f32.mrb[11].mxu1 }
 0xdbf   :  { %v8730_v22 = vpop.f32.mrb[252].mxu0 }
 0xdc0   :  { %8828 = vrot.lane.b32.xlu0 %v8730_v22, %s12066_s23  ;;  %v11535_v5 = vpop.f32.mrb[253].mxu0 }
 0xdc1   :  { %v8801_v57 = vpop.permute.xlu0 %8800  ;;  %v8733_v31 = vpop.f32.mrb[254].mxu0  ;;  %v15666_v5 = vld [vmem:[#allocation12_spill] sm:$0xff] }
 0xdc2   :  { %8849 = vst.msk [vmem:[#allocation2] sm:$0xff] %vm8848_vm7, %v8801_v57  ;;  %v11536_v24 = vpop.f32.mrb[255].mxu0 }
 0xdc6   :  { %v8778_v53 = vpop.f32.mrb[12].mxu1 }
 0xdc7   :  { %8830 = vrot.lane.b32.xlu1 %v8778_v53, %s12066_s23  ;;  %v11541_v32 = vpop.f32.mrb[13].mxu1 }
 0xdc8   :  { %v8781_v59 = vpop.f32.mrb[14].mxu1 }
 0xdc9   :  { %v8805_v17 = vpop.permute.xlu0 %8804  ;;  %v11542_v33 = vpop.f32.mrb[15].mxu1  ;;  %v8865_v56 = vld [vmem:[#allocation2] sm:$0xff] }
 0xdca   :  { %8851 = vst.msk [vmem:[#allocation2 + $0x10] sm:$0xff] %vm8848_vm7, %v8805_v17 }
 0xdcc   :  { %v8803_v16 = vpop.permute.xlu1 %8802 }
 0xdcd   :  { %8850 = vst.msk [vmem:[#allocation2 + $0x8] sm:$0xff] %vm8848_vm7, %v8803_v16 }
 0xdd1   :  { %v8867_v18 = vld [vmem:[#allocation2 + $0x10] sm:$0xff] }
 0xdd4   :  { %v8807_v21 = vpop.permute.xlu1 %8806  ;;  %v8866_v50 = vld [vmem:[#allocation2 + $0x8] sm:$0xff] }
 0xdd5   :  { %8852 = vst.msk [vmem:[#allocation2 + $0x18] sm:$0xff] %vm8848_vm7, %v8807_v21  ;;  %v8881_v48 = vpack.c.bf16 %v8866_v50, %v8865_v56  ;;  %v15667_v21 = vld [vmem:[#allocation13_spill] sm:$0xff] }
 0xdd7   :  { %11547 = vmatprep.mubr.msk.bf16.mxu0 %vm1158_vm1, %v8881_v48 }
 0xdd8   :  { %v8809_v1 = vpop.permute.xlu0 %8808 }
 0xdd9   :  { %8853 = vst.msk [vmem:[#allocation2 + $0x20] sm:$0xff] %vm8848_vm7, %v8809_v1  ;;  %v15668_v1 = vld [vmem:[#allocation14_spill] sm:$0xff] }
 0xddc   :  { %v8868_v10 = vld [vmem:[#allocation2 + $0x18] sm:$0xff] }
 0xddd   :  { %v8882_v9 = vpack.c.bf16 %v8868_v10, %v8867_v18  ;;  %v8811_v20 = vpop.permute.xlu1 %8810  ;;  %v15669_v10 = vld [vmem:[#allocation15_spill] sm:$0xff] }
 0xdde   :  { %8854 = vst.msk [vmem:[#allocation2 + $0x28] sm:$0xff] %vm8848_vm7, %v8811_v20 }
 0xddf   :  { %11548 = vmatmul.mubr.msk.bf16.vlgmr.msra.gmra.mrb[0].mxu0 %vm1158_vm1, %v8882_v9 }
 0xde0   :  { %v8813_v3 = vpop.permute.xlu0 %8812  ;;  %v8869_v7 = vld [vmem:[#allocation2 + $0x20] sm:$0xff] }
 0xde1   :  { %8855 = vst.msk [vmem:[#allocation2 + $0x30] sm:$0xff] %vm8848_vm7, %v8813_v3  ;;  %v15670_v3 = vld [vmem:[#allocation17_spill] sm:$0xff] }
 0xde5   :  { %v8815_v49 = vpop.permute.xlu1 %8814  ;;  %v8870_v13 = vld [vmem:[#allocation2 + $0x28] sm:$0xff] }
 0xde6   :  { %8856 = vst.msk [vmem:[#allocation2 + $0x38] sm:$0xff] %vm8848_vm7, %v8815_v49  ;;  %v8883_v46 = vpack.c.bf16 %v8870_v13, %v8869_v7 }
 0xde8   :  { %11551 = vmatprep.mubr.msk.bf16.mxu0 %vm1158_vm1, %v8883_v46  ;;  %v8817_v2 = vpop.permute.xlu0 %8816  ;;  %v8871_v45 = vld [vmem:[#allocation2 + $0x30] sm:$0xff] }
 0xde9   :  { %8857 = vst.msk [vmem:[#allocation2 + $0x40] sm:$0xff] %vm8848_vm7, %v8817_v2 }
 0xded   :  { %v8819_v19 = vpop.permute.xlu1 %8818  ;;  %v8872_v15 = vld [vmem:[#allocation2 + $0x38] sm:$0xff] }
 0xdee   :  { %8858 = vst.msk [vmem:[#allocation2 + $0x48] sm:$0xff] %vm8848_vm7, %v8819_v19  ;;  %v8884_v29 = vpack.c.bf16 %v8872_v15, %v8871_v45 }
 0xdf0   :  { %11552 = vmatmul.mubr.msk.bf16.gmra.mrb[4].mxu0 %vm1158_vm1, %v8884_v29  ;;  %v8821_v41 = vpop.permute.xlu0 %8820  ;;  %v8873_v38 = vld [vmem:[#allocation2 + $0x40] sm:$0xff] }
 0xdf1   :  { %8859 = vst.msk [vmem:[#allocation2 + $0x50] sm:$0xff] %vm8848_vm7, %v8821_v41 }
 0xdf5   :  { %v8823_v36 = vpop.permute.xlu1 %8822  ;;  %v8874_v26 = vld [vmem:[#allocation2 + $0x48] sm:$0xff] }
 0xdf6   :  { %8860 = vst.msk [vmem:[#allocation2 + $0x58] sm:$0xff] %vm8848_vm7, %v8823_v36  ;;  %v8885_v30 = vpack.c.bf16 %v8874_v26, %v8873_v38  ;;  %v15671_v36 = vld [vmem:[#allocation16_spill] sm:$0xff] }
 0xdf8   :  { %11555 = vmatprep.mubr.msk.bf16.mxu0 %vm1158_vm1, %v8885_v30  ;;  %v8875_v58 = vld [vmem:[#allocation2 + $0x50] sm:$0xff] }
 0xdfd   :  { %v8876_v14 = vld [vmem:[#allocation2 + $0x58] sm:$0xff] }
 0xdfe   :  { %v8886_v60 = vpack.c.bf16 %v8876_v14, %v8875_v58  ;;  %v15672_v58 = vld [vmem:[#allocation18_spill] sm:$0xff] }
 0xe00   :  { %11556 = vmatmul.mubr.msk.bf16.gmra.mrb[8].mxu0 %vm1158_vm1, %v8886_v60  ;;  %v15673_v60 = vld [vmem:[#allocation19_spill] sm:$0xff] }
 0xe21   :  { %v8825_v0 = vpop.permute.xlu0 %8824 }
 0xe22   :  { %8861 = vst.msk [vmem:[#allocation2 + $0x60] sm:$0xff] %vm8848_vm7, %v8825_v0 }
 0xe29   :  { %v8827_v23 = vpop.permute.xlu1 %8826  ;;  %v8877_v40 = vld [vmem:[#allocation2 + $0x60] sm:$0xff] }
 0xe2a   :  { %8862 = vst.msk [vmem:[#allocation2 + $0x68] sm:$0xff] %vm8848_vm7, %v8827_v23 }
 0xe31   :  { %v8878_v27 = vld [vmem:[#allocation2 + $0x68] sm:$0xff] }
 0xe32   :  { %v8829_v8 = vpop.permute.xlu0 %8828  ;;  %v8887_v44 = vpack.c.bf16 %v8878_v27, %v8877_v40  ;;  %v15674_v40 = vld [vmem:[#allocation21_spill] sm:$0xff] }
 0xe33   :  { %8863 = vst.msk [vmem:[#allocation2 + $0x70] sm:$0xff] %vm8848_vm7, %v8829_v8 }
 0xe34   :  { %11559 = vmatprep.mubr.msk.bf16.mxu0 %vm1158_vm1, %v8887_v44 }
 0xe39   :  { %v8831_v54 = vpop.permute.xlu1 %8830 }
 0xe3a   :  { %8864 = vst.msk [vmem:[#allocation2 + $0x78] sm:$0xff] %vm8848_vm7, %v8831_v54  ;;  %v8879_v37 = vld [vmem:[#allocation2 + $0x70] sm:$0xff] }
 0xe41   :  { %v8880_v4 = vld [vmem:[#allocation2 + $0x78] sm:$0xff] }
 0xe42   :  { %v8888_v34 = vpack.c.bf16 %v8880_v4, %v8879_v37 }
 0xe44   :  { %11560 = vmatmul.mubr.msk.bf16.gmra.mrb[12].mxu0 %vm1158_vm1, %v8888_v34 }
 0xeb2   :  { %v11549_v55 = vpop.f32.mrb[0].mxu0 }
 0xeb3   :  { %v8970_v6 = vpop.f32.mrb[1].mxu0  ;;  %v8979_v51 = vadd.f32 %v11549_v55, %v14915_v43 }
 0xeb4   :  { %v8971_v12 = vadd.f32 %v14915_v43, %v8970_v6  ;;  %v11550_v39 = vpop.f32.mrb[2].mxu0 }
 0xeb5   :  { %v8973_v61 = vpop.f32.mrb[3].mxu0  ;;  %v14924_v28 = vadd.f32 %v8979_v51, %v15664_v52  ;;  %v8982_v35 = vadd.f32 %v11550_v39, %v14915_v43 }
 0xeb6   :  { %v14920_v11 = vadd.f32 %v8971_v12, %v15663_v63  ;;  %v8974_v47 = vadd.f32 %v14915_v43, %v8973_v61  ;;  %v15675_v12 = vld [vmem:[#allocation20_spill] sm:$0xff] }
 0xeb7   :  { %v14935_v57 = vadd.f32 %v8982_v35, %v15666_v5  ;;  %v9057_v31 = vsel %vm1158_vm1, %v14924_v28, 0.0  ;;  %v15677_v35 = vld [vmem:[#allocation23_spill] sm:$0xff] }
 0xeb8   :  { %v14928_v42 = vadd.f32 %v8974_v47, %v15665_v25  ;;  %v9051_v62 = vsel %vm1158_vm1, %v14920_v11, 0.0  ;;  %v15676_v47 = vld [vmem:[#allocation22_spill] sm:$0xff] }
 0xeb9   :  { %9052 = vadd.xlane.f32.xlu0 %v9051_v62  ;;  %v9060_v24 = vsel %vm1158_vm1, %v14935_v57, 0.0 }
 0xeba   :  { %v9054_v22 = vsel %vm1158_vm1, %v14928_v42, 0.0 }
 0xebb   :  { %9055 = vadd.xlane.f32.xlu1 %v9054_v22  ;;  %v15678_v22 = vld [vmem:[#allocation24_spill] sm:$0xff] }
 0xebd   :  { %9058 = vadd.xlane.f32.xlu0 %v9057_v31 }
 0xec1   :  { %9061 = vadd.xlane.f32.xlu0 %v9060_v24 }
 0xec3   :  { %v11553_v53 = vpop.f32.mrb[4].mxu0 }
 0xec4   :  { %v8986_v32 = vpop.f32.mrb[5].mxu0  ;;  %v8995_v59 = vadd.f32 %v11553_v53, %v14915_v43 }
 0xec5   :  { %v8987_v17 = vadd.f32 %v14915_v43, %v8986_v32  ;;  %v11554_v33 = vpop.f32.mrb[6].mxu0 }
 0xec6   :  { %v8989_v16 = vpop.f32.mrb[7].mxu0  ;;  %v8998_v50 = vadd.f32 %v11554_v33, %v14915_v43  ;;  %v14949_v18 = vadd.f32 %v8995_v59, %v15668_v1 }
 0xec7   :  { %v14944_v56 = vadd.f32 %v8987_v17, %v15667_v21  ;;  %v8990_v48 = vadd.f32 %v14915_v43, %v8989_v16 }
 0xec8   :  { %v14957_v49 = vadd.f32 %v8998_v50, %v15670_v3  ;;  %v9069_v13 = vsel %vm1158_vm1, %v14949_v18, 0.0 }
 0xec9   :  { %v14952_v9 = vadd.f32 %v8990_v48, %v15669_v10  ;;  %v9063_v20 = vsel %vm1158_vm1, %v14944_v56, 0.0 }
 0xeca   :  { %9064 = vadd.xlane.f32.xlu0 %v9063_v20  ;;  %v9072_v46 = vsel %vm1158_vm1, %v14957_v49, 0.0 }
 0xecb   :  { %v9066_v7 = vsel %vm1158_vm1, %v14952_v9, 0.0 }
 0xecc   :  { %9067 = vadd.xlane.f32.xlu1 %v9066_v7 }
 0xece   :  { %9070 = vadd.xlane.f32.xlu0 %v9069_v13 }
 0xed0   :  { %9073 = vadd.xlane.f32.xlu1 %v9072_v46 }
 0xed3   :  { %v11557_v2 = vpop.f32.mrb[8].mxu0 }
 0xed4   :  { %v9002_v19 = vpop.f32.mrb[9].mxu0  ;;  %v9011_v45 = vadd.f32 %v11557_v2, %v14915_v43 }
 0xed5   :  { %v9003_v15 = vadd.f32 %v14915_v43, %v9002_v19  ;;  %v11558_v29 = vpop.f32.mrb[10].mxu0 }
 0xed6   :  { %v9005_v41 = vpop.f32.mrb[11].mxu0  ;;  %v9014_v26 = vadd.f32 %v11558_v29, %v14915_v43  ;;  %v14973_v14 = vadd.f32 %v9011_v45, %v15672_v58 }
 0xed7   :  { %v14968_v38 = vadd.f32 %v9003_v15, %v15671_v36  ;;  %v9006_v30 = vadd.f32 %v14915_v43, %v9005_v41 }
 0xed8   :  { %v14981_v27 = vadd.f32 %v9014_v26, %v15674_v40  ;;  %v9081_v44 = vsel %vm1158_vm1, %v14973_v14, 0.0 }
 0xed9   :  { %v14976_v0 = vadd.f32 %v9006_v30, %v15673_v60  ;;  %v9075_v23 = vsel %vm1158_vm1, %v14968_v38, 0.0 }
 0xeda   :  { %9076 = vadd.xlane.f32.xlu0 %v9075_v23  ;;  %v9084_v54 = vsel %vm1158_vm1, %v14981_v27, 0.0 }
 0xedb   :  { %v9078_v8 = vsel %vm1158_vm1, %v14976_v0, 0.0 }
 0xedc   :  { %9079 = vadd.xlane.f32.xlu1 %v9078_v8 }
 0xede   :  { %9082 = vadd.xlane.f32.xlu0 %v9081_v44 }
 0xee0   :  { %9085 = vadd.xlane.f32.xlu1 %v9084_v54 }
 0xf17   :  { %v11561_v37 = vpop.f32.mrb[12].mxu0 }
 0xf18   :  { %v9018_v4 = vpop.f32.mrb[13].mxu0  ;;  %v9027_v34 = vadd.f32 %v11561_v37, %v14915_v43 }
 0xf19   :  { %v9019_v55 = vadd.f32 %v14915_v43, %v9018_v4  ;;  %v11562_v6 = vpop.f32.mrb[14].mxu0 }
 0xf1a   :  { %v9021_v51 = vpop.f32.mrb[15].mxu0  ;;  %v9030_v61 = vadd.f32 %v11562_v6, %v14915_v43  ;;  %v14997_v52 = vadd.f32 %v9027_v34, %v15676_v47 }
 0xf1b   :  { %v14992_v39 = vadd.f32 %v9019_v55, %v15675_v12  ;;  %v9022_v63 = vadd.f32 %v14915_v43, %v9021_v51 }
 0xf1c   :  { %v15005_v5 = vadd.f32 %v9030_v61, %v15678_v22  ;;  %v9093_v43 = vsel %vm1158_vm1, %v14997_v52, 0.0 }
 0xf1d   :  { %v15000_v25 = vadd.f32 %v9022_v63, %v15677_v35  ;;  %v9087_v62 = vsel %vm1158_vm1, %v14992_v39, 0.0 }
 0xf1e   :  { %9088 = vadd.xlane.f32.xlu0 %v9087_v62  ;;  %v9096_v24 = vsel %vm1158_vm1, %v15005_v5, 0.0 }
 0xf1f   :  { %v9090_v31 = vsel %vm1158_vm1, %v15000_v25, 0.0 }
 0xf20   :  { %9091 = vadd.xlane.f32.xlu1 %v9090_v31 }
 0xf22   :  { %9094 = vadd.xlane.f32.xlu0 %v9093_v43 }
 0xf24   :  { %9097 = vadd.xlane.f32.xlu1 %v9096_v24 }
 0xf46   :  { %v9053_v53 = vpop.xlane.xlu0 %9052 }
 0xf47   :  { %v9099_v32 = vmul.f32 0.03125, %v9053_v53 }
 0xf48   :  { %v9056_v59 = vpop.xlane.xlu1 %9055 }
 0xf49   :  { %v15014_v17 = vsub.f32 %v14920_v11, %v9099_v32  ;;  %v9100_v33 = vmul.f32 0.03125, %v9056_v59 }
 0xf4a   :  { %v9059_v16 = vpop.xlane.xlu0 %9058 }
 0xf4b   :  { %v15017_v21 = vsub.f32 %v14928_v42, %v9100_v33  ;;  %v9101_v50 = vmul.f32 0.03125, %v9059_v16  ;;  %v9131_v48 = vmul.f32 %v15014_v17, %v15014_v17 }
 0xf4d   :  { %v15022_v1 = vsub.f32 %v14924_v28, %v9101_v50  ;;  %v9147_v10 = vsel %vm1158_vm1, %v9131_v48, 0.0  ;;  %v9132_v20 = vmul.f32 %v15017_v21, %v15017_v21 }
 0xf4e   :  { %v9062_v3 = vpop.xlane.xlu0 %9061  ;;  %9148 = vadd.xlane.f32.xlu0 %v9147_v10 }
 0xf4f   :  { %v9102_v7 = vmul.f32 0.03125, %v9062_v3  ;;  %v9150_v13 = vsel %vm1158_vm1, %v9132_v20, 0.0  ;;  %v9133_v46 = vmul.f32 %v15022_v1, %v15022_v1 }
 0xf50   :  { %9151 = vadd.xlane.f32.xlu1 %v9150_v13 }
 0xf51   :  { %v15031_v2 = vsub.f32 %v14935_v57, %v9102_v7  ;;  %v9153_v19 = vsel %vm1158_vm1, %v9133_v46, 0.0  ;;  %v11642_v46 = vld [vmem:[%s15611_s9] sm:$0xff]  }
 0xf52   :  { %9154 = vadd.xlane.f32.xlu0 %v9153_v19  ;;  %11563 = vmatprep.subr.bf16.mxu1 %v11642_v46  ;;  %v11643_v19 = vld [vmem:[%s15611_s9 + $0x8] sm:$0xff]  }
 0xf53   :  { %v9134_v45 = vmul.f32 %v15031_v2, %v15031_v2  ;;  %11564 = vmatpush3.bf16.msra.mxu1 %v11642_v46  ;;  %v15119_v46 = vld [vmem:[%s15609_s7] ss:$0 sm:$0xff] }
 0xf54   :  { %11565 = vmatprep.subr.bf16.mxu1 %v11643_v19 }
 0xf55   :  { %v9156_v15 = vsel %vm1158_vm1, %v9134_v45, 0.0 }
 0xf56   :  { %9157 = vadd.xlane.f32.xlu1 %v9156_v15 }
 0xf57   :  { %v9065_v29 = vpop.xlane.xlu0 %9064  ;;  %11566 = vmatpush3.bf16.msra.mxu1 %v11643_v19 }
 0xf58   :  { %v9103_v41 = vmul.f32 0.03125, %v9065_v29 }
 0xf59   :  { %v9068_v36 = vpop.xlane.xlu1 %9067 }
 0xf5a   :  { %v15038_v26 = vsub.f32 %v14944_v56, %v9103_v41  ;;  %v9104_v30 = vmul.f32 0.03125, %v9068_v36 }
 0xf5b   :  { %v9071_v58 = vpop.xlane.xlu0 %9070 }
 0xf5c   :  { %v15041_v60 = vsub.f32 %v14952_v9, %v9104_v30  ;;  %v9105_v23 = vmul.f32 0.03125, %v9071_v58  ;;  %v9135_v40 = vmul.f32 %v15038_v26, %v15038_v26 }
 0xf5d   :  { %v9074_v8 = vpop.xlane.xlu1 %9073 }
 0xf5e   :  { %v15046_v44 = vsub.f32 %v14949_v18, %v9105_v23  ;;  %v9106_v54 = vmul.f32 0.03125, %v9074_v8  ;;  %v9159_v37 = vsel %vm1158_vm1, %v9135_v40, 0.0  ;;  %v9136_v4 = vmul.f32 %v15041_v60, %v15041_v60 }
 0xf5f   :  { %9160 = vadd.xlane.f32.xlu0 %v9159_v37 }
 0xf60   :  { %v15052_v34 = vsub.f32 %v14957_v49, %v9106_v54  ;;  %v9162_v55 = vsel %vm1158_vm1, %v9136_v4, 0.0  ;;  %v9137_v6 = vmul.f32 %v15046_v44, %v15046_v44 }
 0xf61   :  { %9163 = vadd.xlane.f32.xlu1 %v9162_v55 }
 0xf62   :  { %v9165_v51 = vsel %vm1158_vm1, %v9137_v6, 0.0  ;;  %v9138_v12 = vmul.f32 %v15052_v34, %v15052_v34 }
 0xf63   :  { %9166 = vadd.xlane.f32.xlu0 %v9165_v51 }
 0xf64   :  { %v9168_v61 = vsel %vm1158_vm1, %v9138_v12, 0.0 }
 0xf65   :  { %9169 = vadd.xlane.f32.xlu1 %v9168_v61 }
 0xf67   :  { %v9077_v63 = vpop.xlane.xlu0 %9076 }
 0xf68   :  { %v9107_v47 = vmul.f32 0.03125, %v9077_v63 }
 0xf69   :  { %v9080_v35 = vpop.xlane.xlu1 %9079 }
 0xf6a   :  { %v15062_v62 = vsub.f32 %v14968_v38, %v9107_v47  ;;  %v9108_v22 = vmul.f32 0.03125, %v9080_v35 }
 0xf6b   :  { %v9083_v31 = vpop.xlane.xlu0 %9082 }
 0xf6c   :  { %v15065_v43 = vsub.f32 %v14976_v0, %v9108_v22  ;;  %v9109_v24 = vmul.f32 0.03125, %v9083_v31  ;;  %v9139_v53 = vmul.f32 %v15062_v62, %v15062_v62 }
 0xf6d   :  { %v9086_v32 = vpop.xlane.xlu1 %9085 }
 0xf6e   :  { %v15070_v59 = vsub.f32 %v14973_v14, %v9109_v24  ;;  %v9110_v33 = vmul.f32 0.03125, %v9086_v32  ;;  %v9171_v16 = vsel %vm1158_vm1, %v9139_v53, 0.0  ;;  %v9140_v50 = vmul.f32 %v15065_v43, %v15065_v43 }
 0xf6f   :  { %9172 = vadd.xlane.f32.xlu0 %v9171_v16 }
 0xf70   :  { %v15076_v48 = vsub.f32 %v14981_v27, %v9110_v33  ;;  %v9174_v10 = vsel %vm1158_vm1, %v9140_v50, 0.0  ;;  %v9141_v20 = vmul.f32 %v15070_v59, %v15070_v59 }
 0xf71   :  { %9175 = vadd.xlane.f32.xlu1 %v9174_v10 }
 0xf72   :  { %v9177_v3 = vsel %vm1158_vm1, %v9141_v20, 0.0  ;;  %v9142_v7 = vmul.f32 %v15076_v48, %v15076_v48 }
 0xf73   :  { %9178 = vadd.xlane.f32.xlu0 %v9177_v3 }
 0xf74   :  { %v9180_v13 = vsel %vm1158_vm1, %v9142_v7, 0.0 }
 0xf75   :  { %9181 = vadd.xlane.f32.xlu1 %v9180_v13 }
 0xfab   :  { %v9089_v45 = vpop.xlane.xlu0 %9088 }
 0xfac   :  { %v9111_v15 = vmul.f32 0.03125, %v9089_v45 }
 0xfad   :  { %v9092_v29 = vpop.xlane.xlu1 %9091 }
 0xfae   :  { %v15092_v41 = vsub.f32 %v14992_v39, %v9111_v15  ;;  %v9112_v36 = vmul.f32 0.03125, %v9092_v29 }
 0xfaf   :  { %v9095_v30 = vpop.xlane.xlu0 %9094 }
 0xfb0   :  { %v15095_v58 = vsub.f32 %v15000_v25, %v9112_v36  ;;  %v9113_v23 = vmul.f32 0.03125, %v9095_v30  ;;  %v9143_v40 = vmul.f32 %v15092_v41, %v15092_v41 }
 0xfb1   :  { %v9098_v8 = vpop.xlane.xlu1 %9097 }
 0xfb2   :  { %v15100_v54 = vsub.f32 %v14997_v52, %v9113_v23  ;;  %v9114_v37 = vmul.f32 0.03125, %v9098_v8  ;;  %v9183_v4 = vsel %vm1158_vm1, %v9143_v40, 0.0  ;;  %v9144_v55 = vmul.f32 %v15095_v58, %v15095_v58  ;;  %v15126_v40 = vld [vmem:[%s15610_s8] ss:$0 sm:$0xff] }
 0xfb3   :  { %9184 = vadd.xlane.f32.xlu0 %v9183_v4 }
 0xfb4   :  { %v15106_v6 = vsub.f32 %v15005_v5, %v9114_v37  ;;  %v9186_v51 = vsel %vm1158_vm1, %v9144_v55, 0.0  ;;  %v9145_v12 = vmul.f32 %v15100_v54, %v15100_v54 }
 0xfb5   :  { %9187 = vadd.xlane.f32.xlu1 %v9186_v51 }
 0xfb6   :  { %v9189_v61 = vsel %vm1158_vm1, %v9145_v12, 0.0  ;;  %v9146_v63 = vmul.f32 %v15106_v6, %v15106_v6 }
 0xfb7   :  { %9190 = vadd.xlane.f32.xlu0 %v9189_v61 }
 0xfb8   :  { %v9192_v47 = vsel %vm1158_vm1, %v9146_v63, 0.0 }
 0xfb9   :  { %9193 = vadd.xlane.f32.xlu1 %v9192_v47 }
 0xfdb   :  { %v9149_v35 = vpop.xlane.xlu0 %9148 }
 0xfdc   :  { %v9195_v22 = vmul.f32 0.03125, %v9149_v35 }
 0xfdd   :  { %v9152_v31 = vpop.xlane.xlu1 %9151 }
 0xfde   :  { %v9211_v24 = vadd.f32 1e-05, %v9195_v22  ;;  %v9196_v53 = vmul.f32 0.03125, %v9152_v31 }
 0xfdf   :  { %v9155_v32 = vpop.xlane.xlu0 %9154 }
 0xfe0   :  { %11936 = vrsqrt.f32 %v9211_v24  ;;  %v9212_v33 = vadd.f32 1e-05, %v9196_v53  ;;  %v9197_v16 = vmul.f32 0.03125, %v9155_v32 }
 0xfe2   :  { %11938 = vrsqrt.f32 %v9212_v33  ;;  %v9213_v50 = vadd.f32 1e-05, %v9197_v16 }
 0xfe3   :  { %v9158_v10 = vpop.xlane.xlu1 %9157 }
 0xfe4   :  { %11940 = vrsqrt.f32 %v9213_v50  ;;  %v9198_v20 = vmul.f32 0.03125, %v9158_v10 }
 0xfe6   :  { %v9214_v3 = vadd.f32 1e-05, %v9198_v20 }
 0xfe8   :  { %11942 = vrsqrt.f32 %v9214_v3 }
 0xfea   :  { %v11937_v7 = vpop.eup %11936 }
 0xfeb   :  { %v9243_v13 = vmul.f32 %v11937_v7, %v15014_v17 }
 0xfec   :  { %v11939_v19 = vpop.eup %11938  ;;  %v9161_v45 = vpop.xlane.xlu0 %9160 }
 0xfed   :  { %v9244_v15 = vmul.f32 %v11939_v19, %v15017_v21  ;;  %v9199_v29 = vmul.f32 0.03125, %v9161_v45  ;;  %v9265_v23 = vmul.f32 %v15119_v46, %v9243_v13 }
 0xfee   :  { %v11941_v36 = vpop.eup %11940  ;;  %v9164_v30 = vpop.xlane.xlu1 %9163 }
 0xfef   :  { %v9245_v17 = vmul.f32 %v11941_v36, %v15022_v1  ;;  %v9215_v8 = vadd.f32 1e-05, %v9199_v29  ;;  %v9200_v37 = vmul.f32 0.03125, %v9164_v30  ;;  %v9266_v4 = vmul.f32 %v15119_v46, %v9244_v15 }
 0xff0   :  { %v9167_v55 = vpop.xlane.xlu0 %9166  ;;  %v9287_v63 = vadd.f32 %v15126_v40, %v9265_v23 }
 0xff1   :  { %11944 = vrsqrt.f32 %v9215_v8  ;;  %v9216_v51 = vadd.f32 1e-05, %v9200_v37  ;;  %v9201_v21 = vmul.f32 0.03125, %v9167_v55  ;;  %v9288_v47 = vadd.f32 %v15126_v40, %v9266_v4 }
 0xff2   :  { %v11943_v12 = vpop.eup %11942  ;;  %v9170_v61 = vpop.xlane.xlu1 %9169  ;;  %v9267_v35 = vmul.f32 %v15119_v46, %v9245_v17 }
 0xff3   :  { %v9246_v22 = vmul.f32 %v11943_v12, %v15031_v2  ;;  %11946 = vrsqrt.f32 %v9216_v51  ;;  %v9217_v1 = vadd.f32 1e-05, %v9201_v21  ;;  %v9202_v31 = vmul.f32 0.03125, %v9170_v61 }
 0xff4   :  { %v9303_v24 = vpack.c.bf16 %v9288_v47, %v9287_v63  ;;  %v9289_v33 = vadd.f32 %v15126_v40, %v9267_v35 }
 0xff5   :  { %v9268_v53 = vmul.f32 %v15119_v46, %v9246_v22  ;;  %11948 = vrsqrt.f32 %v9217_v1  ;;  %v9218_v32 = vadd.f32 1e-05, %v9202_v31 }
 0xff6   :  { %11567 = vmatprep.mubr.msk.bf16.mxu1 %vm1158_vm1, %v9303_v24 }
 0xff7   :  { %v9290_v16 = vadd.f32 %v15126_v40, %v9268_v53  ;;  %11950 = vrsqrt.f32 %v9218_v32 }
 0xff9   :  { %v9304_v50 = vpack.c.bf16 %v9290_v16, %v9289_v33 }
 0xffb   :  { %v11945_v10 = vpop.eup %11944  ;;  %11568 = vmatmul.mubr.msk.bf16.vlgmr.msra.gmra.mrb[16].mxu1 %vm1158_vm1, %v9304_v50 }
 0xffc   :  { %v9247_v2 = vmul.f32 %v11945_v10, %v15038_v26  ;;  %v9173_v20 = vpop.xlane.xlu0 %9172 }
 0xffd   :  { %v11947_v3 = vpop.eup %11946  ;;  %v9203_v7 = vmul.f32 0.03125, %v9173_v20 }
 0xffe   :  { %v9248_v13 = vmul.f32 %v11947_v3, %v15041_v60  ;;  %v9176_v19 = vpop.xlane.xlu1 %9175  ;;  %v9269_v45 = vmul.f32 %v15119_v46, %v9247_v2 }
 0xfff   :  { %v11949_v15 = vpop.eup %11948  ;;  %v9219_v29 = vadd.f32 1e-05, %v9203_v7  ;;  %v9204_v36 = vmul.f32 0.03125, %v9176_v19 }
0x1000   :  { %v9249_v30 = vmul.f32 %v11949_v15, %v15046_v44  ;;  %v9179_v23 = vpop.xlane.xlu0 %9178  ;;  %v9270_v17 = vmul.f32 %v15119_v46, %v9248_v13  ;;  %v9291_v60 = vadd.f32 %v15126_v40, %v9269_v45 }
0x1001   :  { %11952 = vrsqrt.f32 %v9219_v29  ;;  %v9220_v8 = vadd.f32 1e-05, %v9204_v36  ;;  %v9205_v37 = vmul.f32 0.03125, %v9179_v23  ;;  %v11951_v26 = vpop.eup %11950 }
0x1002   :  { %v9271_v4 = vmul.f32 %v15119_v46, %v9249_v30  ;;  %v9182_v55 = vpop.xlane.xlu1 %9181  ;;  %v9292_v51 = vadd.f32 %v15126_v40, %v9270_v17  ;;  %v9250_v21 = vmul.f32 %v11951_v26, %v15052_v34 }
0x1003   :  { %11954 = vrsqrt.f32 %v9220_v8  ;;  %v9221_v12 = vadd.f32 1e-05, %v9205_v37  ;;  %v9206_v61 = vmul.f32 0.03125, %v9182_v55 }
0x1004   :  { %v9305_v44 = vpack.c.bf16 %v9292_v51, %v9291_v60  ;;  %v9272_v63 = vmul.f32 %v15119_v46, %v9250_v21  ;;  %v9293_v35 = vadd.f32 %v15126_v40, %v9271_v4 }
0x1005   :  { %11956 = vrsqrt.f32 %v9221_v12  ;;  %v9222_v47 = vadd.f32 1e-05, %v9206_v61 }
0x1006   :  { %11571 = vmatprep.mubr.msk.bf16.mxu1 %vm1158_vm1, %v9305_v44  ;;  %v9294_v22 = vadd.f32 %v15126_v40, %v9272_v63 }
0x1007   :  { %11958 = vrsqrt.f32 %v9222_v47 }
0x1008   :  { %v9306_v1 = vpack.c.bf16 %v9294_v22, %v9293_v35 }
0x100a   :  { %11572 = vmatmul.mubr.msk.bf16.gmra.mrb[20].mxu1 %vm1158_vm1, %v9306_v1 }
0x100b   :  { %v11953_v31 = vpop.eup %11952 }
0x100c   :  { %v9251_v34 = vmul.f32 %v11953_v31, %v15062_v62 }
0x100d   :  { %v11955_v24 = vpop.eup %11954 }
0x100e   :  { %v9252_v53 = vmul.f32 %v11955_v24, %v15065_v43  ;;  %v9273_v32 = vmul.f32 %v15119_v46, %v9251_v34 }
0x100f   :  { %v11957_v33 = vpop.eup %11956 }
0x1010   :  { %v9253_v16 = vmul.f32 %v11957_v33, %v15070_v59  ;;  %v9274_v50 = vmul.f32 %v15119_v46, %v9252_v53  ;;  %v9295_v3 = vadd.f32 %v15126_v40, %v9273_v32  ;;  %v11647_v53 = vld [vmem:[%s15613_s11 + $0x18] sm:$0xff]   ;;  %v15196_v32 = vld [vmem:[%s15612_s10] ss:$0 sm:$0xff] }
0x1011   :  { %v11959_v10 = vpop.eup %11958 }
0x1012   :  { %v9275_v2 = vmul.f32 %v15119_v46, %v9253_v16  ;;  %v9254_v20 = vmul.f32 %v11959_v10, %v15076_v48  ;;  %v9296_v7 = vadd.f32 %v15126_v40, %v9274_v50 }
0x1014   :  { %v9276_v62 = vmul.f32 %v15119_v46, %v9254_v20  ;;  %v9307_v13 = vpack.c.bf16 %v9296_v7, %v9295_v3  ;;  %v9297_v43 = vadd.f32 %v15126_v40, %v9275_v2 }
0x1016   :  { %v9298_v19 = vadd.f32 %v15126_v40, %v9276_v62  ;;  %11575 = vmatprep.mubr.msk.bf16.mxu1 %vm1158_vm1, %v9307_v13 }
0x1018   :  { %v9308_v59 = vpack.c.bf16 %v9298_v19, %v9297_v43 }
0x101a   :  { %11576 = vmatmul.mubr.msk.bf16.gmra.mrb[24].mxu1 %vm1158_vm1, %v9308_v59 }
0x1040   :  { %v9185_v45 = vpop.xlane.xlu0 %9184 }
0x1041   :  { %v9207_v15 = vmul.f32 0.03125, %v9185_v45 }
0x1042   :  { %v9188_v29 = vpop.xlane.xlu1 %9187 }
0x1043   :  { %v9223_v48 = vadd.f32 1e-05, %v9207_v15  ;;  %v9208_v36 = vmul.f32 0.03125, %v9188_v29 }
0x1044   :  { %v9191_v30 = vpop.xlane.xlu0 %9190 }
0x1045   :  { %11960 = vrsqrt.f32 %v9223_v48  ;;  %v9224_v23 = vadd.f32 1e-05, %v9208_v36  ;;  %v9209_v17 = vmul.f32 0.03125, %v9191_v30 }
0x1046   :  { %v9194_v8 = vpop.xlane.xlu1 %9193 }
0x1047   :  { %11962 = vrsqrt.f32 %v9224_v23  ;;  %v9225_v37 = vadd.f32 1e-05, %v9209_v17  ;;  %v9210_v26 = vmul.f32 0.03125, %v9194_v8 }
0x1049   :  { %11964 = vrsqrt.f32 %v9225_v37  ;;  %v9226_v4 = vadd.f32 1e-05, %v9210_v26 }
0x104b   :  { %11966 = vrsqrt.f32 %v9226_v4 }
0x104f   :  { %v11961_v55 = vpop.eup %11960 }
0x1050   :  { %v9255_v60 = vmul.f32 %v11961_v55, %v15092_v41 }
0x1051   :  { %v11963_v51 = vpop.eup %11962 }
0x1052   :  { %v9256_v21 = vmul.f32 %v11963_v51, %v15095_v58  ;;  %v9277_v12 = vmul.f32 %v15119_v46, %v9255_v60 }
0x1053   :  { %v11965_v61 = vpop.eup %11964 }
0x1054   :  { %v9257_v44 = vmul.f32 %v11965_v61, %v15100_v54  ;;  %v9278_v63 = vmul.f32 %v15119_v46, %v9256_v21  ;;  %v9299_v1 = vadd.f32 %v15126_v40, %v9277_v12 }
0x1055   :  { %v11967_v47 = vpop.eup %11966 }
0x1056   :  { %v9279_v35 = vmul.f32 %v15119_v46, %v9257_v44  ;;  %v9258_v22 = vmul.f32 %v11967_v47, %v15106_v6  ;;  %v9300_v31 = vadd.f32 %v15126_v40, %v9278_v63  ;;  %v11644_v6 = vld [vmem:[%s15613_s11] sm:$0xff]  }
0x1057   :  { %11583 = vmatprep.subr.bf16.mxu0 %v11644_v6 }
0x1058   :  { %v9280_v41 = vmul.f32 %v15119_v46, %v9258_v22  ;;  %v9309_v34 = vpack.c.bf16 %v9300_v31, %v9299_v1  ;;  %v9301_v58 = vadd.f32 %v15126_v40, %v9279_v35  ;;  %11584 = vmatpush3.bf16.msra.mxu0 %v11644_v6  ;;  %v11645_v46 = vld [vmem:[%s15613_s11 + $0x8] sm:$0xff]  }
0x1059   :  { %11585 = vmatprep.subr.bf16.mxu0 %v11645_v46 }
0x105a   :  { %v9302_v24 = vadd.f32 %v15126_v40, %v9280_v41  ;;  %11579 = vmatprep.mubr.msk.bf16.mxu1 %vm1158_vm1, %v9309_v34  ;;  %v11646_v40 = vld [vmem:[%s15613_s11 + $0x10] sm:$0xff]  }
0x105c   :  { %v9310_v54 = vpack.c.bf16 %v9302_v24, %v9301_v58  ;;  %11586 = vmatpush3.bf16.msra.mxu0 %v11645_v46 }
0x105d   :  { %11587 = vmatprep.subr.bf16.mxu0 %v11646_v40 }
0x105e   :  { %11580 = vmatmul.mubr.msk.bf16.gmra.mrb[28].mxu1 %vm1158_vm1, %v9310_v54 }
0x1060   :  { %11588 = vmatpush3.bf16.msra.mxu0 %v11646_v40 }
0x1061   :  { %11589 = vmatprep.subr.bf16.mxu0 %v11647_v53 }
0x1064   :  { %11590 = vmatpush3.bf16.msra.mxu0 %v11647_v53 }
0x10ce   :  { %v11569_v33 = vpop.f32.mrb[16].mxu1 }
0x10cf   :  { %v9401_v16 = vadd.f32 %v11569_v33, %v15196_v32  ;;  %v9392_v50 = vpop.f32.mrb[17].mxu1 }
0x10d0   :  { %v9393_v10 = vadd.f32 %v15196_v32, %v9392_v50  ;;  %v11570_v2 = vpop.f32.mrb[18].mxu1 }
0x10d1   :  { %v9473_v20 = vmul.f32 0.70710677, %v9401_v16  ;;  %v9404_v3 = vadd.f32 %v11570_v2, %v15196_v32  ;;  %v9395_v7 = vpop.f32.mrb[19].mxu1  ;;  %v9457_v8 = vmul.f32 0.5, %v9401_v16 }
0x10d2   :  { %v9471_v62 = vmul.f32 0.70710677, %v9393_v10  ;;  %v9396_v13 = vadd.f32 %v15196_v32, %v9395_v7  ;;  %v9455_v60 = vmul.f32 0.5, %v9393_v10 }
0x10d3   :  { %11968 = verf.f32 %v9473_v20  ;;  %v9474_v43 = vmul.f32 0.70710677, %v9404_v3  ;;  %v9458_v37 = vmul.f32 0.5, %v9404_v3 }
0x10d4   :  { %11970 = verf.f32 %v9471_v62  ;;  %v9472_v19 = vmul.f32 0.70710677, %v9396_v13  ;;  %v9456_v51 = vmul.f32 0.5, %v9396_v13 }
0x10d5   :  { %11972 = verf.f32 %v9474_v43 }
0x10d6   :  { %11974 = verf.f32 %v9472_v19 }
0x10dd   :  { %v11969_v59 = vpop.eup %11968  ;;  %v11573_v29 = vpop.f32.mrb[20].mxu1 }
0x10de   :  { %v11971_v45 = vpop.eup %11970  ;;  %v9505_v15 = vadd.f32 1.0, %v11969_v59  ;;  %v9417_v30 = vadd.f32 %v11573_v29, %v15196_v32  ;;  %v9408_v23 = vpop.f32.mrb[21].mxu1 }
0x10df   :  { %v11973_v48 = vpop.eup %11972  ;;  %v9503_v36 = vadd.f32 1.0, %v11971_v45  ;;  %v9409_v4 = vadd.f32 %v15196_v32, %v9408_v23  ;;  %v11574_v55 = vpop.f32.mrb[22].mxu1 }
0x10e0   :  { %v11975_v17 = vpop.eup %11974  ;;  %v9506_v26 = vadd.f32 1.0, %v11973_v48  ;;  %v9477_v12 = vmul.f32 0.70710677, %v9417_v30  ;;  %v9411_v61 = vpop.f32.mrb[23].mxu1  ;;  %v9521_v44 = vmul.f32 %v9505_v15, %v9457_v8  ;;  %v9420_v35 = vadd.f32 %v11574_v55, %v15196_v32 }
0x10e1   :  { %v9504_v21 = vadd.f32 1.0, %v11975_v17  ;;  %v9475_v47 = vmul.f32 0.70710677, %v9409_v4  ;;  %v9519_v22 = vmul.f32 %v9503_v36, %v9455_v60  ;;  %v9412_v31 = vadd.f32 %v15196_v32, %v9411_v61 }
0x10e2   :  { %v9522_v63 = vmul.f32 %v9506_v26, %v9458_v37  ;;  %11976 = verf.f32 %v9477_v12  ;;  %v9478_v34 = vmul.f32 0.70710677, %v9420_v35  ;;  %v9461_v2 = vmul.f32 0.5, %v9417_v30 }
0x10e3   :  { %v9520_v1 = vmul.f32 %v9504_v21, %v9456_v51  ;;  %11978 = verf.f32 %v9475_v47  ;;  %v9476_v24 = vmul.f32 0.70710677, %v9412_v31  ;;  %v9459_v43 = vmul.f32 0.5, %v9409_v4 }
0x10e4   :  { %v9536_v41 = vpack.c.bf16 %v9522_v63, %v9521_v44  ;;  %11980 = verf.f32 %v9478_v34  ;;  %v9462_v19 = vmul.f32 0.5, %v9420_v35  ;;  %v9460_v15 = vmul.f32 0.5, %v9412_v31 }
0x10e5   :  { %v9535_v58 = vpack.c.bf16 %v9520_v1, %v9519_v22  ;;  %11982 = verf.f32 %v9476_v24 }
0x10e7   :  { %11591 = vmatprep.mubr.msk.bf16.mxu0 %vm9582_vm8, %v9535_v58 }
0x10e8   :  { %11592 = vmatmul.mubr.msk.bf16.vlgmr.msra.gmra.mrb[16].mxu0 %vm9582_vm8, %v9536_v41 }
0x10ec   :  { %v11977_v54 = vpop.eup %11976 }
0x10ed   :  { %v11577_v6 = vpop.f32.mrb[24].mxu1  ;;  %v11979_v46 = vpop.eup %11978  ;;  %v9509_v33 = vadd.f32 1.0, %v11977_v54 }
0x10ee   :  { %v9433_v40 = vadd.f32 %v11577_v6, %v15196_v32  ;;  %v9424_v53 = vpop.f32.mrb[25].mxu1  ;;  %v11981_v10 = vpop.eup %11980  ;;  %v9507_v20 = vadd.f32 1.0, %v11979_v46 }
0x10ef   :  { %v9425_v16 = vadd.f32 %v15196_v32, %v9424_v53  ;;  %v11578_v50 = vpop.f32.mrb[26].mxu1  ;;  %v11983_v13 = vpop.eup %11982  ;;  %v9510_v59 = vadd.f32 1.0, %v11981_v10  ;;  %v9525_v36 = vmul.f32 %v9509_v33, %v9461_v2 }
0x10f0   :  { %v9481_v3 = vmul.f32 0.70710677, %v9433_v40  ;;  %v9436_v7 = vadd.f32 %v11578_v50, %v15196_v32  ;;  %v9427_v62 = vpop.f32.mrb[27].mxu1  ;;  %v9508_v29 = vadd.f32 1.0, %v11983_v13  ;;  %v9523_v30 = vmul.f32 %v9507_v20, %v9459_v43 }
0x10f1   :  { %v9479_v45 = vmul.f32 0.70710677, %v9425_v16  ;;  %v9526_v23 = vmul.f32 %v9510_v59, %v9462_v19  ;;  %v9428_v17 = vadd.f32 %v15196_v32, %v9427_v62  ;;  %v9465_v12 = vmul.f32 0.5, %v9433_v40 }
0x10f2   :  { %11984 = verf.f32 %v9481_v3  ;;  %v9482_v48 = vmul.f32 0.70710677, %v9436_v7  ;;  %v9524_v8 = vmul.f32 %v9508_v29, %v9460_v15  ;;  %v9466_v61 = vmul.f32 0.5, %v9436_v7 }
0x10f3   :  { %11986 = verf.f32 %v9479_v45  ;;  %v9538_v37 = vpack.c.bf16 %v9526_v23, %v9525_v36  ;;  %v9480_v26 = vmul.f32 0.70710677, %v9428_v17  ;;  %v9463_v1 = vmul.f32 0.5, %v9425_v16 }
0x10f4   :  { %11988 = verf.f32 %v9482_v48  ;;  %v9537_v55 = vpack.c.bf16 %v9524_v8, %v9523_v30  ;;  %v9464_v31 = vmul.f32 0.5, %v9428_v17 }
0x10f5   :  { %11990 = verf.f32 %v9480_v26 }
0x10f6   :  { %11595 = vmatprep.mubr.msk.bf16.mxu0 %vm9582_vm8, %v9537_v55 }
0x10f7   :  { %11596 = vmatmul.mubr.msk.bf16.gmra.mrb[20].mxu0 %vm9582_vm8, %v9538_v37 }
0x10fc   :  { %v11985_v4 = vpop.eup %11984 }
0x10fd   :  { %v11987_v60 = vpop.eup %11986  ;;  %v9513_v51 = vadd.f32 1.0, %v11985_v4  ;;  %v15225_v4 = vld [vmem:[%s15614_s12] ss:$0 sm:$0xff]  ;;  %s12067_s12 = smov [#allocation6]  }
0x10fe   :  { %v11989_v21 = vpop.eup %11988  ;;  %v9511_v63 = vadd.f32 1.0, %v11987_v60  ;;  %s10267_s23 = sshll.u32 %s12067_s12, 4  ;;  %s10268_s23 = int_to_ptr.vmem [resolvable:$true] %s10267_s23 }
0x10ff   :  { %v9514_v44 = vadd.f32 1.0, %v11989_v21  ;;  %v11991_v47 = vpop.eup %11990  ;;  %v9529_v35 = vmul.f32 %v9513_v51, %v9465_v12  ;;  %s12022_s24 = scalar_lea.vmem %s10268_s23, 2048  ;;  %p12027_p9 = scmp.lt.s32.totalorder %s10268_s23, %s10268_s23 }
0x1100   :  { %v9512_v41 = vadd.f32 1.0, %v11991_v47  ;;  %v9527_v58 = vmul.f32 %v9511_v63, %v9463_v1  ;;  %p12023_p8 = scmp.ne.s32.totalorder %s10268_s23, %s12022_s24  ;;  %p12028_p10 = scmp.lt.s32.totalorder %s12022_s24, %s12022_s24 }
0x1101   :  { %v9530_v22 = vmul.f32 %v9514_v44, %v9466_v61 }
0x1102   :  { %v9528_v24 = vmul.f32 %v9512_v41, %v9464_v31  ;;  %p12029_p11 = por %p12028_p10, %p12027_p9 }
0x1103   :  { %v9540_v34 = vpack.c.bf16 %v9530_v22, %v9529_v35 }
0x1104   :  { %v9539_v54 = vpack.c.bf16 %v9528_v24, %v9527_v58  ;;  %p12030_p12 = pnand %p12029_p11, %p12023_p8 }
0x1106   :  { %11599 = vmatprep.mubr.msk.bf16.mxu0 %vm9582_vm8, %v9539_v54 }
0x1107   :  { %11600 = vmatmul.mubr.msk.bf16.gmra.mrb[24].mxu0 %vm9582_vm8, %v9540_v34 }
0x1131   :  { %v11581_v6 = vpop.f32.mrb[28].mxu1 }
0x1132   :  { %v9449_v46 = vadd.f32 %v11581_v6, %v15196_v32  ;;  %v9440_v40 = vpop.f32.mrb[29].mxu1 }
0x1133   :  { %v9441_v53 = vadd.f32 %v15196_v32, %v9440_v40  ;;  %v11582_v33 = vpop.f32.mrb[30].mxu1 }
0x1134   :  { %v9485_v50 = vmul.f32 0.70710677, %v9449_v46  ;;  %v9452_v16 = vadd.f32 %v11582_v33, %v15196_v32  ;;  %v9443_v10 = vpop.f32.mrb[31].mxu1  ;;  %v9469_v15 = vmul.f32 0.5, %v9449_v46 }
0x1135   :  { %v9483_v2 = vmul.f32 0.70710677, %v9441_v53  ;;  %v9444_v20 = vadd.f32 %v15196_v32, %v9443_v10  ;;  %v9467_v36 = vmul.f32 0.5, %v9441_v53 }
0x1136   :  { %11992 = verf.f32 %v9485_v50  ;;  %v9486_v3 = vmul.f32 0.70710677, %v9452_v16  ;;  %v9470_v29 = vmul.f32 0.5, %v9452_v16 }
0x1137   :  { %11994 = verf.f32 %v9483_v2  ;;  %v9484_v7 = vmul.f32 0.70710677, %v9444_v20  ;;  %v9468_v23 = vmul.f32 0.5, %v9444_v20 }
0x1138   :  { %11996 = verf.f32 %v9486_v3 }
0x1139   :  { %11998 = verf.f32 %v9484_v7 }
0x1140   :  { %v11993_v62 = vpop.eup %11992 }
0x1141   :  { %v11995_v13 = vpop.eup %11994  ;;  %v9517_v43 = vadd.f32 1.0, %v11993_v62 }
0x1142   :  { %v11997_v19 = vpop.eup %11996  ;;  %v9515_v59 = vadd.f32 1.0, %v11995_v13 }
0x1143   :  { %v11999_v45 = vpop.eup %11998  ;;  %v9518_v48 = vadd.f32 1.0, %v11997_v19  ;;  %v9533_v30 = vmul.f32 %v9517_v43, %v9469_v15 }
0x1144   :  { %v9516_v17 = vadd.f32 1.0, %v11999_v45  ;;  %v9531_v8 = vmul.f32 %v9515_v59, %v9467_v36 }
0x1145   :  { %v9534_v32 = vmul.f32 %v9518_v48, %v9470_v29 }
0x1146   :  { %v9532_v37 = vmul.f32 %v9516_v17, %v9468_v23 }
0x1147   :  { %v9542_v26 = vpack.c.bf16 %v9534_v32, %v9533_v30 }
0x1148   :  { %v9541_v55 = vpack.c.bf16 %v9532_v37, %v9531_v8 }
0x114a   :  { %11603 = vmatprep.mubr.msk.bf16.mxu0 %vm9582_vm8, %v9541_v55 }
0x114b   :  { %11604 = vmatmul.mubr.msk.bf16.gmra.mrb[28].mxu0 %vm9582_vm8, %v9542_v26 }
0x11bb   :  { %v11593_v60 = vpop.f32.mrb[16].mxu0 }
0x11bc   :  { %v9650_v51 = vadd.f32 %v11593_v60, %v15225_v4  ;;  %v9641_v21 = vpop.f32.mrb[17].mxu0 }
0x11bd   :  { %v9642_v12 = vadd.f32 %v15225_v4, %v9641_v21  ;;  %v11594_v61 = vpop.f32.mrb[18].mxu0 }
0x11be   :  { %v9706_v44 = vadd.f32 %v9650_v51, %v14924_v28  ;;  %v9653_v63 = vadd.f32 %v11594_v61, %v15225_v4  ;;  %v9644_v47 = vpop.f32.mrb[19].mxu0 }
0x11bf   :  { %v9704_v35 = vadd.f32 %v9642_v12, %v14920_v11  ;;  %v9645_v22 = vadd.f32 %v15225_v4, %v9644_v47 }
0x11c0   :  { %9722 = vst.msk [vmem:[#allocation2 + $0x10] sm:$0xff] %vm1158_vm1, %v9706_v44  ;;  %v9707_v1 = vadd.f32 %v9653_v63, %v14935_v57 }
0x11c1   :  { %9720 = vst.msk [vmem:[#allocation2] sm:$0xff] %vm1158_vm1, %v9704_v35  ;;  %v9705_v31 = vadd.f32 %v9645_v22, %v14928_v42 }
0x11c2   :  { %9723 = vst.msk [vmem:[#allocation2 + $0x18] sm:$0xff] %vm1158_vm1, %v9707_v1 }
0x11c3   :  { %9721 = vst.msk [vmem:[#allocation2 + $0x8] sm:$0xff] %vm1158_vm1, %v9705_v31 }
0x11c7   :  { %v15239_v28 = vld [vmem:[#allocation2 + $0x10] sm:$0x1]  ;;  %v15241_v41 = vld [vmem:[#allocation2 + $0x11] sm:$0x1]  ;;  %v15243_v34 = vld [vmem:[#allocation2 + $0x12] sm:$0x1] }
0x11c8   :  { %v15245_v11 = vld [vmem:[#allocation2 + $0x13] sm:$0x1]  ;;  %v15247_v58 = vld [vmem:[#allocation2 + $0x14] sm:$0x1]  ;;  %v15249_v24 = vld [vmem:[#allocation2 + $0x15] sm:$0x1] }
0x11c9   :  { %v15251_v54 = vld [vmem:[#allocation2 + $0x16] sm:$0x1]  ;;  %v15253_v42 = vld [vmem:[#allocation2 + $0x17] sm:$0x1]  ;;  %v9771_v40 = vrot.slane %v15239_v28, 6  ;;  %v9841_v53 = vrot.slane %v15241_v41, 6 }
0x11ca   :  { %v11597_v57 = vpop.f32.mrb[20].mxu0  ;;  %v9906_v33 = vrot.slane %v15243_v34, 6  ;;  %v9971_v16 = vrot.slane %v15245_v11, 6  ;;  %v10036_v10 = vrot.slane %v15247_v58, 6  ;;  %v10101_v2 = vrot.slane %v15249_v24, 6 }
0x11cb   :  { %v9666_v6 = vadd.f32 %v11597_v57, %v15225_v4  ;;  %v9657_v46 = vpop.f32.mrb[21].mxu0  ;;  %v10166_v3 = vrot.slane %v15251_v54, 6  ;;  %v10231_v7 = vrot.slane %v15253_v42, 6  ;;  %v15266_v62 = vld [vmem:[#allocation2 + $0x18] sm:$0x1] }
0x11cc   :  { %v9658_v50 = vadd.f32 %v15225_v4, %v9657_v46  ;;  %v9737_v13 = vld [vmem:[#allocation2 + $0x8] sm:$0x1]  ;;  %v15269_v19 = vld [vmem:[#allocation2 + $0x19] sm:$0x1]  ;;  %v15271_v59 = vld [vmem:[#allocation2 + $0x1a] sm:$0x1] }
0x11cd   :  { %v9710_v20 = vadd.f32 %v9666_v6, %v14949_v18  ;;  %v15273_v45 = vld [vmem:[#allocation2 + $0x1b] sm:$0x1]  ;;  %v9808_v15 = vld [vmem:[#allocation2 + $0x9] sm:$0x1]  ;;  %v9873_v18 = vld [vmem:[#allocation2 + $0xa] sm:$0x1] }
0x11ce   :  { %v9708_v43 = vadd.f32 %v9658_v50, %v14944_v56  ;;  %v9938_v29 = vld [vmem:[#allocation2 + $0xb] sm:$0x1]  ;;  %v10003_v48 = vld [vmem:[#allocation2 + $0xc] sm:$0x1]  ;;  %v15277_v36 = vld [vmem:[#allocation2 + $0x1c] sm:$0x1] }
0x11cf   :  { %9726 = vst.msk [vmem:[#allocation2 + $0x30] sm:$0xff] %vm1158_vm1, %v9710_v20  ;;  %v9768_v23 = vrot.slane %v9737_v13, 7  ;;  %v10068_v17 = vld [vmem:[#allocation2 + $0xd] sm:$0x1]  ;;  %v11598_v56 = vpop.f32.mrb[22].mxu0  ;;  %v9839_v37 = vrot.slane %v9808_v15, 7 }
0x11d0   :  { %9724 = vst.msk [vmem:[#allocation2 + $0x20] sm:$0xff] %vm1158_vm1, %v9708_v43  ;;  %v9736_v30 = vld [vmem:[#allocation2] sm:$0x1]  ;;  %v15279_v32 = vld [vmem:[#allocation2 + $0x1d] sm:$0x1]  ;;  %v9660_v26 = vpop.f32.mrb[23].mxu0 }
0x11d1   :  { %v15281_v8 = vld [vmem:[#allocation2 + $0x1e] sm:$0x1]  ;;  %v9807_v55 = vld [vmem:[#allocation2 + $0x1] sm:$0x1]  ;;  %v9774_v60 = vrot.slane %v15266_v62, 5  ;;  %v9904_v51 = vrot.slane %v9873_v18, 7  ;;  %v9770_v50 = vsel %vm9769_vm9, %v9768_v23, %v9736_v30  ;;  %v9661_v15 = vadd.f32 %v15225_v4, %v9660_v26 }
0x11d2   :  { %v9969_v21 = vrot.slane %v9938_v29, 7  ;;  %v10034_v12 = vrot.slane %v10003_v48, 7  ;;  %v10133_v61 = vld [vmem:[#allocation2 + $0xe] sm:$0x1]  ;;  %v9872_v44 = vld [vmem:[#allocation2 + $0x2] sm:$0x1]  ;;  %v9840_v13 = vsel %vm9769_vm9, %v9839_v37, %v9807_v55  ;;  %v9773_v55 = vsel %vm9772_vm10, %v9771_v40, %v9770_v50 }
0x11d3   :  { %v9843_v63 = vrot.slane %v15269_v19, 5  ;;  %v9908_v47 = vrot.slane %v15271_v59, 5  ;;  %v9973_v35 = vrot.slane %v15273_v45, 5  ;;  %v10099_v22 = vrot.slane %v10068_v17, 7  ;;  %v10198_v1 = vld [vmem:[#allocation2 + $0xf] sm:$0x1] }
0x11d4   :  { %v15290_v46 = vld [vmem:[#allocation2 + $0x1f] sm:$0x1]  ;;  %v9937_v20 = vld [vmem:[#allocation2 + $0x3] sm:$0x1]  ;;  %v10002_v62 = vld [vmem:[#allocation2 + $0x4] sm:$0x1]  ;;  %v9669_v19 = vadd.f32 %v11598_v56, %v15225_v4  ;;  %v9905_v29 = vsel %vm9769_vm9, %v9904_v51, %v9872_v44  ;;  %v9709_v56 = vadd.f32 %v9661_v15, %v14952_v9  ;;  %v9842_v51 = vsel %vm9772_vm10, %v9841_v53, %v9840_v13 }
0x11d5   :  { %v10164_v43 = vrot.slane %v10133_v61, 7  ;;  %v10067_v18 = vld [vmem:[#allocation2 + $0x5] sm:$0x1]  ;;  %v9970_v48 = vsel %vm9769_vm9, %v9969_v21, %v9937_v20  ;;  %v10035_v17 = vsel %vm9769_vm9, %v10034_v12, %v10002_v62  ;;  %v10229_v6 = vrot.slane %v10198_v1, 7  ;;  %v10132_v31 = vld [vmem:[#allocation2 + $0x6] sm:$0x1] }
0x11d6   :  { %v10233_v23 = vrot.slane %v15290_v46, 5  ;;  %v10100_v30 = vsel %vm9769_vm9, %v10099_v22, %v10067_v18  ;;  %v9711_v37 = vadd.f32 %v9669_v19, %v14957_v49  ;;  %v15309_v21 = vld [vmem:[#allocation2 + $0x30] sm:$0x1]  ;;  %v15311_v12 = vld [vmem:[#allocation2 + $0x31] sm:$0x1]  ;;  %v9907_v28 = vsel %vm9772_vm10, %v9906_v33, %v9905_v29  ;;  %9725 = vst.msk [vmem:[#allocation2 + $0x28] sm:$0xff] %vm1158_vm1, %v9709_v56 }
0x11d7   :  { %v15313_v61 = vld [vmem:[#allocation2 + $0x32] sm:$0x1]  ;;  %v10197_v9 = vld [vmem:[#allocation2 + $0x7] sm:$0x1]  ;;  %v9972_v41 = vsel %vm9772_vm10, %v9971_v16, %v9970_v48  ;;  %v10037_v40 = vsel %vm9772_vm10, %v10036_v10, %v10035_v17  ;;  %v10165_v53 = vsel %vm9769_vm9, %v10164_v43, %v10132_v31  ;;  %v15327_v22 = vld [vmem:[#allocation2 + $0x33] sm:$0x1]  ;;  %v10102_v34 = vsel %vm9772_vm10, %v10101_v2, %v10100_v30 }
0x11d8   :  { %v15329_v1 = vld [vmem:[#allocation2 + $0x34] sm:$0x1]  ;;  %9727 = vst.msk [vmem:[#allocation2 + $0x38] sm:$0xff] %vm1158_vm1, %v9711_v37  ;;  %v10230_v11 = vsel %vm9769_vm9, %v10229_v6, %v10197_v9  ;;  %v15337_v33 = vld [vmem:[#allocation2 + $0x35] sm:$0x1]  ;;  %v9849_v50 = vrot.slane %v15311_v12, 2  ;;  %v9776_v24 = vsel %vm9775_vm11, %v9774_v60, %v9773_v55  ;;  %v10167_v6 = vsel %vm9772_vm10, %v10166_v3, %v10165_v53 }
0x11d9   :  { %v15339_v58 = vld [vmem:[#allocation2 + $0x36] sm:$0x1]  ;;  %v9740_v16 = vld [vmem:[#allocation2 + $0x20] sm:$0x1]  ;;  %v9914_v20 = vrot.slane %v15313_v61, 2  ;;  %v9979_v62 = vrot.slane %v15327_v22, 2  ;;  %v10232_v60 = vsel %vm9772_vm10, %v10231_v7, %v10230_v11  ;;  %v9909_v29 = vsel %vm9775_vm11, %v9908_v47, %v9907_v28 }
0x11da   :  { %v11601_v57 = vpop.f32.mrb[24].mxu0  ;;  %v9811_v2 = vld [vmem:[#allocation2 + $0x21] sm:$0x1]  ;;  %v10044_v13 = vrot.slane %v15329_v1, 2  ;;  %v9941_v43 = vld [vmem:[#allocation2 + $0x23] sm:$0x1]  ;;  %v9974_v42 = vsel %vm9775_vm11, %v9973_v35, %v9972_v41  ;;  %v10234_v9 = vsel %vm9775_vm11, %v10233_v23, %v10232_v60 }
0x11db   :  { %v9673_v26 = vpop.f32.mrb[25].mxu0  ;;  %v9682_v44 = vadd.f32 %v11601_v57, %v15225_v4  ;;  %v9783_v57 = vrot.slane %v15309_v21, 2  ;;  %v10109_v54 = vrot.slane %v15337_v33, 2  ;;  %v10174_v3 = vrot.slane %v15339_v58, 2  ;;  %v15360_v19 = vld [vmem:[#allocation2 + $0x37] sm:$0x1] }
0x11dc   :  { %v9674_v49 = vadd.f32 %v15225_v4, %v9673_v26  ;;  %v9777_v15 = vrot.slane %v9740_v16, 4  ;;  %v9845_v18 = vrot.slane %v9811_v2, 4  ;;  %v10006_v48 = vld [vmem:[#allocation2 + $0x24] sm:$0x1]  ;;  %v10071_v7 = vld [vmem:[#allocation2 + $0x25] sm:$0x1] }
0x11dd   :  { %v9714_v10 = vadd.f32 %v9682_v44, %v14973_v14  ;;  %v9844_v14 = vsel %vm9775_vm11, %v9843_v63, %v9842_v51  ;;  %v11602_v63 = vpop.f32.mrb[26].mxu0  ;;  %v9975_v56 = vrot.slane %v9941_v43, 4  ;;  %v15679_v26 = vrot.slane %v15277_v36, 5  ;;  %v10136_v51 = vld [vmem:[#allocation2 + $0x26] sm:$0x1] }
0x11de   :  { %v9712_v31 = vadd.f32 %v9674_v49, %v14968_v38  ;;  %v9876_v38 = vld [vmem:[#allocation2 + $0x22] sm:$0x1]  ;;  %v9685_v17 = vadd.f32 %v11602_v63, %v15225_v4  ;;  %v9676_v30 = vpop.f32.mrb[27].mxu0  ;;  %v10201_v59 = vld [vmem:[#allocation2 + $0x27] sm:$0x1]  ;;  %v15680_v45 = vrot.slane %v15279_v32, 5 }
0x11df   :  { %9730 = vst.msk [vmem:[#allocation2 + $0x50] sm:$0xff] %vm1158_vm1, %v9714_v10  ;;  %v9910_v37 = vrot.slane %v9876_v38, 4  ;;  %v10039_v55 = vsel %vm9775_vm11, %v15679_v26, %v10037_v40  ;;  %v9677_v47 = vadd.f32 %v15225_v4, %v9676_v30  ;;  %v15681_v44 = vrot.slane %v15281_v8, 5  ;;  %v9743_v28 = vld [vmem:[#allocation2 + $0x38] sm:$0x1] }
0x11e0   :  { %9728 = vst.msk [vmem:[#allocation2 + $0x40] sm:$0xff] %vm1158_vm1, %v9712_v31  ;;  %v10104_v35 = vsel %vm9775_vm11, %v15680_v45, %v10102_v34  ;;  %v9814_v36 = vld [vmem:[#allocation2 + $0x39] sm:$0x1]  ;;  %v9879_v41 = vld [vmem:[#allocation2 + $0x3a] sm:$0x1]  ;;  %v9715_v40 = vadd.f32 %v9685_v17, %v14981_v27  ;;  %v10239_v53 = vrot.slane %v15360_v19, 2  ;;  %v9779_v8 = vsel %vm9778_vm12, %v9777_v15, %v9776_v24 }
0x11e1   :  { %v10169_v49 = vsel %vm9775_vm11, %v15681_v44, %v10167_v6  ;;  %v10040_v11 = vrot.slane %v10006_v48, 4  ;;  %v10105_v16 = vrot.slane %v10071_v7, 4  ;;  %v9944_v32 = vld [vmem:[#allocation2 + $0x3b] sm:$0x1]  ;;  %v9713_v34 = vadd.f32 %v9677_v47, %v14976_v0  ;;  %v10009_v2 = vld [vmem:[#allocation2 + $0x3c] sm:$0x1] }
0x11e2   :  { %v9846_v10 = vsel %vm9778_vm12, %v9845_v18, %v9844_v14  ;;  %v10170_v31 = vrot.slane %v10136_v51, 4  ;;  %v10235_v46 = vrot.slane %v10201_v59, 4  ;;  %v10074_v23 = vld [vmem:[#allocation2 + $0x3d] sm:$0x1]  ;;  %9731 = vst.msk [vmem:[#allocation2 + $0x58] sm:$0xff] %vm1158_vm1, %v9715_v40  ;;  %v9786_v6 = vrot.slane %v9743_v28, 1 }
0x11e3   :  { %v9851_v38 = vrot.slane %v9814_v36, 1  ;;  %v9916_v27 = vrot.slane %v9879_v41, 1  ;;  %v9981_v43 = vrot.slane %v9944_v32, 1  ;;  %9729 = vst.msk [vmem:[#allocation2 + $0x48] sm:$0xff] %vm1158_vm1, %v9713_v34  ;;  %v9911_v60 = vsel %vm9778_vm12, %v9910_v37, %v9909_v29  ;;  %v9741_v15 = vld [vmem:[#allocation2 + $0x28] sm:$0x1] }
0x11e4   :  { %v9976_v0 = vsel %vm9778_vm12, %v9975_v56, %v9974_v42  ;;  %v10046_v63 = vrot.slane %v10009_v2, 1  ;;  %v10111_v24 = vrot.slane %v10074_v23, 1  ;;  %v9812_v14 = vld [vmem:[#allocation2 + $0x29] sm:$0x1]  ;;  %v10041_v18 = vsel %vm9778_vm12, %v10040_v11, %v10039_v55  ;;  %v9877_v30 = vld [vmem:[#allocation2 + $0x2a] sm:$0x1] }
0x11e5   :  { %v10106_v48 = vsel %vm9778_vm12, %v10105_v16, %v10104_v35  ;;  %v9780_v7 = vrot.slane %v9741_v15, 3  ;;  %v9847_v17 = vrot.slane %v9812_v14, 3  ;;  %v9942_v26 = vld [vmem:[#allocation2 + $0x2b] sm:$0x1]  ;;  %v10171_v51 = vsel %vm9778_vm12, %v10170_v31, %v10169_v49  ;;  %v10007_v37 = vld [vmem:[#allocation2 + $0x2c] sm:$0x1] }
0x11e6   :  { %v10236_v59 = vsel %vm9778_vm12, %v10235_v46, %v10234_v9  ;;  %v9912_v47 = vrot.slane %v9877_v30, 3  ;;  %v9977_v29 = vrot.slane %v9942_v26, 3  ;;  %v10072_v42 = vld [vmem:[#allocation2 + $0x2d] sm:$0x1]  ;;  %v10042_v44 = vrot.slane %v10007_v37, 3 }
0x11e7   :  { %v9782_v56 = vsel %vm9781_vm13, %v9780_v7, %v9779_v8  ;;  %v9848_v45 = vsel %vm9781_vm13, %v9847_v17, %v9846_v10  ;;  %v10107_v55 = vrot.slane %v10072_v42, 3  ;;  %v10137_v36 = vld [vmem:[#allocation2 + $0x2e] sm:$0x1]  ;;  %v10202_v41 = vld [vmem:[#allocation2 + $0x2f] sm:$0x1] }
0x11e8   :  { %v9785_v35 = vsel %vm9784_vm14, %v9783_v57, %v9782_v56  ;;  %v9850_v49 = vsel %vm9784_vm14, %v9849_v50, %v9848_v45  ;;  %v9913_v9 = vsel %vm9781_vm13, %v9912_v47, %v9911_v60  ;;  %v9978_v28 = vsel %vm9781_vm13, %v9977_v29, %v9976_v0  ;;  %v10139_v40 = vld [vmem:[#allocation2 + $0x3e] sm:$0x1]  ;;  %v10204_v11 = vld [vmem:[#allocation2 + $0x3f] sm:$0x1]  ;;  %v15419_v10 = vld [vmem:[#allocation2 + $0x50] sm:$0x1] }
0x11e9   :  { %v9788_v16 = vsel %vm9787_vm15, %v9786_v6, %v9785_v35  ;;  %v9852_v32 = vsel %vm9787_vm15, %v9851_v38, %v9850_v49  ;;  %v9915_v21 = vsel %vm9784_vm14, %v9914_v20, %v9913_v9  ;;  %v9980_v12 = vsel %vm9784_vm14, %v9979_v62, %v9978_v28  ;;  %v15421_v61 = vld [vmem:[#allocation2 + $0x51] sm:$0x1]  ;;  %v15431_v46 = vld [vmem:[#allocation2 + $0x52] sm:$0x1]  ;;  %v15433_v2 = vld [vmem:[#allocation2 + $0x53] sm:$0x1] }
0x11ea   :  { %9805 = vst.msk [vmem:[#allocation6] sm:$0xff] %vm1158_vm1, %v9788_v16  ;;  %9870 = vst.msk [vmem:[#allocation6 + $0x10] sm:$0xff] %vm1158_vm1, %v9852_v32  ;;  %v9917_v57 = vsel %vm9787_vm15, %v9916_v27, %v9915_v21  ;;  %v9982_v50 = vsel %vm9787_vm15, %v9981_v43, %v9980_v12  ;;  %v10043_v34 = vsel %vm9781_vm13, %v10042_v44, %v10041_v18  ;;  %v10172_v62 = vrot.slane %v10137_v36, 3  ;;  %v15437_v43 = vld [vmem:[#allocation2 + $0x54] sm:$0x1] }
0x11eb   :  { %v10108_v8 = vsel %vm9781_vm13, %v10107_v55, %v10106_v48  ;;  %9935 = vst.msk [vmem:[#allocation6 + $0x20] sm:$0xff] %vm1158_vm1, %v9917_v57  ;;  %10000 = vst.msk [vmem:[#allocation6 + $0x30] sm:$0xff] %vm1158_vm1, %v9982_v50  ;;  %v10045_v22 = vsel %vm9784_vm14, %v10044_v13, %v10043_v34  ;;  %v10237_v31 = vrot.slane %v10202_v41, 3  ;;  %v10176_v23 = vrot.slane %v10139_v40, 1  ;;  %v15439_v1 = vld [vmem:[#allocation2 + $0x55] sm:$0x1] }
0x11ec   :  { %v10110_v20 = vsel %vm9784_vm14, %v10109_v54, %v10108_v8  ;;  %v10241_v6 = vrot.slane %v10204_v11, 1  ;;  %v10047_v38 = vsel %vm9787_vm15, %v10046_v63, %v10045_v22  ;;  %v10173_v33 = vsel %vm9781_vm13, %v10172_v62, %v10171_v51  ;;  %v15447_v0 = vld [vmem:[#allocation2 + $0x56] sm:$0x1]  ;;  %v15449_v63 = vld [vmem:[#allocation2 + $0x57] sm:$0x1] }
0x11ed   :  { %v10112_v27 = vsel %vm9787_vm15, %v10111_v24, %v10110_v20  ;;  %10065 = vst.msk [vmem:[#allocation6 + $0x40] sm:$0xff] %vm1158_vm1, %v10047_v38  ;;  %v10238_v13 = vsel %vm9781_vm13, %v10237_v31, %v10236_v59  ;;  %v9791_v54 = vrot.slane %v15419_v10, 6  ;;  %v9855_v60 = vrot.slane %v15421_v61, 6  ;;  %v9747_v48 = vld [vmem:[#allocation2 + $0x58] sm:$0x1] }
0x11ee   :  { %10130 = vst.msk [vmem:[#allocation6 + $0x50] sm:$0xff] %vm1158_vm1, %v10112_v27  ;;  %v10175_v24 = vsel %vm9784_vm14, %v10174_v3, %v10173_v33  ;;  %v10240_v15 = vsel %vm9784_vm14, %v10239_v53, %v10238_v13  ;;  %v9920_v14 = vrot.slane %v15431_v46, 6  ;;  %v9985_v18 = vrot.slane %v15433_v2, 6  ;;  %v9818_v58 = vld [vmem:[#allocation2 + $0x59] sm:$0x1] }
0x11ef   :  { %v10177_v7 = vsel %vm9787_vm15, %v10176_v23, %v10175_v24  ;;  %v10242_v17 = vsel %vm9787_vm15, %v10241_v6, %v10240_v15  ;;  %v10050_v30 = vrot.slane %v15437_v43, 6  ;;  %v10115_v26 = vrot.slane %v15439_v1, 6  ;;  %v9883_v51 = vld [vmem:[#allocation2 + $0x5a] sm:$0x1]  ;;  %v9948_v47 = vld [vmem:[#allocation2 + $0x5b] sm:$0x1] }
0x11f0   :  { %10195 = vst.msk [vmem:[#allocation6 + $0x60] sm:$0xff] %vm1158_vm1, %v10177_v7  ;;  %10260 = vst.msk [vmem:[#allocation6 + $0x70] sm:$0xff] %vm1158_vm1, %v10242_v17  ;;  %v10180_v3 = vrot.slane %v15447_v0, 6  ;;  %v10245_v19 = vrot.slane %v15449_v63, 6  ;;  %v9793_v53 = vrot.slane %v9747_v48, 5  ;;  %v9857_v59 = vrot.slane %v9818_v58, 5 }
0x11f1   :  { %v9922_v29 = vrot.slane %v9883_v51, 5  ;;  %v9987_v37 = vrot.slane %v9948_v47, 5  ;;  %v10013_v42 = vld [vmem:[#allocation2 + $0x5c] sm:$0x1]  ;;  %v10078_v56 = vld [vmem:[#allocation2 + $0x5d] sm:$0x1] }
0x11f2   :  { %v10052_v45 = vrot.slane %v10013_v42, 5  ;;  %v10117_v44 = vrot.slane %v10078_v56, 5  ;;  %v10143_v55 = vld [vmem:[#allocation2 + $0x5e] sm:$0x1]  ;;  %v10208_v35 = vld [vmem:[#allocation2 + $0x5f] sm:$0x1] }
0x11f3   :  { %v9744_v49 = vld [vmem:[#allocation2 + $0x40] sm:$0x1]  ;;  %v9815_v9 = vld [vmem:[#allocation2 + $0x41] sm:$0x1]  ;;  %v10182_v28 = vrot.slane %v10143_v55, 5  ;;  %v10247_v36 = vrot.slane %v10208_v35, 5 }
0x11f4   :  { %v9745_v41 = vld [vmem:[#allocation2 + $0x48] sm:$0x1]  ;;  %v9816_v40 = vld [vmem:[#allocation2 + $0x49] sm:$0x1]  ;;  %v9880_v11 = vld [vmem:[#allocation2 + $0x42] sm:$0x1] }
0x11f5   :  { %v9945_v16 = vld [vmem:[#allocation2 + $0x43] sm:$0x1]  ;;  %v9789_v32 = vrot.slane %v9745_v41, 7  ;;  %v9853_v21 = vrot.slane %v9816_v40, 7  ;;  %v9881_v12 = vld [vmem:[#allocation2 + $0x4a] sm:$0x1] }
0x11f6   :  { %v9946_v57 = vld [vmem:[#allocation2 + $0x4b] sm:$0x1]  ;;  %v9918_v50 = vrot.slane %v9881_v12, 7  ;;  %v10011_v8 = vld [vmem:[#allocation2 + $0x4c] sm:$0x1] }
0x11f7   :  { %v9983_v34 = vrot.slane %v9946_v57, 7  ;;  %v10076_v10 = vld [vmem:[#allocation2 + $0x4d] sm:$0x1]  ;;  %v9790_v61 = vsel %vm9769_vm9, %v9789_v32, %v9744_v49  ;;  %v9854_v22 = vsel %vm9769_vm9, %v9853_v21, %v9815_v9  ;;  %v10048_v20 = vrot.slane %v10011_v8, 7  ;;  %v10141_v31 = vld [vmem:[#allocation2 + $0x4e] sm:$0x1] }
0x11f8   :  { %v10113_v62 = vrot.slane %v10076_v10, 7  ;;  %v10206_v46 = vld [vmem:[#allocation2 + $0x4f] sm:$0x1]  ;;  %v10010_v2 = vld [vmem:[#allocation2 + $0x44] sm:$0x1]  ;;  %v9792_v6 = vsel %vm9772_vm10, %v9791_v54, %v9790_v61  ;;  %v9856_v38 = vsel %vm9772_vm10, %v9855_v60, %v9854_v22  ;;  %v9919_v27 = vsel %vm9769_vm9, %v9918_v50, %v9880_v11 }
0x11f9   :  { %v10075_v23 = vld [vmem:[#allocation2 + $0x45] sm:$0x1]  ;;  %v9984_v43 = vsel %vm9769_vm9, %v9983_v34, %v9945_v16  ;;  %v9921_v1 = vsel %vm9772_vm10, %v9920_v14, %v9919_v27  ;;  %v10049_v13 = vsel %vm9769_vm9, %v10048_v20, %v10010_v2  ;;  %v10178_v15 = vrot.slane %v10141_v31, 7  ;;  %v10140_v48 = vld [vmem:[#allocation2 + $0x46] sm:$0x1] }
0x11fa   :  { %v9986_v33 = vsel %vm9772_vm10, %v9985_v18, %v9984_v43  ;;  %v10114_v0 = vsel %vm9769_vm9, %v10113_v62, %v10075_v23  ;;  %v10051_v63 = vsel %vm9772_vm10, %v10050_v30, %v10049_v13  ;;  %v10243_v54 = vrot.slane %v10206_v46, 7  ;;  %v10205_v60 = vld [vmem:[#allocation2 + $0x47] sm:$0x1] }
0x11fb   :  { %v10116_v24 = vsel %vm9772_vm10, %v10115_v26, %v10114_v0  ;;  %v9794_v7 = vsel %vm9775_vm11, %v9793_v53, %v9792_v6  ;;  %v9858_v17 = vsel %vm9775_vm11, %v9857_v59, %v9856_v38  ;;  %v15482_v14 = vsel %vm9775_vm11, %v9922_v29, %v9921_v1 }
0x11fc   :  { %v15485_v18 = vsel %vm9775_vm11, %v9987_v37, %v9986_v33  ;;  %v10179_v58 = vsel %vm9769_vm9, %v10178_v15, %v10140_v48  ;;  %v10244_v30 = vsel %vm9769_vm9, %v10243_v54, %v10205_v60  ;;  %v15490_v26 = vsel %vm9775_vm11, %v10052_v45, %v10051_v63 }
0x11fd   :  { %v15493_v51 = vsel %vm9775_vm11, %v10117_v44, %v10116_v24  ;;  %v10181_v53 = vsel %vm9772_vm10, %v10180_v3, %v10179_v58  ;;  %v10246_v59 = vsel %vm9772_vm10, %v10245_v19, %v10244_v30 }
0x11fe   :  { %v15498_v47 = vsel %vm9775_vm11, %v10182_v28, %v10181_v53  ;;  %v15501_v29 = vsel %vm9775_vm11, %v10247_v36, %v10246_v59 }
0x121e   :  { %v11605_v37 = vpop.f32.mrb[28].mxu0 }
0x121f   :  { %v9698_v42 = vadd.f32 %v11605_v37, %v15225_v4  ;;  %v9689_v56 = vpop.f32.mrb[29].mxu0 }
0x1220   :  { %v9690_v45 = vadd.f32 %v15225_v4, %v9689_v56  ;;  %v11606_v55 = vpop.f32.mrb[30].mxu0 }
0x1221   :  { %v9718_v44 = vadd.f32 %v9698_v42, %v14997_v52  ;;  %v9701_v35 = vadd.f32 %v11606_v55, %v15225_v4  ;;  %v9692_v3 = vpop.f32.mrb[31].mxu0 }
0x1222   :  { %v9716_v19 = vadd.f32 %v9690_v45, %v14992_v39  ;;  %v9693_v49 = vadd.f32 %v15225_v4, %v9692_v3 }
0x1223   :  { %9734 = vst.msk [vmem:[#allocation2 + $0x70] sm:$0xff] %vm1158_vm1, %v9718_v44  ;;  %v9719_v9 = vadd.f32 %v9701_v35, %v15005_v5 }
0x1224   :  { %9732 = vst.msk [vmem:[#allocation2 + $0x60] sm:$0xff] %vm1158_vm1, %v9716_v19  ;;  %v9717_v28 = vadd.f32 %v9693_v49, %v15000_v25 }
0x1225   :  { %9735 = vst.msk [vmem:[#allocation2 + $0x78] sm:$0xff] %vm1158_vm1, %v9719_v9 }
0x1226   :  { %9733 = vst.msk [vmem:[#allocation2 + $0x68] sm:$0xff] %vm1158_vm1, %v9717_v28 }
0x122a   :  { %v15515_v52 = vld [vmem:[#allocation2 + $0x70] sm:$0x1]  ;;  %v15517_v36 = vld [vmem:[#allocation2 + $0x71] sm:$0x1]  ;;  %v15519_v41 = vld [vmem:[#allocation2 + $0x72] sm:$0x1] }
0x122b   :  { %v15521_v39 = vld [vmem:[#allocation2 + $0x73] sm:$0x1]  ;;  %v9799_v4 = vrot.slane %v15515_v52, 2  ;;  %v9863_v5 = vrot.slane %v15517_v36, 2  ;;  %v15525_v40 = vld [vmem:[#allocation2 + $0x74] sm:$0x1] }
0x122c   :  { %v15527_v11 = vld [vmem:[#allocation2 + $0x75] sm:$0x1]  ;;  %v9748_v25 = vld [vmem:[#allocation2 + $0x60] sm:$0x1]  ;;  %v9819_v16 = vld [vmem:[#allocation2 + $0x61] sm:$0x1] }
0x122d   :  { %v9928_v32 = vrot.slane %v15519_v41, 2  ;;  %v9993_v21 = vrot.slane %v15521_v39, 2  ;;  %v9884_v12 = vld [vmem:[#allocation2 + $0x62] sm:$0x1]  ;;  %v9949_v57 = vld [vmem:[#allocation2 + $0x63] sm:$0x1] }
0x122e   :  { %v9795_v50 = vrot.slane %v9748_v25, 4  ;;  %v9859_v34 = vrot.slane %v9819_v16, 4  ;;  %v10014_v8 = vld [vmem:[#allocation2 + $0x64] sm:$0x1]  ;;  %v10079_v10 = vld [vmem:[#allocation2 + $0x65] sm:$0x1] }
0x122f   :  { %v10058_v61 = vrot.slane %v15525_v40, 2  ;;  %v10123_v22 = vrot.slane %v15527_v11, 2  ;;  %v10144_v20 = vld [vmem:[#allocation2 + $0x66] sm:$0x1]  ;;  %v10209_v62 = vld [vmem:[#allocation2 + $0x67] sm:$0x1] }
0x1230   :  { %v9924_v31 = vrot.slane %v9884_v12, 4  ;;  %v9989_v46 = vrot.slane %v9949_v57, 4  ;;  %v9751_v2 = vld [vmem:[#allocation2 + $0x78] sm:$0x1]  ;;  %v9822_v23 = vld [vmem:[#allocation2 + $0x79] sm:$0x1]  ;;  %v9796_v1 = vsel %vm9778_vm12, %v9795_v50, %v9794_v7  ;;  %v9860_v33 = vsel %vm9778_vm12, %v9859_v34, %v9858_v17 }
0x1231   :  { %v10054_v6 = vrot.slane %v10014_v8, 4  ;;  %v10119_v38 = vrot.slane %v10079_v10, 4  ;;  %v9887_v27 = vld [vmem:[#allocation2 + $0x7a] sm:$0x1]  ;;  %v9952_v43 = vld [vmem:[#allocation2 + $0x7b] sm:$0x1] }
0x1232   :  { %v10184_v13 = vrot.slane %v10144_v20, 4  ;;  %v10249_v0 = vrot.slane %v10209_v62, 4  ;;  %v10017_v63 = vld [vmem:[#allocation2 + $0x7c] sm:$0x1]  ;;  %v10082_v24 = vld [vmem:[#allocation2 + $0x7d] sm:$0x1]  ;;  %v9925_v58 = vsel %vm9778_vm12, %v9924_v31, %v15482_v14  ;;  %v9990_v30 = vsel %vm9778_vm12, %v9989_v46, %v15485_v18 }
0x1233   :  { %v9801_v15 = vrot.slane %v9751_v2, 1  ;;  %v9865_v54 = vrot.slane %v9822_v23, 1  ;;  %v9930_v48 = vrot.slane %v9887_v27, 1  ;;  %v9995_v60 = vrot.slane %v9952_v43, 1  ;;  %v9749_v37 = vld [vmem:[#allocation2 + $0x68] sm:$0x1] }
0x1234   :  { %v10060_v53 = vrot.slane %v10017_v63, 1  ;;  %v10125_v59 = vrot.slane %v10082_v24, 1  ;;  %v9820_v7 = vld [vmem:[#allocation2 + $0x69] sm:$0x1]  ;;  %v10055_v17 = vsel %vm9778_vm12, %v10054_v6, %v15490_v26  ;;  %v10120_v42 = vsel %vm9778_vm12, %v10119_v38, %v15493_v51  ;;  %v9885_v55 = vld [vmem:[#allocation2 + $0x6a] sm:$0x1] }
0x1235   :  { %v9797_v56 = vrot.slane %v9749_v37, 3  ;;  %v9861_v45 = vrot.slane %v9820_v7, 3  ;;  %v9950_v44 = vld [vmem:[#allocation2 + $0x6b] sm:$0x1]  ;;  %v10185_v14 = vsel %vm9778_vm12, %v10184_v13, %v15498_v47  ;;  %v10250_v18 = vsel %vm9778_vm12, %v10249_v0, %v15501_v29  ;;  %v10015_v19 = vld [vmem:[#allocation2 + $0x6c] sm:$0x1] }
0x1236   :  { %v9926_v35 = vrot.slane %v9885_v55, 3  ;;  %v9991_v3 = vrot.slane %v9950_v44, 3  ;;  %v10080_v49 = vld [vmem:[#allocation2 + $0x6d] sm:$0x1]  ;;  %v10056_v28 = vrot.slane %v10015_v19, 3 }
0x1237   :  { %v9798_v9 = vsel %vm9781_vm13, %v9797_v56, %v9796_v1  ;;  %v9862_v26 = vsel %vm9781_vm13, %v9861_v45, %v9860_v33  ;;  %v10121_v51 = vrot.slane %v10080_v49, 3  ;;  %v10145_v16 = vld [vmem:[#allocation2 + $0x6e] sm:$0x1]  ;;  %v10210_v29 = vld [vmem:[#allocation2 + $0x6f] sm:$0x1] }
0x1238   :  { %v9800_v52 = vsel %vm9784_vm14, %v9799_v4, %v9798_v9  ;;  %v9864_v36 = vsel %vm9784_vm14, %v9863_v5, %v9862_v26  ;;  %v9927_v25 = vsel %vm9781_vm13, %v9926_v35, %v9925_v58  ;;  %v9992_v47 = vsel %vm9781_vm13, %v9991_v3, %v9990_v30  ;;  %v10146_v12 = vld [vmem:[#allocation2 + $0x76] sm:$0x1]  ;;  %v10211_v57 = vld [vmem:[#allocation2 + $0x77] sm:$0x1]  ;;  %v10147_v5 = vld [vmem:[#allocation2 + $0x7e] sm:$0x1] }
0x1239   :  { %v9802_v50 = vsel %vm9787_vm15, %v9801_v15, %v9800_v52  ;;  %v9866_v34 = vsel %vm9787_vm15, %v9865_v54, %v9864_v36  ;;  %v9929_v8 = vsel %vm9784_vm14, %v9928_v32, %v9927_v25  ;;  %v9994_v4 = vsel %vm9784_vm14, %v9993_v21, %v9992_v47  ;;  %v10212_v10 = vld [vmem:[#allocation2 + $0x7f] sm:$0x1] }
0x123a   :  { %9806 = vst.msk [vmem:[#allocation6 + $0x8] sm:$0xff] %vm1158_vm1, %v9802_v50  ;;  %9871 = vst.msk [vmem:[#allocation6 + $0x18] sm:$0xff] %vm1158_vm1, %v9866_v34  ;;  %v9931_v20 = vsel %vm9787_vm15, %v9930_v48, %v9929_v8  ;;  %v9996_v62 = vsel %vm9787_vm15, %v9995_v60, %v9994_v4  ;;  %v10057_v31 = vsel %vm9781_vm13, %v10056_v28, %v10055_v17  ;;  %v10186_v21 = vrot.slane %v10145_v16, 3 }
0x123b   :  { %v10122_v41 = vsel %vm9781_vm13, %v10121_v51, %v10120_v42  ;;  %9936 = vst.msk [vmem:[#allocation6 + $0x28] sm:$0xff] %vm1158_vm1, %v9931_v20  ;;  %10001 = vst.msk [vmem:[#allocation6 + $0x38] sm:$0xff] %vm1158_vm1, %v9996_v62  ;;  %v10059_v39 = vsel %vm9784_vm14, %v10058_v61, %v10057_v31  ;;  %v10251_v46 = vrot.slane %v10210_v29, 3  ;;  %v10188_v2 = vrot.slane %v10146_v12, 2 }
0x123c   :  { %v10124_v32 = vsel %vm9784_vm14, %v10123_v22, %v10122_v41  ;;  %v10253_v23 = vrot.slane %v10211_v57, 2  ;;  %v10061_v6 = vsel %vm9787_vm15, %v10060_v53, %v10059_v39  ;;  %v10190_v27 = vrot.slane %v10147_v5, 1 }
0x123d   :  { %v10126_v38 = vsel %vm9787_vm15, %v10125_v59, %v10124_v32  ;;  %v10255_v43 = vrot.slane %v10212_v10, 1  ;;  %10066 = vst.msk [vmem:[#allocation6 + $0x48] sm:$0xff] %vm1158_vm1, %v10061_v6  ;;  %v10187_v40 = vsel %vm9781_vm13, %v10186_v21, %v10185_v14  ;;  %v10252_v11 = vsel %vm9781_vm13, %v10251_v46, %v10250_v18 }
0x123e   :  { %10131 = vst.msk [vmem:[#allocation6 + $0x58] sm:$0xff] %vm1158_vm1, %v10126_v38  ;;  %v10189_v61 = vsel %vm9784_vm14, %v10188_v2, %v10187_v40  ;;  %v10254_v22 = vsel %vm9784_vm14, %v10253_v23, %v10252_v11 }
0x123f   :  { %v10191_v1 = vsel %vm9787_vm15, %v10190_v27, %v10189_v61  ;;  %v10256_v33 = vsel %vm9787_vm15, %v10255_v43, %v10254_v22 }
0x1240   :  { %10196 = vst.msk [vmem:[#allocation6 + $0x68] sm:$0xff] %vm1158_vm1, %v10191_v1  ;;  %10261 = vst.msk [vmem:[#allocation6 + $0x78] sm:$0xff] %vm1158_vm1, %v10256_v33 }
0x1241   :  { %12033 = shalt.err (!%p12030_p12)
}
0x1242   :  { %s12034_s26 = scalar_lea.hbm %s15615_s13, 2048 }
0x1243   :  { %p12035_p13 = scmp.ne.s32.totalorder %s15615_s13, %s12034_s26  ;;  %p12038_p0 = scmp.lt.u32.totalorder %s12034_s26, %s15615_s13 }
0x1245   :  { %p12040_p1 = pnand %p12038_p0, %p12035_p13 }
0x1247   :  { %12043 = shalt.err (!%p12040_p1)
}
0x1248   :  { %10273 = dma.vmem_to_hbm [thread:$0]  %s10268_s23, 2048, %s15615_s13, [#allocation5], %s12049_s18, %s12049_s18, %s12050_s19  }
0x1249   :  { %12046 = dma.done.wait [#allocation5], 2048  }
0x124a   :  { %12047 = vsyncadd [#allocation5], 4294965248 }
0x124b   :  { %10277 = vsyncpa [#allocation4], 1 }
0x124c   :  { %10278 = vsyncpa [#allocation5], 1 }

</bundles_post_ra>
